<compile_context>
chip_gen: v6e
topology: v6e:2x2x1
jax: 0.10.0
libtpu: 0.0.40
codegen_flags: <defaults>
</compile_context>

<pallas_src>
import functools

import jax
import jax.numpy as jnp
from jax import lax
from jax.experimental import pallas as pl
from jax.experimental.pallas import tpu as pltpu

EPS = 1e-5


def _residual_ibn_kernel(has_downsample, fold_w_lanes,
                         x_ref, w1d_ref, g1_ref, b1_ref,
                         w2_ref, g2_ref, b2_ref,
                         w3_ref, g3_ref, b3_ref, *rest):
    if has_downsample:
        gd_ref, bd_ref, out_ref = rest
    else:
        (out_ref,) = rest

    N, H, W, Cin = x_ref.shape
    C = g2_ref.shape[-1]          # out_channels (== mid channels)
    half = C // 2
    M = N * H * W
    inv_hw = 1.0 / (H * W)
    inv_m = 1.0 / M

    x2d = x_ref[...].reshape(M, Cin)                        # bf16 activations

    # ---- conv1 (+ fused downsample 1x1): single MXU pass -------------------
    # Weights were concatenated to (Cin, 2C) in the wrapper when the block has
    # a downsample branch, so the same LHS is pushed through the MXU once.
    h = jnp.dot(x2d, w1d_ref[...], preferred_element_type=jnp.float32)
    if has_downsample:
        h1 = h[:, :C]
        idn_raw = h[:, C:]
        mu_d = jnp.sum(idn_raw, axis=0, keepdims=True) * inv_m
        q_d = jnp.sum(idn_raw * idn_raw, axis=0, keepdims=True) * inv_m
        var_d = jnp.maximum(q_d - mu_d * mu_d, 0.0)
        a_d = gd_ref[...] * lax.rsqrt(var_d + EPS)
        c_d = bd_ref[...] - mu_d * a_d
        idn = idn_raw * a_d + c_d                           # fused BN affine
        # TODO(synk): for the tiled production kernel, store idn as bf16 (or
        # recompute the affine in the epilogue) to shrink its VMEM live range.
    else:
        h1 = h
        idn = x2d                                           # Cin == C identity

    h1 = h1.reshape(N, H, W, C)

    # ---- IBN: single-pass stats; BN stats derived from the IN partials -----
    s1 = jnp.sum(h1, axis=(1, 2), keepdims=True) * inv_hw            # (N,1,1,C)
    q1 = jnp.sum(h1 * h1, axis=(1, 2), keepdims=True) * inv_hw
    var_in = jnp.maximum(q1 - s1 * s1, 0.0)
    mu_bn = jnp.mean(s1, axis=0, keepdims=True)                      # (1,1,1,C)
    var_bn = jnp.maximum(jnp.mean(q1, axis=0, keepdims=True) - mu_bn * mu_bn, 0.0)
    is_in = lax.broadcasted_iota(jnp.int32, (1, 1, 1, C), 3) < half
    mu1 = jnp.where(is_in, s1, mu_bn)
    v1 = jnp.where(is_in, var_in, var_bn)
    a1 = g1_ref[...].reshape(1, 1, 1, C) * lax.rsqrt(v1 + EPS)
    c1 = b1_ref[...].reshape(1, 1, 1, C) - mu1 * a1
    # Fused affine + ReLU, cast once to bf16: this is the conv2 center slab.
    h1b = jnp.maximum(h1 * a1 + c1, 0.0).astype(jnp.bfloat16)

    # ---- conv2: 3x3, stride 1, padding 1, as ONE big MXU matmul ------------
    # K axis = concat of the 3 W-shifted bf16 slabs (kw = -1, 0, +1);
    # the 3 kh taps come out as the 3 C-wide output column groups and are
    # combined by H-row-offset accumulation of f32 values (H is a major axis,
    # so those shifts are cheap block copies, not sublane shuffles).
    zcol = jnp.zeros((N, H, 1, C), jnp.bfloat16)
    slab_m = jnp.concatenate([zcol, h1b[:, :, :W - 1, :]], axis=2)   # h1[x-1]
    slab_p = jnp.concatenate([h1b[:, :, 1:, :], zcol], axis=2)       # h1[x+1]
    lhs = jnp.concatenate([slab_m, h1b, slab_p], axis=-1).reshape(M, 3 * C)

    r = jnp.dot(lhs, w2_ref[...], preferred_element_type=jnp.float32)
    r = r.reshape(N, H, W, 3 * C)
    zrow = jnp.zeros((N, 1, W, C), jnp.float32)
    h2 = (r[..., C:2 * C]                                            # kh = 0
          + jnp.concatenate([zrow, r[:, :H - 1, :, 0:C]], axis=1)    # kh = -1
          + jnp.concatenate([r[:, 1:, :, 2 * C:], zrow], axis=1))    # kh = +1
    h2 = h2.reshape(M, C)

    # ---- bn2: single-pass stats, affine folded into the bf16 cast ----------
    mu2 = jnp.sum(h2, axis=0, keepdims=True) * inv_m
    q2 = jnp.sum(h2 * h2, axis=0, keepdims=True) * inv_m
    a2 = g2_ref[...] * lax.rsqrt(jnp.maximum(q2 - mu2 * mu2, 0.0) + EPS)
    c2 = b2_ref[...] - mu2 * a2
    h2b = (h2 * a2 + c2).astype(jnp.bfloat16)

    # ---- conv3 (1x1) + bn3 --------------------------------------------------
    h3 = jnp.dot(h2b, w3_ref[...], preferred_element_type=jnp.float32)
    mu3 = jnp.sum(h3, axis=0, keepdims=True) * inv_m
    q3 = jnp.sum(h3 * h3, axis=0, keepdims=True) * inv_m
    a3 = g3_ref[...] * lax.rsqrt(jnp.maximum(q3 - mu3 * mu3, 0.0) + EPS)
    c3 = b3_ref[...] - mu3 * a3

    # ---- bn3 affine + residual add + ReLU: one fused elementwise pass ------
    out = jnp.maximum(h3 * a3 + c3 + idn, 0.0)
    if fold_w_lanes:
        # Lane-dense store: fold W into the lane axis so small-C outputs use
        # full 128-lane unmasked stores.
        out_ref[...] = out.reshape(N, H, W * C).astype(out_ref.dtype)
    else:
        out_ref[...] = out.reshape(N, H, W, C).astype(out_ref.dtype)


def _pack_args(x_nhwc, params, has_downsample):
    Cout = params["w1"].shape[0]

    def cvt1x1(w):      # (Cout, Cin, 1, 1) -> (Cin, Cout), bf16
        return jnp.transpose(w[:, :, 0, 0], (1, 0)).astype(jnp.bfloat16)

    def vec(v):         # (C,) -> (1, C) f32 (stats/affine stay in f32)
        return jnp.asarray(v, jnp.float32).reshape(1, -1)

    x = x_nhwc.astype(jnp.bfloat16)

    w1 = cvt1x1(params["w1"])
    if has_downsample:
        w1d = jnp.concatenate([w1, cvt1x1(params["wd"])], axis=1)   # (Cin, 2C)
    else:
        w1d = w1
    g1 = vec(jnp.concatenate([params["in_gamma"], params["bn1_gamma"]]))
    b1 = vec(jnp.concatenate([params["in_beta"], params["bn1_beta"]]))

    # 3x3 conv weights as a (3C, 3C) block matrix:
    #   rows indexed by (kw, ci), cols indexed by (kh, co);
    #   B[kw*C+ci, kh*C+co] = w2[kh, kw, ci, co]  (HWIO)
    w2hwio = jnp.transpose(params["w2"], (2, 3, 1, 0))               # (3,3,Ci,Co)
    w2 = jnp.transpose(w2hwio, (1, 2, 0, 3)).reshape(3 * Cout, 3 * Cout)
    w2 = w2.astype(jnp.bfloat16)

    w3 = cvt1x1(params["w3"])
    g2, b2 = vec(params["bn2_gamma"]), vec(params["bn2_beta"])
    g3, b3 = vec(params["bn3_gamma"]), vec(params["bn3_beta"])

    args = [x, w1d, g1, b1, w2, g2, b2, w3, g3, b3]
    if has_downsample:
        args += [vec(params["bnd_gamma"]), vec(params["bnd_beta"])]
    return args


def residual_ibn_nhwc(x_nhwc, params, stride=1):
    """ResidualIBN forward. Input (N,H,W,Cin) float, output (N,H,W,Cout) f32."""
    assert stride == 1, "TODO(synk): stride > 1 not supported in this kernel"
    N, H, W, Cin = x_nhwc.shape
    Cout = params["w1"].shape[0]
    has_downsample = (stride != 1) or (Cin != Cout)
    if not has_downsample:
        assert Cin == Cout, "identity path requires Cin == Cout"

    args = _pack_args(x_nhwc, params, has_downsample)

    # Advisory cost estimate for XLA scheduling around the custom call.
    M = N * H * W
    c1_cols = (2 if has_downsample else 1) * Cout
    flops = 2 * M * (Cin * c1_cols + (3 * Cout) * (3 * Cout) + Cout * Cout)
    flops += 16 * M * Cout                                   # fused elementwise
    bytes_accessed = (M * Cin * 2 + M * Cout * 4
                      + sum(int(a.size) * a.dtype.itemsize for a in args[1:]))
    cost = pl.CostEstimate(flops=int(flops),
                           transcendentals=int((N + 3) * Cout),
                           bytes_accessed=int(bytes_accessed))

    # Generation-aware VMEM limit (v7x only has 64 MiB per TC).
    vmem_cap = 64 * 1024 * 1024
    try:
        vmem_cap = int(getattr(pltpu.get_tpu_info(), "vmem_capacity_bytes",
                               vmem_cap))
    except Exception:
        pass
    vmem_limit = min(vmem_cap // 2, 64 * 1024 * 1024)

    vmem = pl.BlockSpec(memory_space=pltpu.MemorySpace.VMEM)

    def build(fold_w_lanes):
        out_shape = ((N, H, W * Cout) if fold_w_lanes else (N, H, W, Cout))
        kern = functools.partial(_residual_ibn_kernel, has_downsample,
                                 fold_w_lanes)
        return pl.pallas_call(
            kern,
            out_shape=jax.ShapeDtypeStruct(out_shape, jnp.float32),
            in_specs=[vmem] * len(args),
            out_specs=vmem,
            cost_estimate=cost,
            compiler_params=pltpu.CompilerParams(vmem_limit_bytes=vmem_limit),
        )

    try:
        out = build(True)(*args)       # lane-dense (N, H, W*C) store
    except Exception:
        out = build(False)(*args)      # fallback if the relayout won't lower
    return out.reshape(N, H, W, Cout)


def residual_ibn(x_nchw, params, stride=1):
    """NCHW wrapper matching the PyTorch module's layout."""
    # TODO(synk): the NCHW<->NHWC transposes are HBM round trips; prefer the
    # NHWC entry point above when the surrounding model allows it.
    x_nhwc = jnp.transpose(x_nchw, (0, 2, 3, 1))
    out = residual_ibn_nhwc(x_nhwc, params, stride=stride)
    return jnp.transpose(out, (0, 3, 1, 2))


# ---------------------- pure-JAX f32 reference (for sanity) ------------------
def _bn(h, g, b):
    mu = jnp.mean(h, axis=(0, 1, 2), keepdims=True)
    var = jnp.mean((h - mu) ** 2, axis=(0, 1, 2), keepdims=True)
    return (h - mu) * lax.rsqrt(var + EPS) * g.reshape(1, 1, 1, -1) + b.reshape(1, 1, 1, -1)


def residual_ibn_reference(x_nchw, params, downsample=True):
    x = jnp.transpose(x_nchw, (0, 2, 3, 1)).astype(jnp.float32)
    dn = ("NHWC", "HWIO", "NHWC")
    Cout = params["w1"].shape[0]
    half = Cout // 2

    w1 = jnp.transpose(params["w1"], (2, 3, 1, 0)).astype(jnp.float32)
    h = lax.conv_general_dilated(x, w1, (1, 1), "VALID", dimension_numbers=dn)

    h_in, h_bn = h[..., :half], h[..., half:]
    mu_i = jnp.mean(h_in, axis=(1, 2), keepdims=True)
    var_i = jnp.mean((h_in - mu_i) ** 2, axis=(1, 2), keepdims=True)
    y_in = (h_in - mu_i) * lax.rsqrt(var_i + EPS) * params["in_gamma"] + params["in_beta"]
    y_bn = _bn(h_bn, params["bn1_gamma"], params["bn1_beta"])
    h = jnp.maximum(jnp.concatenate([y_in, y_bn], axis=-1), 0.0)

    w2 = jnp.transpose(params["w2"], (2, 3, 1, 0)).astype(jnp.float32)
    h = lax.conv_general_dilated(h, w2, (1, 1), [(1, 1), (1, 1)], dimension_numbers=dn)
    h = _bn(h, params["bn2_gamma"], params["bn2_beta"])

    w3 = jnp.transpose(params["w3"], (2, 3, 1, 0)).astype(jnp.float32)
    h = lax.conv_general_dilated(h, w3, (1, 1), "VALID", dimension_numbers=dn)
    h = _bn(h, params["bn3_gamma"], params["bn3_beta"])

    if downsample:
        wd = jnp.transpose(params["wd"], (2, 3, 1, 0)).astype(jnp.float32)
        idn = lax.conv_general_dilated(x, wd, (1, 1), "VALID", dimension_numbers=dn)
        idn = _bn(idn, params["bnd_gamma"], params["bnd_beta"])
    else:
        idn = x

    out = jnp.maximum(h + idn, 0.0)
    return jnp.transpose(out, (0, 3, 1, 2))


def make_params(key, cin, cout):
    half = cout // 2
    ks = jax.random.split(key, 12)
    n = jax.random.normal
    return {
        "w1": 0.2 * n(ks[0], (cout, cin, 1, 1), jnp.float32),
        "in_gamma": 1.0 + 0.1 * n(ks[1], (half,), jnp.float32),
        "in_beta": 0.1 * n(ks[2], (half,), jnp.float32),
        "bn1_gamma": 1.0 + 0.1 * n(ks[3], (cout - half,), jnp.float32),
        "bn1_beta": 0.1 * n(ks[4], (cout - half,), jnp.float32),
        "w2": 0.2 * n(ks[5], (cout, cout, 3, 3), jnp.float32),
        "bn2_gamma": 1.0 + 0.1 * n(ks[6], (cout,), jnp.float32),
        "bn2_beta": 0.1 * n(ks[6], (cout,), jnp.float32),
        "w3": 0.2 * n(ks[7], (cout, cout, 1, 1), jnp.float32),
        "bn3_gamma": 1.0 + 0.1 * n(ks[8], (cout,), jnp.float32),
        "bn3_beta": 0.1 * n(ks[9], (cout,), jnp.float32),
        "wd": 0.2 * n(ks[10], (cout, cin, 1, 1), jnp.float32),
        "bnd_gamma": 1.0 + 0.1 * n(ks[11], (cout,), jnp.float32),
        "bnd_beta": 0.1 * n(ks[11], (cout,), jnp.float32),
    }


if __name__ == "__main__":
    key = jax.random.PRNGKey(0)
    kx, kp, kx2, kp2 = jax.random.split(key, 4)

    # Case 1: Cin != Cout -> downsample (1x1 conv + BN) identity branch.
    N, Cin, Cout, H, W = 2, 4, 8, 16, 16
    x = jax.random.normal(kx, (N, Cin, H, W), jnp.float32)
    params = make_params(kp, Cin, Cout)
    out = jax.block_until_ready(residual_ibn(x, params, stride=1))
    ref = residual_ibn_reference(x, params, downsample=True)
    assert out.shape == (N, Cout, H, W)
    max_err = float(jnp.max(jnp.abs(out - ref)))
    mean_err = float(jnp.mean(jnp.abs(out - ref)))
    # bf16 MXU matmuls (f32 accumulation / f32 statistics) vs a pure-f32
    # reference: allow bf16-level tolerance; real bugs produce O(1) errors.
    assert max_err < 1.5e-1 and mean_err < 3e-2, (max_err, mean_err)

    # Case 2: Cin == Cout -> plain identity branch (no downsample).
    x2 = jax.random.normal(kx2, (N, Cout, H, W), jnp.float32)
    params2 = make_params(kp2, Cout, Cout)
    out2 = jax.block_until_ready(residual_ibn(x2, params2, stride=1))
    ref2 = residual_ibn_reference(x2, params2, downsample=False)
    assert out2.shape == (N, Cout, H, W)
    max_err2 = float(jnp.max(jnp.abs(out2 - ref2)))
    mean_err2 = float(jnp.mean(jnp.abs(out2 - ref2)))
    assert max_err2 < 1.5e-1 and mean_err2 < 3e-2, (max_err2, mean_err2)

    print("KERNEL_OK")
</pallas_src>

<mosaic_0001>
module attributes {stable_mosaic.version = 11 : i64} {
  func.func @_residual_ibn_kernel(%arg0: memref<2x16x16x4xbf16, #tpu.memory_space<vmem>>, %arg1: memref<4x16xbf16, #tpu.memory_space<vmem>>, %arg2: memref<1x8xf32, #tpu.memory_space<vmem>>, %arg3: memref<1x8xf32, #tpu.memory_space<vmem>>, %arg4: memref<24x24xbf16, #tpu.memory_space<vmem>>, %arg5: memref<1x8xf32, #tpu.memory_space<vmem>>, %arg6: memref<1x8xf32, #tpu.memory_space<vmem>>, %arg7: memref<8x8xbf16, #tpu.memory_space<vmem>>, %arg8: memref<1x8xf32, #tpu.memory_space<vmem>>, %arg9: memref<1x8xf32, #tpu.memory_space<vmem>>, %arg10: memref<1x8xf32, #tpu.memory_space<vmem>>, %arg11: memref<1x8xf32, #tpu.memory_space<vmem>>, %arg12: memref<2x16x128xf32, #tpu.memory_space<vmem>>) attributes {dimension_semantics = [], scalar_prefetch = 0 : i64, scratch_operands = 0 : i64, tpu.core_type = #tpu.core_type<tc>} {
    %c0 = arith.constant 0 : index
    %c0_0 = arith.constant 0 : index
    %c0_1 = arith.constant 0 : index
    %c0_2 = arith.constant 0 : index
    %0 = vector.load %arg0[%c0, %c0_0, %c0_1, %c0_2] : memref<2x16x16x4xbf16, #tpu.memory_space<vmem>>, vector<2x16x16x4xbf16>
    %1 = vector.shape_cast %0 : vector<2x16x16x4xbf16> to vector<512x4xbf16>
    %c0_3 = arith.constant 0 : index
    %c0_4 = arith.constant 0 : index
    %2 = vector.load %arg1[%c0_3, %c0_4] : memref<4x16xbf16, #tpu.memory_space<vmem>>, vector<4x16xbf16>
    %cst = arith.constant dense<0.000000e+00> : vector<512x16xf32>
    %3 = tpu.matmul %1, %2, %cst {dimension_numbers = #tpu.dot_dimension_numbers<[1], [0], [0], [1], [0, 0, 1, 1], [], []>} : vector<512x4xbf16>, vector<4x16xbf16>, vector<512x16xf32> -> vector<512x16xf32>
    %4 = vector.extract_strided_slice %3 {offsets = [0, 0], sizes = [512, 8], strides = [1, 1]} : vector<512x16xf32> to vector<512x8xf32>
    %5 = vector.extract_strided_slice %3 {offsets = [0, 8], sizes = [512, 8], strides = [1, 1]} : vector<512x16xf32> to vector<512x8xf32>
    %cst_5 = arith.constant dense<0.000000e+00> : vector<8xf32>
    %6 = vector.multi_reduction <add>, %5, %cst_5 [0] : vector<512x8xf32> to vector<8xf32>
    %7 = vector.shape_cast %6 : vector<8xf32> to vector<1x8xf32>
    %cst_6 = arith.constant 0.001953125 : f32
    %8 = vector.broadcast %cst_6 : f32 to vector<1x8xf32>
    %9 = arith.mulf %7, %8 : vector<1x8xf32>
    %10 = arith.mulf %5, %5 : vector<512x8xf32>
    %cst_7 = arith.constant dense<0.000000e+00> : vector<8xf32>
    %11 = vector.multi_reduction <add>, %10, %cst_7 [0] : vector<512x8xf32> to vector<8xf32>
    %12 = vector.shape_cast %11 : vector<8xf32> to vector<1x8xf32>
    %cst_8 = arith.constant 0.001953125 : f32
    %13 = vector.broadcast %cst_8 : f32 to vector<1x8xf32>
    %14 = arith.mulf %12, %13 : vector<1x8xf32>
    %15 = arith.mulf %9, %9 : vector<1x8xf32>
    %16 = arith.subf %14, %15 : vector<1x8xf32>
    %cst_9 = arith.constant 0.000000e+00 : f32
    %17 = vector.broadcast %cst_9 : f32 to vector<1x8xf32>
    %18 = arith.maximumf %16, %17 : vector<1x8xf32>
    %c0_10 = arith.constant 0 : index
    %c0_11 = arith.constant 0 : index
    %19 = vector.load %arg10[%c0_10, %c0_11] : memref<1x8xf32, #tpu.memory_space<vmem>>, vector<1x8xf32>
    %cst_12 = arith.constant 9.99999974E-6 : f32
    %20 = vector.broadcast %cst_12 : f32 to vector<1x8xf32>
    %21 = arith.addf %18, %20 : vector<1x8xf32>
    %22 = math.rsqrt %21 : vector<1x8xf32>
    %23 = arith.mulf %19, %22 : vector<1x8xf32>
    %c0_13 = arith.constant 0 : index
    %c0_14 = arith.constant 0 : index
    %24 = vector.load %arg11[%c0_13, %c0_14] : memref<1x8xf32, #tpu.memory_space<vmem>>, vector<1x8xf32>
    %25 = arith.mulf %9, %23 : vector<1x8xf32>
    %26 = arith.subf %24, %25 : vector<1x8xf32>
    %27 = vector.broadcast %23 : vector<1x8xf32> to vector<512x8xf32>
    %28 = arith.mulf %5, %27 : vector<512x8xf32>
    %29 = vector.broadcast %26 : vector<1x8xf32> to vector<512x8xf32>
    %30 = arith.addf %28, %29 : vector<512x8xf32>
    %31 = vector.shape_cast %4 : vector<512x8xf32> to vector<2x16x16x8xf32>
    %cst_15 = arith.constant dense<0.000000e+00> : vector<2x8xf32>
    %32 = vector.multi_reduction <add>, %31, %cst_15 [1, 2] : vector<2x16x16x8xf32> to vector<2x8xf32>
    %33 = vector.shape_cast %32 : vector<2x8xf32> to vector<2x1x1x8xf32>
    %cst_16 = arith.constant 3.906250e-03 : f32
    %34 = vector.broadcast %cst_16 : f32 to vector<2x1x1x8xf32>
    %35 = arith.mulf %33, %34 : vector<2x1x1x8xf32>
    %36 = arith.mulf %31, %31 : vector<2x16x16x8xf32>
    %cst_17 = arith.constant dense<0.000000e+00> : vector<2x8xf32>
    %37 = vector.multi_reduction <add>, %36, %cst_17 [1, 2] : vector<2x16x16x8xf32> to vector<2x8xf32>
    %38 = vector.shape_cast %37 : vector<2x8xf32> to vector<2x1x1x8xf32>
    %cst_18 = arith.constant 3.906250e-03 : f32
    %39 = vector.broadcast %cst_18 : f32 to vector<2x1x1x8xf32>
    %40 = arith.mulf %38, %39 : vector<2x1x1x8xf32>
    %41 = arith.mulf %35, %35 : vector<2x1x1x8xf32>
    %42 = arith.subf %40, %41 : vector<2x1x1x8xf32>
    %cst_19 = arith.constant 0.000000e+00 : f32
    %43 = vector.broadcast %cst_19 : f32 to vector<2x1x1x8xf32>
    %44 = arith.maximumf %42, %43 : vector<2x1x1x8xf32>
    %cst_20 = arith.constant dense<0.000000e+00> : vector<1x1x8xf32>
    %45 = vector.multi_reduction <add>, %35, %cst_20 [0] : vector<2x1x1x8xf32> to vector<1x1x8xf32>
    %46 = vector.shape_cast %45 : vector<1x1x8xf32> to vector<1x1x1x8xf32>
    %cst_21 = arith.constant 2.000000e+00 : f32
    %47 = vector.broadcast %cst_21 : f32 to vector<1x1x1x8xf32>
    %48 = arith.divf %46, %47 : vector<1x1x1x8xf32>
    %cst_22 = arith.constant dense<0.000000e+00> : vector<1x1x8xf32>
    %49 = vector.multi_reduction <add>, %40, %cst_22 [0] : vector<2x1x1x8xf32> to vector<1x1x8xf32>
    %50 = vector.shape_cast %49 : vector<1x1x8xf32> to vector<1x1x1x8xf32>
    %cst_23 = arith.constant 2.000000e+00 : f32
    %51 = vector.broadcast %cst_23 : f32 to vector<1x1x1x8xf32>
    %52 = arith.divf %50, %51 : vector<1x1x1x8xf32>
    %53 = arith.mulf %48, %48 : vector<1x1x1x8xf32>
    %54 = arith.subf %52, %53 : vector<1x1x1x8xf32>
    %cst_24 = arith.constant 0.000000e+00 : f32
    %55 = vector.broadcast %cst_24 : f32 to vector<1x1x1x8xf32>
    %56 = arith.maximumf %54, %55 : vector<1x1x1x8xf32>
    %57 = tpu.iota {dimensions = array<i32: 3>} : vector<1x1x1x8xi32>
    %c4_i32 = arith.constant 4 : i32
    %58 = vector.broadcast %c4_i32 : i32 to vector<1x1x1x8xi32>
    %59 = arith.cmpi slt, %57, %58 : vector<1x1x1x8xi32>
    %60 = vector.shape_cast %59 : vector<1x1x1x8xi1> to vector<1x1x1x8xi1>
    %61 = vector.broadcast %60 : vector<1x1x1x8xi1> to vector<2x1x1x8xi1>
    %62 = vector.shape_cast %48 : vector<1x1x1x8xf32> to vector<1x1x1x8xf32>
    %63 = vector.broadcast %62 : vector<1x1x1x8xf32> to vector<2x1x1x8xf32>
    %64 = arith.select %61, %35, %63 : vector<2x1x1x8xi1>, vector<2x1x1x8xf32>
    %65 = vector.shape_cast %59 : vector<1x1x1x8xi1> to vector<1x1x1x8xi1>
    %66 = vector.broadcast %65 : vector<1x1x1x8xi1> to vector<2x1x1x8xi1>
    %67 = vector.shape_cast %56 : vector<1x1x1x8xf32> to vector<1x1x1x8xf32>
    %68 = vector.broadcast %67 : vector<1x1x1x8xf32> to vector<2x1x1x8xf32>
    %69 = arith.select %66, %44, %68 : vector<2x1x1x8xi1>, vector<2x1x1x8xf32>
    %c0_25 = arith.constant 0 : index
    %c0_26 = arith.constant 0 : index
    %70 = vector.load %arg2[%c0_25, %c0_26] : memref<1x8xf32, #tpu.memory_space<vmem>>, vector<1x8xf32>
    %71 = vector.shape_cast %70 : vector<1x8xf32> to vector<1x1x1x8xf32>
    %cst_27 = arith.constant 9.99999974E-6 : f32
    %72 = vector.broadcast %cst_27 : f32 to vector<2x1x1x8xf32>
    %73 = arith.addf %69, %72 : vector<2x1x1x8xf32>
    %74 = math.rsqrt %73 : vector<2x1x1x8xf32>
    %75 = vector.broadcast %71 : vector<1x1x1x8xf32> to vector<2x1x1x8xf32>
    %76 = arith.mulf %75, %74 : vector<2x1x1x8xf32>
    %c0_28 = arith.constant 0 : index
    %c0_29 = arith.constant 0 : index
    %77 = vector.load %arg3[%c0_28, %c0_29] : memref<1x8xf32, #tpu.memory_space<vmem>>, vector<1x8xf32>
    %78 = vector.shape_cast %77 : vector<1x8xf32> to vector<1x1x1x8xf32>
    %79 = arith.mulf %64, %76 : vector<2x1x1x8xf32>
    %80 = vector.broadcast %78 : vector<1x1x1x8xf32> to vector<2x1x1x8xf32>
    %81 = arith.subf %80, %79 : vector<2x1x1x8xf32>
    %82 = vector.broadcast %76 : vector<2x1x1x8xf32> to vector<2x16x16x8xf32>
    %83 = arith.mulf %31, %82 : vector<2x16x16x8xf32>
    %84 = vector.broadcast %81 : vector<2x1x1x8xf32> to vector<2x16x16x8xf32>
    %85 = arith.addf %83, %84 : vector<2x16x16x8xf32>
    %cst_30 = arith.constant 0.000000e+00 : f32
    %86 = vector.broadcast %cst_30 : f32 to vector<2x16x16x8xf32>
    %87 = arith.maximumf %85, %86 : vector<2x16x16x8xf32>
    %88 = arith.truncf %87 : vector<2x16x16x8xf32> to vector<2x16x16x8xbf16>
    %cst_31 = arith.constant 0.000000e+00 : bf16
    %89 = vector.broadcast %cst_31 : bf16 to vector<2x16x1x8xbf16>
    %90 = vector.extract_strided_slice %88 {offsets = [0, 0, 0, 0], sizes = [2, 16, 15, 8], strides = [1, 1, 1, 1]} : vector<2x16x16x8xbf16> to vector<2x16x15x8xbf16>
    %91 = tpu.concatenate %89, %90 in 2 : vector<2x16x1x8xbf16>, vector<2x16x15x8xbf16> -> vector<2x16x16x8xbf16>
    %92 = vector.extract_strided_slice %88 {offsets = [0, 0, 1, 0], sizes = [2, 16, 15, 8], strides = [1, 1, 1, 1]} : vector<2x16x16x8xbf16> to vector<2x16x15x8xbf16>
    %93 = tpu.concatenate %92, %89 in 2 : vector<2x16x15x8xbf16>, vector<2x16x1x8xbf16> -> vector<2x16x16x8xbf16>
    %94 = tpu.concatenate %91, %88, %93 in 3 : vector<2x16x16x8xbf16>, vector<2x16x16x8xbf16>, vector<2x16x16x8xbf16> -> vector<2x16x16x24xbf16>
    %95 = vector.shape_cast %94 : vector<2x16x16x24xbf16> to vector<512x24xbf16>
    %c0_32 = arith.constant 0 : index
    %c0_33 = arith.constant 0 : index
    %96 = vector.load %arg4[%c0_32, %c0_33] : memref<24x24xbf16, #tpu.memory_space<vmem>>, vector<24x24xbf16>
    %cst_34 = arith.constant dense<0.000000e+00> : vector<512x24xf32>
    %97 = tpu.matmul %95, %96, %cst_34 {dimension_numbers = #tpu.dot_dimension_numbers<[1], [0], [0], [1], [0, 0, 1, 1], [], []>} : vector<512x24xbf16>, vector<24x24xbf16>, vector<512x24xf32> -> vector<512x24xf32>
    %98 = vector.shape_cast %97 : vector<512x24xf32> to vector<2x16x16x24xf32>
    %cst_35 = arith.constant 0.000000e+00 : f32
    %99 = vector.broadcast %cst_35 : f32 to vector<2x1x16x8xf32>
    %100 = vector.extract_strided_slice %98 {offsets = [0, 0, 0, 8], sizes = [2, 16, 16, 8], strides = [1, 1, 1, 1]} : vector<2x16x16x24xf32> to vector<2x16x16x8xf32>
    %101 = vector.extract_strided_slice %98 {offsets = [0, 0, 0, 0], sizes = [2, 15, 16, 8], strides = [1, 1, 1, 1]} : vector<2x16x16x24xf32> to vector<2x15x16x8xf32>
    %102 = tpu.concatenate %99, %101 in 1 : vector<2x1x16x8xf32>, vector<2x15x16x8xf32> -> vector<2x16x16x8xf32>
    %103 = arith.addf %100, %102 : vector<2x16x16x8xf32>
    %104 = vector.extract_strided_slice %98 {offsets = [0, 1, 0, 16], sizes = [2, 15, 16, 8], strides = [1, 1, 1, 1]} : vector<2x16x16x24xf32> to vector<2x15x16x8xf32>
    %105 = tpu.concatenate %104, %99 in 1 : vector<2x15x16x8xf32>, vector<2x1x16x8xf32> -> vector<2x16x16x8xf32>
    %106 = arith.addf %103, %105 : vector<2x16x16x8xf32>
    %107 = vector.shape_cast %106 : vector<2x16x16x8xf32> to vector<512x8xf32>
    %cst_36 = arith.constant dense<0.000000e+00> : vector<8xf32>
    %108 = vector.multi_reduction <add>, %107, %cst_36 [0] : vector<512x8xf32> to vector<8xf32>
    %109 = vector.shape_cast %108 : vector<8xf32> to vector<1x8xf32>
    %cst_37 = arith.constant 0.001953125 : f32
    %110 = vector.broadcast %cst_37 : f32 to vector<1x8xf32>
    %111 = arith.mulf %109, %110 : vector<1x8xf32>
    %112 = arith.mulf %107, %107 : vector<512x8xf32>
    %cst_38 = arith.constant dense<0.000000e+00> : vector<8xf32>
    %113 = vector.multi_reduction <add>, %112, %cst_38 [0] : vector<512x8xf32> to vector<8xf32>
    %114 = vector.shape_cast %113 : vector<8xf32> to vector<1x8xf32>
    %cst_39 = arith.constant 0.001953125 : f32
    %115 = vector.broadcast %cst_39 : f32 to vector<1x8xf32>
    %116 = arith.mulf %114, %115 : vector<1x8xf32>
    %c0_40 = arith.constant 0 : index
    %c0_41 = arith.constant 0 : index
    %117 = vector.load %arg5[%c0_40, %c0_41] : memref<1x8xf32, #tpu.memory_space<vmem>>, vector<1x8xf32>
    %118 = arith.mulf %111, %111 : vector<1x8xf32>
    %119 = arith.subf %116, %118 : vector<1x8xf32>
    %cst_42 = arith.constant 0.000000e+00 : f32
    %120 = vector.broadcast %cst_42 : f32 to vector<1x8xf32>
    %121 = arith.maximumf %119, %120 : vector<1x8xf32>
    %cst_43 = arith.constant 9.99999974E-6 : f32
    %122 = vector.broadcast %cst_43 : f32 to vector<1x8xf32>
    %123 = arith.addf %121, %122 : vector<1x8xf32>
    %124 = math.rsqrt %123 : vector<1x8xf32>
    %125 = arith.mulf %117, %124 : vector<1x8xf32>
    %c0_44 = arith.constant 0 : index
    %c0_45 = arith.constant 0 : index
    %126 = vector.load %arg6[%c0_44, %c0_45] : memref<1x8xf32, #tpu.memory_space<vmem>>, vector<1x8xf32>
    %127 = arith.mulf %111, %125 : vector<1x8xf32>
    %128 = arith.subf %126, %127 : vector<1x8xf32>
    %129 = vector.broadcast %125 : vector<1x8xf32> to vector<512x8xf32>
    %130 = arith.mulf %107, %129 : vector<512x8xf32>
    %131 = vector.broadcast %128 : vector<1x8xf32> to vector<512x8xf32>
    %132 = arith.addf %130, %131 : vector<512x8xf32>
    %133 = arith.truncf %132 : vector<512x8xf32> to vector<512x8xbf16>
    %c0_46 = arith.constant 0 : index
    %c0_47 = arith.constant 0 : index
    %134 = vector.load %arg7[%c0_46, %c0_47] : memref<8x8xbf16, #tpu.memory_space<vmem>>, vector<8x8xbf16>
    %cst_48 = arith.constant dense<0.000000e+00> : vector<512x8xf32>
    %135 = tpu.matmul %133, %134, %cst_48 {dimension_numbers = #tpu.dot_dimension_numbers<[1], [0], [0], [1], [0, 0, 1, 1], [], []>} : vector<512x8xbf16>, vector<8x8xbf16>, vector<512x8xf32> -> vector<512x8xf32>
    %cst_49 = arith.constant dense<0.000000e+00> : vector<8xf32>
    %136 = vector.multi_reduction <add>, %135, %cst_49 [0] : vector<512x8xf32> to vector<8xf32>
    %137 = vector.shape_cast %136 : vector<8xf32> to vector<1x8xf32>
    %cst_50 = arith.constant 0.001953125 : f32
    %138 = vector.broadcast %cst_50 : f32 to vector<1x8xf32>
    %139 = arith.mulf %137, %138 : vector<1x8xf32>
    %140 = arith.mulf %135, %135 : vector<512x8xf32>
    %cst_51 = arith.constant dense<0.000000e+00> : vector<8xf32>
    %141 = vector.multi_reduction <add>, %140, %cst_51 [0] : vector<512x8xf32> to vector<8xf32>
    %142 = vector.shape_cast %141 : vector<8xf32> to vector<1x8xf32>
    %cst_52 = arith.constant 0.001953125 : f32
    %143 = vector.broadcast %cst_52 : f32 to vector<1x8xf32>
    %144 = arith.mulf %142, %143 : vector<1x8xf32>
    %c0_53 = arith.constant 0 : index
    %c0_54 = arith.constant 0 : index
    %145 = vector.load %arg8[%c0_53, %c0_54] : memref<1x8xf32, #tpu.memory_space<vmem>>, vector<1x8xf32>
    %146 = arith.mulf %139, %139 : vector<1x8xf32>
    %147 = arith.subf %144, %146 : vector<1x8xf32>
    %cst_55 = arith.constant 0.000000e+00 : f32
    %148 = vector.broadcast %cst_55 : f32 to vector<1x8xf32>
    %149 = arith.maximumf %147, %148 : vector<1x8xf32>
    %cst_56 = arith.constant 9.99999974E-6 : f32
    %150 = vector.broadcast %cst_56 : f32 to vector<1x8xf32>
    %151 = arith.addf %149, %150 : vector<1x8xf32>
    %152 = math.rsqrt %151 : vector<1x8xf32>
    %153 = arith.mulf %145, %152 : vector<1x8xf32>
    %c0_57 = arith.constant 0 : index
    %c0_58 = arith.constant 0 : index
    %154 = vector.load %arg9[%c0_57, %c0_58] : memref<1x8xf32, #tpu.memory_space<vmem>>, vector<1x8xf32>
    %155 = arith.mulf %139, %153 : vector<1x8xf32>
    %156 = arith.subf %154, %155 : vector<1x8xf32>
    %157 = vector.broadcast %153 : vector<1x8xf32> to vector<512x8xf32>
    %158 = arith.mulf %135, %157 : vector<512x8xf32>
    %159 = vector.broadcast %156 : vector<1x8xf32> to vector<512x8xf32>
    %160 = arith.addf %158, %159 : vector<512x8xf32>
    %161 = arith.addf %160, %30 : vector<512x8xf32>
    %cst_59 = arith.constant 0.000000e+00 : f32
    %162 = vector.broadcast %cst_59 : f32 to vector<512x8xf32>
    %163 = arith.maximumf %161, %162 : vector<512x8xf32>
    %164 = vector.shape_cast %163 : vector<512x8xf32> to vector<2x16x128xf32>
    %c0_60 = arith.constant 0 : index
    %c0_61 = arith.constant 0 : index
    %c0_62 = arith.constant 0 : index
    %165 = vector.load %arg12[%c0_60, %c0_61, %c0_62] : memref<2x16x128xf32, #tpu.memory_space<vmem>>, vector<2x16x128xf32>
    tpu.vector_store %arg12[%c0_60, %c0_61, %c0_62], %164 {strides = array<i32>} : memref<2x16x128xf32, #tpu.memory_space<vmem>>, vector<2x16x128xf32>,
    return
  }
}

module attributes {stable_mosaic.version = 11 : i64} {
  func.func @_residual_ibn_kernel(%arg0: memref<2x16x16x4xbf16, #tpu.memory_space<vmem>>, %arg1: memref<4x16xbf16, #tpu.memory_space<vmem>>, %arg2: memref<1x8xf32, #tpu.memory_space<vmem>>, %arg3: memref<1x8xf32, #tpu.memory_space<vmem>>, %arg4: memref<24x24xbf16, #tpu.memory_space<vmem>>, %arg5: memref<1x8xf32, #tpu.memory_space<vmem>>, %arg6: memref<1x8xf32, #tpu.memory_space<vmem>>, %arg7: memref<8x8xbf16, #tpu.memory_space<vmem>>, %arg8: memref<1x8xf32, #tpu.memory_space<vmem>>, %arg9: memref<1x8xf32, #tpu.memory_space<vmem>>, %arg10: memref<1x8xf32, #tpu.memory_space<vmem>>, %arg11: memref<1x8xf32, #tpu.memory_space<vmem>>, %arg12: memref<2x16x16x8xf32, #tpu.memory_space<vmem>>) attributes {dimension_semantics = [], scalar_prefetch = 0 : i64, scratch_operands = 0 : i64, tpu.core_type = #tpu.core_type<tc>} {
    %c0 = arith.constant 0 : index
    %c0_0 = arith.constant 0 : index
    %c0_1 = arith.constant 0 : index
    %c0_2 = arith.constant 0 : index
    %0 = vector.load %arg0[%c0, %c0_0, %c0_1, %c0_2] : memref<2x16x16x4xbf16, #tpu.memory_space<vmem>>, vector<2x16x16x4xbf16>
    %1 = vector.shape_cast %0 : vector<2x16x16x4xbf16> to vector<512x4xbf16>
    %c0_3 = arith.constant 0 : index
    %c0_4 = arith.constant 0 : index
    %2 = vector.load %arg1[%c0_3, %c0_4] : memref<4x16xbf16, #tpu.memory_space<vmem>>, vector<4x16xbf16>
    %cst = arith.constant dense<0.000000e+00> : vector<512x16xf32>
    %3 = tpu.matmul %1, %2, %cst {dimension_numbers = #tpu.dot_dimension_numbers<[1], [0], [0], [1], [0, 0, 1, 1], [], []>} : vector<512x4xbf16>, vector<4x16xbf16>, vector<512x16xf32> -> vector<512x16xf32>
    %4 = vector.extract_strided_slice %3 {offsets = [0, 0], sizes = [512, 8], strides = [1, 1]} : vector<512x16xf32> to vector<512x8xf32>
    %5 = vector.extract_strided_slice %3 {offsets = [0, 8], sizes = [512, 8], strides = [1, 1]} : vector<512x16xf32> to vector<512x8xf32>
    %cst_5 = arith.constant dense<0.000000e+00> : vector<8xf32>
    %6 = vector.multi_reduction <add>, %5, %cst_5 [0] : vector<512x8xf32> to vector<8xf32>
    %7 = vector.shape_cast %6 : vector<8xf32> to vector<1x8xf32>
    %cst_6 = arith.constant 0.001953125 : f32
    %8 = vector.broadcast %cst_6 : f32 to vector<1x8xf32>
    %9 = arith.mulf %7, %8 : vector<1x8xf32>
    %10 = arith.mulf %5, %5 : vector<512x8xf32>
    %cst_7 = arith.constant dense<0.000000e+00> : vector<8xf32>
    %11 = vector.multi_reduction <add>, %10, %cst_7 [0] : vector<512x8xf32> to vector<8xf32>
    %12 = vector.shape_cast %11 : vector<8xf32> to vector<1x8xf32>
    %cst_8 = arith.constant 0.001953125 : f32
    %13 = vector.broadcast %cst_8 : f32 to vector<1x8xf32>
    %14 = arith.mulf %12, %13 : vector<1x8xf32>
    %15 = arith.mulf %9, %9 : vector<1x8xf32>
    %16 = arith.subf %14, %15 : vector<1x8xf32>
    %cst_9 = arith.constant 0.000000e+00 : f32
    %17 = vector.broadcast %cst_9 : f32 to vector<1x8xf32>
    %18 = arith.maximumf %16, %17 : vector<1x8xf32>
    %c0_10 = arith.constant 0 : index
    %c0_11 = arith.constant 0 : index
    %19 = vector.load %arg10[%c0_10, %c0_11] : memref<1x8xf32, #tpu.memory_space<vmem>>, vector<1x8xf32>
    %cst_12 = arith.constant 9.99999974E-6 : f32
    %20 = vector.broadcast %cst_12 : f32 to vector<1x8xf32>
    %21 = arith.addf %18, %20 : vector<1x8xf32>
    %22 = math.rsqrt %21 : vector<1x8xf32>
    %23 = arith.mulf %19, %22 : vector<1x8xf32>
    %c0_13 = arith.constant 0 : index
    %c0_14 = arith.constant 0 : index
    %24 = vector.load %arg11[%c0_13, %c0_14] : memref<1x8xf32, #tpu.memory_space<vmem>>, vector<1x8xf32>
    %25 = arith.mulf %9, %23 : vector<1x8xf32>
    %26 = arith.subf %24, %25 : vector<1x8xf32>
    %27 = vector.broadcast %23 : vector<1x8xf32> to vector<512x8xf32>
    %28 = arith.mulf %5, %27 : vector<512x8xf32>
    %29 = vector.broadcast %26 : vector<1x8xf32> to vector<512x8xf32>
    %30 = arith.addf %28, %29 : vector<512x8xf32>
    %31 = vector.shape_cast %4 : vector<512x8xf32> to vector<2x16x16x8xf32>
    %cst_15 = arith.constant dense<0.000000e+00> : vector<2x8xf32>
    %32 = vector.multi_reduction <add>, %31, %cst_15 [1, 2] : vector<2x16x16x8xf32> to vector<2x8xf32>
    %33 = vector.shape_cast %32 : vector<2x8xf32> to vector<2x1x1x8xf32>
    %cst_16 = arith.constant 3.906250e-03 : f32
    %34 = vector.broadcast %cst_16 : f32 to vector<2x1x1x8xf32>
    %35 = arith.mulf %33, %34 : vector<2x1x1x8xf32>
    %36 = arith.mulf %31, %31 : vector<2x16x16x8xf32>
    %cst_17 = arith.constant dense<0.000000e+00> : vector<2x8xf32>
    %37 = vector.multi_reduction <add>, %36, %cst_17 [1, 2] : vector<2x16x16x8xf32> to vector<2x8xf32>
    %38 = vector.shape_cast %37 : vector<2x8xf32> to vector<2x1x1x8xf32>
    %cst_18 = arith.constant 3.906250e-03 : f32
    %39 = vector.broadcast %cst_18 : f32 to vector<2x1x1x8xf32>
    %40 = arith.mulf %38, %39 : vector<2x1x1x8xf32>
    %41 = arith.mulf %35, %35 : vector<2x1x1x8xf32>
    %42 = arith.subf %40, %41 : vector<2x1x1x8xf32>
    %cst_19 = arith.constant 0.000000e+00 : f32
    %43 = vector.broadcast %cst_19 : f32 to vector<2x1x1x8xf32>
    %44 = arith.maximumf %42, %43 : vector<2x1x1x8xf32>
    %cst_20 = arith.constant dense<0.000000e+00> : vector<1x1x8xf32>
    %45 = vector.multi_reduction <add>, %35, %cst_20 [0] : vector<2x1x1x8xf32> to vector<1x1x8xf32>
    %46 = vector.shape_cast %45 : vector<1x1x8xf32> to vector<1x1x1x8xf32>
    %cst_21 = arith.constant 2.000000e+00 : f32
    %47 = vector.broadcast %cst_21 : f32 to vector<1x1x1x8xf32>
    %48 = arith.divf %46, %47 : vector<1x1x1x8xf32>
    %cst_22 = arith.constant dense<0.000000e+00> : vector<1x1x8xf32>
    %49 = vector.multi_reduction <add>, %40, %cst_22 [0] : vector<2x1x1x8xf32> to vector<1x1x8xf32>
    %50 = vector.shape_cast %49 : vector<1x1x8xf32> to vector<1x1x1x8xf32>
    %cst_23 = arith.constant 2.000000e+00 : f32
    %51 = vector.broadcast %cst_23 : f32 to vector<1x1x1x8xf32>
    %52 = arith.divf %50, %51 : vector<1x1x1x8xf32>
    %53 = arith.mulf %48, %48 : vector<1x1x1x8xf32>
    %54 = arith.subf %52, %53 : vector<1x1x1x8xf32>
    %cst_24 = arith.constant 0.000000e+00 : f32
    %55 = vector.broadcast %cst_24 : f32 to vector<1x1x1x8xf32>
    %56 = arith.maximumf %54, %55 : vector<1x1x1x8xf32>
    %57 = tpu.iota {dimensions = array<i32: 3>} : vector<1x1x1x8xi32>
    %c4_i32 = arith.constant 4 : i32
    %58 = vector.broadcast %c4_i32 : i32 to vector<1x1x1x8xi32>
    %59 = arith.cmpi slt, %57, %58 : vector<1x1x1x8xi32>
    %60 = vector.shape_cast %59 : vector<1x1x1x8xi1> to vector<1x1x1x8xi1>
    %61 = vector.broadcast %60 : vector<1x1x1x8xi1> to vector<2x1x1x8xi1>
    %62 = vector.shape_cast %48 : vector<1x1x1x8xf32> to vector<1x1x1x8xf32>
    %63 = vector.broadcast %62 : vector<1x1x1x8xf32> to vector<2x1x1x8xf32>
    %64 = arith.select %61, %35, %63 : vector<2x1x1x8xi1>, vector<2x1x1x8xf32>
    %65 = vector.shape_cast %59 : vector<1x1x1x8xi1> to vector<1x1x1x8xi1>
    %66 = vector.broadcast %65 : vector<1x1x1x8xi1> to vector<2x1x1x8xi1>
    %67 = vector.shape_cast %56 : vector<1x1x1x8xf32> to vector<1x1x1x8xf32>
    %68 = vector.broadcast %67 : vector<1x1x1x8xf32> to vector<2x1x1x8xf32>
    %69 = arith.select %66, %44, %68 : vector<2x1x1x8xi1>, vector<2x1x1x8xf32>
    %c0_25 = arith.constant 0 : index
    %c0_26 = arith.constant 0 : index
    %70 = vector.load %arg2[%c0_25, %c0_26] : memref<1x8xf32, #tpu.memory_space<vmem>>, vector<1x8xf32>
    %71 = vector.shape_cast %70 : vector<1x8xf32> to vector<1x1x1x8xf32>
    %cst_27 = arith.constant 9.99999974E-6 : f32
    %72 = vector.broadcast %cst_27 : f32 to vector<2x1x1x8xf32>
    %73 = arith.addf %69, %72 : vector<2x1x1x8xf32>
    %74 = math.rsqrt %73 : vector<2x1x1x8xf32>
    %75 = vector.broadcast %71 : vector<1x1x1x8xf32> to vector<2x1x1x8xf32>
    %76 = arith.mulf %75, %74 : vector<2x1x1x8xf32>
    %c0_28 = arith.constant 0 : index
    %c0_29 = arith.constant 0 : index
    %77 = vector.load %arg3[%c0_28, %c0_29] : memref<1x8xf32, #tpu.memory_space<vmem>>, vector<1x8xf32>
    %78 = vector.shape_cast %77 : vector<1x8xf32> to vector<1x1x1x8xf32>
    %79 = arith.mulf %64, %76 : vector<2x1x1x8xf32>
    %80 = vector.broadcast %78 : vector<1x1x1x8xf32> to vector<2x1x1x8xf32>
    %81 = arith.subf %80, %79 : vector<2x1x1x8xf32>
    %82 = vector.broadcast %76 : vector<2x1x1x8xf32> to vector<2x16x16x8xf32>
    %83 = arith.mulf %31, %82 : vector<2x16x16x8xf32>
    %84 = vector.broadcast %81 : vector<2x1x1x8xf32> to vector<2x16x16x8xf32>
    %85 = arith.addf %83, %84 : vector<2x16x16x8xf32>
    %cst_30 = arith.constant 0.000000e+00 : f32
    %86 = vector.broadcast %cst_30 : f32 to vector<2x16x16x8xf32>
    %87 = arith.maximumf %85, %86 : vector<2x16x16x8xf32>
    %88 = arith.truncf %87 : vector<2x16x16x8xf32> to vector<2x16x16x8xbf16>
    %cst_31 = arith.constant 0.000000e+00 : bf16
    %89 = vector.broadcast %cst_31 : bf16 to vector<2x16x1x8xbf16>
    %90 = vector.extract_strided_slice %88 {offsets = [0, 0, 0, 0], sizes = [2, 16, 15, 8], strides = [1, 1, 1, 1]} : vector<2x16x16x8xbf16> to vector<2x16x15x8xbf16>
    %91 = tpu.concatenate %89, %90 in 2 : vector<2x16x1x8xbf16>, vector<2x16x15x8xbf16> -> vector<2x16x16x8xbf16>
    %92 = vector.extract_strided_slice %88 {offsets = [0, 0, 1, 0], sizes = [2, 16, 15, 8], strides = [1, 1, 1, 1]} : vector<2x16x16x8xbf16> to vector<2x16x15x8xbf16>
    %93 = tpu.concatenate %92, %89 in 2 : vector<2x16x15x8xbf16>, vector<2x16x1x8xbf16> -> vector<2x16x16x8xbf16>
    %94 = tpu.concatenate %91, %88, %93 in 3 : vector<2x16x16x8xbf16>, vector<2x16x16x8xbf16>, vector<2x16x16x8xbf16> -> vector<2x16x16x24xbf16>
    %95 = vector.shape_cast %94 : vector<2x16x16x24xbf16> to vector<512x24xbf16>
    %c0_32 = arith.constant 0 : index
    %c0_33 = arith.constant 0 : index
    %96 = vector.load %arg4[%c0_32, %c0_33] : memref<24x24xbf16, #tpu.memory_space<vmem>>, vector<24x24xbf16>
    %cst_34 = arith.constant dense<0.000000e+00> : vector<512x24xf32>
    %97 = tpu.matmul %95, %96, %cst_34 {dimension_numbers = #tpu.dot_dimension_numbers<[1], [0], [0], [1], [0, 0, 1, 1], [], []>} : vector<512x24xbf16>, vector<24x24xbf16>, vector<512x24xf32> -> vector<512x24xf32>
    %98 = vector.shape_cast %97 : vector<512x24xf32> to vector<2x16x16x24xf32>
    %cst_35 = arith.constant 0.000000e+00 : f32
    %99 = vector.broadcast %cst_35 : f32 to vector<2x1x16x8xf32>
    %100 = vector.extract_strided_slice %98 {offsets = [0, 0, 0, 8], sizes = [2, 16, 16, 8], strides = [1, 1, 1, 1]} : vector<2x16x16x24xf32> to vector<2x16x16x8xf32>
    %101 = vector.extract_strided_slice %98 {offsets = [0, 0, 0, 0], sizes = [2, 15, 16, 8], strides = [1, 1, 1, 1]} : vector<2x16x16x24xf32> to vector<2x15x16x8xf32>
    %102 = tpu.concatenate %99, %101 in 1 : vector<2x1x16x8xf32>, vector<2x15x16x8xf32> -> vector<2x16x16x8xf32>
    %103 = arith.addf %100, %102 : vector<2x16x16x8xf32>
    %104 = vector.extract_strided_slice %98 {offsets = [0, 1, 0, 16], sizes = [2, 15, 16, 8], strides = [1, 1, 1, 1]} : vector<2x16x16x24xf32> to vector<2x15x16x8xf32>
    %105 = tpu.concatenate %104, %99 in 1 : vector<2x15x16x8xf32>, vector<2x1x16x8xf32> -> vector<2x16x16x8xf32>
    %106 = arith.addf %103, %105 : vector<2x16x16x8xf32>
    %107 = vector.shape_cast %106 : vector<2x16x16x8xf32> to vector<512x8xf32>
    %cst_36 = arith.constant dense<0.000000e+00> : vector<8xf32>
    %108 = vector.multi_reduction <add>, %107, %cst_36 [0] : vector<512x8xf32> to vector<8xf32>
    %109 = vector.shape_cast %108 : vector<8xf32> to vector<1x8xf32>
    %cst_37 = arith.constant 0.001953125 : f32
    %110 = vector.broadcast %cst_37 : f32 to vector<1x8xf32>
    %111 = arith.mulf %109, %110 : vector<1x8xf32>
    %112 = arith.mulf %107, %107 : vector<512x8xf32>
    %cst_38 = arith.constant dense<0.000000e+00> : vector<8xf32>
    %113 = vector.multi_reduction <add>, %112, %cst_38 [0] : vector<512x8xf32> to vector<8xf32>
    %114 = vector.shape_cast %113 : vector<8xf32> to vector<1x8xf32>
    %cst_39 = arith.constant 0.001953125 : f32
    %115 = vector.broadcast %cst_39 : f32 to vector<1x8xf32>
    %116 = arith.mulf %114, %115 : vector<1x8xf32>
    %c0_40 = arith.constant 0 : index
    %c0_41 = arith.constant 0 : index
    %117 = vector.load %arg5[%c0_40, %c0_41] : memref<1x8xf32, #tpu.memory_space<vmem>>, vector<1x8xf32>
    %118 = arith.mulf %111, %111 : vector<1x8xf32>
    %119 = arith.subf %116, %118 : vector<1x8xf32>
    %cst_42 = arith.constant 0.000000e+00 : f32
    %120 = vector.broadcast %cst_42 : f32 to vector<1x8xf32>
    %121 = arith.maximumf %119, %120 : vector<1x8xf32>
    %cst_43 = arith.constant 9.99999974E-6 : f32
    %122 = vector.broadcast %cst_43 : f32 to vector<1x8xf32>
    %123 = arith.addf %121, %122 : vector<1x8xf32>
    %124 = math.rsqrt %123 : vector<1x8xf32>
    %125 = arith.mulf %117, %124 : vector<1x8xf32>
    %c0_44 = arith.constant 0 : index
    %c0_45 = arith.constant 0 : index
    %126 = vector.load %arg6[%c0_44, %c0_45] : memref<1x8xf32, #tpu.memory_space<vmem>>, vector<1x8xf32>
    %127 = arith.mulf %111, %125 : vector<1x8xf32>
    %128 = arith.subf %126, %127 : vector<1x8xf32>
    %129 = vector.broadcast %125 : vector<1x8xf32> to vector<512x8xf32>
    %130 = arith.mulf %107, %129 : vector<512x8xf32>
    %131 = vector.broadcast %128 : vector<1x8xf32> to vector<512x8xf32>
    %132 = arith.addf %130, %131 : vector<512x8xf32>
    %133 = arith.truncf %132 : vector<512x8xf32> to vector<512x8xbf16>
    %c0_46 = arith.constant 0 : index
    %c0_47 = arith.constant 0 : index
    %134 = vector.load %arg7[%c0_46, %c0_47] : memref<8x8xbf16, #tpu.memory_space<vmem>>, vector<8x8xbf16>
    %cst_48 = arith.constant dense<0.000000e+00> : vector<512x8xf32>
    %135 = tpu.matmul %133, %134, %cst_48 {dimension_numbers = #tpu.dot_dimension_numbers<[1], [0], [0], [1], [0, 0, 1, 1], [], []>} : vector<512x8xbf16>, vector<8x8xbf16>, vector<512x8xf32> -> vector<512x8xf32>
    %cst_49 = arith.constant dense<0.000000e+00> : vector<8xf32>
    %136 = vector.multi_reduction <add>, %135, %cst_49 [0] : vector<512x8xf32> to vector<8xf32>
    %137 = vector.shape_cast %136 : vector<8xf32> to vector<1x8xf32>
    %cst_50 = arith.constant 0.001953125 : f32
    %138 = vector.broadcast %cst_50 : f32 to vector<1x8xf32>
    %139 = arith.mulf %137, %138 : vector<1x8xf32>
    %140 = arith.mulf %135, %135 : vector<512x8xf32>
    %cst_51 = arith.constant dense<0.000000e+00> : vector<8xf32>
    %141 = vector.multi_reduction <add>, %140, %cst_51 [0] : vector<512x8xf32> to vector<8xf32>
    %142 = vector.shape_cast %141 : vector<8xf32> to vector<1x8xf32>
    %cst_52 = arith.constant 0.001953125 : f32
    %143 = vector.broadcast %cst_52 : f32 to vector<1x8xf32>
    %144 = arith.mulf %142, %143 : vector<1x8xf32>
    %c0_53 = arith.constant 0 : index
    %c0_54 = arith.constant 0 : index
    %145 = vector.load %arg8[%c0_53, %c0_54] : memref<1x8xf32, #tpu.memory_space<vmem>>, vector<1x8xf32>
    %146 = arith.mulf %139, %139 : vector<1x8xf32>
    %147 = arith.subf %144, %146 : vector<1x8xf32>
    %cst_55 = arith.constant 0.000000e+00 : f32
    %148 = vector.broadcast %cst_55 : f32 to vector<1x8xf32>
    %149 = arith.maximumf %147, %148 : vector<1x8xf32>
    %cst_56 = arith.constant 9.99999974E-6 : f32
    %150 = vector.broadcast %cst_56 : f32 to vector<1x8xf32>
    %151 = arith.addf %149, %150 : vector<1x8xf32>
    %152 = math.rsqrt %151 : vector<1x8xf32>
    %153 = arith.mulf %145, %152 : vector<1x8xf32>
    %c0_57 = arith.constant 0 : index
    %c0_58 = arith.constant 0 : index
    %154 = vector.load %arg9[%c0_57, %c0_58] : memref<1x8xf32, #tpu.memory_space<vmem>>, vector<1x8xf32>
    %155 = arith.mulf %139, %153 : vector<1x8xf32>
    %156 = arith.subf %154, %155 : vector<1x8xf32>
    %157 = vector.broadcast %153 : vector<1x8xf32> to vector<512x8xf32>
    %158 = arith.mulf %135, %157 : vector<512x8xf32>
    %159 = vector.broadcast %156 : vector<1x8xf32> to vector<512x8xf32>
    %160 = arith.addf %158, %159 : vector<512x8xf32>
    %161 = arith.addf %160, %30 : vector<512x8xf32>
    %cst_59 = arith.constant 0.000000e+00 : f32
    %162 = vector.broadcast %cst_59 : f32 to vector<512x8xf32>
    %163 = arith.maximumf %161, %162 : vector<512x8xf32>
    %164 = vector.shape_cast %163 : vector<512x8xf32> to vector<2x16x16x8xf32>
    %c0_60 = arith.constant 0 : index
    %c0_61 = arith.constant 0 : index
    %c0_62 = arith.constant 0 : index
    %c0_63 = arith.constant 0 : index
    %165 = vector.load %arg12[%c0_60, %c0_61, %c0_62, %c0_63] : memref<2x16x16x8xf32, #tpu.memory_space<vmem>>, vector<2x16x16x8xf32>
    tpu.vector_store %arg12[%c0_60, %c0_61, %c0_62, %c0_63], %164 {strides = array<i32>} : memref<2x16x16x8xf32, #tpu.memory_space<vmem>>, vector<2x16x16x8xf32>,
    return
  }
}

</mosaic_0001>

<bundles_post_ra>
// kernel: tpu_custom_call.1
= control target key start
LH: loop header
LB: loop body
LE: loop exit
PB: predicated region body
PF: predicated region fallthrough
CT: control target
= control target key end

     0   :  { %vm364_vm0 = vcmask 1041408   ;;  %vm267_vm1 = vcmask 31744   ;;  %vm1180_vm2 = vcmask 64512   ;;  %vm657_vm3 = vcmask 130112   ;;  %s5911_s16 = smov 16   ;;  %s5913_s17 = smov 120   ;;  %s10597_s1 = inlined_call_operand.vmem [shape: bf16[4,16], index: 1, kind: input, shape index: {}]   ;;  %s10598_s0 = inlined_call_operand.vmem [shape: bf16[2,16,16,4], index: 0, kind: input, shape index: {}]   ;;  %s10599_s4 = inlined_call_operand.vmem [shape: bf16[24,24], index: 4, kind: input, shape index: {}]   ;;  %s10600_s2 = inlined_call_operand.vmem [shape: f32[1,8], index: 2, kind: input, shape index: {}]   ;;  %s10601_s3 = inlined_call_operand.vmem [shape: f32[1,8], index: 3, kind: input, shape index: {}]   ;;  %s10602_s5 = inlined_call_operand.vmem [shape: f32[1,8], index: 5, kind: input, shape index: {}]   ;;  %s10603_s6 = inlined_call_operand.vmem [shape: f32[1,8], index: 6, kind: input, shape index: {}]   ;;  %s10604_s7 = inlined_call_operand.vmem [shape: bf16[8,8], index: 7, kind: input, shape index: {}]   ;;  %s10605_s10 = inlined_call_operand.vmem [shape: f32[1,8], index: 10, kind: input, shape index: {}]   ;;  %s10606_s11 = inlined_call_operand.vmem [shape: f32[1,8], index: 11, kind: input, shape index: {}]   ;;  %s10607_s8 = inlined_call_operand.vmem [shape: f32[1,8], index: 8, kind: input, shape index: {}]   ;;  %s10608_s9 = inlined_call_operand.vmem [shape: f32[1,8], index: 9, kind: input, shape index: {}]   ;;  %s10609_s12 = inlined_call_operand.vmem [shape: f32[2,16,16,8], index: 12, kind: output, shape index: {}]  }
   0x1   :  { %v106_v0 = vld [vmem:[%s10597_s1] sm:$0x3]  ;;  %v5868_v4 = vld [vmem:[%s10598_s0 + $0x8] sm:$0xff]   ;;  %v5870_v6 = vld [vmem:[%s10598_s0 + $0x10] sm:$0xff]   ;;  %vm2600_vm4 = vcmask 1043456   ;;  %vm2135_vm6 = vcmask 1047552  }
   0x2   :  { %5857 = vmatprep.subr.msk.bf16.mxu0 %vm364_vm0, %v106_v0  ;;  %5858 = vmatprep.subr.msk.bf16.mxu1 %vm364_vm0, %v106_v0  ;;  %v366_v1 = vsel %vm364_vm0, %v106_v0, 0  ;;  %v5866_v2 = vld [vmem:[%s10598_s0] sm:$0xff]   ;;  %v5869_v5 = vld [vmem:[%s10598_s0 + $0x88] sm:$0xff]   ;;  %v5871_v7 = vld [vmem:[%s10598_s0 + $0x90] sm:$0xff]   ;;  %vm2136_vm7 = vsmask.f32 7424 }
   0x3   :  { %5656 = vmatpush3.bf16.msra.mxu0 %v366_v1  ;;  %5856 = vmatpush3.bf16.msra.mxu1 %v366_v1  ;;  %v5867_v3 = vld [vmem:[%s10598_s0 + $0x80] sm:$0xff]   ;;  %v5872_v8 = vld [vmem:[%s10598_s0 + $0x18] sm:$0xff]   ;;  %v5876_v12 = vld [vmem:[%s10598_s0 + $0x28] sm:$0xff]   ;;  %vm2004_vm9 = vcmask 1040384   ;;  %vm2005_vm10 = vsmask.f32 256 }
   0x4   :  { %5657 = vmatprep.mubr.msk.bf16.mxu0 %vm267_vm1, %v5866_v2  ;;  %5689 = vmatprep.mubr.msk.bf16.mxu1 %vm267_vm1, %v5867_v3  ;;  %v5873_v9 = vld [vmem:[%s10598_s0 + $0x98] sm:$0xff]   ;;  %v5874_v10 = vld [vmem:[%s10598_s0 + $0x20] sm:$0xff]   ;;  %v5877_v13 = vld [vmem:[%s10598_s0 + $0xa8] sm:$0xff]   ;;  %vm2458_vm12 = vcmask 130048   ;;  %vm2535_vm13 = vcmask 195584  }
   0x5   :  { %v5875_v11 = vld [vmem:[%s10598_s0 + $0xa0] sm:$0xff]   ;;  %v5878_v14 = vld [vmem:[%s10598_s0 + $0x30] sm:$0xff]   ;;  %v5880_v16 = vld [vmem:[%s10598_s0 + $0x38] sm:$0xff]  }
   0x6   :  { %5658 = vmatmul.mubr.msk.bf16.vlgmr.msra.gmra.mxu0 %vm267_vm1, %v5868_v4  ;;  %5690 = vmatmul.mubr.msk.bf16.vlgmr.msra.gmra.mxu1 %vm267_vm1, %v5869_v5  ;;  %v5879_v15 = vld [vmem:[%s10598_s0 + $0xb0] sm:$0xff]   ;;  %v5881_v17 = vld [vmem:[%s10598_s0 + $0xb8] sm:$0xff]   ;;  %v5882_v18 = vld [vmem:[%s10598_s0 + $0x40] sm:$0xff]  }
   0x7   :  { %5661 = vmatprep.mubr.msk.bf16.mxu0 %vm267_vm1, %v5870_v6  ;;  %5693 = vmatprep.mubr.msk.bf16.mxu1 %vm267_vm1, %v5871_v7  ;;  %v5883_v19 = vld [vmem:[%s10598_s0 + $0xc0] sm:$0xff]   ;;  %v5884_v20 = vld [vmem:[%s10598_s0 + $0x48] sm:$0xff]   ;;  %v5886_v22 = vld [vmem:[%s10598_s0 + $0x50] sm:$0xff]  }
   0x8   :  { %v5885_v21 = vld [vmem:[%s10598_s0 + $0xc8] sm:$0xff]   ;;  %v5887_v23 = vld [vmem:[%s10598_s0 + $0xd0] sm:$0xff]   ;;  %v5888_v24 = vld [vmem:[%s10598_s0 + $0x58] sm:$0xff]  }
   0x9   :  { %v5889_v25 = vld [vmem:[%s10598_s0 + $0xd8] sm:$0xff]   ;;  %v5890_v26 = vld [vmem:[%s10598_s0 + $0x60] sm:$0xff]   ;;  %v5892_v28 = vld [vmem:[%s10598_s0 + $0x68] sm:$0xff]  }
   0xa   :  { %v5891_v27 = vld [vmem:[%s10598_s0 + $0xe0] sm:$0xff]   ;;  %v5893_v29 = vld [vmem:[%s10598_s0 + $0xe8] sm:$0xff]   ;;  %v5894_v30 = vld [vmem:[%s10598_s0 + $0x70] sm:$0xff]  }
   0xb   :  { %v5895_v31 = vld [vmem:[%s10598_s0 + $0xf0] sm:$0xff]   ;;  %v5896_v32 = vld [vmem:[%s10598_s0 + $0x78] sm:$0xff]   ;;  %vm6849_vm8 = vmand %vm2135_vm6, %vm2136_vm7 }
   0xc   :  { %v5897_v33 = vld [vmem:[%s10598_s0 + $0xf8] sm:$0xff]   ;;  %vm7442_vm11 = vmand %vm2004_vm9, %vm2005_vm10 }
   0xe   :  { %5662 = vmatmul.mubr.msk.bf16.gmra.mxu0 %vm267_vm1, %v5872_v8  ;;  %5694 = vmatmul.mubr.msk.bf16.gmra.mxu1 %vm267_vm1, %v5873_v9 }
   0xf   :  { %5665 = vmatprep.mubr.msk.bf16.mxu0 %vm267_vm1, %v5874_v10  ;;  %5697 = vmatprep.mubr.msk.bf16.mxu1 %vm267_vm1, %v5875_v11 }
  0x16   :  { %5666 = vmatmul.mubr.msk.bf16.gmra.mxu0 %vm267_vm1, %v5876_v12  ;;  %5698 = vmatmul.mubr.msk.bf16.gmra.mxu1 %vm267_vm1, %v5877_v13 }
  0x17   :  { %5669 = vmatprep.mubr.msk.bf16.mxu0 %vm267_vm1, %v5878_v14  ;;  %5701 = vmatprep.mubr.msk.bf16.mxu1 %vm267_vm1, %v5879_v15 }
  0x1e   :  { %5670 = vmatmul.mubr.msk.bf16.gmra.mxu0 %vm267_vm1, %v5880_v16  ;;  %5702 = vmatmul.mubr.msk.bf16.gmra.mxu1 %vm267_vm1, %v5881_v17 }
  0x1f   :  { %5673 = vmatprep.mubr.msk.bf16.mxu0 %vm267_vm1, %v5882_v18  ;;  %5705 = vmatprep.mubr.msk.bf16.mxu1 %vm267_vm1, %v5883_v19 }
  0x26   :  { %5674 = vmatmul.mubr.msk.bf16.gmra.mxu0 %vm267_vm1, %v5884_v20  ;;  %5706 = vmatmul.mubr.msk.bf16.gmra.mxu1 %vm267_vm1, %v5885_v21 }
  0x27   :  { %5677 = vmatprep.mubr.msk.bf16.mxu0 %vm267_vm1, %v5886_v22  ;;  %5709 = vmatprep.mubr.msk.bf16.mxu1 %vm267_vm1, %v5887_v23 }
  0x2e   :  { %5678 = vmatmul.mubr.msk.bf16.gmra.mxu0 %vm267_vm1, %v5888_v24  ;;  %5710 = vmatmul.mubr.msk.bf16.gmra.mxu1 %vm267_vm1, %v5889_v25 }
  0x2f   :  { %5681 = vmatprep.mubr.msk.bf16.mxu0 %vm267_vm1, %v5890_v26  ;;  %5713 = vmatprep.mubr.msk.bf16.mxu1 %vm267_vm1, %v5891_v27 }
  0x36   :  { %5682 = vmatmul.mubr.msk.bf16.gmra.mxu0 %vm267_vm1, %v5892_v28  ;;  %5714 = vmatmul.mubr.msk.bf16.gmra.mxu1 %vm267_vm1, %v5893_v29 }
  0x37   :  { %5685 = vmatprep.mubr.msk.bf16.mxu0 %vm267_vm1, %v5894_v30  ;;  %5717 = vmatprep.mubr.msk.bf16.mxu1 %vm267_vm1, %v5895_v31 }
  0x3e   :  { %5686 = vmatmul.mubr.msk.bf16.gmra.mxu0 %vm267_vm1, %v5896_v32  ;;  %5718 = vmatmul.mubr.msk.bf16.gmra.mxu1 %vm267_vm1, %v5897_v33 }
  0xc6   :  { %v6111_v34 = vpop.f32.mrf.mxu0  ;;  %v6113_v35 = vpop.f32.mrf.mxu1 }
  0xc7   :  { %10871 = vst [vmem:[#allocation2_spill] sm:$0xff] %v6111_v34  ;;  %10872 = vst [vmem:[#allocation3_spill] sm:$0xff] %v6113_v35  ;;  %v794_v42 = vmul.f32 %v6111_v34, %v6111_v34  ;;  %v1184_v61 = vsel %vm1180_vm2, %v6111_v34, 0.0  ;;  %v6169_v5 = vmul.f32 %v6113_v35, %v6113_v35  ;;  %v1253_v11 = vsel %vm1180_vm2, %v6113_v35, 0.0 }
  0xc8   :  { %v6115_v36 = vpop.f32.mrf.mxu0  ;;  %v6117_v37 = vpop.f32.mrf.mxu1 }
  0xc9   :  { %10873 = vst [vmem:[#allocation4_spill] sm:$0xff] %v6115_v36  ;;  %10874 = vst [vmem:[#allocation5_spill] sm:$0xff] %v6117_v37  ;;  %v792_v40 = vmul.f32 %v6115_v36, %v6115_v36  ;;  %v1181_v45 = vsel %vm1180_vm2, %v6115_v36, 0.0  ;;  %v859_v52 = vsel %vm657_vm3, %v794_v42, 0.0  ;;  %v6152_v57 = vmul.f32 %v6117_v37, %v6117_v37 }
  0xca   :  { %v6119_v38 = vpop.f32.mrf.mxu0  ;;  %v6121_v39 = vpop.f32.mrf.mxu1  ;;  %v1250_v62 = vsel %vm1180_vm2, %v6117_v37, 0.0  ;;  %v1324_v4 = vsel %vm1180_vm2, %v794_v42, 0.0  ;;  %v1393_v22 = vsel %vm1180_vm2, %v6169_v5, 0.0 }
  0xcb   :  { %10875 = vst [vmem:[#allocation6_spill] sm:$0xff] %v6119_v38  ;;  %10876 = vst [vmem:[#allocation7_spill] sm:$0xff] %v6121_v39  ;;  %v856_v48 = vsel %vm657_vm3, %v792_v40, 0.0  ;;  %v1321_v53 = vsel %vm1180_vm2, %v792_v40, 0.0  ;;  %v795_v58 = vmul.f32 %v6119_v38, %v6119_v38  ;;  %v1390_v7 = vsel %vm1180_vm2, %v6152_v57, 0.0 }
  0xcc   :  { %v6125_v41 = vpop.f32.mrf.mxu0  ;;  %v6129_v43 = vpop.f32.mrf.mxu1  ;;  %v1186_v12 = vsel %vm1180_vm2, %v6119_v38, 0.0  ;;  %v6192_v23 = vmul.f32 %v6121_v39, %v6121_v39  ;;  %v1255_v25 = vsel %vm1180_vm2, %v6121_v39, 0.0 }
  0xcd   :  { %10877 = vst [vmem:[#allocation8_spill] sm:$0xff] %v6125_v41  ;;  %10878 = vst [vmem:[#allocation9_spill] sm:$0xff] %v6129_v43  ;;  %v793_v44 = vmul.f32 %v6125_v41, %v6125_v41  ;;  %v1182_v46 = vsel %vm1180_vm2, %v6125_v41, 0.0  ;;  %v6146_v55 = vmul.f32 %v6129_v43, %v6129_v43  ;;  %v1251_v60 = vsel %vm1180_vm2, %v6129_v43, 0.0 }
  0xce   :  { %v6137_v47 = vpop.f32.mrf.mxu0  ;;  %v1183_v50 = vadd.f32 %v1182_v46, %v1181_v45  ;;  %v6148_v56 = vpop.f32.mrf.mxu1  ;;  %v1252_v2 = vadd.f32 %v1251_v60, %v1250_v62  ;;  %v861_v8 = vsel %vm657_vm3, %v795_v58, 0.0  ;;  %v1326_v19 = vsel %vm1180_vm2, %v795_v58, 0.0 }
  0xcf   :  { %10879 = vst [vmem:[#allocation10_spill] sm:$0xff] %v6137_v47  ;;  %v857_v49 = vsel %vm657_vm3, %v793_v44, 0.0  ;;  %v1322_v51 = vsel %vm1180_vm2, %v793_v44, 0.0  ;;  %10880 = vst [vmem:[#allocation11_spill] sm:$0xff] %v6148_v56  ;;  %v1391_v3 = vsel %vm1180_vm2, %v6146_v55, 0.0  ;;  %v798_v31 = vmul.f32 %v6137_v47, %v6137_v47 }
  0xd0   :  { %v858_v54 = vadd.f32 %v857_v49, %v856_v48  ;;  %v1323_v59 = vadd.f32 %v1322_v51, %v1321_v53  ;;  %v6162_v0 = vpop.f32.mrf.mxu0  ;;  %v1185_v1 = vadd.f32 %v1184_v61, %v1183_v50  ;;  %v6171_v6 = vpop.f32.mrf.mxu1  ;;  %v1392_v13 = vadd.f32 %v1391_v3, %v1390_v7 }
  0xd1   :  { %10881 = vst [vmem:[#allocation12_spill] sm:$0xff] %v6162_v0  ;;  %10882 = vst [vmem:[#allocation13_spill] sm:$0xff] %v6171_v6  ;;  %v796_v10 = vmul.f32 %v6162_v0, %v6162_v0  ;;  %v1254_v16 = vadd.f32 %v1253_v11, %v1252_v2  ;;  %v1188_v27 = vsel %vm1180_vm2, %v6162_v0, 0.0  ;;  %v1395_v40 = vsel %vm1180_vm2, %v6192_v23, 0.0 }
  0xd2   :  { %v860_v63 = vadd.f32 %v859_v52, %v858_v54  ;;  %v1325_v9 = vadd.f32 %v1324_v4, %v1323_v59  ;;  %v6182_v15 = vpop.f32.mrf.mxu0  ;;  %v1187_v18 = vadd.f32 %v1186_v12, %v1185_v1  ;;  %v6186_v21 = vpop.f32.mrf.mxu1  ;;  %v1394_v26 = vadd.f32 %v1393_v22, %v1392_v13 }
  0xd3   :  { %10883 = vst [vmem:[#allocation14_spill] sm:$0xff] %v6182_v15  ;;  %v863_v17 = vsel %vm657_vm3, %v796_v10, 0.0  ;;  %10884 = vst [vmem:[#allocation15_spill] sm:$0xff] %v6186_v21  ;;  %v1256_v30 = vadd.f32 %v1255_v25, %v1254_v16  ;;  %v1328_v32 = vsel %vm1180_vm2, %v796_v10, 0.0  ;;  %v6209_v44 = vmul.f32 %v6171_v6, %v6171_v6 }
  0xd4   :  { %v862_v14 = vadd.f32 %v861_v8, %v860_v63  ;;  %v1327_v24 = vadd.f32 %v1326_v19, %v1325_v9  ;;  %v6198_v28 = vpop.f32.mrf.mxu0  ;;  %v1189_v29 = vadd.f32 %v1188_v27, %v1187_v18  ;;  %v6203_v33 = vpop.f32.mrf.mxu1  ;;  %v1257_v46 = vsel %vm1180_vm2, %v6171_v6, 0.0 }
  0xd5   :  { %10885 = vst [vmem:[#allocation16_spill] sm:$0xff] %v6198_v28  ;;  %10886 = vst [vmem:[#allocation17_spill] sm:$0xff] %v6203_v33  ;;  %v797_v45 = vmul.f32 %v6198_v28, %v6198_v28  ;;  %v1396_v48 = vadd.f32 %v1395_v40, %v1394_v26  ;;  %v1190_v49 = vsel %vm1180_vm2, %v6198_v28, 0.0  ;;  %v1258_v51 = vadd.f32 %v1257_v46, %v1256_v30 }
  0xd6   :  { %v864_v20 = vadd.f32 %v863_v17, %v862_v14  ;;  %v1329_v42 = vadd.f32 %v1328_v32, %v1327_v24  ;;  %v6217_v50 = vpop.f32.mrf.mxu0  ;;  %v1191_v53 = vadd.f32 %v1190_v49, %v1189_v29  ;;  %v6222_v54 = vmul.f32 %v6203_v33, %v6203_v33  ;;  %v6226_v61 = vpop.f32.mrf.mxu1 }
  0xd7   :  { %10887 = vst [vmem:[#allocation18_spill] sm:$0xff] %v6217_v50  ;;  %v865_v52 = vsel %vm657_vm3, %v797_v45, 0.0  ;;  %v867_v58 = vsel %vm657_vm3, %v798_v31, 0.0  ;;  %v1330_v60 = vsel %vm1180_vm2, %v797_v45, 0.0  ;;  %10888 = vst [vmem:[#allocation19_spill] sm:$0xff] %v6226_v61  ;;  %v1397_v62 = vsel %vm1180_vm2, %v6209_v44, 0.0 }
  0xd8   :  { %v866_v59 = vadd.f32 %v865_v52, %v864_v20  ;;  %v799_v63 = vmul.f32 %v6182_v15, %v6182_v15  ;;  %v1331_v1 = vadd.f32 %v1330_v60, %v1329_v42  ;;  %v1259_v2 = vsel %vm1180_vm2, %v6203_v33, 0.0  ;;  %v6236_v8 = vpop.f32.mrf.mxu0  ;;  %v6241_v13 = vpop.f32.mrf.mxu1 }
  0xd9   :  { %v1192_v3 = vsel %vm1180_vm2, %v6137_v47, 0.0  ;;  %v1398_v4 = vadd.f32 %v1397_v62, %v1396_v48  ;;  %10889 = vst [vmem:[#allocation20_spill] sm:$0xff] %v6236_v8  ;;  %v1260_v10 = vadd.f32 %v1259_v2, %v1258_v51  ;;  %v1399_v11 = vsel %vm1180_vm2, %v6222_v54, 0.0  ;;  %10890 = vst [vmem:[#allocation21_spill] sm:$0xff] %v6241_v13 }
  0xda   :  { %v868_v7 = vadd.f32 %v867_v58, %v866_v59  ;;  %v1193_v9 = vadd.f32 %v1192_v3, %v1191_v53  ;;  %v1332_v12 = vsel %vm1180_vm2, %v798_v31, 0.0  ;;  %v6245_v14 = vmul.f32 %v6148_v56, %v6148_v56  ;;  %v6254_v25 = vpop.f32.mrf.mxu0  ;;  %v6258_v31 = vpop.f32.mrf.mxu1 }
  0xdb   :  { %v1261_v16 = vsel %vm1180_vm2, %v6148_v56, 0.0  ;;  %v869_v17 = vsel %vm657_vm3, %v799_v63, 0.0  ;;  %v1333_v18 = vadd.f32 %v1332_v12, %v1331_v1  ;;  %v1194_v19 = vsel %vm1180_vm2, %v6182_v15, 0.0  ;;  %10891 = vst [vmem:[#allocation22_spill] sm:$0xff] %v6254_v25  ;;  %10892 = vst [vmem:[#allocation23_spill] sm:$0xff] %v6258_v31 }
  0xdc   :  { %v1400_v20 = vadd.f32 %v1399_v11, %v1398_v4  ;;  %v800_v22 = vmul.f32 %v6236_v8, %v6236_v8  ;;  %v870_v24 = vadd.f32 %v869_v17, %v868_v7  ;;  %v1262_v26 = vadd.f32 %v1261_v16, %v1260_v10  ;;  %v6270_v51 = vpop.f32.mrf.mxu0  ;;  %v6275_v60 = vpop.f32.mrf.mxu1 }
  0xdd   :  { %v1195_v27 = vadd.f32 %v1194_v19, %v1193_v9  ;;  %v1334_v29 = vsel %vm1180_vm2, %v799_v63, 0.0  ;;  %v1401_v32 = vsel %vm1180_vm2, %v6245_v14, 0.0  ;;  %v6264_v40 = vmul.f32 %v6186_v21, %v6186_v21  ;;  %10893 = vst [vmem:[#allocation24_spill] sm:$0xff] %v6270_v51  ;;  %10894 = vst [vmem:[#allocation25_spill] sm:$0xff] %v6275_v60 }
  0xde   :  { %v871_v30 = vsel %vm657_vm3, %v800_v22, 0.0  ;;  %v1335_v45 = vadd.f32 %v1334_v29, %v1333_v18  ;;  %v1263_v46 = vsel %vm1180_vm2, %v6186_v21, 0.0  ;;  %v1402_v48 = vadd.f32 %v1401_v32, %v1400_v20  ;;  %v6289_v9 = vpop.f32.mrf.mxu0  ;;  %v6298_v20 = vpop.f32.mrf.mxu1 }
  0xdf   :  { %v872_v42 = vadd.f32 %v871_v30, %v870_v24  ;;  %v1196_v49 = vsel %vm1180_vm2, %v6236_v8, 0.0  ;;  %v1264_v53 = vadd.f32 %v1263_v46, %v1262_v26  ;;  %v802_v58 = vmul.f32 %v6217_v50, %v6217_v50  ;;  %10895 = vst [vmem:[#allocation26_spill] sm:$0xff] %v6289_v9  ;;  %10896 = vst [vmem:[#allocation27_spill] sm:$0xff] %v6298_v20 }
  0xe0   :  { %v1197_v52 = vadd.f32 %v1196_v49, %v1195_v27  ;;  %v1336_v59 = vsel %vm1180_vm2, %v800_v22, 0.0  ;;  %v1403_v62 = vsel %vm1180_vm2, %v6264_v40, 0.0  ;;  %v6281_v1 = vmul.f32 %v6241_v13, %v6241_v13 }
  0xe1   :  { %v1337_v63 = vadd.f32 %v1336_v59, %v1335_v45  ;;  %v801_v2 = vmul.f32 %v6270_v51, %v6270_v51  ;;  %v1265_v3 = vsel %vm1180_vm2, %v6241_v13, 0.0  ;;  %v1404_v4 = vadd.f32 %v1403_v62, %v1402_v48 }
  0xe2   :  { %v1198_v7 = vsel %vm1180_vm2, %v6270_v51, 0.0  ;;  %v1266_v10 = vadd.f32 %v1265_v3, %v1264_v53  ;;  %v875_v17 = vsel %vm657_vm3, %v802_v58, 0.0  ;;  %v6296_v19 = vmul.f32 %v6275_v60, %v6275_v60 }
  0xe3   :  { %v873_v11 = vsel %vm657_vm3, %v801_v2, 0.0  ;;  %v1199_v12 = vadd.f32 %v1198_v7, %v1197_v52  ;;  %v1338_v16 = vsel %vm1180_vm2, %v801_v2, 0.0  ;;  %v1405_v22 = vsel %vm1180_vm2, %v6281_v1, 0.0  ;;  %v6313_v52 = vpop.f32.mrf.mxu1 }
  0xe4   :  { %v874_v18 = vadd.f32 %v873_v11, %v872_v42  ;;  %v803_v24 = vmul.f32 %v6254_v25, %v6254_v25  ;;  %v1339_v26 = vadd.f32 %v1338_v16, %v1337_v63  ;;  %v1267_v27 = vsel %vm1180_vm2, %v6275_v60, 0.0  ;;  %v6308_v42 = vpop.f32.mrf.mxu0  ;;  %10898 = vst [vmem:[#allocation29_spill] sm:$0xff] %v6313_v52 }
  0xe5   :  { %v1200_v29 = vsel %vm1180_vm2, %v6217_v50, 0.0  ;;  %v1406_v30 = vadd.f32 %v1405_v22, %v1404_v4  ;;  %10897 = vst [vmem:[#allocation28_spill] sm:$0xff] %v6308_v42  ;;  %v1268_v46 = vadd.f32 %v1267_v27, %v1266_v10  ;;  %v1407_v48 = vsel %vm1180_vm2, %v6296_v19, 0.0 }
  0xe6   :  { %v876_v32 = vadd.f32 %v875_v17, %v874_v18  ;;  %v1201_v45 = vadd.f32 %v1200_v29, %v1199_v12  ;;  %v1340_v49 = vsel %vm1180_vm2, %v802_v58, 0.0  ;;  %v6317_v53 = vmul.f32 %v6226_v61, %v6226_v61  ;;  %v6326_v7 = vpop.f32.mrf.mxu0  ;;  %v6330_v18 = vpop.f32.mrf.mxu1 }
  0xe7   :  { %v877_v59 = vsel %vm657_vm3, %v803_v24, 0.0  ;;  %v1341_v62 = vadd.f32 %v1340_v49, %v1339_v26  ;;  %v804_v63 = vmul.f32 %v6308_v42, %v6308_v42  ;;  %v1269_v2 = vsel %vm1180_vm2, %v6226_v61, 0.0  ;;  %10899 = vst [vmem:[#allocation30_spill] sm:$0xff] %v6326_v7  ;;  %10900 = vst [vmem:[#allocation31_spill] sm:$0xff] %v6330_v18 }
  0xe8   :  { %v1202_v3 = vsel %vm1180_vm2, %v6254_v25, 0.0  ;;  %v1408_v4 = vadd.f32 %v1407_v48, %v1406_v30  ;;  %v878_v58 = vadd.f32 %v877_v59, %v876_v32  ;;  %v1270_v10 = vadd.f32 %v1269_v2, %v1268_v46  ;;  %v6347_v59 = vpop.f32.mrf.mxu1 }
  0xe9   :  { %v879_v11 = vsel %vm657_vm3, %v804_v63, 0.0  ;;  %v1203_v12 = vadd.f32 %v1202_v3, %v1201_v45  ;;  %v1342_v16 = vsel %vm1180_vm2, %v803_v24, 0.0  ;;  %v1409_v22 = vsel %vm1180_vm2, %v6317_v53, 0.0  ;;  %v6342_v45 = vpop.f32.mrf.mxu0  ;;  %10902 = vst [vmem:[#allocation33_spill] sm:$0xff] %v6347_v59 }
  0xea   :  { %v880_v17 = vadd.f32 %v879_v11, %v878_v58  ;;  %v6336_v26 = vmul.f32 %v6258_v31, %v6258_v31  ;;  %v1343_v27 = vadd.f32 %v1342_v16, %v1341_v62  ;;  %v1271_v29 = vsel %vm1180_vm2, %v6258_v31, 0.0  ;;  %10901 = vst [vmem:[#allocation32_spill] sm:$0xff] %v6342_v45 }
  0xeb   :  { %v1410_v30 = vadd.f32 %v1409_v22, %v1408_v4  ;;  %v1204_v32 = vsel %vm1180_vm2, %v6308_v42, 0.0  ;;  %v1272_v46 = vadd.f32 %v1271_v29, %v1270_v10  ;;  %v806_v48 = vmul.f32 %v6289_v9, %v6289_v9  ;;  %v6361_v11 = vpop.f32.mrf.mxu0 }
  0xec   :  { %v1205_v24 = vadd.f32 %v1204_v32, %v1203_v12  ;;  %v1344_v49 = vsel %vm1180_vm2, %v804_v63, 0.0  ;;  %v1411_v62 = vsel %vm1180_vm2, %v6336_v26, 0.0  ;;  %v6353_v3 = vmul.f32 %v6313_v52, %v6313_v52  ;;  %10903 = vst [vmem:[#allocation34_spill] sm:$0xff] %v6361_v11 }
  0xed   :  { %v1345_v2 = vadd.f32 %v1344_v49, %v1343_v27  ;;  %v805_v4 = vmul.f32 %v6342_v45, %v6342_v45  ;;  %v1273_v58 = vsel %vm1180_vm2, %v6313_v52, 0.0  ;;  %v1412_v10 = vadd.f32 %v1411_v62, %v1410_v30  ;;  %v6370_v52 = vpop.f32.mrf.mxu1 }
  0xee   :  { %v1206_v63 = vsel %vm1180_vm2, %v6342_v45, 0.0  ;;  %v1274_v12 = vadd.f32 %v1273_v58, %v1272_v46  ;;  %v6366_v27 = vmul.f32 %v6347_v59, %v6347_v59  ;;  %v883_v29 = vsel %vm657_vm3, %v806_v48, 0.0  ;;  %10904 = vst [vmem:[#allocation35_spill] sm:$0xff] %v6370_v52 }
  0xef   :  { %v881_v16 = vsel %vm657_vm3, %v805_v4, 0.0  ;;  %v1207_v22 = vadd.f32 %v1206_v63, %v1205_v24  ;;  %v1346_v49 = vsel %vm1180_vm2, %v805_v4, 0.0  ;;  %v1413_v30 = vsel %vm1180_vm2, %v6353_v3, 0.0  ;;  %v6385_v13 = vpop.f32.mrf.mxu1 }
  0xf0   :  { %v882_v32 = vadd.f32 %v881_v16, %v880_v17  ;;  %v807_v46 = vmul.f32 %v6326_v7, %v6326_v7  ;;  %v1347_v62 = vadd.f32 %v1346_v49, %v1345_v2  ;;  %v1275_v24 = vsel %vm1180_vm2, %v6347_v59, 0.0  ;;  %v6380_v17 = vpop.f32.mrf.mxu0  ;;  %10906 = vst [vmem:[#allocation37_spill] sm:$0xff] %v6385_v13 }
  0xf1   :  { %v1208_v58 = vsel %vm1180_vm2, %v6289_v9, 0.0  ;;  %v1414_v63 = vadd.f32 %v1413_v30, %v1412_v10  ;;  %10905 = vst [vmem:[#allocation36_spill] sm:$0xff] %v6380_v17  ;;  %v1276_v16 = vadd.f32 %v1275_v24, %v1274_v12  ;;  %v1415_v61 = vsel %vm1180_vm2, %v6366_v27, 0.0 }
  0xf2   :  { %v884_v31 = vadd.f32 %v883_v29, %v882_v32  ;;  %v1209_v4 = vadd.f32 %v1208_v58, %v1207_v22  ;;  %v1348_v60 = vsel %vm1180_vm2, %v806_v48, 0.0  ;;  %v6389_v2 = vmul.f32 %v6298_v20, %v6298_v20  ;;  %v6398_v30 = vpop.f32.mrf.mxu0 }
  0xf3   :  { %v1277_v49 = vsel %vm1180_vm2, %v6298_v20, 0.0  ;;  %v885_v10 = vsel %vm657_vm3, %v807_v46, 0.0  ;;  %v1349_v29 = vadd.f32 %v1348_v60, %v1347_v62  ;;  %v1210_v12 = vsel %vm1180_vm2, %v6326_v7, 0.0  ;;  %10907 = vst [vmem:[#allocation38_spill] sm:$0xff] %v6398_v30  ;;  %v6402_v20 = vpop.f32.mrf.mxu1 }
  0xf4   :  { %v1416_v22 = vadd.f32 %v1415_v61, %v1414_v63  ;;  %v808_v32 = vmul.f32 %v6380_v17, %v6380_v17  ;;  %v886_v48 = vadd.f32 %v885_v10, %v884_v31  ;;  %v1278_v24 = vadd.f32 %v1277_v49, %v1276_v16  ;;  %10908 = vst [vmem:[#allocation39_spill] sm:$0xff] %v6402_v20 }
  0xf5   :  { %v1211_v58 = vadd.f32 %v1210_v12, %v1209_v4  ;;  %v1350_v59 = vsel %vm1180_vm2, %v807_v46, 0.0  ;;  %v1417_v60 = vsel %vm1180_vm2, %v6389_v2, 0.0  ;;  %v6408_v61 = vmul.f32 %v6330_v18, %v6330_v18  ;;  %v6414_v4 = vpop.f32.mrf.mxu0  ;;  %v6419_v33 = vpop.f32.mrf.mxu1 }
  0xf6   :  { %v887_v21 = vsel %vm657_vm3, %v808_v32, 0.0  ;;  %v1351_v63 = vadd.f32 %v1350_v59, %v1349_v29  ;;  %v1279_v31 = vsel %vm1180_vm2, %v6330_v18, 0.0  ;;  %v1418_v16 = vadd.f32 %v1417_v60, %v1416_v22  ;;  %10909 = vst [vmem:[#allocation40_spill] sm:$0xff] %v6414_v4  ;;  %10910 = vst [vmem:[#allocation41_spill] sm:$0xff] %v6419_v33 }
  0xf7   :  { %v888_v62 = vadd.f32 %v887_v21, %v886_v48  ;;  %v1212_v46 = vsel %vm1180_vm2, %v6380_v17, 0.0  ;;  %v1280_v10 = vadd.f32 %v1279_v31, %v1278_v24  ;;  %v810_v12 = vmul.f32 %v6361_v11, %v6361_v11 }
  0xf8   :  { %v1213_v49 = vadd.f32 %v1212_v46, %v1211_v58  ;;  %v1352_v56 = vsel %vm1180_vm2, %v808_v32, 0.0  ;;  %v1419_v21 = vsel %vm1180_vm2, %v6408_v61, 0.0  ;;  %v6425_v29 = vmul.f32 %v6385_v13, %v6385_v13  ;;  %v6433_v58 = vpop.f32.mrf.mxu0 }
  0xf9   :  { %v1353_v59 = vadd.f32 %v1352_v56, %v1351_v63  ;;  %v809_v22 = vmul.f32 %v6414_v4, %v6414_v4  ;;  %v1281_v48 = vsel %vm1180_vm2, %v6385_v13, 0.0  ;;  %v1420_v24 = vadd.f32 %v1419_v21, %v1418_v16  ;;  %10911 = vst [vmem:[#allocation42_spill] sm:$0xff] %v6433_v58  ;;  %v6442_v13 = vpop.f32.mrf.mxu1 }
  0xfa   :  { %v1214_v32 = vsel %vm1180_vm2, %v6414_v4, 0.0  ;;  %v1282_v60 = vadd.f32 %v1281_v48, %v1280_v10  ;;  %v891_v46 = vsel %vm657_vm3, %v810_v12, 0.0  ;;  %v6440_v6 = vmul.f32 %v6419_v33, %v6419_v33  ;;  %10912 = vst [vmem:[#allocation43_spill] sm:$0xff] %v6442_v13 }
  0xfb   :  { %v889_v31 = vsel %vm657_vm3, %v809_v22, 0.0  ;;  %v1215_v56 = vadd.f32 %v1214_v32, %v1213_v49  ;;  %v1354_v63 = vsel %vm1180_vm2, %v809_v22, 0.0  ;;  %v1421_v16 = vsel %vm1180_vm2, %v6425_v29, 0.0  ;;  %v6452_v32 = vpop.f32.mrf.mxu0  ;;  %v6457_v37 = vpop.f32.mrf.mxu1 }
  0xfc   :  { %v890_v18 = vadd.f32 %v889_v31, %v888_v62  ;;  %v811_v10 = vmul.f32 %v6398_v30, %v6398_v30  ;;  %v1355_v21 = vadd.f32 %v1354_v63, %v1353_v59  ;;  %v1283_v49 = vsel %vm1180_vm2, %v6419_v33, 0.0  ;;  %10913 = vst [vmem:[#allocation44_spill] sm:$0xff] %v6452_v32  ;;  %10914 = vst [vmem:[#allocation45_spill] sm:$0xff] %v6457_v37 }
  0xfd   :  { %v1216_v22 = vsel %vm1180_vm2, %v6361_v11, 0.0  ;;  %v1422_v62 = vadd.f32 %v1421_v16, %v1420_v24  ;;  %v1284_v39 = vadd.f32 %v1283_v49, %v1282_v60  ;;  %v1423_v35 = vsel %vm1180_vm2, %v6440_v6, 0.0 }
  0xfe   :  { %v892_v48 = vadd.f32 %v891_v46, %v890_v18  ;;  %v1217_v31 = vadd.f32 %v1216_v22, %v1215_v56  ;;  %v1356_v43 = vsel %vm1180_vm2, %v810_v12, 0.0  ;;  %v6461_v59 = vmul.f32 %v6370_v52, %v6370_v52  ;;  %v6470_v46 = vpop.f32.mrf.mxu0 }
  0xff   :  { %v893_v63 = vsel %vm657_vm3, %v811_v10, 0.0  ;;  %v1357_v33 = vadd.f32 %v1356_v43, %v1355_v21  ;;  %v812_v18 = vmul.f32 %v6452_v32, %v6452_v32  ;;  %v1285_v24 = vsel %vm1180_vm2, %v6370_v52, 0.0  ;;  %10915 = vst [vmem:[#allocation46_spill] sm:$0xff] %v6470_v46  ;;  %v6474_v21 = vpop.f32.mrf.mxu1 }
 0x100   :  { %v1218_v60 = vsel %vm1180_vm2, %v6398_v30, 0.0  ;;  %v1424_v56 = vadd.f32 %v1423_v35, %v1422_v62  ;;  %v894_v12 = vadd.f32 %v893_v63, %v892_v48  ;;  %v1286_v16 = vadd.f32 %v1285_v24, %v1284_v39  ;;  %10916 = vst [vmem:[#allocation47_spill] sm:$0xff] %v6474_v21 }
 0x101   :  { %v895_v49 = vsel %vm657_vm3, %v812_v18, 0.0  ;;  %v1219_v22 = vadd.f32 %v1218_v60, %v1217_v31  ;;  %v1358_v11 = vsel %vm1180_vm2, %v811_v10, 0.0  ;;  %v1425_v4 = vsel %vm1180_vm2, %v6461_v59, 0.0  ;;  %v6486_v31 = vpop.f32.mrf.mxu0 }
 0x102   :  { %v896_v43 = vadd.f32 %v895_v49, %v894_v12  ;;  %v6480_v52 = vmul.f32 %v6402_v20, %v6402_v20  ;;  %v1359_v35 = vadd.f32 %v1358_v11, %v1357_v33  ;;  %v1287_v62 = vsel %vm1180_vm2, %v6402_v20, 0.0  ;;  %10917 = vst [vmem:[#allocation48_spill] sm:$0xff] %v6486_v31  ;;  %v6491_v12 = vpop.f32.mrf.mxu1 }
 0x103   :  { %v1426_v39 = vadd.f32 %v1425_v4, %v1424_v56  ;;  %v1220_v48 = vsel %vm1180_vm2, %v6452_v32, 0.0  ;;  %v1288_v63 = vadd.f32 %v1287_v62, %v1286_v16  ;;  %v814_v24 = vmul.f32 %v6433_v58, %v6433_v58  ;;  %10918 = vst [vmem:[#allocation49_spill] sm:$0xff] %v6491_v12 }
 0x104   :  { %v1221_v10 = vadd.f32 %v1220_v48, %v1219_v22  ;;  %v1360_v60 = vsel %vm1180_vm2, %v812_v18, 0.0  ;;  %v1427_v33 = vsel %vm1180_vm2, %v6480_v52, 0.0  ;;  %v6497_v4 = vmul.f32 %v6457_v37, %v6457_v37  ;;  %v6505_v22 = vpop.f32.mrf.mxu0 }
 0x105   :  { %v1361_v11 = vadd.f32 %v1360_v60, %v1359_v35  ;;  %v813_v56 = vmul.f32 %v6486_v31, %v6486_v31  ;;  %v1289_v16 = vsel %vm1180_vm2, %v6457_v37, 0.0  ;;  %v1428_v49 = vadd.f32 %v1427_v33, %v1426_v39  ;;  %10919 = vst [vmem:[#allocation50_spill] sm:$0xff] %v6505_v22 }
 0x106   :  { %v1222_v18 = vsel %vm1180_vm2, %v6486_v31, 0.0  ;;  %v1290_v62 = vadd.f32 %v1289_v16, %v1288_v63  ;;  %v6510_v60 = vmul.f32 %v6491_v12, %v6491_v12  ;;  %v899_v20 = vsel %vm657_vm3, %v814_v24, 0.0 }
 0x107   :  { %v897_v48 = vsel %vm657_vm3, %v813_v56, 0.0  ;;  %v1223_v35 = vadd.f32 %v1222_v18, %v1221_v10  ;;  %v1362_v30 = vsel %vm1180_vm2, %v813_v56, 0.0  ;;  %v1429_v39 = vsel %vm1180_vm2, %v6497_v4, 0.0  ;;  %v6520_v10 = vpop.f32.mrf.mxu1 }
 0x108   :  { %v898_v32 = vadd.f32 %v897_v48, %v896_v43  ;;  %v815_v33 = vmul.f32 %v6470_v46, %v6470_v46  ;;  %v1363_v37 = vadd.f32 %v1362_v30, %v1361_v11  ;;  %v1291_v63 = vsel %vm1180_vm2, %v6491_v12, 0.0  ;;  %10920 = vst [vmem:[#allocation51_spill] sm:$0xff] %v6520_v10  ;;  %v6524_v43 = vpop.f32.mrf.mxu0 }
 0x109   :  { %v1224_v16 = vsel %vm1180_vm2, %v6433_v58, 0.0  ;;  %v1430_v18 = vadd.f32 %v1429_v39, %v1428_v49  ;;  %10921 = vst [vmem:[#allocation52_spill] sm:$0xff] %v6524_v43  ;;  %v1292_v48 = vadd.f32 %v1291_v63, %v1290_v62  ;;  %v1431_v17 = vsel %vm1180_vm2, %v6510_v60, 0.0 }
 0x10a   :  { %v900_v31 = vadd.f32 %v899_v20, %v898_v32  ;;  %v1225_v56 = vadd.f32 %v1224_v16, %v1223_v35  ;;  %v1364_v7 = vsel %vm1180_vm2, %v814_v24, 0.0  ;;  %v6531_v30 = vmul.f32 %v6442_v13, %v6442_v13  ;;  %v6536_v20 = vpop.f32.mrf.mxu1  ;;  %v6542_v39 = vpop.f32.mrf.mxu0 }
 0x10b   :  { %v1293_v11 = vsel %vm1180_vm2, %v6442_v13, 0.0  ;;  %v901_v12 = vsel %vm657_vm3, %v815_v33, 0.0  ;;  %v1365_v49 = vadd.f32 %v1364_v7, %v1363_v37  ;;  %10922 = vst [vmem:[#allocation53_spill] sm:$0xff] %v6536_v20  ;;  %v1226_v32 = vsel %vm1180_vm2, %v6470_v46, 0.0  ;;  %10923 = vst [vmem:[#allocation54_spill] sm:$0xff] %v6542_v39 }
 0x10c   :  { %v1432_v62 = vadd.f32 %v1431_v17, %v1430_v18  ;;  %v816_v35 = vmul.f32 %v6524_v43, %v6524_v43  ;;  %v902_v24 = vadd.f32 %v901_v12, %v900_v31  ;;  %v1294_v63 = vadd.f32 %v1293_v11, %v1292_v48  ;;  %v6552_v46 = vpop.f32.mrf.mxu1 }
 0x10d   :  { %v1227_v16 = vadd.f32 %v1226_v32, %v1225_v56  ;;  %v1366_v58 = vsel %vm1180_vm2, %v815_v33, 0.0  ;;  %v1433_v37 = vsel %vm1180_vm2, %v6531_v30, 0.0  ;;  %v6550_v7 = vmul.f32 %v6474_v21, %v6474_v21  ;;  %10924 = vst [vmem:[#allocation55_spill] sm:$0xff] %v6552_v46  ;;  %v6558_v56 = vpop.f32.mrf.mxu0 }
 0x10e   :  { %v903_v13 = vsel %vm657_vm3, %v816_v35, 0.0  ;;  %v1367_v18 = vadd.f32 %v1366_v58, %v1365_v49  ;;  %v1295_v31 = vsel %vm1180_vm2, %v6474_v21, 0.0  ;;  %v1434_v12 = vadd.f32 %v1433_v37, %v1432_v62  ;;  %10925 = vst [vmem:[#allocation56_spill] sm:$0xff] %v6558_v56 }
 0x10f   :  { %v904_v17 = vadd.f32 %v903_v13, %v902_v24  ;;  %v1228_v33 = vsel %vm1180_vm2, %v6524_v43, 0.0  ;;  %v1296_v11 = vadd.f32 %v1295_v31, %v1294_v63  ;;  %v818_v32 = vmul.f32 %v6505_v22, %v6505_v22  ;;  %v6571_v24 = vpop.f32.mrf.mxu1  ;;  %v6577_v37 = vpop.f32.mrf.mxu0 }
 0x110   :  { %v1229_v48 = vadd.f32 %v1228_v33, %v1227_v16  ;;  %v1368_v9 = vsel %vm1180_vm2, %v816_v35, 0.0  ;;  %v1435_v13 = vsel %vm1180_vm2, %v6550_v7, 0.0  ;;  %v6567_v49 = vmul.f32 %v6536_v20, %v6536_v20  ;;  %10926 = vst [vmem:[#allocation57_spill] sm:$0xff] %v6571_v24  ;;  %10927 = vst [vmem:[#allocation58_spill] sm:$0xff] %v6577_v37 }
 0x111   :  { %v1369_v58 = vadd.f32 %v1368_v9, %v1367_v18  ;;  %v817_v62 = vmul.f32 %v6558_v56, %v6558_v56  ;;  %v1297_v63 = vsel %vm1180_vm2, %v6536_v20, 0.0  ;;  %v1436_v16 = vadd.f32 %v1435_v13, %v1434_v12 }
 0x112   :  { %v1230_v35 = vsel %vm1180_vm2, %v6558_v56, 0.0  ;;  %v1298_v31 = vadd.f32 %v1297_v63, %v1296_v11  ;;  %v907_v21 = vsel %vm657_vm3, %v818_v32, 0.0  ;;  %v6584_v45 = vmul.f32 %v6571_v24, %v6571_v24 }
 0x113   :  { %v905_v9 = vsel %vm657_vm3, %v817_v62, 0.0  ;;  %v1231_v18 = vadd.f32 %v1230_v35, %v1229_v48  ;;  %v1370_v33 = vsel %vm1180_vm2, %v817_v62, 0.0  ;;  %v1437_v12 = vsel %vm1180_vm2, %v6567_v49, 0.0  ;;  %v6592_v48 = vpop.f32.mrf.mxu1  ;;  %v6596_v35 = vpop.f32.mrf.mxu0 }
 0x114   :  { %v906_v43 = vadd.f32 %v905_v9, %v904_v17  ;;  %v819_v13 = vmul.f32 %v6542_v39, %v6542_v39  ;;  %v1371_v20 = vadd.f32 %v1370_v33, %v1369_v58  ;;  %v1299_v11 = vsel %vm1180_vm2, %v6571_v24, 0.0  ;;  %10928 = vst [vmem:[#allocation59_spill] sm:$0xff] %v6592_v48  ;;  %10929 = vst [vmem:[#allocation60_spill] sm:$0xff] %v6596_v35 }
 0x115   :  { %v1232_v62 = vsel %vm1180_vm2, %v6505_v22, 0.0  ;;  %v1438_v17 = vadd.f32 %v1437_v12, %v1436_v16  ;;  %v1300_v56 = vadd.f32 %v1299_v11, %v1298_v31  ;;  %v1439_v42 = vsel %vm1180_vm2, %v6584_v45, 0.0  ;;  %v6614_v12 = vpop.f32.mrf.mxu0 }
 0x116   :  { %v908_v63 = vadd.f32 %v907_v21, %v906_v43  ;;  %v1233_v9 = vadd.f32 %v1232_v62, %v1231_v18  ;;  %v1372_v25 = vsel %vm1180_vm2, %v818_v32, 0.0  ;;  %v6603_v58 = vmul.f32 %v6520_v10, %v6520_v10  ;;  %v6608_v21 = vpop.f32.mrf.mxu1  ;;  %10931 = vst [vmem:[#allocation62_spill] sm:$0xff] %v6614_v12 }
 0x117   :  { %v909_v33 = vsel %vm657_vm3, %v819_v13, 0.0  ;;  %v1373_v24 = vadd.f32 %v1372_v25, %v1371_v20  ;;  %v820_v16 = vmul.f32 %v6596_v35, %v6596_v35  ;;  %10930 = vst [vmem:[#allocation61_spill] sm:$0xff] %v6608_v21  ;;  %v1301_v43 = vsel %vm1180_vm2, %v6520_v10, 0.0 }
 0x118   :  { %v1234_v31 = vsel %vm1180_vm2, %v6542_v39, 0.0  ;;  %v1440_v18 = vadd.f32 %v1439_v42, %v1438_v17  ;;  %v910_v32 = vadd.f32 %v909_v33, %v908_v63  ;;  %v1302_v11 = vadd.f32 %v1301_v43, %v1300_v56  ;;  %v6626_v63 = vpop.f32.mrf.mxu1  ;;  %v6632_v33 = vpop.f32.mrf.mxu0 }
 0x119   :  { %v911_v62 = vsel %vm657_vm3, %v820_v16, 0.0  ;;  %v1235_v22 = vadd.f32 %v1234_v31, %v1233_v9  ;;  %v1374_v25 = vsel %vm1180_vm2, %v819_v13, 0.0  ;;  %v6620_v20 = vmul.f32 %v6552_v46, %v6552_v46  ;;  %10932 = vst [vmem:[#allocation63_spill] sm:$0xff] %v6626_v63  ;;  %10933 = vst [vmem:[#allocation64_spill] sm:$0xff] %v6632_v33 }
 0x11a   :  { %v912_v50 = vadd.f32 %v911_v62, %v910_v32  ;;  %v1441_v10 = vsel %vm1180_vm2, %v6603_v58, 0.0  ;;  %v822_v42 = vmul.f32 %v6577_v37, %v6577_v37  ;;  %v1375_v17 = vadd.f32 %v1374_v25, %v1373_v24 }
 0x11b   :  { %v1303_v56 = vsel %vm1180_vm2, %v6552_v46, 0.0  ;;  %v1442_v9 = vadd.f32 %v1441_v10, %v1440_v18  ;;  %v1236_v13 = vsel %vm1180_vm2, %v6596_v35, 0.0  ;;  %v919_v32 = vsel %vm657_vm3, %v6152_v57, 0.0 }
 0x11c   :  { %v1237_v43 = vadd.f32 %v1236_v13, %v1235_v22  ;;  %v1304_v31 = vadd.f32 %v1303_v56, %v1302_v11  ;;  %v1443_v62 = vsel %vm1180_vm2, %v6620_v20, 0.0  ;;  %v1376_v24 = vsel %vm1180_vm2, %v820_v16, 0.0  ;;  %v6646_v22 = vpop.f32.mrf.mxu1 }
 0x11d   :  { %v915_v25 = vsel %vm657_vm3, %v822_v42, 0.0  ;;  %v1377_v39 = vadd.f32 %v1376_v24, %v1375_v17  ;;  %v6642_v10 = vmul.f32 %v6608_v21, %v6608_v21  ;;  %v821_v18 = vmul.f32 %v6632_v33, %v6632_v33  ;;  %10934 = vst [vmem:[#allocation65_spill] sm:$0xff] %v6646_v22 }
 0x11e   :  { %v1240_v57 = vsel %vm1180_vm2, %v6577_v37, 0.0  ;;  %v1305_v11 = vsel %vm1180_vm2, %v6608_v21, 0.0  ;;  %v1444_v56 = vadd.f32 %v1443_v62, %v1442_v9  ;;  %v1238_v16 = vsel %vm1180_vm2, %v6632_v33, 0.0 }
 0x11f   :  { %v1306_v17 = vadd.f32 %v1305_v11, %v1304_v31  ;;  %v823_v13 = vmul.f32 %v6614_v12, %v6614_v12  ;;  %v913_v24 = vsel %vm657_vm3, %v821_v18, 0.0  ;;  %v1239_v46 = vadd.f32 %v1238_v16, %v1237_v43 }
 0x120   :  { %v1380_v35 = vsel %vm1180_vm2, %v822_v42, 0.0  ;;  %v914_v51 = vadd.f32 %v913_v24, %v912_v50  ;;  %v1378_v8 = vsel %vm1180_vm2, %v821_v18, 0.0  ;;  %v6661_v37 = vmul.f32 %v6646_v22, %v6646_v22 }
 0x121   :  { %v6665_v9 = vmul.f32 %v6592_v48, %v6592_v48  ;;  %v1445_v31 = vsel %vm1180_vm2, %v6642_v10, 0.0  ;;  %v1241_v62 = vadd.f32 %v1240_v57, %v1239_v46  ;;  %v1379_v11 = vadd.f32 %v1378_v8, %v1377_v39 }
 0x122   :  { %v1446_v21 = vadd.f32 %v1445_v31, %v1444_v56  ;;  %v1242_v42 = vsel %vm1180_vm2, %v6614_v12, 0.0  ;;  %v916_v50 = vadd.f32 %v915_v25, %v914_v51  ;;  %v1307_v43 = vsel %vm1180_vm2, %v6646_v22, 0.0 }
 0x123   :  { %v917_v18 = vsel %vm657_vm3, %v823_v13, 0.0  ;;  %v1243_v16 = vadd.f32 %v1242_v42, %v1241_v62  ;;  %v1381_v24 = vadd.f32 %v1380_v35, %v1379_v11  ;;  %v1308_v33 = vadd.f32 %v1307_v43, %v1306_v17 }
 0x124   :  { %v1309_v15 = vsel %vm1180_vm2, %v6592_v48, 0.0  ;;  %v1382_v47 = vsel %vm1180_vm2, %v823_v13, 0.0  ;;  %v918_v46 = vadd.f32 %v917_v18, %v916_v50  ;;  %v1447_v8 = vsel %vm1180_vm2, %v6661_v37, 0.0 }
 0x125   :  { %v6681_v51 = vmul.f32 %v6626_v63, %v6626_v63  ;;  %v1244_v39 = vrot.slane %v1243_v16, 4  ;;  %v1383_v25 = vadd.f32 %v1382_v47, %v1381_v24  ;;  %v1310_v57 = vadd.f32 %v1309_v15, %v1308_v33 }
 0x126   :  { %v921_v35 = vsel %vm657_vm3, %v6146_v55, 0.0  ;;  %v1311_v56 = vsel %vm1180_vm2, %v6626_v63, 0.0  ;;  %v920_v17 = vadd.f32 %v919_v32, %v918_v46  ;;  %v1448_v31 = vadd.f32 %v1447_v8, %v1446_v21  ;;  %v5898_v55 = vld [vmem:[%s10599_s4 + $0x8] ss:$0 sps:$4 sm:$0xff]  }
 0x127   :  { %v1449_v13 = vsel %vm1180_vm2, %v6665_v9, 0.0  ;;  %v1245_v62 = vadd.f32 %v1244_v39, %v1243_v16  ;;  %v1384_v11 = vrot.slane %v1383_v25, 4  ;;  %v1312_v42 = vadd.f32 %v1311_v56, %v1310_v57  ;;  %5859 = vmatprep.subr.msk.bf16.mxu1 %vm2600_vm4, %v5898_v55 }
 0x128   :  { %v923_v50 = vsel %vm657_vm3, %v6169_v5, 0.0  ;;  %v922_v43 = vadd.f32 %v921_v35, %v920_v17  ;;  %v1450_v47 = vadd.f32 %v1449_v13, %v1448_v31  ;;  %v1451_v15 = vsel %vm1180_vm2, %v6681_v51, 0.0 }
 0x129   :  { %v1246_v33 = vrot.slane %v1245_v62, 2  ;;  %v1385_v21 = vadd.f32 %v1384_v11, %v1383_v25  ;;  %v1313_v32 = vrot.slane %v1312_v42, 4  ;;  %v925_v18 = vsel %vm657_vm3, %v6192_v23, 0.0 }
 0x12a   :  { %v924_v16 = vadd.f32 %v923_v50, %v922_v43  ;;  %v1452_v24 = vadd.f32 %v1451_v15, %v1450_v47  ;;  %v2602_v35 = vsel %vm2600_vm4, %v5898_v55, 0  ;;  %v927_v56 = vsel %vm657_vm3, %v6209_v44, 0.0 }
 0x12b   :  { %v1247_v46 = vadd.f32 %v1246_v33, %v1245_v62  ;;  %v1386_v8 = vrot.slane %v1385_v21, 2  ;;  %v1314_v5 = vadd.f32 %v1313_v32, %v1312_v42  ;;  %5722 = vmatpush3.bf16.msra.mxu1 %v2602_v35  ;;  %v929_v62 = vsel %vm657_vm3, %v6222_v54, 0.0 }
 0x12c   :  { %v926_v39 = vadd.f32 %v925_v18, %v924_v16  ;;  %v1453_v57 = vrot.slane %v1452_v24, 4  ;;  %v931_v43 = vsel %vm657_vm3, %v6245_v14, 0.0  ;;  %v1000_v33 = vlaneseq }
 0x12d   :  { %v1248_v25 = vrot.slane %v1247_v46, 1  ;;  %v1387_v17 = vadd.f32 %v1386_v8, %v1385_v21  ;;  %v1315_v31 = vrot.slane %v1314_v5, 2  ;;  %v933_v16 = vsel %vm657_vm3, %v6264_v40, 0.0 }
 0x12e   :  { %v928_v23 = vadd.f32 %v927_v56, %v926_v39  ;;  %v1454_v13 = vadd.f32 %v1453_v57, %v1452_v24  ;;  %v935_v54 = vsel %vm657_vm3, %v6281_v1, 0.0  ;;  %v6715_v57 = vand.u32 127, %v1000_v33 }
 0x12f   :  { %v1249_v11 = vadd.f32 %v1248_v25, %v1247_v46  ;;  %v1388_v42 = vrot.slane %v1387_v17, 1  ;;  %v1316_v50 = vadd.f32 %v1315_v31, %v1314_v5  ;;  %v937_v25 = vsel %vm657_vm3, %v6296_v19, 0.0 }
 0x130   :  { %v930_v47 = vadd.f32 %v929_v62, %v928_v23  ;;  %v1455_v55 = vrot.slane %v1454_v13, 2  ;;  %vm1481_vm5 = vcmp.lt.s32.totalorder %v6715_v57, 4  ;;  %v941_v19 = vsel %vm657_vm3, %v6336_v26, 0.0  ;;  %v5899_v26 = vld [vmem:[%s10599_s4] sm:$0xff]  }
 0x131   :  { %v6706_v15 = vmul.f32 0.00390625, %v1249_v11  ;;  %v1389_v44 = vadd.f32 %v1388_v42, %v1387_v17  ;;  %v1317_v21 = vrot.slane %v1316_v50, 1  ;;  %5723 = vmatprep.subr.bf16.mxu1 %v5899_v26 }
 0x132   :  { %v932_v32 = vadd.f32 %v931_v43, %v930_v47  ;;  %v1456_v18 = vadd.f32 %v1455_v55, %v1454_v13  ;;  %v939_v13 = vsel %vm657_vm3, %v6317_v53, 0.0  ;;  %v943_v53 = vsel %vm657_vm3, %v6353_v3, 0.0  ;;  %5724 = vmatpush3.bf16.msra.mxu1 %v5899_v26 }
 0x133   :  { %v1318_v24 = vadd.f32 %v1317_v21, %v1316_v50  ;;  %v1459_v5 = vmul.f32 0.00390625, %v1389_v44  ;;  %v1467_v14 = vsel %vm1180_vm2, %v6706_v15, 0.0  ;;  %v1461_v42 = vmul.f32 %v6706_v15, %v6706_v15 }
 0x134   :  { %v934_v46 = vadd.f32 %v933_v16, %v932_v32  ;;  %v1457_v8 = vrot.slane %v1456_v18, 1 }
 0x135   :  { %v1320_v39 = vmul.f32 0.00390625, %v1318_v24  ;;  %v1472_v62 = vsel %vm1180_vm2, %v1459_v5, 0.0  ;;  %v1463_v16 = vsub.f32 %v1459_v5, %v1461_v42  ;;  %v949_v5 = vsel %vm657_vm3, %v6408_v61, 0.0 }
 0x136   :  { %v936_v35 = vadd.f32 %v935_v54, %v934_v46  ;;  %v1458_v56 = vadd.f32 %v1457_v8, %v1456_v18  ;;  %v945_v54 = vsel %vm657_vm3, %v6366_v27, 0.0  ;;  %v955_v61 = vsel %vm657_vm3, %v6461_v59, 0.0 }
 0x137   :  { %v1462_v40 = vmul.f32 %v1320_v39, %v1320_v39  ;;  %v1468_v17 = vsel %vm1180_vm2, %v1320_v39, 0.0  ;;  %v1465_v3 = vmax.f32 %v1463_v16, 0.0 }
 0x138   :  { %v938_v31 = vadd.f32 %v937_v25, %v936_v35  ;;  %v1460_v1 = vmul.f32 0.00390625, %v1458_v56  ;;  %v1469_v23 = vadd.f32 %v1468_v17, %v1467_v14  ;;  %v947_v14 = vsel %vm657_vm3, %v6389_v2, 0.0 }
 0x139   :  { %v951_v17 = vsel %vm657_vm3, %v6425_v29, 0.0  ;;  %v959_v29 = vsel %vm657_vm3, %v6497_v4, 0.0 }
 0x13a   :  { %v940_v11 = vadd.f32 %v939_v13, %v938_v31  ;;  %v1464_v50 = vsub.f32 %v1460_v1, %v1462_v40  ;;  %v1471_v43 = vmul.f32 0.5, %v1469_v23  ;;  %v1473_v47 = vsel %vm1180_vm2, %v1460_v1, 0.0 }
 0x13b   :  { %v1474_v44 = vadd.f32 %v1473_v47, %v1472_v62  ;;  %v953_v23 = vsel %vm657_vm3, %v6440_v6, 0.0  ;;  %v6759_v6 = vshrl.u32 %v1000_v33, 7  ;;  %v967_v33 = vsel %vm657_vm3, %v6567_v49, 0.0 }
 0x13c   :  { %v942_v55 = vadd.f32 %v941_v19, %v940_v11  ;;  %v1476_v21 = vmul.f32 %v1471_v43, %v1471_v43  ;;  %v1485_v32 = vsel %vm1481_vm5, %v1320_v39, %v1471_v43  ;;  %v1466_v56 = vmax.f32 %v1464_v50, 0.0 }
 0x13d   :  { %v1475_v24 = vmul.f32 0.5, %v1474_v44  ;;  %v957_v11 = vsel %vm657_vm3, %v6480_v52, 0.0  ;;  %v961_v19 = vsel %vm657_vm3, %v6510_v60, 0.0  ;;  %10935 = vst [vmem:[#allocation66_spill] sm:$0xff] %v6759_v6  ;;  %v1488_v52 = vld [vmem:[%s10600_s2] sm:$0x1] }
 0x13e   :  { %v944_v18 = vadd.f32 %v943_v53, %v942_v55  ;;  %v963_v55 = vsel %vm657_vm3, %v6531_v30, 0.0  ;;  %v965_v44 = vsel %vm657_vm3, %v6550_v7, 0.0  ;;  %v6769_v4 = vsub.s32 0, %v6759_v6  ;;  %v6781_v7 = vld [vmem:[%s10601_s3] sm:$0x1]  ;;  %s5910_s3 = smov 8  }
 0x13f   :  { %v1477_v8 = vsub.f32 %v1475_v24, %v1476_v21  ;;  %v1484_v30 = vsel %vm1481_vm5, %v6706_v15, %v1471_v43  ;;  %v971_v15 = vsel %vm657_vm3, %v6603_v58, 0.0  ;;  %v973_v43 = vsel %vm657_vm3, %v6620_v20, 0.0 }
 0x140   :  { %v946_v46 = vadd.f32 %v945_v54, %v944_v18  ;;  %10936 = vst [vmem:[#allocation67_spill] sm:$0xff] %v6769_v4  ;;  %v969_v54 = vsel %vm657_vm3, %v6584_v45, 0.0  ;;  %v975_v20 = vsel %vm657_vm3, %v6642_v10, 0.0 }
 0x141   :  { %v1478_v39 = vmax.f32 %v1477_v8, 0.0 }
 0x142   :  { %v948_v35 = vadd.f32 %v947_v14, %v946_v46  ;;  %v979_v14 = vsel %vm657_vm3, %v6665_v9, 0.0 }
 0x143   :  { %v1486_v27 = vsel %vm1481_vm5, %v1465_v3, %v1478_v39  ;;  %v1487_v40 = vsel %vm1481_vm5, %v1466_v56, %v1478_v39 }
 0x144   :  { %v950_v25 = vadd.f32 %v949_v5, %v948_v35  ;;  %v1489_v2 = vadd.f32 1e-05, %v1486_v27  ;;  %v1490_v31 = vadd.f32 1e-05, %v1487_v40 }
 0x146   :  { %v952_v1 = vadd.f32 %v951_v17, %v950_v25  ;;  %5900 = vrsqrt.f32 %v1489_v2 }
 0x147   :  { %5902 = vrsqrt.f32 %v1490_v31  ;;  %v977_v31 = vsel %vm657_vm3, %v6661_v37, 0.0  ;;  %v10937_v37 = vld [vmem:[#allocation10_spill] sm:$0xff] }
 0x148   :  { %v954_v13 = vadd.f32 %v953_v23, %v952_v1 }
 0x14a   :  { %v956_v62 = vadd.f32 %v955_v61, %v954_v13 }
 0x14c   :  { %v958_v42 = vadd.f32 %v957_v11, %v956_v62  ;;  %v981_v11 = vsel %vm657_vm3, %v6681_v51, 0.0 }
 0x14e   :  { %v960_v50 = vadd.f32 %v959_v29, %v958_v42 }
 0x150   :  { %v962_v47 = vadd.f32 %v961_v19, %v960_v50 }
 0x152   :  { %v964_v59 = vadd.f32 %v963_v55, %v962_v47 }
 0x153   :  { %v5901_v53 = vpop.eup %5900 }
 0x154   :  { %v966_v60 = vadd.f32 %v965_v44, %v964_v59  ;;  %v5903_v21 = vpop.eup %5902  ;;  %v1493_v18 = vmul.f32 %v5901_v53, %v1488_v52  ;;  %v10938_v59 = vld [vmem:[#allocation14_spill] sm:$0xff] }
 0x155   :  { %v6776_v24 = vmul.f32 %v5903_v21, %v1488_v52 }
 0x156   :  { %v968_v16 = vadd.f32 %v967_v33, %v966_v60  ;;  %v1496_v26 = vmul.f32 %v1493_v18, %v1484_v30  ;;  %v6786_v46 = vrot.slane %v1493_v18, %v6769_v4 }
 0x157   :  { %v6789_v8 = vmul.f32 %v6776_v24, %v1485_v32 }
 0x158   :  { %v970_v49 = vadd.f32 %v969_v54, %v968_v16  ;;  %v1498_v57 = vsub.f32 %v6781_v7, %v1496_v26  ;;  %v1512_v3 = vmul.f32 %v6786_v46, %v6115_v36  ;;  %v1513_v32 = vmul.f32 %v6786_v46, %v6125_v41 }
 0x159   :  { %v1514_v58 = vmul.f32 %v6111_v34, %v6786_v46  ;;  %v1515_v56 = vmul.f32 %v6119_v38, %v6786_v46  ;;  %v1516_v39 = vmul.f32 %v6786_v46, %v6162_v0  ;;  %v1517_v5 = vmul.f32 %v6786_v46, %v6198_v28 }
 0x15a   :  { %v972_v45 = vadd.f32 %v971_v15, %v970_v49  ;;  %v6801_v35 = vrot.slane %v1498_v57, %v6769_v4  ;;  %v1518_v55 = vmul.f32 %v10937_v37, %v6786_v46  ;;  %v1519_v52 = vmul.f32 %v10938_v59, %v6786_v46  ;;  %v10942_v57 = vld [vmem:[#allocation20_spill] sm:$0xff] }
 0x15c   :  { %v974_v9 = vadd.f32 %v973_v43, %v972_v45  ;;  %v1588_v25 = vadd.f32 %v6801_v35, %v1512_v3  ;;  %v1589_v27 = vadd.f32 %v6801_v35, %v1513_v32  ;;  %v1590_v40 = vadd.f32 %v6801_v35, %v1514_v58 }
 0x15d   :  { %v1591_v17 = vadd.f32 %v6801_v35, %v1515_v56  ;;  %v1592_v10 = vadd.f32 %v6801_v35, %v1516_v39  ;;  %v1593_v1 = vadd.f32 %v6801_v35, %v1517_v5  ;;  %v1594_v21 = vadd.f32 %v6801_v35, %v1518_v55  ;;  %v10943_v56 = vld [vmem:[#allocation24_spill] sm:$0xff] }
 0x15e   :  { %v976_v2 = vadd.f32 %v975_v20, %v974_v9  ;;  %v1652_v23 = vmax.f32 %v1588_v25, 0.0  ;;  %v1653_v13 = vmax.f32 %v1589_v27, 0.0  ;;  %v1654_v61 = vmax.f32 %v1590_v40, 0.0 }
 0x15f   :  { %v1655_v62 = vmax.f32 %v1591_v17, 0.0  ;;  %v1656_v29 = vmax.f32 %v1592_v10, 0.0  ;;  %v1657_v50 = vmax.f32 %v1593_v1, 0.0  ;;  %v1595_v33 = vadd.f32 %v6801_v35, %v1519_v52 }
 0x160   :  { %v978_v42 = vadd.f32 %v977_v31, %v976_v2  ;;  %v6825_v19 = vpack.c.bf16 %v1653_v13, %v1652_v23  ;;  %v1520_v43 = vmul.f32 %v6786_v46, %v10942_v57  ;;  %v1658_v3 = vmax.f32 %v1594_v21, 0.0  ;;  %v10944_v31 = vld [vmem:[#allocation18_spill] sm:$0xff] }
 0x161   :  { %v6827_v47 = vpack.c.bf16 %v1655_v62, %v1654_v61  ;;  %v6833_v53 = vpack.c.bf16 %v1657_v50, %v1656_v29  ;;  %v1659_v32 = vmax.f32 %v1595_v33, 0.0  ;;  %v1521_v20 = vmul.f32 %v6786_v46, %v10943_v56  ;;  %v10945_v23 = vld [vmem:[#allocation22_spill] sm:$0xff]  ;;  %v10947_v33 = vld [vmem:[#allocation32_spill] sm:$0xff] }
 0x162   :  { %v980_v44 = vadd.f32 %v979_v14, %v978_v42  ;;  %2202 = vrot.lane.b32.xlu0 %v6825_v19, %s5910_s3  ;;  %v10728_v51 = vshll.u32 %v6825_v19, 16  ;;  %v10732_v30 = vshrl.u32 %v6825_v19, 16  ;;  %v1596_v25 = vadd.f32 %v6801_v35, %v1520_v43  ;;  %v10946_v42 = vld [vmem:[#allocation28_spill] sm:$0xff] }
 0x163   :  { %v10727_v60 = vshll.u32 %v6827_v47, 16  ;;  %v10726_v16 = vshll.u32 %v6833_v53, 16  ;;  %v10731_v45 = vshrl.u32 %v6827_v47, 16  ;;  %v10729_v58 = vshrl.u32 %v6833_v53, 16 }
 0x164   :  { %v6841_v18 = vadd.f32 %v981_v11, %v980_v44  ;;  %v2039_v54 = vrot.slane %v10728_v51, 1  ;;  %v6869_v5 = vpack.c.bf16 %v1659_v32, %v1658_v3  ;;  %v1597_v40 = vadd.f32 %v6801_v35, %v1521_v20 }
 0x165   :  { %v2041_v26 = vrot.slane %v10727_v60, 1  ;;  %v2043_v15 = vrot.slane %v10726_v16, 1  ;;  %v1660_v17 = vmax.f32 %v1596_v25, 0.0  ;;  %v1522_v10 = vmul.f32 %v10944_v31, %v6786_v46 }
 0x166   :  { %10939 = vst [vmem:[#allocation68_spill] sm:$0xff] %v6841_v18  ;;  %2204 = vrot.lane.b32.xlu0 %v6827_v47, %s5910_s3  ;;  %v2040_v14 = vor.u32 %v2039_v54, %v10732_v30  ;;  %v10722_v2 = vshll.u32 %v6869_v5, 16  ;;  %v1661_v1 = vmax.f32 %v1597_v40, 0.0  ;;  %v1523_v13 = vmul.f32 %v10945_v23, %v6786_v46 }
 0x167   :  { %v2042_v39 = vor.u32 %v2041_v26, %v10731_v45  ;;  %v2044_v27 = vor.u32 %v2043_v15, %v10729_v58  ;;  %v1598_v11 = vadd.f32 %v6801_v35, %v1522_v10  ;;  %v1524_v29 = vmul.f32 %v6786_v46, %v10946_v42  ;;  %v10949_v10 = vld [vmem:[#allocation30_spill] sm:$0xff]  ;;  %v10958_v45 = vld [vmem:[#allocation52_spill] sm:$0xff] }
 0x168   :  { %v2138_v9 = vsel %vm6849_vm8, %v2040_v14, 0  ;;  %v2045_v62 = vrot.slane %v10722_v2, 1  ;;  %v6893_v55 = vpack.c.bf16 %v1661_v1, %v1660_v17  ;;  %v1599_v52 = vadd.f32 %v6801_v35, %v1523_v13  ;;  %v10950_v13 = vld [vmem:[#allocation36_spill] sm:$0xff]  ;;  %v10957_v58 = vld [vmem:[#allocation46_spill] sm:$0xff] }
 0x169   :  { %2298 = vrot.lane.b32.xlu1 %v2138_v9, %s5911_s16  ;;  %v2139_v61 = vsel %vm6849_vm8, %v2042_v39, 0  ;;  %v2140_v50 = vsel %vm6849_vm8, %v2044_v27, 0  ;;  %v10725_v44 = vshrl.u32 %v6869_v5, 16  ;;  %v1662_v21 = vmax.f32 %v1598_v11, 0.0  ;;  %v10948_v27 = vld [vmem:[#allocation26_spill] sm:$0xff] }
 0x16a   :  { %2206 = vrot.lane.b32.xlu0 %v6833_v53, %s5910_s3  ;;  %v1525_v54 = vmul.f32 %v6786_v46, %v10947_v33  ;;  %v1600_v26 = vadd.f32 %v6801_v35, %v1524_v29  ;;  %v10718_v15 = vshll.u32 %v6893_v55, 16  ;;  %v1663_v14 = vmax.f32 %v1599_v52, 0.0 }
 0x16b   :  { %v2046_v43 = vor.u32 %v2045_v62, %v10725_v44  ;;  %v10724_v20 = vshrl.u32 %v6893_v55, 16  ;;  %v1526_v40 = vmul.f32 %v10948_v27, %v6786_v46  ;;  %v1527_v1 = vmul.f32 %v10949_v10, %v6786_v46  ;;  %v10951_v62 = vld [vmem:[#allocation40_spill] sm:$0xff] }
 0x16c   :  { %v1601_v3 = vadd.f32 %v6801_v35, %v1525_v54  ;;  %v1664_v32 = vmax.f32 %v1600_v26, 0.0  ;;  %v2047_v9 = vrot.slane %v10718_v15, 1  ;;  %v6912_v39 = vpack.c.bf16 %v1663_v14, %v1662_v21 }
 0x16d   :  { %2300 = vrot.lane.b32.xlu1 %v2139_v61, %s5911_s16  ;;  %v1528_v61 = vmul.f32 %v6786_v46, %v10950_v13  ;;  %v1529_v11 = vmul.f32 %v6786_v46, %v10951_v62  ;;  %v2141_v29 = vsel %vm6849_vm8, %v2046_v43, 0  ;;  %v1602_v21 = vadd.f32 %v6801_v35, %v1526_v40 }
 0x16e   :  { %2302 = vrot.lane.b32.xlu0 %v2140_v50, %s5911_s16  ;;  %v1665_v25 = vmax.f32 %v1601_v3, 0.0  ;;  %v2048_v17 = vor.u32 %v2047_v9, %v10724_v20  ;;  %v10719_v52 = vshll.u32 %v6912_v39, 16  ;;  %v1603_v26 = vadd.f32 %v6801_v35, %v1527_v1 }
 0x16f   :  { %v1604_v14 = vadd.f32 %v6801_v35, %v1528_v61  ;;  %v1605_v3 = vadd.f32 %v6801_v35, %v1529_v11  ;;  %v10721_v43 = vshrl.u32 %v6912_v39, 16  ;;  %v10952_v11 = vld [vmem:[#allocation34_spill] sm:$0xff]  ;;  %v1536_v30 = vmul.f32 %v6786_v46, %v10958_v45 }
 0x170   :  { %v6926_v50 = vpack.c.bf16 %v1665_v25, %v1664_v32  ;;  %v2142_v54 = vsel %vm6849_vm8, %v2048_v17, 0  ;;  %v2049_v32 = vrot.slane %v10719_v52, 1  ;;  %v1666_v25 = vmax.f32 %v1602_v21, 0.0 }
 0x171   :  { %2208 = vrot.lane.b32.xlu1 %v6869_v5, %s5910_s3  ;;  %v1667_v40 = vmax.f32 %v1603_v26, 0.0  ;;  %v1669_v15 = vmax.f32 %v1605_v3, 0.0  ;;  %v1612_v45 = vadd.f32 %v6801_v35, %v1536_v30 }
 0x172   :  { %2210 = vrot.lane.b32.xlu0 %v6893_v55, %s5910_s3  ;;  %v10720_v9 = vshll.u32 %v6926_v50, 16  ;;  %v2050_v17 = vor.u32 %v2049_v32, %v10721_v43  ;;  %v10723_v1 = vshrl.u32 %v6926_v50, 16 }
 0x173   :  { %v6950_v52 = vpack.c.bf16 %v1667_v40, %v1666_v25 }
 0x174   :  { %v2051_v61 = vrot.slane %v10720_v9, 1  ;;  %v10954_v9 = vld [vmem:[#allocation44_spill] sm:$0xff]  ;;  %v2143_v25 = vsel %vm6849_vm8, %v2050_v17, 0 }
 0x175   :  { %2304 = vrot.lane.b32.xlu1 %v2141_v29, %s5911_s16  ;;  %v1668_v29 = vmax.f32 %v1604_v14, 0.0  ;;  %v10953_v14 = vld [vmem:[#allocation38_spill] sm:$0xff]  ;;  %v1532_v43 = vmul.f32 %v6786_v46, %v10954_v9  ;;  %v10978_v9 = vld [vmem:[#allocation17_spill] sm:$0xff] }
 0x176   :  { %2306 = vrot.lane.b32.xlu0 %v2142_v54, %s5911_s16  ;;  %v1530_v54 = vmul.f32 %v10952_v11, %v6786_v46  ;;  %v2052_v26 = vor.u32 %v2051_v61, %v10723_v1  ;;  %v1531_v3 = vmul.f32 %v10953_v14, %v6786_v46  ;;  %v10734_v61 = vshrl.u32 %v6950_v52, 16 }
 0x177   :  { %v6952_v21 = vpack.c.bf16 %v1669_v15, %v1668_v29  ;;  %v10730_v15 = vshll.u32 %v6950_v52, 16  ;;  %v10955_v29 = vld [vmem:[#allocation48_spill] sm:$0xff] }
 0x178   :  { %v1606_v32 = vadd.f32 %v6801_v35, %v1530_v54  ;;  %v1533_v2 = vmul.f32 %v6786_v46, %v10955_v29  ;;  %v1607_v1 = vadd.f32 %v6801_v35, %v1531_v3  ;;  %v1608_v54 = vadd.f32 %v6801_v35, %v1532_v43  ;;  %v10956_v43 = vld [vmem:[#allocation42_spill] sm:$0xff] }
 0x179   :  { %2212 = vrot.lane.b32.xlu1 %v6912_v39, %s5910_s3  ;;  %v10733_v40 = vshll.u32 %v6952_v21, 16  ;;  %v2144_v44 = vsel %vm6849_vm8, %v2052_v26, 0  ;;  %v2053_v17 = vrot.slane %v10730_v15, 1  ;;  %v10736_v16 = vshrl.u32 %v6952_v21, 16 }
 0x17a   :  { %2214 = vrot.lane.b32.xlu0 %v6926_v50, %s5910_s3  ;;  %v1670_v20 = vmax.f32 %v1606_v32, 0.0  ;;  %v1671_v51 = vmax.f32 %v1607_v1, 0.0  ;;  %v1609_v3 = vadd.f32 %v6801_v35, %v1533_v2  ;;  %v1672_v32 = vmax.f32 %v1608_v54, 0.0 }
 0x17b   :  { %v2055_v60 = vrot.slane %v10733_v40, 1  ;;  %v2054_v26 = vor.u32 %v2053_v17, %v10734_v61  ;;  %v1535_v15 = vmul.f32 %v10957_v58, %v6786_v46  ;;  %v1499_v54 = vsub.f32 %v6781_v7, %v6789_v8  ;;  %v10960_v61 = vld [vmem:[#allocation56_spill] sm:$0xff] }
 0x17c   :  { %v1673_v1 = vmax.f32 %v1609_v3, 0.0  ;;  %v1537_v18 = vmul.f32 %v6786_v46, %v10960_v61 }
 0x17d   :  { %2308 = vrot.lane.b32.xlu1 %v2143_v25, %s5911_s16  ;;  %v1534_v25 = vmul.f32 %v10956_v43, %v6786_v46  ;;  %v2056_v40 = vor.u32 %v2055_v60, %v10736_v16  ;;  %v1611_v17 = vadd.f32 %v6801_v35, %v1535_v15  ;;  %v1676_v15 = vmax.f32 %v1612_v45, 0.0 }
 0x17e   :  { %2310 = vrot.lane.b32.xlu0 %v2144_v44, %s5911_s16  ;;  %v6992_v44 = vpack.c.bf16 %v1671_v51, %v1670_v20  ;;  %v2145_v51 = vsel %vm6849_vm8, %v2054_v26, 0  ;;  %v7007_v60 = vpack.c.bf16 %v1673_v1, %v1672_v32  ;;  %v1613_v3 = vadd.f32 %v6801_v35, %v1537_v18  ;;  %v10964_v18 = vld [vmem:[#allocation54_spill] sm:$0xff] }
 0x17f   :  { %v1610_v2 = vadd.f32 %v6801_v35, %v1534_v25  ;;  %v1675_v20 = vmax.f32 %v1611_v17, 0.0  ;;  %v10962_v25 = vld [vmem:[#allocation50_spill] sm:$0xff]  ;;  %v2146_v30 = vsel %vm6849_vm8, %v2056_v40, 0  ;;  %v1539_v45 = vmul.f32 %v10964_v18, %v6786_v46  ;;  %v10968_v18 = vld [vmem:[#allocation64_spill] sm:$0xff] }
 0x180   :  { %10959 = vst [vmem:[#allocation69_spill] sm:$0xff] %v6992_v44  ;;  %10961 = vst [vmem:[#allocation70_spill] sm:$0xff] %v7007_v60  ;;  %v10737_v7 = vshll.u32 %v6992_v44, 16  ;;  %v1538_v16 = vmul.f32 %v10962_v25, %v6786_v46  ;;  %v10738_v32 = vshll.u32 %v7007_v60, 16  ;;  %v7041_v40 = vrot.slane %v6776_v24, %v6769_v4 }
 0x181   :  { %2216 = vrot.lane.b32.xlu1 %v6950_v52, %s5910_s3  ;;  %v1674_v8 = vmax.f32 %v1610_v2, 0.0  ;;  %v1677_v2 = vmax.f32 %v1613_v3, 0.0  ;;  %v10967_v3 = vld [vmem:[#allocation60_spill] sm:$0xff] }
 0x182   :  { %2218 = vrot.lane.b32.xlu0 %v6952_v21, %s5910_s3  ;;  %v2057_v26 = vrot.slane %v10737_v7, 1  ;;  %v1614_v17 = vadd.f32 %v6801_v35, %v1538_v16  ;;  %v2059_v61 = vrot.slane %v10738_v32, 1  ;;  %v10965_v7 = vshrl.u32 %v6992_v44, 16 }
 0x183   :  { %v7020_v1 = vpack.c.bf16 %v1675_v20, %v1674_v8  ;;  %v7031_v58 = vpack.c.bf16 %v1677_v2, %v1676_v15  ;;  %v1615_v8 = vadd.f32 %v6801_v35, %v1539_v45  ;;  %v1540_v16 = vmul.f32 %v6786_v46, %v10967_v3 }
 0x184   :  { %v2058_v25 = vor.u32 %v2057_v26, %v10965_v7  ;;  %v1678_v20 = vmax.f32 %v1614_v17, 0.0  ;;  %v7044_v32 = vrot.slane %v1499_v54, %v6769_v4  ;;  %v10969_v7 = vshrl.u32 %v7007_v60, 16 }
 0x185   :  { %2312 = vrot.lane.b32.xlu1 %v2145_v51, %s5911_s16  ;;  %10963 = vst [vmem:[#allocation71_spill] sm:$0xff] %v7020_v1  ;;  %10966 = vst [vmem:[#allocation72_spill] sm:$0xff] %v7031_v58  ;;  %v10739_v51 = vshll.u32 %v7020_v1, 16  ;;  %v10740_v26 = vshll.u32 %v7031_v58, 16  ;;  %v1679_v45 = vmax.f32 %v1615_v8, 0.0  ;;  %v1616_v24 = vadd.f32 %v6801_v35, %v1540_v16 }
 0x186   :  { %2314 = vrot.lane.b32.xlu0 %v2146_v30, %s5911_s16  ;;  %v1541_v30 = vmul.f32 %v6786_v46, %v10968_v18  ;;  %v2060_v15 = vor.u32 %v2059_v61, %v10969_v7  ;;  %v2147_v17 = vsel %vm6849_vm8, %v2058_v25, 0  ;;  %v10970_v7 = vld [vmem:[#allocation58_spill] sm:$0xff]  ;;  %v1543_v8 = vmul.f32 %v6614_v12, %v6786_v46 }
 0x187   :  { %v2061_v2 = vrot.slane %v10739_v51, 1  ;;  %v2063_v61 = vrot.slane %v10740_v26, 1  ;;  %v1542_v3 = vmul.f32 %v10970_v7, %v6786_v46  ;;  %v7064_v43 = vpack.c.bf16 %v1679_v45, %v1678_v20  ;;  %v10971_v26 = vld [vmem:[#allocation5_spill] sm:$0xff] }
 0x188   :  { %v1617_v54 = vadd.f32 %v6801_v35, %v1541_v30  ;;  %v1680_v29 = vmax.f32 %v1616_v24, 0.0  ;;  %v2148_v25 = vsel %vm6849_vm8, %v2060_v15, 0  ;;  %v1544_v18 = vmul.f32 %v7041_v40, %v10971_v26  ;;  %v10973_v15 = vld [vmem:[#allocation9_spill] sm:$0xff] }
 0x189   :  { %2220 = vrot.lane.b32.xlu1 %v6992_v44, %s5910_s3  ;;  %v1618_v30 = vadd.f32 %v6801_v35, %v1542_v3  ;;  %v10972_v20 = vshrl.u32 %v7020_v1, 16  ;;  %v10743_v46 = vshll.u32 %v7064_v43, 16  ;;  %v1545_v16 = vmul.f32 %v7041_v40, %v10973_v15  ;;  %v10977_v7 = vld [vmem:[#allocation13_spill] sm:$0xff] }
 0x18a   :  { %2222 = vrot.lane.b32.xlu0 %v7007_v60, %s5910_s3  ;;  %v1681_v51 = vmax.f32 %v1617_v54, 0.0  ;;  %v1619_v54 = vadd.f32 %v6801_v35, %v1543_v8  ;;  %v1620_v3 = vadd.f32 %v7044_v32, %v1544_v18  ;;  %v10974_v12 = vshrl.u32 %v7031_v58, 16  ;;  %v10975_v35 = vld [vmem:[#allocation3_spill] sm:$0xff] }
 0x18b   :  { %v2062_v45 = vor.u32 %v2061_v2, %v10972_v20  ;;  %v1546_v8 = vmul.f32 %v10975_v35, %v7041_v40  ;;  %v11014_v56 = vshrl.u32 %v7064_v43, 16 }
 0x18c   :  { %v7078_v24 = vpack.c.bf16 %v1681_v51, %v1680_v29  ;;  %v2064_v26 = vor.u32 %v2063_v61, %v10974_v12  ;;  %v1683_v29 = vmax.f32 %v1619_v54, 0.0  ;;  %v1621_v51 = vadd.f32 %v7044_v32, %v1545_v16  ;;  %v10976_v61 = vld [vmem:[#allocation7_spill] sm:$0xff] }
 0x18d   :  { %2316 = vrot.lane.b32.xlu1 %v2147_v17, %s5911_s16  ;;  %v1682_v17 = vmax.f32 %v1618_v30, 0.0  ;;  %v1684_v2 = vmax.f32 %v1620_v3, 0.0  ;;  %v2149_v18 = vsel %vm6849_vm8, %v2062_v45, 0  ;;  %v2065_v12 = vrot.slane %v10743_v46, 1 }
 0x18e   :  { %2318 = vrot.lane.b32.xlu0 %v2148_v25, %s5911_s16  ;;  %v10744_v25 = vshll.u32 %v7078_v24, 16  ;;  %v1547_v30 = vmul.f32 %v10976_v61, %v7041_v40  ;;  %v1685_v54 = vmax.f32 %v1621_v51, 0.0  ;;  %v1622_v3 = vadd.f32 %v7044_v32, %v1546_v8 }
 0x18f   :  { %v7103_v16 = vpack.c.bf16 %v1683_v29, %v1682_v17  ;;  %v1548_v45 = vmul.f32 %v7041_v40, %v10977_v7  ;;  %v1549_v46 = vmul.f32 %v7041_v40, %v10978_v9  ;;  %v10745_v17 = vshrl.u32 %v7078_v24, 16 }
 0x190   :  { %v2067_v20 = vrot.slane %v10744_v25, 1  ;;  %v1623_v15 = vadd.f32 %v7044_v32, %v1547_v30  ;;  %v2150_v25 = vsel %vm6849_vm8, %v2064_v26, 0  ;;  %v7116_v29 = vpack.c.bf16 %v1685_v54, %v1684_v2 }
 0x191   :  { %2224 = vrot.lane.b32.xlu1 %v7020_v1, %s5910_s3  ;;  %v1686_v51 = vmax.f32 %v1622_v3, 0.0  ;;  %v10746_v8 = vshll.u32 %v7103_v16, 16  ;;  %v1624_v35 = vadd.f32 %v7044_v32, %v1548_v45  ;;  %v1625_v7 = vadd.f32 %v7044_v32, %v1549_v46  ;;  %v10980_v3 = vld [vmem:[#allocation11_spill] sm:$0xff] }
 0x192   :  { %2226 = vrot.lane.b32.xlu0 %v7031_v58, %s5910_s3  ;;  %v1687_v30 = vmax.f32 %v1623_v15, 0.0  ;;  %v10979_v9 = vshrl.u32 %v7064_v43, 16  ;;  %v2068_v26 = vor.u32 %v2067_v20, %v10745_v17  ;;  %v10981_v46 = vld [vmem:[#allocation15_spill] sm:$0xff]  ;;  %v10982_v17 = vld [vmem:[#allocation21_spill] sm:$0xff] }
 0x193   :  { %v1688_v2 = vmax.f32 %v1624_v35, 0.0  ;;  %v1689_v54 = vmax.f32 %v1625_v7, 0.0  ;;  %v1551_v45 = vmul.f32 %v10981_v46, %v7041_v40  ;;  %v1552_v15 = vmul.f32 %v7041_v40, %v10982_v17  ;;  %v10984_v46 = vld [vmem:[#allocation25_spill] sm:$0xff] }
 0x194   :  { %v7126_v61 = vpack.c.bf16 %v1687_v30, %v1686_v51  ;;  %v2152_v51 = vsel %vm6849_vm8, %v2068_v26, 0  ;;  %v10747_v30 = vshrl.u32 %v7103_v16, 16  ;;  %v10748_v26 = vshrl.u32 %v7116_v29, 16 }
 0x195   :  { %2320 = vrot.lane.b32.xlu1 %v2149_v18, %s5911_s16  ;;  %v2066_v18 = vor.u32 %v2065_v12, %v10979_v9  ;;  %v2069_v9 = vrot.slane %v10746_v8, 1  ;;  %v7139_v12 = vpack.c.bf16 %v1689_v54, %v1688_v2  ;;  %v1627_v35 = vadd.f32 %v7044_v32, %v1551_v45 }
 0x196   :  { %2322 = vrot.lane.b32.xlu0 %v2150_v25, %s5911_s16  ;;  %v1550_v25 = vmul.f32 %v10980_v3, %v7041_v40  ;;  %v10983_v2 = vshll.u32 %v7116_v29, 16  ;;  %v1553_v45 = vmul.f32 %v7041_v40, %v10984_v46  ;;  %v1628_v17 = vadd.f32 %v7044_v32, %v1552_v15 }
 0x197   :  { %v2151_v20 = vsel %vm6849_vm8, %v2066_v18, 0  ;;  %v2070_v18 = vor.u32 %v2069_v9, %v10747_v30  ;;  %v10987_v9 = vld [vmem:[#allocation29_spill] sm:$0xff] }
 0x198   :  { %v1626_v7 = vadd.f32 %v7044_v32, %v1550_v25  ;;  %v2071_v54 = vrot.slane %v10983_v2, 1  ;;  %v1691_v25 = vmax.f32 %v1627_v35, 0.0  ;;  %v10985_v35 = vld [vmem:[#allocation19_spill] sm:$0xff]  ;;  %v1692_v46 = vmax.f32 %v1628_v17, 0.0 }
 0x199   :  { %2228 = vrot.lane.b32.xlu1 %v7064_v43, %s5910_s3  ;;  %v1554_v2 = vmul.f32 %v10985_v35, %v7041_v40  ;;  %v1556_v30 = vmul.f32 %v7041_v40, %v10987_v9  ;;  %v2153_v17 = vsel %vm6849_vm8, %v2070_v18, 0 }
 0x19a   :  { %2230 = vrot.lane.b32.xlu0 %v7078_v24, %s5910_s3  ;;  %v1690_v8 = vmax.f32 %v1626_v7, 0.0  ;;  %v1629_v7 = vadd.f32 %v7044_v32, %v1553_v45  ;;  %v2072_v15 = vor.u32 %v2071_v54, %v10748_v26  ;;  %v10990_v54 = vshll.u32 %v7139_v12, 16 }
 0x19b   :  { %v1632_v9 = vadd.f32 %v7044_v32, %v1556_v30 }
 0x19c   :  { %v7162_v14 = vpack.c.bf16 %v1691_v25, %v1690_v8  ;;  %v1693_v8 = vmax.f32 %v1629_v7, 0.0  ;;  %v1630_v25 = vadd.f32 %v7044_v32, %v1554_v2  ;;  %v2075_v7 = vrot.slane %v10990_v54, 1  ;;  %v10993_v54 = vld [vmem:[#allocation37_spill] sm:$0xff] }
 0x19d   :  { %2324 = vrot.lane.b32.xlu1 %v2151_v20, %s5911_s16  ;;  %v10988_v20 = vld [vmem:[#allocation33_spill] sm:$0xff]  ;;  %v1696_v18 = vmax.f32 %v1632_v9, 0.0  ;;  %v2154_v30 = vsel %vm6849_vm8, %v2072_v15, 0  ;;  %v1560_v15 = vmul.f32 %v7041_v40, %v10993_v54 }
 0x19e   :  { %2326 = vrot.lane.b32.xlu0 %v2152_v51, %s5911_s16  ;;  %v10986_v51 = vld [vmem:[#allocation23_spill] sm:$0xff]  ;;  %v1557_v3 = vmul.f32 %v7041_v40, %v10988_v20  ;;  %v7188_v2 = vpack.c.bf16 %v1693_v8, %v1692_v46  ;;  %v1694_v26 = vmax.f32 %v1630_v25, 0.0  ;;  %v11023_v0 = vshrl.u32 %v7162_v14, 16 }
 0x19f   :  { %v1555_v11 = vmul.f32 %v10986_v51, %v7041_v40  ;;  %v10989_v51 = vshll.u32 %v7126_v61, 16  ;;  %v10992_v46 = vld [vmem:[#allocation31_spill] sm:$0xff] }
 0x1a0   :  { %v1633_v13 = vadd.f32 %v7044_v32, %v1557_v3  ;;  %v1559_v8 = vmul.f32 %v10992_v46, %v7041_v40  ;;  %v10750_v3 = vshll.u32 %v7162_v14, 16 }
 0x1a1   :  { %2232 = vrot.lane.b32.xlu1 %v7103_v16, %s5910_s3  ;;  %v1631_v45 = vadd.f32 %v7044_v32, %v1555_v11  ;;  %v2073_v35 = vrot.slane %v10989_v51, 1  ;;  %v10991_v11 = vld [vmem:[#allocation27_spill] sm:$0xff]  ;;  %v10749_v51 = vshrl.u32 %v7126_v61, 16 }
 0x1a2   :  { %2234 = vrot.lane.b32.xlu0 %v7116_v29, %s5910_s3  ;;  %v1558_v10 = vmul.f32 %v10991_v11, %v7041_v40  ;;  %v1697_v25 = vmax.f32 %v1633_v13, 0.0  ;;  %v10994_v11 = vshrl.u32 %v7139_v12, 16  ;;  %v10751_v13 = vshll.u32 %v7188_v2, 16 }
 0x1a3   :  { %v1695_v62 = vmax.f32 %v1631_v45, 0.0  ;;  %v2074_v20 = vor.u32 %v2073_v35, %v10749_v51  ;;  %v2077_v35 = vrot.slane %v10750_v3, 1 }
 0x1a4   :  { %v1634_v45 = vadd.f32 %v7044_v32, %v1558_v10  ;;  %v2076_v46 = vor.u32 %v2075_v7, %v10994_v11  ;;  %v7212_v27 = vpack.c.bf16 %v1697_v25, %v1696_v18 }
 0x1a5   :  { %2328 = vrot.lane.b32.xlu1 %v2153_v17, %s5911_s16  ;;  %v7202_v9 = vpack.c.bf16 %v1695_v62, %v1694_v26  ;;  %v1635_v17 = vadd.f32 %v7044_v32, %v1559_v8  ;;  %v10995_v62 = vld [vmem:[#allocation41_spill] sm:$0xff]  ;;  %v1636_v8 = vadd.f32 %v7044_v32, %v1560_v15  ;;  %v2155_v25 = vsel %vm6849_vm8, %v2074_v20, 0 }
 0x1a6   :  { %2330 = vrot.lane.b32.xlu0 %v2154_v30, %s5911_s16  ;;  %v1698_v30 = vmax.f32 %v1634_v45, 0.0  ;;  %v1561_v26 = vmul.f32 %v7041_v40, %v10995_v62  ;;  %v10752_v45 = vshrl.u32 %v7162_v14, 16  ;;  %v2156_v15 = vsel %vm6849_vm8, %v2076_v46, 0 }
 0x1a7   :  { %v1699_v10 = vmax.f32 %v1635_v17, 0.0  ;;  %v1700_v11 = vmax.f32 %v1636_v8, 0.0  ;;  %v10996_v17 = vld [vmem:[#allocation35_spill] sm:$0xff]  ;;  %v10753_v62 = vshrl.u32 %v7188_v2, 16  ;;  %v11006_v23 = vshrl.u32 %v7202_v9, 16 }
 0x1a8   :  { %v1637_v18 = vadd.f32 %v7044_v32, %v1561_v26  ;;  %v1562_v51 = vmul.f32 %v10996_v17, %v7041_v40  ;;  %v10997_v26 = vld [vmem:[#allocation39_spill] sm:$0xff]  ;;  %v2078_v20 = vor.u32 %v2077_v35, %v10752_v45  ;;  %v10998_v17 = vld [vmem:[#allocation45_spill] sm:$0xff]  ;;  %v11026_v41 = vshrl.u32 %v7212_v27, 16 }
 0x1a9   :  { %2236 = vrot.lane.b32.xlu1 %v7126_v61, %s5910_s3  ;;  %v7224_v7 = vpack.c.bf16 %v1699_v10, %v1698_v30  ;;  %v2079_v30 = vrot.slane %v10751_v13, 1  ;;  %v1563_v8 = vmul.f32 %v10997_v26, %v7041_v40  ;;  %v10999_v26 = vld [vmem:[#allocation49_spill] sm:$0xff] }
 0x1aa   :  { %2238 = vrot.lane.b32.xlu0 %v7139_v12, %s5910_s3  ;;  %v1701_v10 = vmax.f32 %v1637_v18, 0.0  ;;  %v1638_v3 = vadd.f32 %v7044_v32, %v1562_v51 }
 0x1ab   :  { %v1639_v18 = vadd.f32 %v7044_v32, %v1563_v8  ;;  %v2080_v51 = vor.u32 %v2079_v30, %v10753_v62  ;;  %v11002_v30 = vshll.u32 %v7202_v9, 16  ;;  %v11027_v4 = vshrl.u32 %v7224_v7, 16 }
 0x1ac   :  { %v7247_v54 = vpack.c.bf16 %v1701_v10, %v1700_v11  ;;  %v1702_v13 = vmax.f32 %v1638_v3, 0.0  ;;  %v11000_v10 = vld [vmem:[#allocation43_spill] sm:$0xff] }
 0x1ad   :  { %2332 = vrot.lane.b32.xlu1 %v2155_v25, %s5911_s16  ;;  %v1564_v25 = vmul.f32 %v7041_v40, %v10998_v17  ;;  %v1703_v45 = vmax.f32 %v1639_v18, 0.0  ;;  %v1566_v8 = vmul.f32 %v11000_v10, %v7041_v40  ;;  %v2081_v62 = vrot.slane %v11002_v30, 1 }
 0x1ae   :  { %2334 = vrot.lane.b32.xlu0 %v2156_v15, %s5911_s16  ;;  %v1565_v15 = vmul.f32 %v7041_v40, %v10999_v26  ;;  %v2157_v26 = vsel %vm6849_vm8, %v2078_v20, 0  ;;  %v11004_v10 = vshll.u32 %v7212_v27, 16 }
 0x1af   :  { %v1640_v33 = vadd.f32 %v7044_v32, %v1564_v25  ;;  %v11001_v25 = vld [vmem:[#allocation47_spill] sm:$0xff]  ;;  %v7269_v35 = vpack.c.bf16 %v1703_v45, %v1702_v13  ;;  %v1642_v17 = vadd.f32 %v7044_v32, %v1566_v8  ;;  %v11005_v13 = vld [vmem:[#allocation57_spill] sm:$0xff] }
 0x1b0   :  { %v1641_v11 = vadd.f32 %v7044_v32, %v1565_v15  ;;  %v1567_v46 = vmul.f32 %v11001_v25, %v7041_v40  ;;  %v2158_v25 = vsel %vm6849_vm8, %v2080_v51, 0  ;;  %v2083_v30 = vrot.slane %v11004_v10, 1 }
 0x1b1   :  { %2240 = vrot.lane.b32.xlu1 %v7162_v14, %s5910_s3  ;;  %v1704_v3 = vmax.f32 %v1640_v33, 0.0  ;;  %v11003_v33 = vld [vmem:[#allocation53_spill] sm:$0xff]  ;;  %v1569_v45 = vmul.f32 %v7041_v40, %v11005_v13  ;;  %v10754_v51 = vshll.u32 %v7224_v7, 16  ;;  %v2082_v10 = vor.u32 %v2081_v62, %v11006_v23 }
 0x1b2   :  { %2242 = vrot.lane.b32.xlu0 %v7188_v2, %s5910_s3  ;;  %v1705_v18 = vmax.f32 %v1641_v11, 0.0  ;;  %v1643_v15 = vadd.f32 %v7044_v32, %v1567_v46  ;;  %v1568_v42 = vmul.f32 %v7041_v40, %v11003_v33  ;;  %v1706_v46 = vmax.f32 %v1642_v17, 0.0 }
 0x1b3   :  { %v1645_v20 = vadd.f32 %v7044_v32, %v1569_v45  ;;  %v11007_v23 = vshrl.u32 %v6825_v19, 16 }
 0x1b4   :  { %v7284_v11 = vpack.c.bf16 %v1705_v18, %v1704_v3  ;;  %v1707_v8 = vmax.f32 %v1643_v15, 0.0  ;;  %v1644_v33 = vadd.f32 %v7044_v32, %v1568_v42  ;;  %v10756_v42 = vshll.u32 %v7247_v54, 16 }
 0x1b5   :  { %2336 = vrot.lane.b32.xlu1 %v2157_v26, %s5911_s16  ;;  %v10755_v26 = vshrl.u32 %v7212_v27, 16  ;;  %v1709_v3 = vmax.f32 %v1645_v20, 0.0  ;;  %v7307_v62 = vrot.slane %v11007_v23, 7  ;;  %v2159_v15 = vsel %vm6849_vm8, %v2082_v10, 0 }
 0x1b6   :  { %2338 = vrot.lane.b32.xlu0 %v2158_v25, %s5911_s16  ;;  %v7292_v31 = vpack.c.bf16 %v1707_v8, %v1706_v46  ;;  %v1708_v13 = vmax.f32 %v1644_v33, 0.0  ;;  %v2085_v25 = vrot.slane %v10754_v51, 1  ;;  %v11009_v46 = vld [vmem:[#allocation55_spill] sm:$0xff]  ;;  %v11011_v10 = vshrl.u32 %v6827_v47, 16 }
 0x1b7   :  { %v2084_v17 = vor.u32 %v2083_v30, %v10755_v26  ;;  %v11008_v30 = vld [vmem:[#allocation51_spill] sm:$0xff]  ;;  %v1571_v8 = vmul.f32 %v11009_v46, %v7041_v40  ;;  %v11012_v26 = vshrl.u32 %v6833_v53, 16 }
 0x1b8   :  { %v7303_v18 = vpack.c.bf16 %v1709_v3, %v1708_v13  ;;  %v1570_v20 = vmul.f32 %v11008_v30, %v7041_v40  ;;  %v2087_v13 = vrot.slane %v10756_v42, 1  ;;  %v11010_v3 = vld [vmem:[#allocation61_spill] sm:$0xff]  ;;  %v7325_v51 = vrot.slane %v11011_v10, 7 }
 0x1b9   :  { %2244 = vrot.lane.b32.xlu1 %v7202_v9, %s5910_s3  ;;  %v2160_v45 = vsel %vm6849_vm8, %v2084_v17, 0  ;;  %v1572_v23 = vmul.f32 %v7041_v40, %v11010_v3  ;;  %v7329_v33 = vrot.slane %v11012_v26, 7  ;;  %v11013_v42 = vshrl.u32 %v7224_v7, 16 }
 0x1ba   :  { %2246 = vrot.lane.b32.xlu0 %v7212_v27, %s5910_s3  ;;  %v1646_v17 = vadd.f32 %v7044_v32, %v1570_v20  ;;  %v1917_v3 = vshrl.u32 %v7247_v54, 16  ;;  %v1647_v30 = vadd.f32 %v7044_v32, %v1571_v8  ;;  %v7342_v26 = vrot.slane %v11014_v56, 7 }
 0x1bb   :  { %v2086_v46 = vor.u32 %v2085_v25, %v11013_v42  ;;  %v1648_v10 = vadd.f32 %v7044_v32, %v1572_v23  ;;  %v11015_v8 = vshrl.u32 %v7078_v24, 16  ;;  %v11017_v42 = vshrl.u32 %v7116_v29, 16 }
 0x1bc   :  { %v1710_v57 = vmax.f32 %v1646_v17, 0.0  ;;  %v1711_v25 = vmax.f32 %v1647_v30, 0.0  ;;  %v1574_v17 = vmul.f32 %v6592_v48, %v7041_v40  ;;  %v11021_v30 = vshll.u32 %v7292_v31, 16 }
 0x1bd   :  { %2340 = vrot.lane.b32.xlu1 %v2159_v15, %s5911_s16  ;;  %v1573_v15 = vmul.f32 %v7041_v40, %v6646_v22  ;;  %v2088_v22 = vor.u32 %v2087_v13, %v1917_v3  ;;  %v1712_v59 = vmax.f32 %v1648_v10, 0.0  ;;  %v1849_v23 = vrot.slane %v11015_v8, 7 }
 0x1be   :  { %2342 = vrot.lane.b32.xlu0 %v2160_v45, %s5911_s16  ;;  %v10763_v45 = vshll.u32 %v7269_v35, 16  ;;  %v2161_v13 = vsel %vm6849_vm8, %v2086_v46, 0  ;;  %v7361_v10 = vpack.c.bf16 %v1711_v25, %v1710_v57  ;;  %v1650_v48 = vadd.f32 %v7044_v32, %v1574_v17 }
 0x1bf   :  { %v1649_v20 = vadd.f32 %v7044_v32, %v1573_v15  ;;  %v1575_v15 = vmul.f32 %v6626_v63, %v7041_v40  ;;  %v11016_v63 = vshrl.u32 %v7103_v16, 16  ;;  %v1863_v37 = vrot.slane %v11017_v42, 7 }
 0x1c0   :  { %v2089_v8 = vrot.slane %v10763_v45, 1  ;;  %v2162_v57 = vsel %vm6849_vm8, %v2088_v22, 0  ;;  %v11018_v25 = vshll.u32 %v7284_v11, 16  ;;  %v1714_v17 = vmax.f32 %v1650_v48, 0.0 }
 0x1c1   :  { %2248 = vrot.lane.b32.xlu1 %v7224_v7, %s5910_s3  ;;  %v1713_v56 = vmax.f32 %v1649_v20, 0.0  ;;  %v1651_v40 = vadd.f32 %v7044_v32, %v1575_v15  ;;  %v1856_v46 = vrot.slane %v11016_v63, 7  ;;  %v1924_v32 = vshrl.u32 %v7269_v35, 16 }
 0x1c2   :  { %2250 = vrot.lane.b32.xlu0 %v7247_v54, %s5910_s3  ;;  %v2091_v45 = vrot.slane %v11018_v25, 1  ;;  %v11020_v15 = vshrl.u32 %v7139_v12, 16  ;;  %v2093_v22 = vrot.slane %v11021_v30, 1  ;;  %v11022_v28 = vshll.u32 %v7303_v18, 16 }
 0x1c3   :  { %v7365_v20 = vpack.c.bf16 %v1713_v56, %v1712_v59  ;;  %v11019_v59 = vshrl.u32 %v7126_v61, 16  ;;  %v1715_v63 = vmax.f32 %v1651_v40, 0.0  ;;  %v2090_v34 = vor.u32 %v2089_v8, %v1924_v32 }
 0x1c4   :  { %v1877_v42 = vrot.slane %v11020_v15, 7  ;;  %v2095_v25 = vrot.slane %v11022_v28, 1  ;;  %v11025_v40 = vshrl.u32 %v7202_v9, 16  ;;  %v1938_v30 = vshrl.u32 %v7292_v31, 16 }
 0x1c5   :  { %2344 = vrot.lane.b32.xlu1 %v2161_v13, %s5911_s16  ;;  %v1870_v56 = vrot.slane %v11019_v59, 7  ;;  %v1931_v13 = vshrl.u32 %v7284_v11, 16  ;;  %v1884_v59 = vrot.slane %v11023_v0, 7  ;;  %v7393_v48 = vpack.c.bf16 %v1715_v63, %v1714_v17 }
 0x1c6   :  { %2346 = vrot.lane.b32.xlu0 %v2162_v57, %s5911_s16  ;;  %v11024_v57 = vshrl.u32 %v7188_v2, 16  ;;  %v1898_v15 = vrot.slane %v11025_v40, 7  ;;  %v1945_v28 = vshrl.u32 %v7303_v18, 16  ;;  %v1905_v0 = vrot.slane %v11026_v41, 7 }
 0x1c7   :  { %v2092_v36 = vor.u32 %v2091_v45, %v1931_v13  ;;  %v1919_v8 = vrot.slane %v1917_v3, 7  ;;  %v1926_v17 = vrot.slane %v1924_v32, 7  ;;  %v11028_v63 = vshll.u32 %v6825_v19, 16 }
 0x1c8   :  { %v1891_v38 = vrot.slane %v11024_v57, 7  ;;  %v1912_v57 = vrot.slane %v11027_v4, 7  ;;  %v2094_v45 = vor.u32 %v2093_v22, %v1938_v30  ;;  %v2096_v6 = vor.u32 %v2095_v25, %v1945_v28 }
 0x1c9   :  { %2252 = vrot.lane.b32.xlu1 %v7269_v35, %s5910_s3  ;;  %v7410_v40 = vor.u32 %v11028_v63, %v7307_v62  ;;  %v1952_v58 = vshrl.u32 %v7361_v10, 16  ;;  %v2163_v41 = vsel %vm6849_vm8, %v2090_v34, 0  ;;  %v1955_v1 = vshll.u32 %v7361_v10, 16 }
 0x1ca   :  { %2254 = vrot.lane.b32.xlu0 %v7284_v11, %s5910_s3  ;;  %v1959_v4 = vshrl.u32 %v7365_v20, 16  ;;  %v1962_v3 = vshll.u32 %v7365_v20, 16  ;;  %v1933_v32 = vrot.slane %v1931_v13, 7  ;;  %v2164_v19 = vsel %vm6849_vm8, %v2092_v36, 0 }
 0x1cb   :  { %v11029_v62 = vshll.u32 %v7064_v43, 16  ;;  %v11030_v25 = vshll.u32 %v7078_v24, 16  ;;  %v1940_v63 = vrot.slane %v1938_v30, 7  ;;  %v1966_v60 = vshrl.u32 %v7393_v48, 16 }
 0x1cc   :  { %v11032_v36 = vshll.u32 %v7116_v29, 16  ;;  %v2165_v24 = vsel %vm6849_vm8, %v2094_v45, 0  ;;  %v1961_v30 = vrot.slane %v1959_v4, 7 }
 0x1cd   :  { %2348 = vrot.lane.b32.xlu1 %v2163_v41, %s5911_s16  ;;  %v7424_v22 = vor.u32 %v11029_v62, %v7342_v26  ;;  %v7428_v34 = vor.u32 %v11030_v25, %v1849_v23  ;;  %v11031_v41 = vshll.u32 %v7103_v16, 16  ;;  %v1947_v26 = vrot.slane %v1945_v28, 7 }
 0x1ce   :  { %2350 = vrot.lane.b32.xlu0 %v2164_v19, %s5911_s16  ;;  %v7438_v44 = vor.u32 %v11032_v36, %v1863_v37  ;;  %v2166_v23 = vsel %vm6849_vm8, %v2096_v6, 0  ;;  %v1954_v16 = vrot.slane %v1952_v58, 7  ;;  %v2099_v19 = vrot.slane %v1962_v3, 1 }
 0x1cf   :  { %v7434_v13 = vor.u32 %v11031_v41, %v1856_v46  ;;  %v2097_v46 = vrot.slane %v1955_v1, 1  ;;  %v11035_v37 = vshll.u32 %v7126_v61, 16  ;;  %v11036_v62 = vshll.u32 %v7139_v12, 16 }
 0x1d0   :  { %v11037_v28 = vshll.u32 %v7162_v14, 16  ;;  %v11038_v6 = vshll.u32 %v7188_v2, 16  ;;  %v11039_v36 = vshll.u32 %v7202_v9, 16  ;;  %v1968_v12 = vrot.slane %v1966_v60, 7 }
 0x1d1   :  { %v7452_v29 = vor.u32 %v11035_v37, %v1870_v56  ;;  %2256 = vrot.lane.b32.xlu1 %v7292_v31, %s5910_s3  ;;  %v7458_v25 = vor.u32 %v11036_v62, %v1877_v42  ;;  %v11040_v56 = vshll.u32 %v7212_v27, 16  ;;  %v11042_v37 = vshll.u32 %v7247_v54, 16 }
 0x1d2   :  { %v7462_v45 = vor.u32 %v11037_v28, %v1884_v59  ;;  %v7466_v41 = vor.u32 %v11038_v6, %v1891_v38  ;;  %v7470_v61 = vor.u32 %v11039_v36, %v1898_v15  ;;  %2258 = vrot.lane.b32.xlu0 %v7303_v18, %s5910_s3  ;;  %v11041_v38 = vshll.u32 %v7224_v7, 16 }
 0x1d3   :  { %v2024_v14 = vsel %vm7442_vm11, 0, %v7452_v29  ;;  %v7481_v42 = vor.u32 %v11040_v56, %v1905_v0  ;;  %v2025_v9 = vsel %vm7442_vm11, 0, %v7458_v25  ;;  %v7507_v62 = vor.u32 %v11042_v37, %v1919_v8 }
 0x1d4   :  { %v7485_v2 = vor.u32 %v11041_v38, %v1912_v57  ;;  %v2026_v59 = vsel %vm7442_vm11, 0, %v7462_v45  ;;  %v2027_v15 = vsel %vm7442_vm11, 0, %v7466_v41  ;;  %v2203_v0 = vpop.permute.xlu0 %2202  ;;  %v11043_v28 = vshll.u32 %v7269_v35, 16 }
 0x1d5   :  { %2352 = vrot.lane.b32.xlu1 %v2165_v24, %s5911_s16  ;;  %v1969_v36 = vshll.u32 %v7393_v48, 16  ;;  %v11044_v56 = vshll.u32 %v7284_v11, 16  ;;  %v11045_v7 = vshll.u32 %v7292_v31, 16  ;;  %v11046_v54 = vshll.u32 %v7303_v18, 16 }
 0x1d6   :  { %v2030_v57 = vsel %vm7442_vm11, 0, %v7485_v2  ;;  %v7511_v6 = vor.u32 %v11043_v28, %v1926_v17  ;;  %2354 = vrot.lane.b32.xlu0 %v2166_v23, %s5911_s16  ;;  %v2031_v35 = vsel %vm7442_vm11, 0, %v7507_v62  ;;  %v7534_v17 = vor.u32 %v1955_v1, %v1954_v16 }
 0x1d7   :  { %v7517_v38 = vor.u32 %v11044_v56, %v1933_v32  ;;  %v7521_v27 = vor.u32 %v11045_v7, %v1940_v63  ;;  %v7525_v8 = vor.u32 %v11046_v54, %v1947_v26  ;;  %v7536_v32 = vor.u32 %v1962_v3, %v1961_v30 }
 0x1d8   :  { %v2032_v11 = vsel %vm7442_vm11, 0, %v7511_v6  ;;  %v7547_v24 = vor.u32 %v1969_v36, %v1968_v12  ;;  %v2205_v26 = vpop.permute.xlu0 %2204  ;;  %v2098_v23 = vor.u32 %v2097_v46, %v1952_v58  ;;  %v2036_v1 = vsel %vm7442_vm11, 0, %v7534_v17 }
 0x1d9   :  { %v2033_v31 = vsel %vm7442_vm11, 0, %v7517_v38  ;;  %v2034_v18 = vsel %vm7442_vm11, 0, %v7521_v27  ;;  %v2035_v63 = vsel %vm7442_vm11, 0, %v7525_v8  ;;  %v2037_v3 = vsel %vm7442_vm11, 0, %v7536_v32  ;;  %2260 = vrot.lane.b32.xlu1 %v7361_v10, %s5910_s3 }
 0x1da   :  { %v2100_v16 = vor.u32 %v2099_v19, %v1959_v4  ;;  %v2038_v30 = vsel %vm7442_vm11, 0, %v7547_v24  ;;  %v2007_v58 = vsel %vm7442_vm11, 0, %v7410_v40  ;;  %v11047_v46 = vshll.u32 %v6827_v47, 16  ;;  %2262 = vrot.lane.b32.xlu0 %v7365_v20, %s5910_s3 }
 0x1db   :  { %v2364_v10 = vsel %vm1180_vm2, %v2007_v58, %v2203_v0  ;;  %v2299_v7 = vpop.permute.xlu1 %2298  ;;  %v11048_v4 = vshll.u32 %v6833_v53, 16  ;;  %v2167_v40 = vsel %vm6849_vm8, %v2098_v23, 0  ;;  %v2101_v56 = vrot.slane %v1969_v36, 1 }
 0x1dc   :  { %v1761_v12 = vor.u32 %v11047_v46, %v7325_v51  ;;  %v2460_v37 = vsel %vm2458_vm12, %v2364_v10, %v2299_v7  ;;  %v2207_v28 = vpop.permute.xlu0 %2206  ;;  %v2168_v47 = vsel %vm6849_vm8, %v2100_v16, 0  ;;  %v11049_v51 = vshrl.u32 %v6869_v5, 16 }
 0x1dd   :  { %v1768_v19 = vor.u32 %v11048_v4, %v7329_v33  ;;  %2356 = vrot.lane.b32.xlu1 %v2167_v40, %s5911_s16  ;;  %5725 = vmatprep.mubr.msk.bf16.mxu1 %vm2535_vm13, %v2460_v37  ;;  %v11050_v33 = vshrl.u32 %v6893_v55, 16  ;;  %v2102_v10 = vor.u32 %v2101_v56, %v1966_v60  ;;  %v5912_v4 = vmov 0.0  }
 0x1de   :  { %v1772_v20 = vrot.slane %v11049_v51, 7  ;;  %v2008_v53 = vsel %vm7442_vm11, 0, %v1761_v12  ;;  %2358 = vrot.lane.b32.xlu0 %v2168_v47, %s5911_s16  ;;  %v11052_v37 = vshll.u32 %v6893_v55, 16  ;;  %v11054_v47 = vshrl.u32 %v6926_v50, 16 }
 0x1df   :  { %v1779_v0 = vrot.slane %v11050_v33, 7  ;;  %v2367_v36 = vsel %vm1180_vm2, %v2008_v53, %v2205_v26  ;;  %v2009_v54 = vsel %vm7442_vm11, 0, %v1768_v19  ;;  %v2301_v23 = vpop.permute.xlu1 %2300  ;;  %v11051_v26 = vshll.u32 %v6869_v5, 16 }
 0x1e0   :  { %v2370_v58 = vsel %vm1180_vm2, %v2009_v54, %v2207_v28  ;;  %v2462_v16 = vsel %vm2458_vm12, %v2367_v36, %v2301_v23  ;;  %v2303_v46 = vpop.permute.xlu0 %2302  ;;  %v2169_v40 = vsel %vm6849_vm8, %v2102_v10, 0  ;;  %v1793_v51 = vrot.slane %v11054_v47, 7 }
 0x1e1   :  { %v2464_v12 = vsel %vm2458_vm12, %v2370_v58, %v2303_v46  ;;  %2264 = vrot.lane.b32.xlu1 %v7393_v48, %s5910_s3  ;;  %5726 = vmatmul.mubr.msk.bf16.vlgmr.msra.gmra.mxu1 %vm2535_vm13, %v2462_v16  ;;  %v1775_v7 = vor.u32 %v11051_v26, %v1772_v20  ;;  %v1782_v28 = vor.u32 %v11052_v37, %v1779_v0  ;;  %v11053_v48 = vshrl.u32 %v6912_v39, 16 }
 0x1e2   :  { %5729 = vmatprep.mubr.msk.bf16.mxu1 %vm2535_vm13, %v2464_v12  ;;  %2954 = vrot.lane.b32.xlu0 %v5912_v4, %s5910_s3  ;;  %v11055_v54 = vshll.u32 %v6912_v39, 16  ;;  %v11056_v16 = vshll.u32 %v6926_v50, 16  ;;  %v11057_v12 = vshrl.u32 %v6950_v52, 16 }
 0x1e3   :  { %v2209_v19 = vpop.permute.xlu1 %2208  ;;  %v1786_v56 = vrot.slane %v11053_v48, 7  ;;  %v2010_v5 = vsel %vm7442_vm11, 0, %v1775_v7  ;;  %v2011_v55 = vsel %vm7442_vm11, 0, %v1782_v28 }
 0x1e4   :  { %v2211_v60 = vpop.permute.xlu0 %2210  ;;  %v2373_v20 = vsel %vm1180_vm2, %v2010_v5, %v2209_v19  ;;  %v1796_v46 = vor.u32 %v11056_v16, %v1793_v51  ;;  %v1800_v26 = vrot.slane %v11057_v12, 7  ;;  %v11058_v19 = vshrl.u32 %v6952_v21, 16 }
 0x1e5   :  { %2360 = vrot.lane.b32.xlu1 %v2169_v40, %s5911_s16  ;;  %v2376_v49 = vsel %vm1180_vm2, %v2011_v55, %v2211_v60  ;;  %v1789_v23 = vor.u32 %v11055_v54, %v1786_v56  ;;  %v11059_v56 = vshll.u32 %v6950_v52, 16  ;;  %v11060_v51 = vshll.u32 %v6952_v21, 16 }
 0x1e6   :  { %v1807_v37 = vrot.slane %v11058_v19, 7  ;;  %v2013_v39 = vsel %vm7442_vm11, 0, %v1796_v46 }
 0x1e7   :  { %v2305_v53 = vpop.permute.xlu1 %2304  ;;  %v2012_v7 = vsel %vm7442_vm11, 0, %v1789_v23  ;;  %v1803_v5 = vor.u32 %v11059_v56, %v1800_v26 }
 0x1e8   :  { %v2466_v33 = vsel %vm2458_vm12, %v2373_v20, %v2305_v53  ;;  %v2307_v0 = vpop.permute.xlu0 %2306  ;;  %v1810_v20 = vor.u32 %v11060_v51, %v1807_v37  ;;  %v11061_v53 = vld [vmem:[#allocation69_spill] sm:$0xff] }
 0x1e9   :  { %v2468_v36 = vsel %vm2458_vm12, %v2376_v49, %v2307_v0  ;;  %5730 = vmatmul.mubr.msk.bf16.gmra.mxu1 %vm2535_vm13, %v2466_v33  ;;  %3265 = vrot.lane.b32.xlu1 %v5912_v4, %s5913_s17  ;;  %v11062_v49 = vshrl.u32 %v11061_v53, 16  ;;  %v2014_v0 = vsel %vm7442_vm11, 0, %v1803_v5  ;;  %v11065_v26 = vshll.u32 %v11061_v53, 16 }
 0x1ea   :  { %5733 = vmatprep.mubr.msk.bf16.mxu1 %vm2535_vm13, %v2468_v36  ;;  %v11063_v36 = vld [vmem:[#allocation70_spill] sm:$0xff]  ;;  %v2015_v52 = vsel %vm7442_vm11, 0, %v1810_v20 }
 0x1eb   :  { %v2213_v58 = vpop.permute.xlu1 %2212  ;;  %v1814_v33 = vrot.slane %v11062_v49, 7  ;;  %v11064_v54 = vshrl.u32 %v11063_v36, 16  ;;  %v11066_v37 = vshll.u32 %v11063_v36, 16 }
 0x1ec   :  { %v2215_v10 = vpop.permute.xlu0 %2214  ;;  %v2379_v4 = vsel %vm1180_vm2, %v2012_v7, %v2213_v58 }
 0x1ed   :  { %v2382_v60 = vsel %vm1180_vm2, %v2013_v39, %v2215_v10  ;;  %v1821_v23 = vrot.slane %v11064_v54, 7  ;;  %v1817_v7 = vor.u32 %v11065_v26, %v1814_v33 }
 0x1ef   :  { %v2309_v28 = vpop.permute.xlu1 %2308 }
 0x1f0   :  { %v2470_v50 = vsel %vm2458_vm12, %v2379_v4, %v2309_v28  ;;  %v2311_v40 = vpop.permute.xlu0 %2310  ;;  %v1824_v4 = vor.u32 %v11066_v37, %v1821_v23  ;;  %v11067_v28 = vld [vmem:[#allocation71_spill] sm:$0xff] }
 0x1f1   :  { %v2472_v48 = vsel %vm2458_vm12, %v2382_v60, %v2311_v40  ;;  %5734 = vmatmul.mubr.msk.bf16.gmra.mxu1 %vm2535_vm13, %v2470_v50  ;;  %v11068_v60 = vshrl.u32 %v11067_v28, 16  ;;  %v2016_v40 = vsel %vm7442_vm11, 0, %v1817_v7 }
 0x1f2   :  { %5737 = vmatprep.mubr.msk.bf16.mxu1 %vm2535_vm13, %v2472_v48  ;;  %v11069_v48 = vld [vmem:[#allocation72_spill] sm:$0xff]  ;;  %v2017_v51 = vsel %vm7442_vm11, 0, %v1824_v4 }
 0x1f3   :  { %v2217_v47 = vpop.permute.xlu1 %2216  ;;  %v1828_v50 = vrot.slane %v11068_v60, 7  ;;  %v11070_v56 = vshrl.u32 %v11069_v48, 16  ;;  %v11072_v23 = vshll.u32 %v11069_v48, 16  ;;  %v2021_v60 = vsel %vm7442_vm11, 0, %v7428_v34 }
 0x1f4   :  { %v2219_v55 = vpop.permute.xlu0 %2218  ;;  %v2385_v58 = vsel %vm1180_vm2, %v2014_v0, %v2217_v47  ;;  %v11071_v0 = vshll.u32 %v11067_v28, 16 }
 0x1f5   :  { %v2388_v46 = vsel %vm1180_vm2, %v2015_v52, %v2219_v55  ;;  %v1835_v5 = vrot.slane %v11070_v56, 7 }
 0x1f6   :  { %v1831_v36 = vor.u32 %v11071_v0, %v1828_v50 }
 0x1f7   :  { %v2313_v16 = vpop.permute.xlu1 %2312 }
 0x1f8   :  { %v2474_v21 = vsel %vm2458_vm12, %v2385_v58, %v2313_v16  ;;  %v2315_v10 = vpop.permute.xlu0 %2314  ;;  %v1838_v58 = vor.u32 %v11072_v23, %v1835_v5  ;;  %v2018_v16 = vsel %vm7442_vm11, 0, %v1831_v36 }
 0x1f9   :  { %v2476_v12 = vsel %vm2458_vm12, %v2388_v46, %v2315_v10  ;;  %5738 = vmatmul.mubr.msk.bf16.gmra.mxu1 %vm2535_vm13, %v2474_v21 }
 0x1fa   :  { %5741 = vmatprep.mubr.msk.bf16.mxu1 %vm2535_vm13, %v2476_v12  ;;  %v2019_v21 = vsel %vm7442_vm11, 0, %v1838_v58 }
 0x1fb   :  { %v2221_v19 = vpop.permute.xlu1 %2220 }
 0x1fc   :  { %v2223_v39 = vpop.permute.xlu0 %2222  ;;  %v2391_v47 = vsel %vm1180_vm2, %v2016_v40, %v2221_v19 }
 0x1fd   :  { %v2394_v55 = vsel %vm1180_vm2, %v2017_v51, %v2223_v39  ;;  %v2020_v39 = vsel %vm7442_vm11, 0, %v7424_v22  ;;  %v2022_v51 = vsel %vm7442_vm11, 0, %v7434_v13 }
 0x1ff   :  { %v2317_v20 = vpop.permute.xlu1 %2316 }
 0x200   :  { %v2478_v53 = vsel %vm2458_vm12, %v2391_v47, %v2317_v20  ;;  %v2319_v49 = vpop.permute.xlu0 %2318  ;;  %v2023_v20 = vsel %vm7442_vm11, 0, %v7438_v44 }
 0x201   :  { %v2480_v33 = vsel %vm2458_vm12, %v2394_v55, %v2319_v49  ;;  %5742 = vmatmul.mubr.msk.bf16.gmra.mxu1 %vm2535_vm13, %v2478_v53 }
 0x202   :  { %5745 = vmatprep.mubr.msk.bf16.mxu1 %vm2535_vm13, %v2480_v33 }
 0x203   :  { %v2225_v54 = vpop.permute.xlu1 %2224 }
 0x204   :  { %v2227_v52 = vpop.permute.xlu0 %2226  ;;  %v2397_v46 = vsel %vm1180_vm2, %v2018_v16, %v2225_v54 }
 0x205   :  { %v2400_v12 = vsel %vm1180_vm2, %v2019_v21, %v2227_v52 }
 0x207   :  { %v2321_v10 = vpop.permute.xlu1 %2320 }
 0x208   :  { %v2482_v26 = vsel %vm2458_vm12, %v2397_v46, %v2321_v10  ;;  %v2323_v7 = vpop.permute.xlu0 %2322 }
 0x209   :  { %v2484_v19 = vsel %vm2458_vm12, %v2400_v12, %v2323_v7  ;;  %5746 = vmatmul.mubr.msk.bf16.gmra.mxu1 %vm2535_vm13, %v2482_v26 }
 0x20a   :  { %5749 = vmatprep.mubr.msk.bf16.mxu1 %vm2535_vm13, %v2484_v19 }
 0x20b   :  { %v2229_v37 = vpop.permute.xlu1 %2228 }
 0x20c   :  { %v2231_v4 = vpop.permute.xlu0 %2230  ;;  %v2403_v28 = vsel %vm1180_vm2, %v2020_v39, %v2229_v37 }
 0x20d   :  { %v2406_v40 = vsel %vm1180_vm2, %v2021_v60, %v2231_v4 }
 0x20f   :  { %v2325_v50 = vpop.permute.xlu1 %2324 }
 0x210   :  { %v2486_v48 = vsel %vm2458_vm12, %v2403_v28, %v2325_v50  ;;  %v2327_v56 = vpop.permute.xlu0 %2326 }
 0x211   :  { %v2488_v5 = vsel %vm2458_vm12, %v2406_v40, %v2327_v56  ;;  %5750 = vmatmul.mubr.msk.bf16.gmra.mxu1 %vm2535_vm13, %v2486_v48 }
 0x212   :  { %5753 = vmatprep.mubr.msk.bf16.mxu1 %vm2535_vm13, %v2488_v5 }
 0x213   :  { %v2233_v47 = vpop.permute.xlu1 %2232 }
 0x214   :  { %v2235_v22 = vpop.permute.xlu0 %2234  ;;  %v2409_v34 = vsel %vm1180_vm2, %v2022_v51, %v2233_v47 }
 0x215   :  { %v2412_v53 = vsel %vm1180_vm2, %v2023_v20, %v2235_v22 }
 0x217   :  { %v2329_v55 = vpop.permute.xlu1 %2328 }
 0x218   :  { %v2490_v49 = vsel %vm2458_vm12, %v2409_v34, %v2329_v55  ;;  %v2331_v33 = vpop.permute.xlu0 %2330 }
 0x219   :  { %v2492_v0 = vsel %vm2458_vm12, %v2412_v53, %v2331_v33  ;;  %5754 = vmatmul.mubr.msk.bf16.gmra.mxu1 %vm2535_vm13, %v2490_v49 }
 0x21a   :  { %5757 = vmatprep.mubr.msk.bf16.mxu1 %vm2535_vm13, %v2492_v0 }
 0x21b   :  { %v2237_v36 = vpop.permute.xlu1 %2236 }
 0x21c   :  { %v2239_v13 = vpop.permute.xlu0 %2238  ;;  %v2415_v44 = vsel %vm1180_vm2, %v2024_v14, %v2237_v36 }
 0x21d   :  { %v2418_v23 = vsel %vm1180_vm2, %v2025_v9, %v2239_v13 }
 0x21f   :  { %v2333_v54 = vpop.permute.xlu1 %2332 }
 0x220   :  { %v2494_v58 = vsel %vm2458_vm12, %v2415_v44, %v2333_v54  ;;  %v2335_v52 = vpop.permute.xlu0 %2334 }
 0x221   :  { %v2496_v16 = vsel %vm2458_vm12, %v2418_v23, %v2335_v52  ;;  %5758 = vmatmul.mubr.msk.bf16.gmra.mxu1 %vm2535_vm13, %v2494_v58 }
 0x222   :  { %5761 = vmatprep.mubr.msk.bf16.mxu1 %vm2535_vm13, %v2496_v16 }
 0x223   :  { %v2241_v46 = vpop.permute.xlu1 %2240 }
 0x224   :  { %v2243_v29 = vpop.permute.xlu0 %2242  ;;  %v2421_v14 = vsel %vm1180_vm2, %v2026_v59, %v2241_v46  ;;  %v11073_v59 = vsel %vm7442_vm11, 0, %v7470_v61 }
 0x225   :  { %v2424_v9 = vsel %vm1180_vm2, %v2027_v15, %v2243_v29  ;;  %v11074_v15 = vsel %vm7442_vm11, 0, %v7481_v42 }
 0x227   :  { %v2337_v25 = vpop.permute.xlu1 %2336 }
 0x228   :  { %v2498_v21 = vsel %vm2458_vm12, %v2421_v14, %v2337_v25  ;;  %v2339_v10 = vpop.permute.xlu0 %2338 }
 0x229   :  { %v2500_v12 = vsel %vm2458_vm12, %v2424_v9, %v2339_v10  ;;  %5762 = vmatmul.mubr.msk.bf16.gmra.mxu1 %vm2535_vm13, %v2498_v21 }
 0x22a   :  { %5765 = vmatprep.mubr.msk.bf16.mxu1 %vm2535_vm13, %v2500_v12 }
 0x22b   :  { %v2245_v26 = vpop.permute.xlu1 %2244 }
 0x22c   :  { %v2247_v45 = vpop.permute.xlu0 %2246  ;;  %v2427_v7 = vsel %vm1180_vm2, %v11073_v59, %v2245_v26 }
 0x22d   :  { %v2430_v19 = vsel %vm1180_vm2, %v11074_v15, %v2247_v45 }
 0x22f   :  { %v2341_v41 = vpop.permute.xlu1 %2340 }
 0x230   :  { %v2502_v37 = vsel %vm2458_vm12, %v2427_v7, %v2341_v41  ;;  %v2343_v4 = vpop.permute.xlu0 %2342 }
 0x231   :  { %v2504_v39 = vsel %vm2458_vm12, %v2430_v19, %v2343_v4  ;;  %5766 = vmatmul.mubr.msk.bf16.gmra.mxu1 %vm2535_vm13, %v2502_v37 }
 0x232   :  { %5769 = vmatprep.mubr.msk.bf16.mxu1 %vm2535_vm13, %v2504_v39 }
 0x233   :  { %v2249_v28 = vpop.permute.xlu1 %2248 }
 0x234   :  { %v2251_v61 = vpop.permute.xlu0 %2250  ;;  %v2433_v60 = vsel %vm1180_vm2, %v2030_v57, %v2249_v28 }
 0x235   :  { %v2436_v50 = vsel %vm1180_vm2, %v2031_v35, %v2251_v61 }
 0x237   :  { %v2345_v42 = vpop.permute.xlu1 %2344 }
 0x238   :  { %v2506_v40 = vsel %vm2458_vm12, %v2433_v60, %v2345_v42  ;;  %v2347_v48 = vpop.permute.xlu0 %2346 }
 0x239   :  { %v2508_v56 = vsel %vm2458_vm12, %v2436_v50, %v2347_v48  ;;  %5770 = vmatmul.mubr.msk.bf16.gmra.mxu1 %vm2535_vm13, %v2506_v40 }
 0x23a   :  { %5773 = vmatprep.mubr.msk.bf16.mxu1 %vm2535_vm13, %v2508_v56 }
 0x23b   :  { %v2253_v5 = vpop.permute.xlu1 %2252 }
 0x23c   :  { %v2255_v2 = vpop.permute.xlu0 %2254  ;;  %v2439_v57 = vsel %vm1180_vm2, %v2032_v11, %v2253_v5 }
 0x23d   :  { %v2442_v35 = vsel %vm1180_vm2, %v2033_v31, %v2255_v2 }
 0x23f   :  { %v2349_v62 = vpop.permute.xlu1 %2348 }
 0x240   :  { %v2510_v47 = vsel %vm2458_vm12, %v2439_v57, %v2349_v62  ;;  %v2351_v22 = vpop.permute.xlu0 %2350 }
 0x241   :  { %v2512_v51 = vsel %vm2458_vm12, %v2442_v35, %v2351_v22  ;;  %5774 = vmatmul.mubr.msk.bf16.gmra.mxu1 %vm2535_vm13, %v2510_v47 }
 0x242   :  { %5777 = vmatprep.mubr.msk.bf16.mxu1 %vm2535_vm13, %v2512_v51 }
 0x243   :  { %v2257_v34 = vpop.permute.xlu1 %2256 }
 0x244   :  { %v2259_v6 = vpop.permute.xlu0 %2258  ;;  %v2445_v11 = vsel %vm1180_vm2, %v2034_v18, %v2257_v34 }
 0x245   :  { %v2448_v31 = vsel %vm1180_vm2, %v2035_v63, %v2259_v6 }
 0x247   :  { %v2353_v38 = vpop.permute.xlu1 %2352 }
 0x248   :  { %v2514_v20 = vsel %vm2458_vm12, %v2445_v11, %v2353_v38  ;;  %v2355_v55 = vpop.permute.xlu0 %2354 }
 0x249   :  { %v2516_v53 = vsel %vm2458_vm12, %v2448_v31, %v2355_v55  ;;  %5778 = vmatmul.mubr.msk.bf16.gmra.mxu1 %vm2535_vm13, %v2514_v20 }
 0x24a   :  { %5781 = vmatprep.mubr.msk.bf16.mxu1 %vm2535_vm13, %v2516_v53 }
 0x24b   :  { %v2261_v49 = vpop.permute.xlu1 %2260 }
 0x24c   :  { %v2263_v27 = vpop.permute.xlu0 %2262  ;;  %v2451_v18 = vsel %vm1180_vm2, %v2036_v1, %v2261_v49 }
 0x24d   :  { %v2454_v63 = vsel %vm1180_vm2, %v2037_v3, %v2263_v27 }
 0x24f   :  { %v2357_v8 = vpop.permute.xlu1 %2356 }
 0x250   :  { %v2518_v33 = vsel %vm2458_vm12, %v2451_v18, %v2357_v8  ;;  %v2359_v0 = vpop.permute.xlu0 %2358 }
 0x251   :  { %v2520_v36 = vsel %vm2458_vm12, %v2454_v63, %v2359_v0  ;;  %5782 = vmatmul.mubr.msk.bf16.gmra.mxu1 %vm2535_vm13, %v2518_v33 }
 0x252   :  { %5785 = vmatprep.mubr.msk.bf16.mxu1 %vm2535_vm13, %v2520_v36 }
 0x253   :  { %v2265_v13 = vpop.permute.xlu1 %2264 }
 0x254   :  { %v2457_v17 = vsel %vm1180_vm2, %v2038_v30, %v2265_v13  ;;  %v7994_v40 = vpop.permute.xlu0 %2954 }
 0x255   :  { %11083 = vst [vmem:[#allocation77_spill] sm:$0xff] %v7994_v40 }
 0x257   :  { %v2361_v1 = vpop.permute.xlu1 %2360 }
 0x258   :  { %v2522_v32 = vsel %vm2458_vm12, %v2457_v17, %v2361_v1 }
 0x259   :  { %5786 = vmatmul.mubr.msk.bf16.gmra.mxu1 %vm2535_vm13, %v2522_v32 }
 0x25b   :  { %v7998_v48 = vpop.permute.xlu1 %3265 }
 0x25c   :  { %11084 = vst [vmem:[#allocation78_spill] sm:$0xff] %v7998_v48 }
 0x2a1   :  { %v7818_v3 = vpop.f32.mrf.mxu1 }
 0x2a2   :  { %3205 = vrot.lane.b32.xlu0 %v7818_v3, %s5913_s17 }
 0x2a3   :  { %v7822_v44 = vpop.f32.mrf.mxu1 }
 0x2a4   :  { %2956 = vrot.lane.b32.xlu1 %v7822_v44, %s5910_s3  ;;  %v3137_v48 = vadd.f32 %v7994_v40, %v7822_v44 }
 0x2a5   :  { %v7826_v43 = vpop.f32.mrf.mxu1 }
 0x2a6   :  { %2960 = vrot.lane.b32.xlu0 %v7818_v3, %s5910_s3 }
 0x2a7   :  { %v7830_v24 = vpop.f32.mrf.mxu1 }
 0x2a8   :  { %3207 = vrot.lane.b32.xlu1 %v7826_v43, %s5913_s17 }
 0x2a9   :  { %v7834_v30 = vpop.f32.mrf.mxu1 }
 0x2aa   :  { %2962 = vrot.lane.b32.xlu0 %v7826_v43, %s5910_s3 }
 0x2ab   :  { %v7838_v54 = vpop.f32.mrf.mxu1 }
 0x2ac   :  { %3213 = vrot.lane.b32.xlu1 %v7834_v30, %s5913_s17 }
 0x2ad   :  { %v7842_v23 = vpop.f32.mrf.mxu1 }
 0x2ae   :  { %2958 = vrot.lane.b32.xlu0 %v7830_v24, %s5910_s3 }
 0x2af   :  { %v7846_v58 = vpop.f32.mrf.mxu1 }
 0x2b0   :  { %3209 = vrot.lane.b32.xlu1 %v7838_v54, %s5913_s17 }
 0x2b1   :  { %v7850_v52 = vpop.f32.mrf.mxu1 }
 0x2b2   :  { %2968 = vrot.lane.b32.xlu0 %v7834_v30, %s5910_s3 }
 0x2b3   :  { %v7854_v16 = vpop.f32.mrf.mxu1 }
 0x2b4   :  { %3215 = vrot.lane.b32.xlu1 %v7842_v23, %s5913_s17 }
 0x2b5   :  { %v7858_v46 = vpop.f32.mrf.mxu1 }
 0x2b6   :  { %2964 = vrot.lane.b32.xlu0 %v7838_v54, %s5910_s3 }
 0x2b7   :  { %v7864_v29 = vpop.f32.mrf.mxu1 }
 0x2b8   :  { %3211 = vrot.lane.b32.xlu1 %v7846_v58, %s5913_s17 }
 0x2b9   :  { %v7870_v14 = vpop.f32.mrf.mxu1 }
 0x2ba   :  { %2970 = vrot.lane.b32.xlu0 %v7842_v23, %s5910_s3 }
 0x2bb   :  { %v7876_v25 = vpop.f32.mrf.mxu1 }
 0x2bc   :  { %3221 = vrot.lane.b32.xlu1 %v7850_v52, %s5913_s17 }
 0x2bd   :  { %v7882_v9 = vpop.f32.mrf.mxu1 }
 0x2be   :  { %2966 = vrot.lane.b32.xlu0 %v7846_v58, %s5910_s3 }
 0x2bf   :  { %v7888_v21 = vpop.f32.mrf.mxu1 }
 0x2c0   :  { %3217 = vrot.lane.b32.xlu1 %v7854_v16, %s5913_s17 }
 0x2c1   :  { %v7894_v10 = vpop.f32.mrf.mxu1 }
 0x2c2   :  { %2976 = vrot.lane.b32.xlu0 %v7850_v52, %s5910_s3 }
 0x2c3   :  { %v7900_v12 = vpop.f32.mrf.mxu1 }
 0x2c4   :  { %3223 = vrot.lane.b32.xlu1 %v7858_v46, %s5913_s17 }
 0x2c5   :  { %v7906_v26 = vpop.f32.mrf.mxu1 }
 0x2c6   :  { %2972 = vrot.lane.b32.xlu0 %v7854_v16, %s5910_s3 }
 0x2c7   :  { %v7912_v45 = vpop.f32.mrf.mxu1 }
 0x2c8   :  { %3219 = vrot.lane.b32.xlu1 %v7864_v29, %s5913_s17 }
 0x2c9   :  { %v7918_v59 = vpop.f32.mrf.mxu1 }
 0x2ca   :  { %2978 = vrot.lane.b32.xlu0 %v7858_v46, %s5910_s3 }
 0x2cb   :  { %v7924_v7 = vpop.f32.mrf.mxu1 }
 0x2cc   :  { %3229 = vrot.lane.b32.xlu1 %v7870_v14, %s5913_s17 }
 0x2cd   :  { %v7930_v41 = vpop.f32.mrf.mxu1 }
 0x2ce   :  { %2974 = vrot.lane.b32.xlu0 %v7864_v29, %s5910_s3 }
 0x2cf   :  { %v7936_v15 = vpop.f32.mrf.mxu1 }
 0x2d0   :  { %3225 = vrot.lane.b32.xlu1 %v7876_v25, %s5913_s17 }
 0x2d1   :  { %v7942_v19 = vpop.f32.mrf.mxu1 }
 0x2d2   :  { %2984 = vrot.lane.b32.xlu0 %v7870_v14, %s5910_s3  ;;  %11075 = vst [vmem:[#allocation69_spill] sm:$0xff] %v7942_v19 }
 0x2d3   :  { %v7948_v37 = vpop.f32.mrf.mxu1 }
 0x2d4   :  { %3231 = vrot.lane.b32.xlu1 %v7882_v9, %s5913_s17 }
 0x2d5   :  { %v7954_v4 = vpop.f32.mrf.mxu1 }
 0x2d6   :  { %2980 = vrot.lane.b32.xlu0 %v7876_v25, %s5910_s3  ;;  %11076 = vst [vmem:[#allocation70_spill] sm:$0xff] %v7954_v4 }
 0x2d7   :  { %v7960_v39 = vpop.f32.mrf.mxu1 }
 0x2d8   :  { %3227 = vrot.lane.b32.xlu1 %v7888_v21, %s5913_s17  ;;  %11077 = vst [vmem:[#allocation71_spill] sm:$0xff] %v7960_v39 }
 0x2d9   :  { %v7966_v28 = vpop.f32.mrf.mxu1 }
 0x2da   :  { %2986 = vrot.lane.b32.xlu0 %v7882_v9, %s5910_s3  ;;  %11078 = vst [vmem:[#allocation72_spill] sm:$0xff] %v7966_v28 }
 0x2db   :  { %v7972_v61 = vpop.f32.mrf.mxu1 }
 0x2dc   :  { %3237 = vrot.lane.b32.xlu1 %v7894_v10, %s5913_s17  ;;  %11079 = vst [vmem:[#allocation73_spill] sm:$0xff] %v7972_v61 }
 0x2dd   :  { %v7978_v60 = vpop.f32.mrf.mxu1 }
 0x2de   :  { %2982 = vrot.lane.b32.xlu0 %v7888_v21, %s5910_s3  ;;  %11080 = vst [vmem:[#allocation74_spill] sm:$0xff] %v7978_v60 }
 0x2df   :  { %v7984_v42 = vpop.f32.mrf.mxu1 }
 0x2e0   :  { %3233 = vrot.lane.b32.xlu1 %v7900_v12, %s5913_s17  ;;  %11081 = vst [vmem:[#allocation75_spill] sm:$0xff] %v7984_v42 }
 0x2e1   :  { %v7990_v50 = vpop.f32.mrf.mxu1 }
 0x2e2   :  { %2992 = vrot.lane.b32.xlu0 %v7894_v10, %s5910_s3  ;;  %11082 = vst [vmem:[#allocation76_spill] sm:$0xff] %v7990_v50 }
 0x2e3   :  { %v8000_v56 = vpop.f32.mrf.mxu1 }
 0x2e4   :  { %3239 = vrot.lane.b32.xlu1 %v7906_v26, %s5913_s17  ;;  %11085 = vst [vmem:[#allocation79_spill] sm:$0xff] %v8000_v56 }
 0x2e5   :  { %v8008_v2 = vpop.f32.mrf.mxu1 }
 0x2e6   :  { %2988 = vrot.lane.b32.xlu0 %v7900_v12, %s5910_s3  ;;  %11086 = vst [vmem:[#allocation80_spill] sm:$0xff] %v8008_v2 }
 0x2e7   :  { %v8016_v35 = vpop.f32.mrf.mxu1 }
 0x2e8   :  { %3235 = vrot.lane.b32.xlu1 %v7912_v45, %s5913_s17  ;;  %11087 = vst [vmem:[#allocation81_spill] sm:$0xff] %v8016_v35 }
 0x2e9   :  { %v8024_v51 = vpop.f32.mrf.mxu1 }
 0x2ea   :  { %2994 = vrot.lane.b32.xlu0 %v7906_v26, %s5910_s3  ;;  %11088 = vst [vmem:[#allocation82_spill] sm:$0xff] %v8024_v51 }
 0x2eb   :  { %v8032_v11 = vpop.f32.mrf.mxu1 }
 0x2ec   :  { %3245 = vrot.lane.b32.xlu1 %v7918_v59, %s5913_s17  ;;  %11089 = vst [vmem:[#allocation83_spill] sm:$0xff] %v8032_v11 }
 0x2ed   :  { %v8040_v20 = vpop.f32.mrf.mxu1 }
 0x2ee   :  { %2990 = vrot.lane.b32.xlu0 %v7912_v45, %s5910_s3  ;;  %11090 = vst [vmem:[#allocation84_spill] sm:$0xff] %v8040_v20 }
 0x2ef   :  { %v8050_v49 = vpop.f32.mrf.mxu1 }
 0x2f0   :  { %3241 = vrot.lane.b32.xlu1 %v7924_v7, %s5913_s17  ;;  %11091 = vst [vmem:[#allocation85_spill] sm:$0xff] %v8050_v49 }
 0x2f1   :  { %v8058_v8 = vpop.f32.mrf.mxu1 }
 0x2f2   :  { %3000 = vrot.lane.b32.xlu0 %v7918_v59, %s5910_s3  ;;  %11092 = vst [vmem:[#allocation86_spill] sm:$0xff] %v8058_v8 }
 0x2f3   :  { %v8068_v0 = vpop.f32.mrf.mxu1 }
 0x2f4   :  { %3247 = vrot.lane.b32.xlu1 %v7930_v41, %s5913_s17  ;;  %11093 = vst [vmem:[#allocation87_spill] sm:$0xff] %v8068_v0 }
 0x2f5   :  { %v8078_v17 = vpop.f32.mrf.mxu1 }
 0x2f6   :  { %2996 = vrot.lane.b32.xlu0 %v7924_v7, %s5910_s3  ;;  %11094 = vst [vmem:[#allocation88_spill] sm:$0xff] %v8078_v17 }
 0x2f8   :  { %3243 = vrot.lane.b32.xlu1 %v7936_v15, %s5913_s17 }
 0x2fa   :  { %3002 = vrot.lane.b32.xlu0 %v7930_v41, %s5910_s3 }
 0x2fc   :  { %3253 = vrot.lane.b32.xlu1 %v7942_v19, %s5913_s17 }
 0x2fe   :  { %2998 = vrot.lane.b32.xlu0 %v7936_v15, %s5910_s3 }
 0x300   :  { %3249 = vrot.lane.b32.xlu1 %v7948_v37, %s5913_s17 }
 0x302   :  { %3008 = vrot.lane.b32.xlu0 %v7942_v19, %s5910_s3 }
 0x304   :  { %3255 = vrot.lane.b32.xlu1 %v7954_v4, %s5913_s17 }
 0x306   :  { %3004 = vrot.lane.b32.xlu0 %v7948_v37, %s5910_s3 }
 0x308   :  { %3251 = vrot.lane.b32.xlu1 %v7960_v39, %s5913_s17 }
 0x30a   :  { %3010 = vrot.lane.b32.xlu0 %v7954_v4, %s5910_s3 }
 0x30c   :  { %3261 = vrot.lane.b32.xlu1 %v7966_v28, %s5913_s17 }
 0x30e   :  { %3006 = vrot.lane.b32.xlu0 %v7960_v39, %s5910_s3 }
 0x310   :  { %3257 = vrot.lane.b32.xlu1 %v7972_v61, %s5913_s17 }
 0x312   :  { %3012 = vrot.lane.b32.xlu0 %v7972_v61, %s5910_s3 }
 0x314   :  { %v8004_v5 = vpop.permute.xlu0 %3205  ;;  %3263 = vrot.lane.b32.xlu1 %v7978_v60, %s5913_s17 }
 0x316   :  { %v2957_v57 = vpop.permute.xlu1 %2956  ;;  %3014 = vrot.lane.b32.xlu0 %v7984_v42, %s5910_s3 }
 0x318   :  { %v8012_v62 = vpop.permute.xlu0 %2960  ;;  %3259 = vrot.lane.b32.xlu1 %v7984_v42, %s5913_s17 }
 0x31a   :  { %v3208_v47 = vpop.permute.xlu1 %3207  ;;  %3267 = vrot.lane.b32.xlu0 %v7990_v50, %s5913_s17 }
 0x31c   :  { %v8020_v22 = vpop.permute.xlu0 %2962  ;;  %3020 = vrot.lane.b32.xlu1 %v7990_v50, %s5910_s3 }
 0x31e   :  { %v8026_v34 = vpop.permute.xlu1 %3213  ;;  %3269 = vrot.lane.b32.xlu0 %v8008_v2, %s5913_s17 }
 0x320   :  { %v2959_v6 = vpop.permute.xlu0 %2958  ;;  %3016 = vrot.lane.b32.xlu1 %v8000_v56, %s5910_s3 }
 0x321   :  { %v3140_v4 = vadd.f32 %v7826_v43, %v2959_v6 }
 0x322   :  { %v3210_v38 = vpop.permute.xlu1 %3209  ;;  %3275 = vrot.lane.b32.xlu0 %v8024_v51, %s5913_s17 }
 0x324   :  { %v8036_v31 = vpop.permute.xlu0 %2968  ;;  %3022 = vrot.lane.b32.xlu1 %v8008_v2, %s5910_s3 }
 0x326   :  { %v8042_v55 = vpop.permute.xlu1 %3215  ;;  %3271 = vrot.lane.b32.xlu0 %v8032_v11, %s5913_s17 }
 0x328   :  { %v8046_v53 = vpop.permute.xlu0 %2964  ;;  %3018 = vrot.lane.b32.xlu1 %v8016_v35, %s5910_s3 }
 0x32a   :  { %v3212_v27 = vpop.permute.xlu1 %3211  ;;  %3277 = vrot.lane.b32.xlu0 %v8040_v20, %s5913_s17 }
 0x32c   :  { %v8054_v18 = vpop.permute.xlu0 %2970  ;;  %3028 = vrot.lane.b32.xlu1 %v8024_v51, %s5910_s3  ;;  %v8088_v51 = vpop.f32.mrf.mxu1 }
 0x32d   :  { %11095 = vst [vmem:[#allocation89_spill] sm:$0xff] %v8088_v51 }
 0x32e   :  { %v8060_v63 = vpop.permute.xlu1 %3221  ;;  %3273 = vrot.lane.b32.xlu0 %v8050_v49, %s5913_s17  ;;  %v8098_v2 = vpop.f32.mrf.mxu1 }
 0x32f   :  { %11096 = vst [vmem:[#allocation90_spill] sm:$0xff] %v8098_v2 }
 0x330   :  { %v8064_v33 = vpop.permute.xlu0 %2966  ;;  %3024 = vrot.lane.b32.xlu1 %v8032_v11, %s5910_s3  ;;  %v8108_v35 = vpop.f32.mrf.mxu1 }
 0x332   :  { %v8070_v36 = vpop.permute.xlu1 %3217  ;;  %3283 = vrot.lane.b32.xlu0 %v8058_v8, %s5913_s17  ;;  %v8122_v28 = vpop.f32.mrf.mxu1 }
 0x334   :  { %v8074_v13 = vpop.permute.xlu0 %2976  ;;  %3030 = vrot.lane.b32.xlu1 %v8040_v20, %s5910_s3 }
 0x336   :  { %v8080_v1 = vpop.permute.xlu1 %3223  ;;  %3279 = vrot.lane.b32.xlu0 %v8068_v0, %s5913_s17 }
 0x338   :  { %v8084_v32 = vpop.permute.xlu0 %2972  ;;  %3026 = vrot.lane.b32.xlu1 %v8050_v49, %s5910_s3 }
 0x33a   :  { %v8090_v11 = vpop.permute.xlu1 %3219  ;;  %3285 = vrot.lane.b32.xlu0 %v8078_v17, %s5913_s17 }
 0x33c   :  { %v8094_v20 = vpop.permute.xlu0 %2978  ;;  %3036 = vrot.lane.b32.xlu1 %v8058_v8, %s5910_s3  ;;  %v3138_v8 = vadd.f32 %v7994_v40, %v7830_v24  ;;  %v8132_v24 = vadd.f32 %v8004_v5, %v3137_v48 }
 0x33e   :  { %v8100_v50 = vpop.permute.xlu1 %3229  ;;  %3281 = vrot.lane.b32.xlu0 %v8088_v51, %s5913_s17  ;;  %v8125_v42 = vadd.f32 %v3208_v47, %v3138_v8  ;;  %11098 = vst [vmem:[#allocation92_spill] sm:$0xff] %v8132_v24  ;;  %v3586_v43 = vmul.f32 %v8132_v24, %v8132_v24  ;;  %v3452_v6 = vsel %vm657_vm3, %v8132_v24, 0.0 }
 0x340   :  { %v8104_v49 = vpop.permute.xlu0 %2974  ;;  %3032 = vrot.lane.b32.xlu1 %v8068_v0, %s5910_s3  ;;  %v3139_v0 = vadd.f32 %v7818_v3, %v2957_v57  ;;  %11097 = vst [vmem:[#allocation91_spill] sm:$0xff] %v8125_v42  ;;  %v8141_v3 = vpop.f32.mrf.mxu1  ;;  %v3587_v44 = vmul.f32 %v8125_v42, %v8125_v42  ;;  %v8145_v57 = vadd.f32 %v3212_v27, %v3140_v4  ;;  %v3453_v48 = vsel %vm657_vm3, %v8125_v42, 0.0 }
 0x341   :  { %v3141_v27 = vadd.f32 %v8012_v62, %v7838_v54 }
 0x342   :  { %v8110_v56 = vpop.permute.xlu1 %3225  ;;  %3291 = vrot.lane.b32.xlu0 %v8098_v2, %s5913_s17  ;;  %11100 = vst [vmem:[#allocation94_spill] sm:$0xff] %v8145_v57  ;;  %v8163_v4 = vpop.f32.mrf.mxu1  ;;  %v3651_v8 = vsel %vm657_vm3, %v3587_v44, 0.0  ;;  %v3589_v42 = vmul.f32 %v8145_v57, %v8145_v57  ;;  %v3457_v62 = vsel %vm657_vm3, %v8145_v57, 0.0 }
 0x343   :  { %v8178_v40 = vadd.f32 %v8026_v34, %v3141_v27  ;;  %v3143_v34 = vadd.f32 %v7834_v30, %v8046_v53 }
 0x344   :  { %v8116_v60 = vpop.permute.xlu0 %2984  ;;  %3038 = vrot.lane.b32.xlu1 %v8078_v17, %s5910_s3  ;;  %v8135_v17 = vadd.f32 %v3210_v38, %v3139_v0 }
 0x345   :  { %v8206_v30 = vadd.f32 %v8070_v36, %v3143_v34 }
 0x346   :  { %v8127_v61 = vpop.permute.xlu1 %3231  ;;  %3287 = vrot.lane.b32.xlu0 %v8108_v35, %s5913_s17  ;;  %11099 = vst [vmem:[#allocation93_spill] sm:$0xff] %v8135_v17  ;;  %v3588_v5 = vmul.f32 %v8135_v17, %v8135_v17  ;;  %v3455_v0 = vsel %vm657_vm3, %v8135_v17, 0.0 }
 0x347   :  { %v3592_v36 = vmul.f32 %v8206_v30, %v8206_v30  ;;  %v3463_v34 = vsel %vm657_vm3, %v8206_v30, 0.0 }
 0x348   :  { %v8137_v19 = vpop.permute.xlu0 %2980  ;;  %3034 = vrot.lane.b32.xlu1 %v8088_v51, %s5910_s3  ;;  %v3454_v51 = vadd.f32 %v3453_v48, %v3452_v6  ;;  %v3653_v54 = vsel %vm657_vm3, %v3588_v5, 0.0  ;;  %v8187_v48 = vpop.f32.mrf.mxu1  ;;  %v3655_v5 = vsel %vm657_vm3, %v3589_v42, 0.0 }
 0x34a   :  { %v8147_v47 = vpop.permute.xlu1 %3227  ;;  %3293 = vrot.lane.b32.xlu0 %v8122_v28, %s5913_s17  ;;  %v3456_v17 = vadd.f32 %v3455_v0, %v3454_v51  ;;  %v8212_v53 = vpop.f32.mrf.mxu1 }
 0x34c   :  { %v8159_v38 = vpop.permute.xlu0 %2986  ;;  %3044 = vrot.lane.b32.xlu1 %v8098_v2, %s5910_s3  ;;  %v3650_v2 = vsel %vm657_vm3, %v3586_v43, 0.0  ;;  %v3142_v43 = vadd.f32 %v8020_v22, %v7846_v58  ;;  %v3458_v27 = vadd.f32 %v3457_v62, %v3456_v17  ;;  %v3144_v58 = vadd.f32 %v7842_v23, %v8064_v33 }
 0x34d   :  { %v3652_v44 = vadd.f32 %v3651_v8, %v3650_v2  ;;  %v3590_v2 = vmul.f32 %v8178_v40, %v8178_v40  ;;  %v3459_v17 = vsel %vm657_vm3, %v8178_v40, 0.0 }
 0x34e   :  { %v8172_v24 = vpop.permute.xlu1 %3237  ;;  %3289 = vrot.lane.b32.xlu0 %v8141_v3, %s5913_s17  ;;  %v8201_v51 = vadd.f32 %v8042_v55, %v3142_v43  ;;  %v8217_v55 = vadd.f32 %v8090_v11, %v3144_v58  ;;  %v3460_v8 = vadd.f32 %v3459_v17, %v3458_v27  ;;  %v8232_v11 = vpop.f32.mrf.mxu1 }
 0x34f   :  { %v3654_v6 = vadd.f32 %v3653_v54, %v3652_v44  ;;  %v3657_v23 = vsel %vm657_vm3, %v3590_v2, 0.0  ;;  %v3145_v44 = vadd.f32 %v8036_v31, %v7854_v16  ;;  %v3661_v16 = vsel %vm657_vm3, %v3592_v36, 0.0 }
 0x350   :  { %v8183_v39 = vpop.permute.xlu0 %2982  ;;  %3040 = vrot.lane.b32.xlu1 %v8108_v35, %s5910_s3  ;;  %11101 = vst [vmem:[#allocation95_spill] sm:$0xff] %v8201_v51  ;;  %v3591_v33 = vmul.f32 %v8201_v51, %v8201_v51  ;;  %v3461_v43 = vsel %vm657_vm3, %v8201_v51, 0.0  ;;  %v3465_v31 = vsel %vm657_vm3, %v8217_v55, 0.0 }
 0x351   :  { %v3656_v42 = vadd.f32 %v3655_v5, %v3654_v6  ;;  %v3593_v5 = vmul.f32 %v8217_v55, %v8217_v55  ;;  %v3462_v6 = vadd.f32 %v3461_v43, %v3460_v8  ;;  %v8248_v58 = vadd.f32 %v8060_v63, %v3145_v44  ;;  %v8257_v8 = vpop.f32.mrf.mxu1 }
 0x352   :  { %v8194_v57 = vpop.permute.xlu1 %3233  ;;  %3299 = vrot.lane.b32.xlu0 %v8163_v4, %s5913_s17  ;;  %v3659_v2 = vsel %vm657_vm3, %v3591_v33, 0.0  ;;  %v3146_v33 = vadd.f32 %v8054_v18, %v7864_v29  ;;  %v3147_v63 = vadd.f32 %v7850_v52, %v8084_v32  ;;  %v3148_v29 = vadd.f32 %v7858_v46, %v8104_v49 }
 0x353   :  { %v3658_v54 = vadd.f32 %v3657_v23, %v3656_v42  ;;  %v3464_v17 = vadd.f32 %v3463_v34, %v3462_v6  ;;  %v3663_v36 = vsel %vm657_vm3, %v3593_v5, 0.0  ;;  %v8282_v5 = vpop.f32.mrf.mxu1  ;;  %v3467_v6 = vsel %vm657_vm3, %v8248_v58, 0.0 }
 0x354   :  { %v8208_v22 = vpop.permute.xlu0 %2992  ;;  %3046 = vrot.lane.b32.xlu1 %v8122_v28, %s5910_s3  ;;  %v8271_v34 = vadd.f32 %v8080_v1, %v3146_v33  ;;  %v8276_v52 = vadd.f32 %v8110_v56, %v3147_v63  ;;  %v8287_v1 = vadd.f32 %v8147_v47, %v3148_v29 }
 0x355   :  { %v3660_v42 = vadd.f32 %v3659_v2, %v3658_v54  ;;  %v3466_v43 = vadd.f32 %v3465_v31, %v3464_v17  ;;  %v3594_v54 = vmul.f32 %v8248_v58, %v8248_v58  ;;  %v8302_v47 = vpop.f32.mrf.mxu1  ;;  %v3149_v17 = vadd.f32 %v8074_v13, %v7876_v25 }
 0x356   :  { %v8219_v0 = vpop.permute.xlu1 %3239  ;;  %3295 = vrot.lane.b32.xlu0 %v8187_v48, %s5913_s17  ;;  %11102 = vst [vmem:[#allocation96_spill] sm:$0xff] %v8271_v34  ;;  %v3595_v56 = vmul.f32 %v8271_v34, %v8271_v34  ;;  %v3596_v49 = vmul.f32 %v8276_v52, %v8276_v52  ;;  %v3469_v33 = vsel %vm657_vm3, %v8271_v34, 0.0  ;;  %v3471_v63 = vsel %vm657_vm3, %v8276_v52, 0.0 }
 0x357   :  { %v3662_v44 = vadd.f32 %v3661_v16, %v3660_v42  ;;  %v3468_v2 = vadd.f32 %v3467_v6, %v3466_v43  ;;  %v3665_v46 = vsel %vm657_vm3, %v3594_v54, 0.0  ;;  %v8318_v29 = vadd.f32 %v8100_v50, %v3149_v17 }
 0x358   :  { %v8228_v62 = vpop.permute.xlu0 %2988  ;;  %3042 = vrot.lane.b32.xlu1 %v8141_v3, %s5910_s3  ;;  %v3667_v54 = vsel %vm657_vm3, %v3595_v56, 0.0  ;;  %v3669_v25 = vsel %vm657_vm3, %v3596_v49, 0.0  ;;  %v3473_v13 = vsel %vm657_vm3, %v8287_v1, 0.0  ;;  %v3150_v56 = vadd.f32 %v8094_v20, %v7888_v21 }
 0x359   :  { %v3664_v18 = vadd.f32 %v3663_v36, %v3662_v44  ;;  %v3597_v36 = vmul.f32 %v8287_v1, %v8287_v1  ;;  %v3470_v44 = vadd.f32 %v3469_v33, %v3468_v2  ;;  %v8327_v2 = vpop.f32.mrf.mxu1  ;;  %v3151_v50 = vadd.f32 %v7870_v14, %v8137_v19 }
 0x35a   :  { %v8242_v27 = vpop.permute.xlu1 %3235  ;;  %3301 = vrot.lane.b32.xlu0 %v8212_v53, %s5913_s17  ;;  %v3152_v21 = vadd.f32 %v7882_v9, %v8183_v39 }
 0x35b   :  { %v3666_v31 = vadd.f32 %v3665_v46, %v3664_v18  ;;  %v3472_v6 = vadd.f32 %v3471_v63, %v3470_v44  ;;  %v3671_v49 = vsel %vm657_vm3, %v3597_v36, 0.0  ;;  %v8339_v63 = vadd.f32 %v8127_v61, %v3150_v56  ;;  %v8350_v36 = vpop.f32.mrf.mxu1 }
 0x35c   :  { %v8253_v23 = vpop.permute.xlu0 %2994  ;;  %3052 = vrot.lane.b32.xlu1 %v8163_v4, %s5910_s3  ;;  %v8344_v20 = vadd.f32 %v8194_v57, %v3151_v50  ;;  %v3475_v44 = vsel %vm657_vm3, %v8318_v29, 0.0  ;;  %v8355_v61 = vadd.f32 %v8242_v27, %v3152_v21 }
 0x35d   :  { %v3668_v18 = vadd.f32 %v3667_v54, %v3666_v31  ;;  %v3474_v33 = vadd.f32 %v3473_v13, %v3472_v6  ;;  %v3598_v31 = vmul.f32 %v8318_v29, %v8318_v29  ;;  %11103 = vst [vmem:[#allocation97_spill] sm:$0xff] %v8339_v63  ;;  %v3599_v39 = vmul.f32 %v8339_v63, %v8339_v63  ;;  %v8370_v27 = vpop.f32.mrf.mxu1 }
 0x35e   :  { %v8264_v51 = vpop.permute.xlu1 %3245  ;;  %3297 = vrot.lane.b32.xlu0 %v8232_v11, %s5913_s17  ;;  %v3600_v57 = vmul.f32 %v8344_v20, %v8344_v20  ;;  %v3153_v6 = vadd.f32 %v8116_v60, %v7900_v12  ;;  %v3477_v56 = vsel %vm657_vm3, %v8339_v63, 0.0  ;;  %v3479_v50 = vsel %vm657_vm3, %v8344_v20, 0.0 }
 0x35f   :  { %v3670_v17 = vadd.f32 %v3669_v25, %v3668_v18  ;;  %v3476_v54 = vadd.f32 %v3475_v44, %v3474_v33  ;;  %v3673_v9 = vsel %vm657_vm3, %v3598_v31, 0.0  ;;  %v3675_v31 = vsel %vm657_vm3, %v3599_v39, 0.0 }
 0x360   :  { %v8278_v32 = vpop.permute.xlu0 %2990  ;;  %3048 = vrot.lane.b32.xlu1 %v8187_v48, %s5910_s3  ;;  %v8386_v21 = vadd.f32 %v8172_v24, %v3153_v6  ;;  %v3677_v12 = vsel %vm657_vm3, %v3600_v57, 0.0  ;;  %v3481_v60 = vsel %vm657_vm3, %v8355_v61, 0.0  ;;  %v3154_v39 = vadd.f32 %v8159_v38, %v7912_v45 }
 0x361   :  { %v3672_v14 = vadd.f32 %v3671_v49, %v3670_v17  ;;  %v3601_v49 = vmul.f32 %v8355_v61, %v8355_v61  ;;  %v3478_v17 = vadd.f32 %v3477_v56, %v3476_v54  ;;  %v8395_v54 = vpop.f32.mrf.mxu1  ;;  %v3155_v24 = vadd.f32 %v7894_v10, %v8228_v62 }
 0x362   :  { %v8289_v16 = vpop.permute.xlu1 %3241  ;;  %3307 = vrot.lane.b32.xlu0 %v8257_v8, %s5913_s17  ;;  %11104 = vst [vmem:[#allocation98_spill] sm:$0xff] %v8386_v21  ;;  %v3156_v45 = vadd.f32 %v7906_v26, %v8278_v32 }
 0x363   :  { %v3674_v13 = vadd.f32 %v3673_v9, %v3672_v14  ;;  %v3480_v44 = vadd.f32 %v3479_v50, %v3478_v17  ;;  %v3679_v57 = vsel %vm657_vm3, %v3601_v49, 0.0  ;;  %v8409_v50 = vadd.f32 %v8219_v0, %v3154_v39  ;;  %v8420_v49 = vpop.f32.mrf.mxu1 }
 0x364   :  { %v8298_v42 = vpop.permute.xlu0 %3000  ;;  %3054 = vrot.lane.b32.xlu1 %v8212_v53, %s5910_s3  ;;  %v8414_v10 = vadd.f32 %v8289_v16, %v3155_v24  ;;  %v3483_v17 = vsel %vm657_vm3, %v8386_v21, 0.0 }
 0x365   :  { %v3676_v14 = vadd.f32 %v3675_v31, %v3674_v13  ;;  %v3482_v56 = vadd.f32 %v3481_v60, %v3480_v44  ;;  %v3602_v13 = vmul.f32 %v8386_v21, %v8386_v21  ;;  %11105 = vst [vmem:[#allocation99_spill] sm:$0xff] %v8409_v50  ;;  %v3603_v32 = vmul.f32 %v8409_v50, %v8409_v50 }
 0x366   :  { %v8312_v43 = vpop.permute.xlu1 %3247  ;;  %3303 = vrot.lane.b32.xlu0 %v8282_v5, %s5913_s17  ;;  %11106 = vst [vmem:[#allocation100_spill] sm:$0xff] %v8414_v10  ;;  %v3604_v16 = vmul.f32 %v8414_v10, %v8414_v10  ;;  %v3157_v44 = vadd.f32 %v8208_v22, %v7924_v7  ;;  %v3485_v39 = vsel %vm657_vm3, %v8409_v50, 0.0  ;;  %v3487_v24 = vsel %vm657_vm3, %v8414_v10, 0.0 }
 0x367   :  { %v3678_v6 = vadd.f32 %v3677_v12, %v3676_v14  ;;  %v3484_v0 = vadd.f32 %v3483_v17, %v3482_v56  ;;  %v3681_v26 = vsel %vm657_vm3, %v3602_v13, 0.0  ;;  %v3683_v13 = vsel %vm657_vm3, %v3603_v32, 0.0 }
 0x368   :  { %v8323_v46 = vpop.permute.xlu0 %2996  ;;  %3050 = vrot.lane.b32.xlu1 %v8232_v11, %s5910_s3  ;;  %v3685_v7 = vsel %vm657_vm3, %v3604_v16, 0.0 }
 0x369   :  { %v3680_v38 = vadd.f32 %v3679_v57, %v3678_v6  ;;  %v3486_v6 = vadd.f32 %v3485_v39, %v3484_v0  ;;  %v3158_v39 = vadd.f32 %v8253_v23, %v7936_v15 }
 0x36a   :  { %v3244_v34 = vpop.permute.xlu1 %3243  ;;  %3309 = vrot.lane.b32.xlu0 %v8302_v47, %s5913_s17 }
 0x36b   :  { %v8424_v31 = vadd.f32 %v3244_v34, %v3156_v45  ;;  %v3682_v60 = vadd.f32 %v3681_v26, %v3680_v38  ;;  %v8437_v34 = vpop.f32.mrf.mxu1  ;;  %v8453_v45 = vadd.f32 %v8264_v51, %v3157_v44  ;;  %v3488_v17 = vadd.f32 %v3487_v24, %v3486_v6 }
 0x36c   :  { %v8346_v19 = vpop.permute.xlu0 %3002  ;;  %3060 = vrot.lane.b32.xlu1 %v8257_v8, %s5910_s3  ;;  %v3159_v51 = vadd.f32 %v7918_v59, %v8323_v46  ;;  %v8472_v24 = vadd.f32 %v8312_v43, %v3158_v39 }
 0x36d   :  { %11107 = vst [vmem:[#allocation101_spill] sm:$0xff] %v8424_v31  ;;  %v3605_v57 = vmul.f32 %v8424_v31, %v8424_v31  ;;  %11108 = vst [vmem:[#allocation102_spill] sm:$0xff] %v8453_v45  ;;  %v3489_v22 = vsel %vm657_vm3, %v8424_v31, 0.0  ;;  %v3684_v38 = vadd.f32 %v3683_v13, %v3682_v60  ;;  %v8460_v0 = vpop.f32.mrf.mxu1  ;;  %v3606_v60 = vmul.f32 %v8453_v45, %v8453_v45 }
 0x36e   :  { %v8357_v25 = vpop.permute.xlu1 %3253  ;;  %3305 = vrot.lane.b32.xlu0 %v8327_v2, %s5913_s17  ;;  %v3490_v44 = vadd.f32 %v3489_v22, %v3488_v17  ;;  %11109 = vst [vmem:[#allocation103_spill] sm:$0xff] %v8472_v24  ;;  %v3491_v6 = vsel %vm657_vm3, %v8453_v45, 0.0  ;;  %v3161_v17 = vadd.f32 %v8298_v42, %v7948_v37  ;;  %v3493_v39 = vsel %vm657_vm3, %v8472_v24, 0.0 }
 0x36f   :  { %v3687_v32 = vsel %vm657_vm3, %v3605_v57, 0.0  ;;  %v3686_v16 = vadd.f32 %v3685_v7, %v3684_v38  ;;  %v8483_v57 = vpop.f32.mrf.mxu1 }
 0x370   :  { %v8366_v18 = vpop.permute.xlu0 %2998  ;;  %3056 = vrot.lane.b32.xlu1 %v8282_v5, %s5910_s3  ;;  %v3492_v43 = vadd.f32 %v3491_v6, %v3490_v44 }
 0x371   :  { %v3160_v15 = vadd.f32 %v7930_v41, %v8366_v18  ;;  %v3688_v59 = vadd.f32 %v3687_v32, %v3686_v16  ;;  %v3689_v41 = vsel %vm657_vm3, %v3606_v60, 0.0  ;;  %v3607_v18 = vmul.f32 %v8472_v24, %v8472_v24 }
 0x372   :  { %v8380_v33 = vpop.permute.xlu1 %3249  ;;  %3315 = vrot.lane.b32.xlu0 %v8350_v36, %s5913_s17  ;;  %v3494_v16 = vadd.f32 %v3493_v39, %v3492_v43  ;;  %v11113_v43 = vld [vmem:[#allocation71_spill] sm:$0xff] }
 0x373   :  { %v8477_v23 = vadd.f32 %v8380_v33, %v3159_v51  ;;  %v3690_v22 = vadd.f32 %v3689_v41, %v3688_v59  ;;  %v3691_v60 = vsel %vm657_vm3, %v3607_v18, 0.0  ;;  %v3162_v39 = vadd.f32 %v8346_v19, %v11113_v43  ;;  %v11114_v18 = vld [vmem:[#allocation69_spill] sm:$0xff] }
 0x374   :  { %v8391_v9 = vpop.permute.xlu0 %3008  ;;  %3062 = vrot.lane.b32.xlu1 %v8302_v47, %s5910_s3 }
 0x375   :  { %11110 = vst [vmem:[#allocation104_spill] sm:$0xff] %v8477_v23  ;;  %v3608_v33 = vmul.f32 %v8477_v23, %v8477_v23  ;;  %v3495_v51 = vsel %vm657_vm3, %v8477_v23, 0.0  ;;  %v3692_v59 = vadd.f32 %v3691_v60, %v3690_v22 }
 0x376   :  { %v8402_v63 = vpop.permute.xlu1 %3255  ;;  %3311 = vrot.lane.b32.xlu0 %v8370_v27, %s5913_s17  ;;  %v3496_v6 = vadd.f32 %v3495_v51, %v3494_v16  ;;  %v11116_v16 = vld [vmem:[#allocation70_spill] sm:$0xff] }
 0x377   :  { %v3693_v37 = vsel %vm657_vm3, %v3608_v33, 0.0  ;;  %v8537_v51 = vadd.f32 %v8402_v63, %v3162_v39  ;;  %v11119_v39 = vld [vmem:[#allocation73_spill] sm:$0xff] }
 0x378   :  { %v8416_v62 = vpop.permute.xlu0 %3004  ;;  %3058 = vrot.lane.b32.xlu1 %v8327_v2, %s5910_s3 }
 0x379   :  { %v3163_v24 = vadd.f32 %v11114_v18, %v8416_v62  ;;  %11115 = vst [vmem:[#allocation71_spill] sm:$0xff] %v8537_v51  ;;  %v3165_v18 = vadd.f32 %v8391_v9, %v11119_v39 }
 0x37a   :  { %v3252_v12 = vpop.permute.xlu1 %3251  ;;  %3317 = vrot.lane.b32.xlu0 %v8395_v54, %s5913_s17 }
 0x37b   :  { %v8487_v13 = vadd.f32 %v3252_v12, %v3160_v15  ;;  %v8502_v12 = vpop.f32.mrf.mxu1  ;;  %v8516_v15 = vadd.f32 %v8357_v25, %v3161_v17  ;;  %v3694_v17 = vadd.f32 %v3693_v37, %v3692_v59 }
 0x37c   :  { %v8433_v14 = vpop.permute.xlu0 %3010  ;;  %3068 = vrot.lane.b32.xlu1 %v8350_v36, %s5910_s3 }
 0x37d   :  { %11111 = vst [vmem:[#allocation105_spill] sm:$0xff] %v8487_v13  ;;  %v3609_v32 = vmul.f32 %v8487_v13, %v8487_v13  ;;  %11112 = vst [vmem:[#allocation106_spill] sm:$0xff] %v8516_v15  ;;  %v3497_v42 = vsel %vm657_vm3, %v8487_v13, 0.0  ;;  %v3610_v22 = vmul.f32 %v8516_v15, %v8516_v15 }
 0x37e   :  { %v8447_v56 = vpop.permute.xlu1 %3261  ;;  %3313 = vrot.lane.b32.xlu0 %v8420_v49, %s5913_s17  ;;  %v3498_v33 = vadd.f32 %v3497_v42, %v3496_v6 }
 0x37f   :  { %v3695_v25 = vsel %vm657_vm3, %v3609_v32, 0.0  ;;  %v3499_v32 = vsel %vm657_vm3, %v8516_v15, 0.0  ;;  %v3697_v63 = vsel %vm657_vm3, %v3610_v22, 0.0 }
 0x380   :  { %v3007_v26 = vpop.permute.xlu0 %3006  ;;  %3064 = vrot.lane.b32.xlu1 %v8370_v27, %s5910_s3  ;;  %v3696_v62 = vadd.f32 %v3695_v25, %v3694_v17  ;;  %v3500_v42 = vadd.f32 %v3499_v32, %v3498_v33 }
 0x381   :  { %v3164_v19 = vadd.f32 %v11116_v16, %v3007_v26  ;;  %v3611_v26 = vmul.f32 %v8537_v51, %v8537_v51 }
 0x382   :  { %v3258_v50 = vpop.permute.xlu1 %3257  ;;  %3323 = vrot.lane.b32.xlu0 %v8437_v34, %s5913_s17 }
 0x383   :  { %v8540_v60 = vadd.f32 %v3258_v50, %v3163_v24  ;;  %v3698_v24 = vadd.f32 %v3697_v63, %v3696_v62  ;;  %v3699_v16 = vsel %vm657_vm3, %v3611_v26, 0.0  ;;  %v11122_v26 = vld [vmem:[#allocation72_spill] sm:$0xff] }
 0x384   :  { %v8479_v46 = vpop.permute.xlu0 %3012  ;;  %3070 = vrot.lane.b32.xlu1 %v8395_v54, %s5910_s3 }
 0x385   :  { %11117 = vst [vmem:[#allocation69_spill] sm:$0xff] %v8540_v60  ;;  %v3612_v50 = vmul.f32 %v8540_v60, %v8540_v60  ;;  %v3503_v25 = vsel %vm657_vm3, %v8540_v60, 0.0  ;;  %v3700_v32 = vadd.f32 %v3699_v16, %v3698_v24  ;;  %v11124_v16 = vld [vmem:[#allocation78_spill] sm:$0xff] }
 0x386   :  { %v8489_v7 = vpop.permute.xlu1 %3263  ;;  %3319 = vrot.lane.b32.xlu0 %v8460_v0, %s5913_s17 }
 0x387   :  { %v3701_v62 = vsel %vm657_vm3, %v3612_v50, 0.0  ;;  %v3167_v50 = vadd.f32 %v11122_v26, %v8479_v46 }
 0x388   :  { %v8498_v38 = vpop.permute.xlu0 %3014  ;;  %3066 = vrot.lane.b32.xlu1 %v8420_v49, %s5910_s3 }
 0x38a   :  { %v3260_v44 = vpop.permute.xlu1 %3259  ;;  %3321 = vrot.lane.b32.xlu0 %v8502_v12, %s5913_s17 }
 0x38b   :  { %v8548_v37 = vadd.f32 %v3260_v44, %v3164_v19  ;;  %v3501_v44 = vsel %vm657_vm3, %v8537_v51, 0.0  ;;  %v8569_v19 = vadd.f32 %v8447_v56, %v3165_v18  ;;  %v11121_v51 = vld [vmem:[#allocation75_spill] sm:$0xff] }
 0x38c   :  { %v8521_v41 = vpop.permute.xlu0 %3267  ;;  %3072 = vrot.lane.b32.xlu1 %v8460_v0, %s5910_s3  ;;  %v3502_v33 = vadd.f32 %v3501_v44, %v3500_v42  ;;  %v3166_v15 = vadd.f32 %v8433_v14, %v11121_v51  ;;  %v3702_v44 = vadd.f32 %v3701_v62, %v3700_v32  ;;  %v8592_v62 = vadd.f32 %v11124_v16, %v3167_v50 }
 0x38d   :  { %11118 = vst [vmem:[#allocation70_spill] sm:$0xff] %v8548_v37  ;;  %v3613_v17 = vmul.f32 %v8548_v37, %v8548_v37  ;;  %11120 = vst [vmem:[#allocation73_spill] sm:$0xff] %v8569_v19  ;;  %v3505_v9 = vsel %vm657_vm3, %v8548_v37, 0.0  ;;  %v3614_v56 = vmul.f32 %v8569_v19, %v8569_v19  ;;  %v3507_v14 = vsel %vm657_vm3, %v8569_v19, 0.0  ;;  %v11128_v19 = vld [vmem:[#allocation79_spill] sm:$0xff] }
 0x38e   :  { %v8530_v45 = vpop.permute.xlu1 %3020  ;;  %3325 = vrot.lane.b32.xlu0 %v8483_v57, %s5913_s17  ;;  %v3504_v63 = vadd.f32 %v3503_v25, %v3502_v33  ;;  %v8582_v18 = vadd.f32 %v8489_v7, %v3166_v15  ;;  %11125 = vst [vmem:[#allocation72_spill] sm:$0xff] %v8592_v62  ;;  %v11126_v7 = vld [vmem:[#allocation74_spill] sm:$0xff] }
 0x38f   :  { %v3703_v42 = vsel %vm657_vm3, %v3613_v17, 0.0  ;;  %v3705_v33 = vsel %vm657_vm3, %v3614_v56, 0.0  ;;  %v3168_v15 = vadd.f32 %v11126_v7, %v8498_v38  ;;  %v11129_v38 = vld [vmem:[#allocation77_spill] sm:$0xff] }
 0x390   :  { %v8542_v43 = vpop.permute.xlu0 %3269  ;;  %3074 = vrot.lane.b32.xlu1 %v8502_v12, %s5910_s3  ;;  %v3506_v60 = vadd.f32 %v3505_v9, %v3504_v63  ;;  %11123 = vst [vmem:[#allocation75_spill] sm:$0xff] %v8582_v18  ;;  %v3704_v24 = vadd.f32 %v3703_v42, %v3702_v44  ;;  %v3615_v46 = vmul.f32 %v8582_v18, %v8582_v18  ;;  %v3509_v63 = vsel %vm657_vm3, %v8582_v18, 0.0  ;;  %v11131_v18 = vld [vmem:[#allocation81_spill] sm:$0xff] }
 0x391   :  { %v3616_v44 = vmul.f32 %v8592_v62, %v8592_v62  ;;  %v8604_v26 = vadd.f32 %v11124_v16, %v3168_v15  ;;  %v3170_v37 = vadd.f32 %v11129_v38, %v11131_v18 }
 0x392   :  { %v3017_v59 = vpop.permute.xlu1 %3016  ;;  %v3508_v51 = vadd.f32 %v3507_v14, %v3506_v60  ;;  %v3706_v9 = vadd.f32 %v3705_v33, %v3704_v24  ;;  %v3707_v56 = vsel %vm657_vm3, %v3615_v46, 0.0  ;;  %v3169_v24 = vadd.f32 %v11129_v38, %v11128_v19 }
 0x393   :  { %11127 = vst [vmem:[#allocation78_spill] sm:$0xff] %v8604_v26  ;;  %v3511_v33 = vsel %vm657_vm3, %v8592_v62, 0.0  ;;  %v3617_v46 = vmul.f32 %v8604_v26, %v8604_v26  ;;  %v3513_v19 = vsel %vm657_vm3, %v8604_v26, 0.0  ;;  %v8628_v23 = vadd.f32 %v8542_v43, %v3170_v37 }
 0x394   :  { %v8555_v6 = vpop.permute.xlu0 %3275  ;;  %v3510_v42 = vadd.f32 %v3509_v63, %v3508_v51  ;;  %v3708_v50 = vadd.f32 %v3707_v56, %v3706_v9  ;;  %v3709_v63 = vsel %vm657_vm3, %v3616_v44, 0.0  ;;  %v8618_v15 = vadd.f32 %v8521_v41, %v3169_v24  ;;  %v11133_v41 = vld [vmem:[#allocation76_spill] sm:$0xff] }
 0x395   :  { %11132 = vst [vmem:[#allocation79_spill] sm:$0xff] %v8628_v23  ;;  %v3171_v24 = vadd.f32 %v11133_v41, %v3017_v59  ;;  %v3619_v43 = vmul.f32 %v8628_v23, %v8628_v23 }
 0x396   :  { %v8565_v22 = vpop.permute.xlu1 %3022  ;;  %v3512_v7 = vadd.f32 %v3511_v33, %v3510_v42  ;;  %11130 = vst [vmem:[#allocation74_spill] sm:$0xff] %v8618_v15  ;;  %v3710_v9 = vadd.f32 %v3709_v63, %v3708_v50  ;;  %v3711_v33 = vsel %vm657_vm3, %v3617_v46, 0.0  ;;  %v3618_v44 = vmul.f32 %v8618_v15, %v8618_v15 }
 0x397   :  { %v3515_v18 = vsel %vm657_vm3, %v8618_v15, 0.0  ;;  %v11140_v15 = vld [vmem:[#allocation82_spill] sm:$0xff] }
 0x398   :  { %v3272_v39 = vpop.permute.xlu0 %3271  ;;  %v3514_v62 = vadd.f32 %v3513_v19, %v3512_v7  ;;  %v3712_v50 = vadd.f32 %v3711_v33, %v3710_v9  ;;  %v11135_v7 = vld [vmem:[#allocation80_spill] sm:$0xff]  ;;  %v3713_v21 = vsel %vm657_vm3, %v3618_v44, 0.0  ;;  %v3517_v33 = vsel %vm657_vm3, %v8628_v23, 0.0 }
 0x399   :  { %v8635_v38 = vadd.f32 %v3272_v39, %v3171_v24  ;;  %v3715_v44 = vsel %vm657_vm3, %v3619_v43, 0.0  ;;  %v11139_v43 = vld [vmem:[#allocation85_spill] sm:$0xff] }
 0x39a   :  { %v3019_v13 = vpop.permute.xlu1 %3018  ;;  %v3516_v26 = vadd.f32 %v3515_v18, %v3514_v62  ;;  %v3714_v59 = vadd.f32 %v3713_v21, %v3712_v50  ;;  %v11137_v62 = vld [vmem:[#allocation83_spill] sm:$0xff] }
 0x39b   :  { %11134 = vst [vmem:[#allocation77_spill] sm:$0xff] %v8635_v38  ;;  %v3172_v19 = vadd.f32 %v11135_v7, %v3019_v13  ;;  %v3620_v39 = vmul.f32 %v8635_v38, %v8635_v38  ;;  %v3173_v24 = vadd.f32 %v8530_v45, %v11137_v62  ;;  %v3519_v18 = vsel %vm657_vm3, %v8635_v38, 0.0 }
 0x39c   :  { %v8584_v25 = vpop.permute.xlu0 %3277  ;;  %v3518_v41 = vadd.f32 %v3517_v33, %v3516_v26  ;;  %v3174_v62 = vadd.f32 %v8565_v22, %v11139_v43 }
 0x39d   :  { %v8659_v7 = vadd.f32 %v8555_v6, %v3173_v24  ;;  %v3717_v26 = vsel %vm657_vm3, %v3620_v39, 0.0 }
 0x39e   :  { %v8588_v17 = vpop.permute.xlu1 %3028  ;;  %v3520_v45 = vadd.f32 %v3519_v18, %v3518_v41  ;;  %v8673_v39 = vadd.f32 %v8584_v25, %v3174_v62  ;;  %v11142_v41 = vld [vmem:[#allocation84_spill] sm:$0xff] }
 0x39f   :  { %11138 = vst [vmem:[#allocation76_spill] sm:$0xff] %v8659_v7  ;;  %v3622_v6 = vmul.f32 %v8659_v7, %v8659_v7  ;;  %v3523_v22 = vsel %vm657_vm3, %v8659_v7, 0.0 }
 0x3a0   :  { %v3274_v32 = vpop.permute.xlu0 %3273  ;;  %11141 = vst [vmem:[#allocation80_spill] sm:$0xff] %v8673_v39 }
 0x3a1   :  { %v8643_v37 = vadd.f32 %v3274_v32, %v3172_v19  ;;  %v3716_v32 = vadd.f32 %v3715_v44, %v3714_v59 }
 0x3a2   :  { %v3025_v60 = vpop.permute.xlu1 %3024 }
 0x3a3   :  { %11136 = vst [vmem:[#allocation81_spill] sm:$0xff] %v8643_v37  ;;  %v3621_v21 = vmul.f32 %v8643_v37, %v8643_v37  ;;  %v3521_v19 = vsel %vm657_vm3, %v8643_v37, 0.0  ;;  %v3175_v59 = vadd.f32 %v11140_v15, %v3025_v60  ;;  %v3718_v44 = vadd.f32 %v3717_v26, %v3716_v32 }
 0x3a4   :  { %v8606_v14 = vpop.permute.xlu0 %3283  ;;  %v3522_v38 = vadd.f32 %v3521_v19, %v3520_v45  ;;  %v3721_v32 = vsel %vm657_vm3, %v3622_v6, 0.0  ;;  %v3623_v26 = vmul.f32 %v8673_v39, %v8673_v39 }
 0x3a5   :  { %v3719_v23 = vsel %vm657_vm3, %v3621_v21, 0.0 }
 0x3a6   :  { %v8612_v51 = vpop.permute.xlu1 %3030  ;;  %v3720_v37 = vadd.f32 %v3719_v23, %v3718_v44  ;;  %v3524_v60 = vadd.f32 %v3523_v22, %v3522_v38  ;;  %v3525_v23 = vsel %vm657_vm3, %v8673_v39, 0.0  ;;  %v11144_v22 = vld [vmem:[#allocation89_spill] sm:$0xff] }
 0x3a8   :  { %v3280_v56 = vpop.permute.xlu0 %3279  ;;  %v3526_v43 = vadd.f32 %v3525_v23, %v3524_v60  ;;  %v11145_v60 = vld [vmem:[#allocation86_spill] sm:$0xff] }
 0x3a9   :  { %v8675_v24 = vadd.f32 %v3280_v56, %v3175_v59  ;;  %v3722_v56 = vadd.f32 %v3721_v32, %v3720_v37  ;;  %v3723_v59 = vsel %vm657_vm3, %v3623_v26, 0.0  ;;  %v3178_v32 = vadd.f32 %v8612_v51, %v11144_v22 }
 0x3aa   :  { %v3027_v42 = vpop.permute.xlu1 %3026 }
 0x3ab   :  { %v3176_v18 = vadd.f32 %v11142_v41, %v3027_v42  ;;  %v3624_v25 = vmul.f32 %v8675_v24, %v8675_v24  ;;  %v11143_v42 = vld [vmem:[#allocation87_spill] sm:$0xff]  ;;  %v3527_v38 = vsel %vm657_vm3, %v8675_v24, 0.0  ;;  %v3724_v41 = vadd.f32 %v3723_v59, %v3722_v56  ;;  %v11146_v56 = vld [vmem:[#allocation88_spill] sm:$0xff] }
 0x3ac   :  { %v8631_v63 = vpop.permute.xlu0 %3285 }
 0x3ad   :  { %v3725_v44 = vsel %vm657_vm3, %v3624_v25, 0.0  ;;  %v8711_v25 = vadd.f32 %v8631_v63, %v3178_v32 }
 0x3ae   :  { %v8638_v46 = vpop.permute.xlu1 %3036  ;;  %v3726_v39 = vadd.f32 %v3725_v44, %v3724_v41 }
 0x3af   :  { %v3627_v41 = vmul.f32 %v8711_v25, %v8711_v25 }
 0x3b0   :  { %v3282_v9 = vpop.permute.xlu0 %3281 }
 0x3b1   :  { %v8680_v21 = vadd.f32 %v3282_v9, %v3176_v18  ;;  %v3177_v9 = vadd.f32 %v8588_v17, %v11143_v42  ;;  %v3528_v17 = vadd.f32 %v3527_v38, %v3526_v43 }
 0x3b2   :  { %v3033_v13 = vpop.permute.xlu1 %3032 }
 0x3b3   :  { %v3625_v45 = vmul.f32 %v8680_v21, %v8680_v21  ;;  %v8699_v37 = vadd.f32 %v8606_v14, %v3177_v9  ;;  %v3529_v6 = vsel %vm657_vm3, %v8680_v21, 0.0  ;;  %v3179_v23 = vadd.f32 %v11145_v60, %v3033_v13 }
 0x3b4   :  { %v8656_v50 = vpop.permute.xlu0 %3291  ;;  %v3530_v26 = vadd.f32 %v3529_v6, %v3528_v17  ;;  %v3731_v60 = vsel %vm657_vm3, %v3627_v41, 0.0 }
 0x3b5   :  { %v3727_v42 = vsel %vm657_vm3, %v3625_v45, 0.0  ;;  %v3626_v14 = vmul.f32 %v8699_v37, %v8699_v37  ;;  %v3531_v51 = vsel %vm657_vm3, %v8699_v37, 0.0 }
 0x3b6   :  { %v8664_v33 = vpop.permute.xlu1 %3038  ;;  %v3728_v43 = vadd.f32 %v3727_v42, %v3726_v39  ;;  %v3532_v13 = vadd.f32 %v3531_v51, %v3530_v26  ;;  %v3181_v39 = vadd.f32 %v8638_v46, %v8108_v35  ;;  %v11147_v51 = vld [vmem:[#allocation90_spill] sm:$0xff] }
 0x3b7   :  { %v3729_v6 = vsel %vm657_vm3, %v3626_v14, 0.0 }
 0x3b8   :  { %v3288_v31 = vpop.permute.xlu0 %3287  ;;  %v3730_v63 = vadd.f32 %v3729_v6, %v3728_v43 }
 0x3b9   :  { %v8713_v9 = vadd.f32 %v3288_v31, %v3179_v23  ;;  %v8735_v23 = vadd.f32 %v8656_v50, %v3181_v39 }
 0x3ba   :  { %v3035_v10 = vpop.permute.xlu1 %3034 }
 0x3bb   :  { %v3180_v38 = vadd.f32 %v11146_v56, %v3035_v10  ;;  %v3628_v31 = vmul.f32 %v8713_v9, %v8713_v9  ;;  %v3533_v10 = vsel %vm657_vm3, %v8711_v25, 0.0  ;;  %v3732_v56 = vadd.f32 %v3731_v60, %v3730_v63 }
 0x3bc   :  { %v3294_v15 = vpop.permute.xlu0 %3293  ;;  %v3534_v32 = vadd.f32 %v3533_v10, %v3532_v13  ;;  %v3630_v50 = vmul.f32 %v8735_v23, %v8735_v23 }
 0x3bd   :  { %v3733_v26 = vsel %vm657_vm3, %v3628_v31, 0.0 }
 0x3be   :  { %v8687_v19 = vpop.permute.xlu1 %3044  ;;  %v3734_v6 = vadd.f32 %v3733_v26, %v3732_v56  ;;  %v3737_v60 = vsel %vm657_vm3, %v3630_v50, 0.0 }
 0x3c0   :  { %v3290_v62 = vpop.permute.xlu0 %3289 }
 0x3c1   :  { %v8718_v45 = vadd.f32 %v3290_v62, %v3180_v38  ;;  %v3535_v62 = vsel %vm657_vm3, %v8713_v9, 0.0  ;;  %v3182_v38 = vadd.f32 %v8664_v33, %v8141_v3  ;;  %v3539_v3 = vsel %vm657_vm3, %v8735_v23, 0.0 }
 0x3c2   :  { %v3041_v18 = vpop.permute.xlu1 %3040  ;;  %v3536_v35 = vadd.f32 %v3535_v62, %v3534_v32 }
 0x3c3   :  { %v3629_v22 = vmul.f32 %v8718_v45, %v8718_v45  ;;  %v3537_v14 = vsel %vm657_vm3, %v8718_v45, 0.0  ;;  %v3183_v13 = vadd.f32 %v11147_v51, %v3041_v18  ;;  %v8746_v31 = vadd.f32 %v3294_v15, %v3182_v38 }
 0x3c4   :  { %v3300_v7 = vpop.permute.xlu0 %3299  ;;  %v3538_v41 = vadd.f32 %v3537_v14, %v3536_v35 }
 0x3c5   :  { %v3735_v43 = vsel %vm657_vm3, %v3629_v22, 0.0  ;;  %v3631_v26 = vmul.f32 %v8746_v31, %v8746_v31 }
 0x3c6   :  { %v3047_v59 = vpop.permute.xlu1 %3046  ;;  %v3736_v62 = vadd.f32 %v3735_v43, %v3734_v6  ;;  %v3540_v18 = vadd.f32 %v3539_v3, %v3538_v41 }
 0x3c7   :  { %v3739_v51 = vsel %vm657_vm3, %v3631_v26, 0.0 }
 0x3c8   :  { %v3296_v44 = vpop.permute.xlu0 %3295 }
 0x3c9   :  { %v8748_v39 = vadd.f32 %v3296_v44, %v3183_v13  ;;  %v3738_v44 = vadd.f32 %v3737_v60, %v3736_v62 }
 0x3ca   :  { %v3043_v17 = vpop.permute.xlu1 %3042 }
 0x3cb   :  { %v3184_v63 = vadd.f32 %v8122_v28, %v3043_v17  ;;  %v3632_v15 = vmul.f32 %v8748_v39, %v8748_v39  ;;  %v3541_v28 = vsel %vm657_vm3, %v8746_v31, 0.0  ;;  %v3185_v17 = vadd.f32 %v8687_v19, %v8187_v48 }
 0x3cc   :  { %v3302_v42 = vpop.permute.xlu0 %3301  ;;  %v3543_v56 = vsel %vm657_vm3, %v8748_v39, 0.0  ;;  %v3542_v38 = vadd.f32 %v3541_v28, %v3540_v18  ;;  %v3186_v19 = vadd.f32 %v3047_v59, %v8232_v11 }
 0x3cd   :  { %v8769_v13 = vadd.f32 %v3300_v7, %v3185_v17  ;;  %v3741_v6 = vsel %vm657_vm3, %v3632_v15, 0.0 }
 0x3ce   :  { %v3053_v46 = vpop.permute.xlu1 %3052  ;;  %v3544_v50 = vadd.f32 %v3543_v56, %v3542_v38  ;;  %v8779_v26 = vadd.f32 %v3302_v42, %v3186_v19 }
 0x3cf   :  { %v3634_v7 = vmul.f32 %v8769_v13, %v8769_v13  ;;  %v3547_v17 = vsel %vm657_vm3, %v8769_v13, 0.0 }
 0x3d0   :  { %v3298_v10 = vpop.permute.xlu0 %3297 }
 0x3d1   :  { %v8753_v33 = vadd.f32 %v3298_v10, %v3184_v63  ;;  %v3740_v10 = vadd.f32 %v3739_v51, %v3738_v44  ;;  %v3549_v51 = vsel %vm657_vm3, %v8779_v26, 0.0 }
 0x3d2   :  { %v3049_v32 = vpop.permute.xlu1 %3048 }
 0x3d3   :  { %v3633_v35 = vmul.f32 %v8753_v33, %v8753_v33  ;;  %v3545_v41 = vsel %vm657_vm3, %v8753_v33, 0.0  ;;  %v3187_v62 = vadd.f32 %v8163_v4, %v3049_v32  ;;  %v3742_v3 = vadd.f32 %v3741_v6, %v3740_v10 }
 0x3d4   :  { %v3308_v22 = vpop.permute.xlu0 %3307  ;;  %v3546_v18 = vadd.f32 %v3545_v41, %v3544_v50  ;;  %v3745_v4 = vsel %vm657_vm3, %v3634_v7, 0.0  ;;  %v3635_v32 = vmul.f32 %v8779_v26, %v8779_v26  ;;  %v3189_v6 = vadd.f32 %v3053_v46, %v8282_v5 }
 0x3d5   :  { %v3743_v63 = vsel %vm657_vm3, %v3633_v35, 0.0 }
 0x3d6   :  { %v3055_v14 = vpop.permute.xlu1 %3054  ;;  %v3744_v28 = vadd.f32 %v3743_v63, %v3742_v3  ;;  %v3548_v59 = vadd.f32 %v3547_v17, %v3546_v18  ;;  %v8801_v19 = vadd.f32 %v3308_v22, %v3189_v6 }
 0x3d7   :  { %v3190_v46 = vadd.f32 %v3055_v14, %v8327_v2 }
 0x3d8   :  { %v3304_v43 = vpop.permute.xlu0 %3303  ;;  %v3746_v38 = vadd.f32 %v3745_v4, %v3744_v28  ;;  %v3550_v10 = vadd.f32 %v3549_v51, %v3548_v59  ;;  %v3638_v22 = vmul.f32 %v8801_v19, %v8801_v19 }
 0x3d9   :  { %v8781_v15 = vadd.f32 %v3304_v43, %v3187_v62 }
 0x3da   :  { %v3051_v48 = vpop.permute.xlu1 %3050  ;;  %v3753_v51 = vsel %vm657_vm3, %v3638_v22, 0.0 }
 0x3db   :  { %v3188_v11 = vadd.f32 %v8212_v53, %v3051_v48  ;;  %v3636_v42 = vmul.f32 %v8781_v15, %v8781_v15  ;;  %v3551_v53 = vsel %vm657_vm3, %v8781_v15, 0.0  ;;  %v3747_v48 = vsel %vm657_vm3, %v3635_v32, 0.0 }
 0x3dc   :  { %v3310_v60 = vpop.permute.xlu0 %3309  ;;  %v3748_v3 = vadd.f32 %v3747_v48, %v3746_v38  ;;  %v3552_v18 = vadd.f32 %v3551_v53, %v3550_v10  ;;  %v3555_v38 = vsel %vm657_vm3, %v8801_v19, 0.0 }
 0x3dd   :  { %v3749_v63 = vsel %vm657_vm3, %v3636_v42, 0.0 }
 0x3de   :  { %v3061_v44 = vpop.permute.xlu1 %3060  ;;  %v3750_v17 = vadd.f32 %v3749_v63, %v3748_v3 }
 0x3e0   :  { %v3306_v56 = vpop.permute.xlu0 %3305 }
 0x3e1   :  { %v8791_v35 = vadd.f32 %v3306_v56, %v3188_v11  ;;  %v8811_v56 = vadd.f32 %v3310_v60, %v3190_v46 }
 0x3e2   :  { %v3057_v43 = vpop.permute.xlu1 %3056 }
 0x3e3   :  { %v3637_v41 = vmul.f32 %v8791_v35, %v8791_v35  ;;  %v3553_v62 = vsel %vm657_vm3, %v8791_v35, 0.0  ;;  %v3191_v28 = vadd.f32 %v8257_v8, %v3057_v43  ;;  %v3639_v8 = vmul.f32 %v8811_v56, %v8811_v56 }
 0x3e4   :  { %v3316_v50 = vpop.permute.xlu0 %3315  ;;  %v3554_v11 = vadd.f32 %v3553_v62, %v3552_v18  ;;  %v3557_v53 = vsel %vm657_vm3, %v8811_v56, 0.0 }
 0x3e5   :  { %v3751_v7 = vsel %vm657_vm3, %v3637_v41, 0.0  ;;  %v3193_v41 = vadd.f32 %v3061_v44, %v8370_v27  ;;  %v3755_v3 = vsel %vm657_vm3, %v3639_v8, 0.0 }
 0x3e6   :  { %v3063_v5 = vpop.permute.xlu1 %3062  ;;  %v3752_v32 = vadd.f32 %v3751_v7, %v3750_v17  ;;  %v3556_v2 = vadd.f32 %v3555_v38, %v3554_v11 }
 0x3e7   :  { %v8829_v18 = vadd.f32 %v3316_v50, %v3193_v41  ;;  %v3194_v27 = vadd.f32 %v3063_v5, %v8420_v49 }
 0x3e8   :  { %v3312_v59 = vpop.permute.xlu0 %3311  ;;  %v3754_v6 = vadd.f32 %v3753_v51, %v3752_v32  ;;  %v3558_v63 = vadd.f32 %v3557_v53, %v3556_v2 }
 0x3e9   :  { %v8813_v4 = vadd.f32 %v3312_v59, %v3191_v28  ;;  %v3642_v50 = vmul.f32 %v8829_v18, %v8829_v18  ;;  %v3563_v49 = vsel %vm657_vm3, %v8829_v18, 0.0 }
 0x3ea   :  { %v3059_v42 = vpop.permute.xlu1 %3058  ;;  %v3756_v28 = vadd.f32 %v3755_v3, %v3754_v6 }
 0x3eb   :  { %v3640_v43 = vmul.f32 %v8813_v4, %v8813_v4  ;;  %v3559_v10 = vsel %vm657_vm3, %v8813_v4, 0.0  ;;  %v3192_v48 = vadd.f32 %v8302_v47, %v3059_v42  ;;  %v3761_v53 = vsel %vm657_vm3, %v3642_v50, 0.0 }
 0x3ec   :  { %v3318_v14 = vpop.permute.xlu0 %3317  ;;  %v3560_v17 = vadd.f32 %v3559_v10, %v3558_v63 }
 0x3ed   :  { %v3757_v46 = vsel %vm657_vm3, %v3640_v43, 0.0  ;;  %v8841_v42 = vadd.f32 %v3318_v14, %v3194_v27 }
 0x3ee   :  { %v3069_v60 = vpop.permute.xlu1 %3068  ;;  %v3758_v59 = vadd.f32 %v3757_v46, %v3756_v28 }
 0x3ef   :  { %v3197_v8 = vadd.f32 %v3069_v60, %v8460_v0  ;;  %v3643_v41 = vmul.f32 %v8841_v42, %v8841_v42 }
 0x3f0   :  { %v3314_v62 = vpop.permute.xlu0 %3313 }
 0x3f1   :  { %v8832_v7 = vadd.f32 %v3314_v62, %v3192_v48  ;;  %v3565_v62 = vsel %vm657_vm3, %v8841_v42, 0.0  ;;  %v3763_v28 = vsel %vm657_vm3, %v3643_v41, 0.0 }
 0x3f2   :  { %v3065_v11 = vpop.permute.xlu1 %3064 }
 0x3f3   :  { %v3561_v44 = vsel %vm657_vm3, %v8832_v7, 0.0  ;;  %v3641_v47 = vmul.f32 %v8832_v7, %v8832_v7  ;;  %v3195_v5 = vadd.f32 %v8350_v36, %v3065_v11 }
 0x3f4   :  { %v3562_v22 = vadd.f32 %v3561_v44, %v3560_v17  ;;  %v3324_v32 = vpop.permute.xlu0 %3323 }
 0x3f5   :  { %v3759_v38 = vsel %vm657_vm3, %v3641_v47, 0.0  ;;  %v8853_v48 = vadd.f32 %v3324_v32, %v3197_v8 }
 0x3f6   :  { %v3760_v2 = vadd.f32 %v3759_v38, %v3758_v59  ;;  %v3071_v51 = vpop.permute.xlu1 %3070  ;;  %v3564_v43 = vadd.f32 %v3563_v49, %v3562_v22 }
 0x3f7   :  { %v3646_v27 = vmul.f32 %v8853_v48, %v8853_v48  ;;  %v3198_v22 = vadd.f32 %v3071_v51, %v8502_v12 }
 0x3f8   :  { %v3320_v6 = vpop.permute.xlu0 %3319  ;;  %v3762_v10 = vadd.f32 %v3761_v53, %v3760_v2  ;;  %v3566_v3 = vadd.f32 %v3565_v62, %v3564_v43 }
 0x3f9   :  { %v8851_v14 = vadd.f32 %v3320_v6, %v3195_v5  ;;  %v3571_v5 = vsel %vm657_vm3, %v8853_v48, 0.0  ;;  %v3769_v41 = vsel %vm657_vm3, %v3646_v27, 0.0 }
 0x3fa   :  { %v3067_v63 = vpop.permute.xlu1 %3066  ;;  %v3764_v44 = vadd.f32 %v3763_v28, %v3762_v10 }
 0x3fb   :  { %v3567_v36 = vsel %vm657_vm3, %v8851_v14, 0.0  ;;  %v3644_v0 = vmul.f32 %v8851_v14, %v8851_v14  ;;  %v3196_v60 = vadd.f32 %v8395_v54, %v3067_v63 }
 0x3fc   :  { %v3322_v46 = vpop.permute.xlu0 %3321  ;;  %v3568_v47 = vadd.f32 %v3567_v36, %v3566_v3 }
 0x3fd   :  { %v3765_v17 = vsel %vm657_vm3, %v3644_v0, 0.0  ;;  %v8864_v11 = vadd.f32 %v3322_v46, %v3196_v60 }
 0x3fe   :  { %v3073_v59 = vpop.permute.xlu1 %3072  ;;  %v3766_v38 = vadd.f32 %v3765_v17, %v3764_v44 }
 0x3ff   :  { %v3569_v32 = vsel %vm657_vm3, %v8864_v11, 0.0  ;;  %v3645_v54 = vmul.f32 %v8864_v11, %v8864_v11  ;;  %v3199_v50 = vadd.f32 %v8437_v34, %v3073_v59 }
 0x400   :  { %v3570_v2 = vadd.f32 %v3569_v32, %v3568_v47  ;;  %v3326_v49 = vpop.permute.xlu0 %3325 }
 0x401   :  { %v3767_v8 = vsel %vm657_vm3, %v3645_v54, 0.0  ;;  %v8878_v43 = vadd.f32 %v11124_v16, %v3199_v50  ;;  %v8880_v12 = vadd.f32 %v3326_v49, %v3198_v22 }
 0x402   :  { %v3768_v51 = vadd.f32 %v3767_v8, %v3766_v38  ;;  %v3572_v6 = vadd.f32 %v3571_v5, %v3570_v2  ;;  %v3075_v53 = vpop.permute.xlu1 %3074 }
 0x403   :  { %v3648_v34 = vmul.f32 %v8878_v43, %v8878_v43  ;;  %v3573_v10 = vsel %vm657_vm3, %v8880_v12, 0.0  ;;  %v3647_v63 = vmul.f32 %v8880_v12, %v8880_v12  ;;  %v3200_v0 = vadd.f32 %v8483_v57, %v3075_v53 }
 0x404   :  { %v3770_v62 = vadd.f32 %v3769_v41, %v3768_v51  ;;  %v3574_v36 = vadd.f32 %v3573_v10, %v3572_v6  ;;  %v3575_v60 = vsel %vm657_vm3, %v8878_v43, 0.0 }
 0x405   :  { %v3771_v3 = vsel %vm657_vm3, %v3647_v63, 0.0  ;;  %v8894_v17 = vadd.f32 %v11124_v16, %v3200_v0  ;;  %v3773_v27 = vsel %vm657_vm3, %v3648_v34, 0.0 }
 0x406   :  { %v3576_v46 = vadd.f32 %v3575_v60, %v3574_v36  ;;  %v3772_v28 = vadd.f32 %v3771_v3, %v3770_v62  ;;  %v5914_v60 = vmov 1966171168  }
 0x407   :  { %v3577_v47 = vsel %vm657_vm3, %v8894_v17, 0.0  ;;  %v3649_v59 = vmul.f32 %v8894_v17, %v8894_v17  ;;  %v998_v3 = vunpack.c.l.s4 %v5914_v60 }
 0x408   :  { %v3774_v44 = vadd.f32 %v3773_v27, %v3772_v28  ;;  %v3578_v57 = vadd.f32 %v3577_v47, %v3576_v46  ;;  %v11148_v28 = vld [vmem:[#allocation66_spill] sm:$0xff] }
 0x409   :  { %v3775_v22 = vsel %vm657_vm3, %v3649_v59, 0.0  ;;  %v999_v46 = vunpack.c.0.s8 %v998_v3  ;;  %v11155_v3 = vld [vmem:[#allocation16_spill] sm:$0xff] }
 0x40a   :  { %v3579_v32 = vrot.slane %v3578_v57, 4  ;;  %v3776_v54 = vadd.f32 %v3775_v22, %v3774_v44 }
 0x40b   :  { %v8903_v27 = vsub.s32 %v999_v46, %v11148_v28  ;;  %v667_v46 = vsel %vm657_vm3, %v11155_v3, 0.0 }
 0x40c   :  { %v3580_v50 = vadd.f32 %v3579_v32, %v3578_v57  ;;  %v3777_v38 = vrot.slane %v3776_v54, 4  ;;  %v3784_v57 = vld [vmem:[%s10602_s5] sm:$0x1] }
 0x40e   :  { %v3581_v2 = vrot.slane %v3580_v50, 2  ;;  %v3778_v49 = vadd.f32 %v3777_v38, %v3776_v54  ;;  %v11149_v54 = vld [vmem:[#allocation67_spill] sm:$0xff]  ;;  %v11150_v38 = vld [vmem:[#allocation8_spill] sm:$0xff] }
 0x410   :  { %v3582_v16 = vadd.f32 %v3581_v2, %v3580_v50  ;;  %v3779_v5 = vrot.slane %v3778_v49, 2  ;;  %v659_v2 = vsel %vm657_vm3, %v11150_v38, 0.0 }
 0x412   :  { %v3583_v8 = vrot.slane %v3582_v16, 1  ;;  %v3780_v51 = vadd.f32 %v3779_v5, %v3778_v49  ;;  %v11151_v49 = vld [vmem:[#allocation4_spill] sm:$0xff] }
 0x414   :  { %v3584_v6 = vadd.f32 %v3583_v8, %v3582_v16  ;;  %v3781_v53 = vrot.slane %v3780_v51, 1  ;;  %v658_v16 = vsel %vm657_vm3, %v11151_v49, 0.0  ;;  %v11152_v8 = vld [vmem:[#allocation2_spill] sm:$0xff] }
 0x415   :  { %v660_v5 = vadd.f32 %v659_v2, %v658_v16 }
 0x416   :  { %v3585_v41 = vmul.f32 0.001953125, %v3584_v6  ;;  %v3782_v34 = vadd.f32 %v3781_v53, %v3780_v51  ;;  %v661_v51 = vsel %vm657_vm3, %v11152_v8, 0.0  ;;  %v11153_v53 = vld [vmem:[#allocation6_spill] sm:$0xff] }
 0x417   :  { %v662_v6 = vadd.f32 %v661_v51, %v660_v5  ;;  %v11159_v51 = vld [vmem:[#allocation24_spill] sm:$0xff] }
 0x418   :  { %v3783_v10 = vmul.f32 0.001953125, %v3782_v34  ;;  %v3785_v63 = vmul.f32 %v3585_v41, %v3585_v41  ;;  %v663_v34 = vsel %vm657_vm3, %v11153_v53, 0.0 }
 0x41a   :  { %v3786_v62 = vsub.f32 %v3783_v10, %v3785_v63  ;;  %v664_v10 = vadd.f32 %v663_v34, %v662_v6  ;;  %v675_v6 = vsel %vm657_vm3, %v11159_v51, 0.0 }
 0x41c   :  { %v3787_v36 = vmax.f32 %v3786_v62, 0.0  ;;  %v11154_v62 = vld [vmem:[#allocation12_spill] sm:$0xff] }
 0x41e   :  { %v3788_v0 = vadd.f32 1e-05, %v3787_v36  ;;  %v665_v36 = vsel %vm657_vm3, %v11154_v62, 0.0 }
 0x41f   :  { %v666_v60 = vadd.f32 %v665_v36, %v664_v10  ;;  %v11160_v10 = vld [vmem:[#allocation18_spill] sm:$0xff] }
 0x420   :  { %5904 = vrsqrt.f32 %v3788_v0  ;;  %v677_v36 = vsel %vm657_vm3, %v11160_v10, 0.0 }
 0x42d   :  { %v5905_v44 = vpop.eup %5904 }
 0x42e   :  { %v3797_v47 = vrot.slane %v5905_v44, %v8903_v27 }
 0x430   :  { %v3804_v59 = vrot.slane %v3797_v47, %v8903_v27  ;;  %v668_v47 = vadd.f32 %v667_v46, %v666_v60  ;;  %v11161_v60 = vld [vmem:[#allocation22_spill] sm:$0xff] }
 0x431   :  { %v679_v46 = vsel %vm657_vm3, %v11161_v60, 0.0 }
 0x432   :  { %3805 = vrot.lane.b32.xlu0 %v3804_v59, %s5913_s17  ;;  %v11156_v59 = vld [vmem:[#allocation10_spill] sm:$0xff] }
 0x4a4   :  { %v3806_v22 = vpop.permute.xlu0 %3805 }
 0x4a5   :  { %v3808_v32 = vmul.f32 %v3806_v22, %v3784_v57  ;;  %v669_v57 = vsel %vm657_vm3, %v11156_v59, 0.0 }
 0x4a6   :  { %v670_v22 = vadd.f32 %v669_v57, %v668_v47 }
 0x4a7   :  { %v3814_v50 = vrot.slane %v3808_v32, %v11149_v54  ;;  %v11157_v32 = vld [vmem:[#allocation14_spill] sm:$0xff] }
 0x4a9   :  { %3815 = vrot.lane.b32.xlu1 %v3814_v50, %s5910_s3  ;;  %v671_v50 = vsel %vm657_vm3, %v11157_v32, 0.0 }
 0x4aa   :  { %v672_v2 = vadd.f32 %v671_v50, %v670_v22  ;;  %v11163_v22 = vld [vmem:[#allocation32_spill] sm:$0xff] }
 0x4ab   :  { %v683_v50 = vsel %vm657_vm3, %v11163_v22, 0.0 }
 0x51b   :  { %v8921_v63 = vpop.permute.xlu1 %3815 }
 0x51c   :  { %v3818_v0 = vmul.f32 %v8921_v63, %v3585_v41  ;;  %v11158_v41 = vld [vmem:[#allocation20_spill] sm:$0xff] }
 0x51d   :  { %v673_v16 = vsel %vm657_vm3, %v11158_v41, 0.0 }
 0x51e   :  { %v3826_v28 = vrot.slane %v3818_v0, %v8903_v27  ;;  %v674_v5 = vadd.f32 %v673_v16, %v672_v2  ;;  %v11164_v16 = vld [vmem:[#allocation26_spill] sm:$0xff] }
 0x51f   :  { %v685_v41 = vsel %vm657_vm3, %v11164_v16, 0.0 }
 0x520   :  { %v3833_v44 = vrot.slane %v3826_v28, %v8903_v27  ;;  %v676_v34 = vadd.f32 %v675_v6, %v674_v5  ;;  %v11165_v6 = vld [vmem:[#allocation30_spill] sm:$0xff] }
 0x521   :  { %v687_v10 = vsel %vm657_vm3, %v11165_v6, 0.0 }
 0x522   :  { %3834 = vrot.lane.b32.xlu0 %v3833_v44, %s5913_s17  ;;  %v678_v0 = vadd.f32 %v677_v36, %v676_v34  ;;  %v11162_v44 = vld [vmem:[#allocation28_spill] sm:$0xff] }
 0x523   :  { %v681_v47 = vsel %vm657_vm3, %v11162_v44, 0.0  ;;  %v11166_v36 = vld [vmem:[#allocation36_spill] sm:$0xff] }
 0x524   :  { %v680_v28 = vadd.f32 %v679_v46, %v678_v0  ;;  %v689_v60 = vsel %vm657_vm3, %v11166_v36, 0.0  ;;  %v11167_v46 = vld [vmem:[#allocation40_spill] sm:$0xff] }
 0x525   :  { %v691_v44 = vsel %vm657_vm3, %v11167_v46, 0.0 }
 0x526   :  { %v682_v57 = vadd.f32 %v681_v47, %v680_v28  ;;  %v11168_v47 = vld [vmem:[#allocation34_spill] sm:$0xff] }
 0x527   :  { %v693_v22 = vsel %vm657_vm3, %v11168_v47, 0.0 }
 0x528   :  { %v684_v2 = vadd.f32 %v683_v50, %v682_v57  ;;  %v11169_v50 = vld [vmem:[#allocation38_spill] sm:$0xff] }
 0x529   :  { %v695_v16 = vsel %vm657_vm3, %v11169_v50, 0.0 }
 0x52a   :  { %v686_v5 = vadd.f32 %v685_v41, %v684_v2  ;;  %v11170_v2 = vld [vmem:[#allocation44_spill] sm:$0xff] }
 0x52b   :  { %v697_v6 = vsel %vm657_vm3, %v11170_v2, 0.0 }
 0x52c   :  { %v688_v34 = vadd.f32 %v687_v10, %v686_v5  ;;  %v11171_v5 = vld [vmem:[#allocation48_spill] sm:$0xff] }
 0x52d   :  { %v699_v36 = vsel %vm657_vm3, %v11171_v5, 0.0 }
 0x52e   :  { %v690_v0 = vadd.f32 %v689_v60, %v688_v34  ;;  %v11172_v34 = vld [vmem:[#allocation42_spill] sm:$0xff] }
 0x52f   :  { %v701_v46 = vsel %vm657_vm3, %v11172_v34, 0.0 }
 0x530   :  { %v692_v28 = vadd.f32 %v691_v44, %v690_v0  ;;  %v11173_v0 = vld [vmem:[#allocation46_spill] sm:$0xff] }
 0x531   :  { %v703_v47 = vsel %vm657_vm3, %v11173_v0, 0.0 }
 0x532   :  { %v694_v57 = vadd.f32 %v693_v22, %v692_v28  ;;  %v11174_v28 = vld [vmem:[#allocation52_spill] sm:$0xff] }
 0x533   :  { %v705_v50 = vsel %vm657_vm3, %v11174_v28, 0.0 }
 0x534   :  { %v696_v41 = vadd.f32 %v695_v16, %v694_v57  ;;  %v11175_v57 = vld [vmem:[#allocation56_spill] sm:$0xff] }
 0x535   :  { %v707_v2 = vsel %vm657_vm3, %v11175_v57, 0.0 }
 0x536   :  { %v698_v10 = vadd.f32 %v697_v6, %v696_v41  ;;  %v11176_v41 = vld [vmem:[#allocation50_spill] sm:$0xff] }
 0x537   :  { %v709_v5 = vsel %vm657_vm3, %v11176_v41, 0.0 }
 0x538   :  { %v700_v60 = vadd.f32 %v699_v36, %v698_v10  ;;  %v11177_v10 = vld [vmem:[#allocation54_spill] sm:$0xff] }
 0x539   :  { %v711_v34 = vsel %vm657_vm3, %v11177_v10, 0.0 }
 0x53a   :  { %v702_v44 = vadd.f32 %v701_v46, %v700_v60  ;;  %v11178_v60 = vld [vmem:[#allocation60_spill] sm:$0xff] }
 0x53b   :  { %v713_v0 = vsel %vm657_vm3, %v11178_v60, 0.0 }
 0x53c   :  { %v704_v22 = vadd.f32 %v703_v47, %v702_v44  ;;  %v11179_v44 = vld [vmem:[#allocation64_spill] sm:$0xff] }
 0x53d   :  { %v715_v28 = vsel %vm657_vm3, %v11179_v44, 0.0 }
 0x53e   :  { %v706_v16 = vadd.f32 %v705_v50, %v704_v22  ;;  %v11180_v22 = vld [vmem:[#allocation58_spill] sm:$0xff] }
 0x53f   :  { %v717_v57 = vsel %vm657_vm3, %v11180_v22, 0.0 }
 0x540   :  { %v708_v6 = vadd.f32 %v707_v2, %v706_v16  ;;  %v11181_v16 = vld [vmem:[#allocation62_spill] sm:$0xff] }
 0x541   :  { %v719_v41 = vsel %vm657_vm3, %v11181_v16, 0.0 }
 0x542   :  { %v710_v36 = vadd.f32 %v709_v5, %v708_v6  ;;  %v11182_v6 = vld [vmem:[#allocation5_spill] sm:$0xff] }
 0x543   :  { %v721_v10 = vsel %vm657_vm3, %v11182_v6, 0.0 }
 0x544   :  { %v712_v46 = vadd.f32 %v711_v34, %v710_v36  ;;  %v11183_v36 = vld [vmem:[#allocation9_spill] sm:$0xff] }
 0x545   :  { %v723_v60 = vsel %vm657_vm3, %v11183_v36, 0.0  ;;  %v11187_v36 = vld [vmem:[#allocation17_spill] sm:$0xff] }
 0x546   :  { %v714_v47 = vadd.f32 %v713_v0, %v712_v46  ;;  %v11184_v46 = vld [vmem:[#allocation3_spill] sm:$0xff]  ;;  %v731_v16 = vsel %vm657_vm3, %v11187_v36, 0.0 }
 0x548   :  { %v716_v50 = vadd.f32 %v715_v28, %v714_v47  ;;  %v3809_v28 = vld [vmem:[%s10603_s6] sm:$0x1]  ;;  %v725_v47 = vsel %vm657_vm3, %v11184_v46, 0.0  ;;  %v11188_v46 = vld [vmem:[#allocation11_spill] sm:$0xff] }
 0x54a   :  { %v718_v2 = vadd.f32 %v717_v57, %v716_v50 }
 0x54c   :  { %v720_v5 = vadd.f32 %v719_v41, %v718_v2  ;;  %v11185_v2 = vld [vmem:[#allocation7_spill] sm:$0xff] }
 0x54d   :  { %v727_v6 = vsel %vm657_vm3, %v11185_v2, 0.0  ;;  %v11190_v2 = vld [vmem:[#allocation21_spill] sm:$0xff] }
 0x54e   :  { %v722_v34 = vadd.f32 %v721_v10, %v720_v5  ;;  %v11186_v5 = vld [vmem:[#allocation13_spill] sm:$0xff] }
 0x550   :  { %v724_v0 = vadd.f32 %v723_v60, %v722_v34  ;;  %v729_v60 = vsel %vm657_vm3, %v11186_v5, 0.0 }
 0x552   :  { %v726_v50 = vadd.f32 %v725_v47, %v724_v0  ;;  %v733_v0 = vsel %vm657_vm3, %v11188_v46, 0.0  ;;  %v11189_v47 = vld [vmem:[#allocation15_spill] sm:$0xff] }
 0x554   :  { %v728_v10 = vadd.f32 %v727_v6, %v726_v50  ;;  %v737_v6 = vsel %vm657_vm3, %v11190_v2, 0.0 }
 0x556   :  { %v730_v34 = vadd.f32 %v729_v60, %v728_v10  ;;  %v11192_v60 = vld [vmem:[#allocation19_spill] sm:$0xff] }
 0x557   :  { %v741_v36 = vsel %vm657_vm3, %v11192_v60, 0.0 }
 0x558   :  { %v732_v44 = vadd.f32 %v731_v16, %v730_v34  ;;  %v11193_v34 = vld [vmem:[#allocation23_spill] sm:$0xff] }
 0x559   :  { %v743_v46 = vsel %vm657_vm3, %v11193_v34, 0.0 }
 0x594   :  { %v3835_v57 = vpop.permute.xlu0 %3834 }
 0x595   :  { %v3837_v22 = vsub.f32 %v3809_v28, %v3835_v57  ;;  %v734_v28 = vadd.f32 %v733_v0, %v732_v44  ;;  %v11194_v0 = vld [vmem:[#allocation29_spill] sm:$0xff] }
 0x597   :  { %v3906_v41 = vrot.slane %v3837_v22, %v11149_v54  ;;  %v735_v22 = vsel %vm657_vm3, %v11189_v47, 0.0  ;;  %v745_v47 = vsel %vm657_vm3, %v11194_v0, 0.0 }
 0x598   :  { %v736_v57 = vadd.f32 %v735_v22, %v734_v28  ;;  %v11195_v22 = vld [vmem:[#allocation33_spill] sm:$0xff] }
 0x599   :  { %3907 = vrot.lane.b32.xlu1 %v3906_v41, %s5910_s3  ;;  %v11191_v41 = vld [vmem:[#allocation25_spill] sm:$0xff]  ;;  %v747_v2 = vsel %vm657_vm3, %v11195_v22, 0.0  ;;  %v11205_v22 = vld [vmem:[#allocation47_spill] sm:$0xff] }
 0x59a   :  { %v738_v50 = vadd.f32 %v737_v6, %v736_v57  ;;  %v739_v5 = vsel %vm657_vm3, %v11191_v41, 0.0  ;;  %v11196_v6 = vld [vmem:[#allocation27_spill] sm:$0xff] }
 0x59b   :  { %v749_v41 = vsel %vm657_vm3, %v11196_v6, 0.0 }
 0x59c   :  { %v740_v10 = vadd.f32 %v739_v5, %v738_v50  ;;  %v11197_v50 = vld [vmem:[#allocation31_spill] sm:$0xff] }
 0x59d   :  { %v751_v60 = vsel %vm657_vm3, %v11197_v50, 0.0  ;;  %v11204_v50 = vld [vmem:[#allocation43_spill] sm:$0xff] }
 0x59e   :  { %v742_v16 = vadd.f32 %v741_v36, %v740_v10  ;;  %v11198_v10 = vld [vmem:[#allocation37_spill] sm:$0xff] }
 0x59f   :  { %v753_v34 = vsel %vm657_vm3, %v11198_v10, 0.0  ;;  %v11203_v10 = vld [vmem:[#allocation49_spill] sm:$0xff] }
 0x5a0   :  { %v744_v44 = vadd.f32 %v743_v46, %v742_v16  ;;  %v11199_v16 = vld [vmem:[#allocation41_spill] sm:$0xff] }
 0x5a1   :  { %v755_v0 = vsel %vm657_vm3, %v11199_v16, 0.0  ;;  %v763_v16 = vsel %vm657_vm3, %v11203_v10, 0.0 }
 0x5a2   :  { %v746_v28 = vadd.f32 %v745_v47, %v744_v44  ;;  %v11200_v44 = vld [vmem:[#allocation35_spill] sm:$0xff] }
 0x5a4   :  { %v748_v57 = vadd.f32 %v747_v2, %v746_v28  ;;  %v4006_v2 = vld [vmem:[%s10604_s7] sm:$0xf] }
 0x5a5   :  { %5860 = vmatprep.subr.msk.bf16.mxu0 %vm2600_vm4, %v4006_v2 }
 0x5a6   :  { %v750_v5 = vadd.f32 %v749_v41, %v748_v57  ;;  %v4200_v41 = vsel %vm2600_vm4, %v4006_v2, 0  ;;  %v11201_v57 = vld [vmem:[#allocation39_spill] sm:$0xff]  ;;  %v765_v2 = vsel %vm657_vm3, %v11204_v50, 0.0 }
 0x5a7   :  { %5790 = vmatpush3.bf16.msra.mxu0 %v4200_v41 }
 0x5a8   :  { %v752_v36 = vadd.f32 %v751_v60, %v750_v5  ;;  %v757_v60 = vsel %vm657_vm3, %v11200_v44, 0.0  ;;  %v767_v44 = vsel %vm657_vm3, %v11205_v22, 0.0 }
 0x5aa   :  { %v754_v46 = vadd.f32 %v753_v34, %v752_v36  ;;  %v759_v34 = vsel %vm657_vm3, %v11201_v57, 0.0  ;;  %v11202_v36 = vld [vmem:[#allocation45_spill] sm:$0xff] }
 0x5ac   :  { %v756_v47 = vadd.f32 %v755_v0, %v754_v46  ;;  %v761_v0 = vsel %vm657_vm3, %v11202_v36, 0.0 }
 0x5ae   :  { %v758_v28 = vadd.f32 %v757_v60, %v756_v47  ;;  %v11206_v60 = vld [vmem:[#allocation53_spill] sm:$0xff] }
 0x5af   :  { %v769_v57 = vsel %vm657_vm3, %v11206_v60, 0.0 }
 0x5b0   :  { %v760_v5 = vadd.f32 %v759_v34, %v758_v28  ;;  %v11207_v34 = vld [vmem:[#allocation57_spill] sm:$0xff] }
 0x5b1   :  { %v771_v36 = vsel %vm657_vm3, %v11207_v34, 0.0 }
 0x5b2   :  { %v762_v46 = vadd.f32 %v761_v0, %v760_v5  ;;  %v11208_v0 = vld [vmem:[#allocation51_spill] sm:$0xff] }
 0x5b3   :  { %v773_v10 = vsel %vm657_vm3, %v11208_v0, 0.0 }
 0x5b4   :  { %v764_v6 = vadd.f32 %v763_v16, %v762_v46  ;;  %v11209_v46 = vld [vmem:[#allocation55_spill] sm:$0xff] }
 0x5b5   :  { %v775_v50 = vsel %vm657_vm3, %v11209_v46, 0.0 }
 0x5b6   :  { %v766_v41 = vadd.f32 %v765_v2, %v764_v6  ;;  %v11210_v2 = vld [vmem:[#allocation61_spill] sm:$0xff] }
 0x5b7   :  { %v777_v22 = vsel %vm657_vm3, %v11210_v2, 0.0  ;;  %v11216_v2 = vld [vmem:[#allocation92_spill] sm:$0xff] }
 0x5b8   :  { %v768_v47 = vadd.f32 %v767_v44, %v766_v41  ;;  %v11211_v41 = vld [vmem:[#allocation65_spill] sm:$0xff] }
 0x5b9   :  { %v779_v60 = vsel %vm657_vm3, %v11211_v41, 0.0 }
 0x5ba   :  { %v770_v28 = vadd.f32 %v769_v57, %v768_v47  ;;  %v11212_v47 = vld [vmem:[#allocation59_spill] sm:$0xff] }
 0x5bb   :  { %v781_v34 = vsel %vm657_vm3, %v11212_v47, 0.0 }
 0x5bc   :  { %v772_v5 = vadd.f32 %v771_v36, %v770_v28  ;;  %v11213_v28 = vld [vmem:[#allocation63_spill] sm:$0xff] }
 0x5bd   :  { %v783_v0 = vsel %vm657_vm3, %v11213_v28, 0.0 }
 0x5be   :  { %v774_v16 = vadd.f32 %v773_v10, %v772_v5  ;;  %v11214_v5 = vld [vmem:[#allocation93_spill] sm:$0xff] }
 0x5bf   :  { %v3840_v46 = vmul.f32 %v8921_v63, %v11214_v5 }
 0x5c0   :  { %v776_v6 = vadd.f32 %v775_v50, %v774_v16  ;;  %v11215_v50 = vld [vmem:[#allocation94_spill] sm:$0xff] }
 0x5c1   :  { %v3841_v16 = vmul.f32 %v8921_v63, %v11215_v50 }
 0x5c2   :  { %v778_v44 = vadd.f32 %v777_v22, %v776_v6  ;;  %v3838_v22 = vmul.f32 %v8921_v63, %v11216_v2  ;;  %v11217_v6 = vld [vmem:[#allocation91_spill] sm:$0xff] }
 0x5c4   :  { %v780_v57 = vadd.f32 %v779_v60, %v778_v44  ;;  %v3839_v60 = vmul.f32 %v8921_v63, %v11217_v6 }
 0x5c6   :  { %v782_v36 = vadd.f32 %v781_v34, %v780_v57  ;;  %v3844_v34 = vmul.f32 %v8921_v63, %v8206_v30  ;;  %v3842_v57 = vmul.f32 %v8921_v63, %v8178_v40 }
 0x5c8   :  { %v784_v10 = vadd.f32 %v783_v0, %v782_v36  ;;  %v3845_v0 = vmul.f32 %v8921_v63, %v8217_v55  ;;  %v11218_v36 = vld [vmem:[#allocation95_spill] sm:$0xff] }
 0x5c9   :  { %v3843_v5 = vmul.f32 %v8921_v63, %v11218_v36 }
 0x5ca   :  { %v785_v28 = vrot.slane %v784_v10, 4 }
 0x60b   :  { %v9065_v44 = vpop.permute.xlu1 %3907 }
 0x60c   :  { %v3912_v50 = vadd.f32 %v9065_v44, %v3840_v46  ;;  %v3913_v2 = vadd.f32 %v9065_v44, %v3841_v16  ;;  %v3910_v6 = vadd.f32 %v9065_v44, %v3838_v22  ;;  %v3911_v47 = vadd.f32 %v9065_v44, %v3839_v60  ;;  %v11219_v60 = vld [vmem:[#allocation96_spill] sm:$0xff] }
 0x60d   :  { %v3916_v30 = vadd.f32 %v9065_v44, %v3844_v34  ;;  %v3917_v41 = vadd.f32 %v9065_v44, %v3845_v0  ;;  %v3914_v40 = vadd.f32 %v9065_v44, %v3842_v57  ;;  %v3915_v59 = vadd.f32 %v9065_v44, %v3843_v5  ;;  %v11220_v0 = vld [vmem:[#allocation68_spill] sm:$0xff] }
 0x60e   :  { %v3975_v55 = vpack.c.bf16 %v3913_v2, %v3912_v50  ;;  %v3974_v51 = vpack.c.bf16 %v3911_v47, %v3910_v6  ;;  %v3848_v46 = vmul.f32 %v8921_v63, %v8276_v52  ;;  %v3849_v16 = vmul.f32 %v8921_v63, %v8287_v1 }
 0x60f   :  { %v3846_v22 = vmul.f32 %v8921_v63, %v8248_v58  ;;  %v3847_v47 = vmul.f32 %v8921_v63, %v11219_v60  ;;  %v786_v34 = vadd.f32 %v785_v28, %v784_v10  ;;  %v983_v57 = vrot.slane %v11220_v0, 4  ;;  %v11221_v10 = vld [vmem:[#allocation97_spill] sm:$0xff] }
 0x610   :  { %4041 = vrot.lane.b32.xlu1 %v3975_v55, %s5913_s17  ;;  %4039 = vrot.lane.b32.xlu0 %v3974_v51, %s5913_s17  ;;  %v3920_v36 = vadd.f32 %v9065_v44, %v3848_v46  ;;  %v3921_v52 = vadd.f32 %v9065_v44, %v3849_v16  ;;  %v3977_v5 = vpack.c.bf16 %v3917_v41, %v3916_v30  ;;  %v11222_v16 = vld [vmem:[#allocation100_spill] sm:$0xff] }
 0x611   :  { %v3976_v50 = vpack.c.bf16 %v3915_v59, %v3914_v40  ;;  %v3918_v1 = vadd.f32 %v9065_v44, %v3846_v22  ;;  %v3919_v2 = vadd.f32 %v9065_v44, %v3847_v47  ;;  %v3852_v51 = vmul.f32 %v8921_v63, %v8344_v20  ;;  %v11224_v47 = vld [vmem:[#allocation98_spill] sm:$0xff] }
 0x612   :  { %v3853_v58 = vmul.f32 %v8921_v63, %v8355_v61  ;;  %v3850_v28 = vmul.f32 %v8921_v63, %v8318_v29  ;;  %v3851_v59 = vmul.f32 %v8921_v63, %v11221_v10  ;;  %v787_v41 = vrot.slane %v786_v34, 2  ;;  %v11223_v29 = vld [vmem:[#allocation101_spill] sm:$0xff]  ;;  %v11226_v10 = vld [vmem:[#allocation104_spill] sm:$0xff] }
 0x613   :  { %v984_v6 = vadd.f32 %v983_v57, %v11220_v0  ;;  %v3924_v30 = vadd.f32 %v9065_v44, %v3852_v51  ;;  %v3979_v55 = vpack.c.bf16 %v3921_v52, %v3920_v36  ;;  %v3978_v40 = vpack.c.bf16 %v3919_v2, %v3918_v1  ;;  %v11225_v57 = vld [vmem:[#allocation99_spill] sm:$0xff] }
 0x614   :  { %4045 = vrot.lane.b32.xlu1 %v3977_v5, %s5913_s17  ;;  %4043 = vrot.lane.b32.xlu0 %v3976_v50, %s5913_s17  ;;  %v3925_v20 = vadd.f32 %v9065_v44, %v3853_v58  ;;  %v3922_v61 = vadd.f32 %v9065_v44, %v3850_v28  ;;  %v3923_v46 = vadd.f32 %v9065_v44, %v3851_v59 }
 0x615   :  { %v3856_v22 = vmul.f32 %v8921_v63, %v11222_v16  ;;  %v3857_v60 = vmul.f32 %v8921_v63, %v11223_v29  ;;  %v3854_v0 = vmul.f32 %v8921_v63, %v11224_v47  ;;  %v3855_v36 = vmul.f32 %v8921_v63, %v11225_v57  ;;  %v11230_v57 = vld [vmem:[#allocation69_spill] sm:$0xff] }
 0x616   :  { %v788_v52 = vadd.f32 %v787_v41, %v786_v34  ;;  %v985_v5 = vrot.slane %v984_v6, 2  ;;  %v3981_v50 = vpack.c.bf16 %v3925_v20, %v3924_v30  ;;  %v3980_v2 = vpack.c.bf16 %v3923_v46, %v3922_v61  ;;  %v11228_v34 = vld [vmem:[#allocation102_spill] sm:$0xff]  ;;  %v11229_v30 = vld [vmem:[#allocation103_spill] sm:$0xff] }
 0x617   :  { %v3928_v1 = vadd.f32 %v9065_v44, %v3856_v22  ;;  %v3929_v51 = vadd.f32 %v9065_v44, %v3857_v60  ;;  %v3926_v58 = vadd.f32 %v9065_v44, %v3854_v0  ;;  %v3927_v28 = vadd.f32 %v9065_v44, %v3855_v36 }
 0x618   :  { %4049 = vrot.lane.b32.xlu1 %v3979_v55, %s5913_s17  ;;  %4047 = vrot.lane.b32.xlu0 %v3978_v40, %s5913_s17  ;;  %v3860_v59 = vmul.f32 %v8921_v63, %v11226_v10  ;;  %v11227_v55 = vld [vmem:[#allocation105_spill] sm:$0xff]  ;;  %v3858_v41 = vmul.f32 %v8921_v63, %v11228_v34  ;;  %v3859_v20 = vmul.f32 %v8921_v63, %v11229_v30  ;;  %v789_v61 = vrot.slane %v788_v52, 1  ;;  %v11233_v10 = vld [vmem:[#allocation71_spill] sm:$0xff]  ;;  %v11234_v30 = vld [vmem:[#allocation72_spill] sm:$0xff] }
 0x619   :  { %v3861_v40 = vmul.f32 %v8921_v63, %v11227_v55  ;;  %v986_v46 = vadd.f32 %v985_v5, %v984_v6  ;;  %v3983_v29 = vpack.c.bf16 %v3929_v51, %v3928_v1  ;;  %v3982_v60 = vpack.c.bf16 %v3927_v28, %v3926_v58  ;;  %v11232_v5 = vld [vmem:[#allocation106_spill] sm:$0xff] }
 0x61a   :  { %v3932_v16 = vadd.f32 %v9065_v44, %v3860_v59  ;;  %v3930_v47 = vadd.f32 %v9065_v44, %v3858_v41  ;;  %v3931_v0 = vadd.f32 %v9065_v44, %v3859_v20  ;;  %v3864_v36 = vmul.f32 %v8921_v63, %v11230_v57 }
 0x61b   :  { %v3933_v22 = vadd.f32 %v9065_v44, %v3861_v40  ;;  %v3863_v1 = vmul.f32 %v8921_v63, %v11233_v10  ;;  %v790_v51 = vadd.f32 %v789_v61, %v788_v52  ;;  %v987_v58 = vrot.slane %v986_v46, 1  ;;  %v11236_v52 = vld [vmem:[#allocation73_spill] sm:$0xff] }
 0x61c   :  { %4053 = vrot.lane.b32.xlu1 %v3981_v50, %s5913_s17  ;;  %4051 = vrot.lane.b32.xlu0 %v3980_v2, %s5913_s17  ;;  %v11231_v50 = vld [vmem:[#allocation70_spill] sm:$0xff]  ;;  %v3862_v2 = vmul.f32 %v8921_v63, %v11232_v5  ;;  %v3936_v59 = vadd.f32 %v9065_v44, %v3864_v36  ;;  %v3984_v55 = vpack.c.bf16 %v3931_v0, %v3930_v47  ;;  %v11238_v10 = vld [vmem:[#allocation77_spill] sm:$0xff] }
 0x61d   :  { %v3865_v6 = vmul.f32 %v8921_v63, %v11231_v50  ;;  %v3985_v28 = vpack.c.bf16 %v3933_v22, %v3932_v16  ;;  %v3935_v41 = vadd.f32 %v9065_v44, %v3863_v1  ;;  %v3868_v20 = vmul.f32 %v8921_v63, %v11234_v30  ;;  %v11237_v16 = vld [vmem:[#allocation75_spill] sm:$0xff] }
 0x61e   :  { %v3934_v34 = vadd.f32 %v9065_v44, %v3862_v2  ;;  %v3866_v61 = vmul.f32 %v8921_v63, %v11236_v52  ;;  %v3867_v22 = vmul.f32 %v8921_v63, %v11237_v16  ;;  %v9165_v47 = vmul.f32 0.001953125, %v790_v51 }
 0x61f   :  { %v3937_v40 = vadd.f32 %v9065_v44, %v3865_v6  ;;  %v988_v0 = vadd.f32 %v987_v58, %v986_v46  ;;  %v3940_v57 = vadd.f32 %v9065_v44, %v3868_v20  ;;  %v3872_v1 = vmul.f32 %v8921_v63, %v11238_v10  ;;  %v11240_v46 = vld [vmem:[#allocation74_spill] sm:$0xff]  ;;  %v11241_v58 = vld [vmem:[#allocation79_spill] sm:$0xff] }
 0x620   :  { %4057 = vrot.lane.b32.xlu1 %v3983_v29, %s5913_s17  ;;  %4055 = vrot.lane.b32.xlu0 %v3982_v60, %s5913_s17  ;;  %v11235_v29 = vld [vmem:[#allocation78_spill] sm:$0xff]  ;;  %v3986_v6 = vpack.c.bf16 %v3935_v41, %v3934_v34  ;;  %v3938_v5 = vadd.f32 %v9065_v44, %v3866_v61  ;;  %v3939_v2 = vadd.f32 %v9065_v44, %v3867_v22  ;;  %v11242_v22 = vld [vmem:[#allocation76_spill] sm:$0xff] }
 0x621   :  { %v3869_v60 = vmul.f32 %v8921_v63, %v11235_v29  ;;  %v3987_v50 = vpack.c.bf16 %v3937_v40, %v3936_v59  ;;  %v3870_v51 = vmul.f32 %v8921_v63, %v11240_v46  ;;  %v3871_v59 = vmul.f32 %v8921_v63, %v11241_v58 }
 0x622   :  { %v989_v40 = vmul.f32 0.001953125, %v988_v0  ;;  %v990_v34 = vmul.f32 %v9165_v47, %v9165_v47  ;;  %v3944_v41 = vadd.f32 %v9065_v44, %v3872_v1  ;;  %v3988_v29 = vpack.c.bf16 %v3939_v2, %v3938_v5 }
 0x623   :  { %v3941_v36 = vadd.f32 %v9065_v44, %v3869_v60  ;;  %v3942_v60 = vadd.f32 %v9065_v44, %v3870_v51  ;;  %v3943_v52 = vadd.f32 %v9065_v44, %v3871_v59  ;;  %v3876_v61 = vmul.f32 %v8921_v63, %v8675_v24 }
 0x624   :  { %4061 = vrot.lane.b32.xlu1 %v3985_v28, %s5913_s17  ;;  %4059 = vrot.lane.b32.xlu0 %v3984_v55, %s5913_s17  ;;  %v11239_v28 = vld [vmem:[#allocation81_spill] sm:$0xff]  ;;  %v3877_v16 = vmul.f32 %v8921_v63, %v8680_v21  ;;  %v3874_v0 = vmul.f32 %v8921_v63, %v11242_v22  ;;  %v3880_v21 = vmul.f32 %v8921_v63, %v8713_v9 }
 0x625   :  { %v3873_v55 = vmul.f32 %v8921_v63, %v11239_v28  ;;  %v3989_v20 = vpack.c.bf16 %v3941_v36, %v3940_v57  ;;  %v991_v36 = vsub.f32 %v989_v40, %v990_v34  ;;  %v3948_v5 = vadd.f32 %v9065_v44, %v3876_v61 }
 0x626   :  { %v3990_v2 = vpack.c.bf16 %v3943_v52, %v3942_v60  ;;  %v3949_v24 = vadd.f32 %v9065_v44, %v3877_v16  ;;  %v3946_v10 = vadd.f32 %v9065_v44, %v3874_v0  ;;  %v3881_v28 = vmul.f32 %v8921_v63, %v8718_v45 }
 0x627   :  { %v3945_v30 = vadd.f32 %v9065_v44, %v3873_v55  ;;  %v3878_v55 = vmul.f32 %v8921_v63, %v8699_v37  ;;  %v3879_v46 = vmul.f32 %v8921_v63, %v8711_v25  ;;  %v3952_v51 = vadd.f32 %v9065_v44, %v3880_v21 }
 0x628   :  { %4065 = vrot.lane.b32.xlu1 %v3987_v50, %s5913_s17  ;;  %4063 = vrot.lane.b32.xlu0 %v3986_v6, %s5913_s17  ;;  %v11243_v50 = vld [vmem:[#allocation80_spill] sm:$0xff]  ;;  %v3953_v58 = vadd.f32 %v9065_v44, %v3881_v28  ;;  %v992_v59 = vmax.f32 %v991_v36, 0.0  ;;  %v3993_v40 = vpack.c.bf16 %v3949_v24, %v3948_v5  ;;  %v3885_v37 = vmul.f32 %v8921_v63, %v8753_v33 }
 0x629   :  { %v3875_v57 = vmul.f32 %v8921_v63, %v11243_v50  ;;  %v3991_v6 = vpack.c.bf16 %v3945_v30, %v3944_v41  ;;  %v3950_v34 = vadd.f32 %v9065_v44, %v3878_v55  ;;  %v3951_v45 = vadd.f32 %v9065_v44, %v3879_v46 }
 0x62a   :  { %v3884_v41 = vmul.f32 %v8921_v63, %v8748_v39  ;;  %v3882_v25 = vmul.f32 %v8921_v63, %v8735_v23  ;;  %v3883_v30 = vmul.f32 %v8921_v63, %v8746_v31  ;;  %v994_v60 = vadd.f32 1e-05, %v992_v59 }
 0x62b   :  { %v3947_v1 = vadd.f32 %v9065_v44, %v3875_v57  ;;  %v3994_v52 = vpack.c.bf16 %v3951_v45, %v3950_v34  ;;  %v3957_v39 = vadd.f32 %v9065_v44, %v3885_v37  ;;  %v3888_v33 = vmul.f32 %v8921_v63, %v8781_v15 }
 0x62c   :  { %4069 = vrot.lane.b32.xlu1 %v3989_v20, %s5913_s17  ;;  %4067 = vrot.lane.b32.xlu0 %v3988_v29, %s5913_s17  ;;  %v3995_v20 = vpack.c.bf16 %v3953_v58, %v3952_v51  ;;  %v3956_v29 = vadd.f32 %v9065_v44, %v3884_v41  ;;  %v3954_v61 = vadd.f32 %v9065_v44, %v3882_v25  ;;  %5906 = vrsqrt.f32 %v994_v60 }
 0x62d   :  { %v3992_v9 = vpack.c.bf16 %v3947_v1, %v3946_v10  ;;  %v3955_v16 = vadd.f32 %v9065_v44, %v3883_v30  ;;  %v3889_v23 = vmul.f32 %v8921_v63, %v8791_v35  ;;  %v3886_v31 = vmul.f32 %v8921_v63, %v8769_v13 }
 0x62e   :  { %v3887_v22 = vmul.f32 %v8921_v63, %v8779_v26  ;;  %v3960_v0 = vadd.f32 %v9065_v44, %v3888_v33  ;;  %v3997_v57 = vpack.c.bf16 %v3957_v39, %v3956_v29  ;;  %v3893_v13 = vmul.f32 %v8921_v63, %v8832_v7 }
 0x62f   :  { %v3961_v50 = vadd.f32 %v9065_v44, %v3889_v23  ;;  %v3996_v15 = vpack.c.bf16 %v3955_v16, %v3954_v61  ;;  %v3958_v36 = vadd.f32 %v9065_v44, %v3886_v31  ;;  %v3890_v26 = vmul.f32 %v8921_v63, %v8801_v19 }
 0x630   :  { %4073 = vrot.lane.b32.xlu1 %v3991_v6, %s5913_s17  ;;  %4071 = vrot.lane.b32.xlu0 %v3990_v2, %s5913_s17  ;;  %v3959_v35 = vadd.f32 %v9065_v44, %v3887_v22  ;;  %v3892_v6 = vmul.f32 %v8921_v63, %v8813_v4  ;;  %v3891_v5 = vmul.f32 %v8921_v63, %v8811_v56 }
 0x631   :  { %v3965_v24 = vadd.f32 %v9065_v44, %v3893_v13  ;;  %v3999_v10 = vpack.c.bf16 %v3961_v50, %v3960_v0  ;;  %v3962_v4 = vadd.f32 %v9065_v44, %v3890_v26  ;;  %v3896_v21 = vmul.f32 %v8921_v63, %v8851_v14 }
 0x632   :  { %v3964_v2 = vadd.f32 %v9065_v44, %v3892_v6  ;;  %v3998_v1 = vpack.c.bf16 %v3959_v35, %v3958_v36  ;;  %v3963_v7 = vadd.f32 %v9065_v44, %v3891_v5  ;;  %v3897_v19 = vmul.f32 %v8921_v63, %v8864_v11 }
 0x633   :  { %v3894_v56 = vmul.f32 %v8921_v63, %v8829_v18  ;;  %v3895_v28 = vmul.f32 %v8921_v63, %v8841_v42  ;;  %v3968_v46 = vadd.f32 %v9065_v44, %v3896_v21  ;;  %v3901_v11 = vmul.f32 %v8921_v63, %v8894_v17 }
 0x634   :  { %4077 = vrot.lane.b32.xlu1 %v3993_v40, %s5913_s17  ;;  %4075 = vrot.lane.b32.xlu0 %v3992_v9, %s5913_s17  ;;  %v4001_v55 = vpack.c.bf16 %v3965_v24, %v3964_v2  ;;  %v4000_v51 = vpack.c.bf16 %v3963_v7, %v3962_v4  ;;  %v3969_v58 = vadd.f32 %v9065_v44, %v3897_v19  ;;  %v993_v24 = vld [vmem:[%s10605_s10] sm:$0x1] }
 0x635   :  { %v3966_v14 = vadd.f32 %v9065_v44, %v3894_v56  ;;  %v3967_v59 = vadd.f32 %v9065_v44, %v3895_v28  ;;  %v3900_v40 = vmul.f32 %v8921_v63, %v8878_v43  ;;  %v3898_v18 = vmul.f32 %v8921_v63, %v8853_v48 }
 0x636   :  { %v3899_v42 = vmul.f32 %v8921_v63, %v8880_v12  ;;  %v3973_v34 = vadd.f32 %v9065_v44, %v3901_v11  ;;  %v4003_v41 = vpack.c.bf16 %v3969_v58, %v3968_v46 }
 0x637   :  { %v3972_v9 = vadd.f32 %v9065_v44, %v3900_v40  ;;  %v4002_v43 = vpack.c.bf16 %v3967_v59, %v3966_v14  ;;  %v3970_v37 = vadd.f32 %v9065_v44, %v3898_v18 }
 0x638   :  { %4081 = vrot.lane.b32.xlu1 %v3995_v20, %s5913_s17  ;;  %4079 = vrot.lane.b32.xlu0 %v3994_v52, %s5913_s17  ;;  %v3971_v17 = vadd.f32 %v9065_v44, %v3899_v42 }
 0x639   :  { %v5907_v45 = vpop.eup %5906  ;;  %v4005_v25 = vpack.c.bf16 %v3973_v34, %v3972_v9 }
 0x63a   :  { %v4004_v48 = vpack.c.bf16 %v3971_v17, %v3970_v37  ;;  %v1003_v30 = vrot.slane %v5907_v45, %v8903_v27 }
 0x63c   :  { %4085 = vrot.lane.b32.xlu1 %v3997_v57, %s5913_s17  ;;  %4083 = vrot.lane.b32.xlu0 %v3996_v15, %s5913_s17  ;;  %v1010_v12 = vrot.slane %v1003_v30, %v8903_v27 }
 0x640   :  { %4089 = vrot.lane.b32.xlu1 %v3999_v10, %s5913_s17  ;;  %4087 = vrot.lane.b32.xlu0 %v3998_v1, %s5913_s17 }
 0x644   :  { %4093 = vrot.lane.b32.xlu1 %v4001_v55, %s5913_s17  ;;  %4091 = vrot.lane.b32.xlu0 %v4000_v51, %s5913_s17 }
 0x648   :  { %4097 = vrot.lane.b32.xlu1 %v4003_v41, %s5913_s17  ;;  %4095 = vrot.lane.b32.xlu0 %v4002_v43, %s5913_s17 }
 0x64c   :  { %4101 = vrot.lane.b32.xlu1 %v4005_v25, %s5913_s17  ;;  %4099 = vrot.lane.b32.xlu0 %v4004_v48, %s5913_s17 }
 0x650   :  { %1011 = vrot.lane.b32.xlu0 %v1010_v12, %s5913_s17 }
 0x682   :  { %v4042_v63 = vpop.permute.xlu1 %4041  ;;  %v4040_v20 = vpop.permute.xlu0 %4039 }
 0x683   :  { %5791 = vmatprep.mubr.msk.bf16.mxu0 %vm1180_vm2, %v4040_v20 }
 0x684   :  { %5792 = vmatmul.mubr.msk.bf16.vlgmr.msra.gmra.mxu0 %vm1180_vm2, %v4042_v63 }
 0x686   :  { %v4044_v44 = vpop.permute.xlu0 %4043  ;;  %v4046_v60 = vpop.permute.xlu1 %4045 }
 0x687   :  { %5795 = vmatprep.mubr.msk.bf16.mxu0 %vm1180_vm2, %v4044_v44 }
 0x68a   :  { %v4048_v29 = vpop.permute.xlu0 %4047  ;;  %v4050_v61 = vpop.permute.xlu1 %4049 }
 0x68c   :  { %5796 = vmatmul.mubr.msk.bf16.gmra.mxu0 %vm1180_vm2, %v4046_v60 }
 0x68d   :  { %5799 = vmatprep.mubr.msk.bf16.mxu0 %vm1180_vm2, %v4048_v29 }
 0x68e   :  { %v4052_v52 = vpop.permute.xlu0 %4051  ;;  %v4054_v23 = vpop.permute.xlu1 %4053 }
 0x692   :  { %v4056_v39 = vpop.permute.xlu0 %4055  ;;  %v4058_v0 = vpop.permute.xlu1 %4057 }
 0x694   :  { %5800 = vmatmul.mubr.msk.bf16.gmra.mxu0 %vm1180_vm2, %v4050_v61 }
 0x695   :  { %5803 = vmatprep.mubr.msk.bf16.mxu0 %vm1180_vm2, %v4052_v52 }
 0x696   :  { %v4060_v16 = vpop.permute.xlu0 %4059  ;;  %v4062_v15 = vpop.permute.xlu1 %4061 }
 0x69a   :  { %v4064_v33 = vpop.permute.xlu0 %4063  ;;  %v4066_v6 = vpop.permute.xlu1 %4065 }
 0x69c   :  { %5804 = vmatmul.mubr.msk.bf16.gmra.mxu0 %vm1180_vm2, %v4054_v23 }
 0x69d   :  { %5807 = vmatprep.mubr.msk.bf16.mxu0 %vm1180_vm2, %v4056_v39 }
 0x69e   :  { %v4068_v31 = vpop.permute.xlu0 %4067  ;;  %v4070_v5 = vpop.permute.xlu1 %4069 }
 0x6a2   :  { %v4072_v22 = vpop.permute.xlu0 %4071  ;;  %v4074_v1 = vpop.permute.xlu1 %4073 }
 0x6a4   :  { %5808 = vmatmul.mubr.msk.bf16.gmra.mxu0 %vm1180_vm2, %v4058_v0 }
 0x6a5   :  { %5811 = vmatprep.mubr.msk.bf16.mxu0 %vm1180_vm2, %v4060_v16 }
 0x6a6   :  { %v4076_v50 = vpop.permute.xlu0 %4075  ;;  %v4078_v21 = vpop.permute.xlu1 %4077 }
 0x6aa   :  { %v4080_v57 = vpop.permute.xlu0 %4079  ;;  %v4082_v19 = vpop.permute.xlu1 %4081 }
 0x6ac   :  { %5812 = vmatmul.mubr.msk.bf16.gmra.mxu0 %vm1180_vm2, %v4062_v15 }
 0x6ad   :  { %5815 = vmatprep.mubr.msk.bf16.mxu0 %vm1180_vm2, %v4064_v33 }
 0x6ae   :  { %v4084_v36 = vpop.permute.xlu0 %4083  ;;  %v4086_v56 = vpop.permute.xlu1 %4085 }
 0x6b2   :  { %v4088_v35 = vpop.permute.xlu0 %4087  ;;  %v4090_v28 = vpop.permute.xlu1 %4089 }
 0x6b4   :  { %5816 = vmatmul.mubr.msk.bf16.gmra.mxu0 %vm1180_vm2, %v4066_v6 }
 0x6b5   :  { %5819 = vmatprep.mubr.msk.bf16.mxu0 %vm1180_vm2, %v4068_v31 }
 0x6b6   :  { %v4092_v13 = vpop.permute.xlu0 %4091  ;;  %v4094_v55 = vpop.permute.xlu1 %4093 }
 0x6ba   :  { %v4096_v26 = vpop.permute.xlu0 %4095  ;;  %v4098_v46 = vpop.permute.xlu1 %4097 }
 0x6bc   :  { %5820 = vmatmul.mubr.msk.bf16.gmra.mxu0 %vm1180_vm2, %v4070_v5 }
 0x6bd   :  { %5823 = vmatprep.mubr.msk.bf16.mxu0 %vm1180_vm2, %v4072_v22 }
 0x6be   :  { %v4100_v2 = vpop.permute.xlu0 %4099  ;;  %v4102_v51 = vpop.permute.xlu1 %4101 }
 0x6c2   :  { %v1012_v10 = vpop.permute.xlu0 %1011 }
 0x6c3   :  { %v1014_v4 = vmul.f32 %v1012_v10, %v993_v24 }
 0x6c4   :  { %5824 = vmatmul.mubr.msk.bf16.gmra.mxu0 %vm1180_vm2, %v4074_v1 }
 0x6c5   :  { %v1020_v7 = vrot.slane %v1014_v4, %v11149_v54  ;;  %5827 = vmatprep.mubr.msk.bf16.mxu0 %vm1180_vm2, %v4076_v50 }
 0x6c7   :  { %1021 = vrot.lane.b32.xlu1 %v1020_v7, %s5910_s3 }
 0x6cc   :  { %5828 = vmatmul.mubr.msk.bf16.gmra.mxu0 %vm1180_vm2, %v4078_v21 }
 0x6cd   :  { %5831 = vmatprep.mubr.msk.bf16.mxu0 %vm1180_vm2, %v4080_v57 }
 0x6d4   :  { %5832 = vmatmul.mubr.msk.bf16.gmra.mxu0 %vm1180_vm2, %v4082_v19 }
 0x6d5   :  { %5835 = vmatprep.mubr.msk.bf16.mxu0 %vm1180_vm2, %v4084_v36 }
 0x6dc   :  { %5836 = vmatmul.mubr.msk.bf16.gmra.mxu0 %vm1180_vm2, %v4086_v56 }
 0x6dd   :  { %5839 = vmatprep.mubr.msk.bf16.mxu0 %vm1180_vm2, %v4088_v35 }
 0x6e4   :  { %5840 = vmatmul.mubr.msk.bf16.gmra.mxu0 %vm1180_vm2, %v4090_v28 }
 0x6e5   :  { %5843 = vmatprep.mubr.msk.bf16.mxu0 %vm1180_vm2, %v4092_v13 }
 0x6ec   :  { %5844 = vmatmul.mubr.msk.bf16.gmra.mxu0 %vm1180_vm2, %v4094_v55 }
 0x6ed   :  { %5847 = vmatprep.mubr.msk.bf16.mxu0 %vm1180_vm2, %v4096_v26 }
 0x6f4   :  { %5848 = vmatmul.mubr.msk.bf16.gmra.mxu0 %vm1180_vm2, %v4098_v46 }
 0x6f5   :  { %5851 = vmatprep.mubr.msk.bf16.mxu0 %vm1180_vm2, %v4100_v2 }
 0x6fc   :  { %5852 = vmatmul.mubr.msk.bf16.gmra.mxu0 %vm1180_vm2, %v4102_v51 }
 0x739   :  { %v9329_v58 = vpop.permute.xlu1 %1021 }
 0x73a   :  { %v1024_v14 = vmul.f32 %v9329_v58, %v9165_v47 }
 0x73c   :  { %v1032_v59 = vrot.slane %v1024_v14, %v8903_v27 }
 0x73e   :  { %v1039_v40 = vrot.slane %v1032_v59, %v8903_v27 }
 0x740   :  { %1040 = vrot.lane.b32.xlu0 %v1039_v40, %s5913_s17 }
 0x744   :  { %v9336_v11 = vpop.f32.mrf.mxu0 }
 0x745   :  { %11244 = vst [vmem:[#allocation83_spill] sm:$0xff] %v9336_v11  ;;  %v4627_v47 = vmul.f32 %v9336_v11, %v9336_v11  ;;  %v4494_v17 = vsel %vm1180_vm2, %v9336_v11, 0.0 }
 0x746   :  { %v9338_v18 = vpop.f32.mrf.mxu0 }
 0x747   :  { %11245 = vst [vmem:[#allocation85_spill] sm:$0xff] %v9338_v18  ;;  %v4625_v9 = vmul.f32 %v9338_v18, %v9338_v18  ;;  %v4491_v45 = vsel %vm1180_vm2, %v9338_v18, 0.0  ;;  %v4692_v44 = vsel %vm1180_vm2, %v4627_v47, 0.0 }
 0x748   :  { %v9340_v42 = vpop.f32.mrf.mxu0 }
 0x749   :  { %11246 = vst [vmem:[#allocation82_spill] sm:$0xff] %v9340_v42  ;;  %v4689_v25 = vsel %vm1180_vm2, %v4625_v9, 0.0  ;;  %v4628_v48 = vmul.f32 %v9340_v42, %v9340_v42  ;;  %v4496_v29 = vsel %vm1180_vm2, %v9340_v42, 0.0 }
 0x74a   :  { %v9344_v34 = vpop.f32.mrf.mxu0 }
 0x74b   :  { %11247 = vst [vmem:[#allocation84_spill] sm:$0xff] %v9344_v34  ;;  %v4492_v27 = vsel %vm1180_vm2, %v9344_v34, 0.0  ;;  %v4626_v41 = vmul.f32 %v9344_v34, %v9344_v34  ;;  %v4694_v16 = vsel %vm1180_vm2, %v4628_v48, 0.0 }
 0x74c   :  { %v4493_v43 = vadd.f32 %v4492_v27, %v4491_v45  ;;  %v9354_v37 = vpop.f32.mrf.mxu0 }
 0x74d   :  { %11248 = vst [vmem:[#allocation87_spill] sm:$0xff] %v9354_v37  ;;  %v4690_v30 = vsel %vm1180_vm2, %v4626_v41, 0.0  ;;  %v4631_v0 = vmul.f32 %v9354_v37, %v9354_v37  ;;  %v4502_v13 = vsel %vm1180_vm2, %v9354_v37, 0.0 }
 0x74e   :  { %v4495_v12 = vadd.f32 %v4494_v17, %v4493_v43  ;;  %v4691_v63 = vadd.f32 %v4690_v30, %v4689_v25  ;;  %v9362_v20 = vpop.f32.mrf.mxu0 }
 0x74f   :  { %11249 = vst [vmem:[#allocation89_spill] sm:$0xff] %v9362_v20  ;;  %v4629_v60 = vmul.f32 %v9362_v20, %v9362_v20  ;;  %v4498_v33 = vsel %vm1180_vm2, %v9362_v20, 0.0  ;;  %v4700_v1 = vsel %vm1180_vm2, %v4631_v0, 0.0 }
 0x750   :  { %v4497_v52 = vadd.f32 %v4496_v29, %v4495_v12  ;;  %v4693_v39 = vadd.f32 %v4692_v44, %v4691_v63  ;;  %v9369_v61 = vpop.f32.mrf.mxu0 }
 0x751   :  { %11250 = vst [vmem:[#allocation86_spill] sm:$0xff] %v9369_v61  ;;  %v4696_v50 = vsel %vm1180_vm2, %v4629_v60, 0.0  ;;  %v4632_v26 = vmul.f32 %v9369_v61, %v9369_v61  ;;  %v4504_v4 = vsel %vm1180_vm2, %v9369_v61, 0.0 }
 0x752   :  { %v4695_v23 = vadd.f32 %v4694_v16, %v4693_v39  ;;  %v4499_v31 = vadd.f32 %v4498_v33, %v4497_v52  ;;  %v9374_v22 = vpop.f32.mrf.mxu0 }
 0x753   :  { %11251 = vst [vmem:[#allocation88_spill] sm:$0xff] %v9374_v22  ;;  %v4500_v57 = vsel %vm1180_vm2, %v9374_v22, 0.0  ;;  %v4630_v15 = vmul.f32 %v9374_v22, %v9374_v22  ;;  %v4702_v28 = vsel %vm1180_vm2, %v4632_v26, 0.0 }
 0x754   :  { %v4697_v36 = vadd.f32 %v4696_v50, %v4695_v23  ;;  %v4501_v35 = vadd.f32 %v4500_v57, %v4499_v31  ;;  %v9383_v6 = vpop.f32.mrf.mxu0 }
 0x755   :  { %11252 = vst [vmem:[#allocation90_spill] sm:$0xff] %v9383_v6  ;;  %v4698_v5 = vsel %vm1180_vm2, %v4630_v15, 0.0  ;;  %v4635_v59 = vmul.f32 %v9383_v6, %v9383_v6  ;;  %v4510_v43 = vsel %vm1180_vm2, %v9383_v6, 0.0 }
 0x756   :  { %v4503_v2 = vadd.f32 %v4502_v13, %v4501_v35  ;;  %v4699_v24 = vadd.f32 %v4698_v5, %v4697_v36  ;;  %v9390_v10 = vpop.f32.mrf.mxu0 }
 0x757   :  { %11253 = vst [vmem:[#allocation66_spill] sm:$0xff] %v9390_v10  ;;  %v4633_v7 = vmul.f32 %v9390_v10, %v9390_v10  ;;  %v4506_v55 = vsel %vm1180_vm2, %v9390_v10, 0.0  ;;  %v4708_v63 = vsel %vm1180_vm2, %v4635_v59, 0.0 }
 0x758   :  { %v4505_v21 = vadd.f32 %v4504_v4, %v4503_v2  ;;  %v4701_v19 = vadd.f32 %v4700_v1, %v4699_v24  ;;  %v9397_v56 = vpop.f32.mrf.mxu0 }
 0x759   :  { %11254 = vst [vmem:[#allocation67_spill] sm:$0xff] %v9397_v56  ;;  %v4704_v40 = vsel %vm1180_vm2, %v4633_v7, 0.0  ;;  %v4636_v17 = vmul.f32 %v9397_v56, %v9397_v56  ;;  %v4512_v44 = vsel %vm1180_vm2, %v9397_v56, 0.0 }
 0x75a   :  { %v4703_v46 = vadd.f32 %v4702_v28, %v4701_v19  ;;  %v4507_v51 = vadd.f32 %v4506_v55, %v4505_v21  ;;  %v9402_v14 = vpop.f32.mrf.mxu0 }
 0x75b   :  { %11255 = vst [vmem:[#allocation8_spill] sm:$0xff] %v9402_v14  ;;  %v4508_v9 = vsel %vm1180_vm2, %v9402_v14, 0.0  ;;  %v4634_v47 = vmul.f32 %v9402_v14, %v9402_v14  ;;  %v4710_v16 = vsel %vm1180_vm2, %v4636_v17, 0.0 }
 0x75c   :  { %v4705_v45 = vadd.f32 %v4704_v40, %v4703_v46  ;;  %v4509_v27 = vadd.f32 %v4508_v9, %v4507_v51  ;;  %v9411_v41 = vpop.f32.mrf.mxu0 }
 0x75d   :  { %11256 = vst [vmem:[#allocation4_spill] sm:$0xff] %v9411_v41  ;;  %v4706_v25 = vsel %vm1180_vm2, %v4634_v47, 0.0  ;;  %v4639_v50 = vmul.f32 %v9411_v41, %v9411_v41  ;;  %v4518_v5 = vsel %vm1180_vm2, %v9411_v41, 0.0 }
 0x75e   :  { %v4511_v48 = vadd.f32 %v4510_v43, %v4509_v27  ;;  %v4707_v30 = vadd.f32 %v4706_v25, %v4705_v45  ;;  %v9418_v12 = vpop.f32.mrf.mxu0 }
 0x75f   :  { %11257 = vst [vmem:[#allocation2_spill] sm:$0xff] %v9418_v12  ;;  %v4637_v29 = vmul.f32 %v9418_v12, %v9418_v12  ;;  %v4514_v33 = vsel %vm1180_vm2, %v9418_v12, 0.0  ;;  %v4716_v21 = vsel %vm1180_vm2, %v4639_v50, 0.0 }
 0x760   :  { %v4513_v60 = vadd.f32 %v4512_v44, %v4511_v48  ;;  %v4709_v52 = vadd.f32 %v4708_v63, %v4707_v30  ;;  %v9425_v39 = vpop.f32.mrf.mxu0 }
 0x761   :  { %11258 = vst [vmem:[#allocation6_spill] sm:$0xff] %v9425_v39  ;;  %v4712_v57 = vsel %vm1180_vm2, %v4637_v29, 0.0  ;;  %v4640_v2 = vmul.f32 %v9425_v39, %v9425_v39  ;;  %v4520_v19 = vsel %vm1180_vm2, %v9425_v39, 0.0 }
 0x762   :  { %v4711_v23 = vadd.f32 %v4710_v16, %v4709_v52  ;;  %v4515_v31 = vadd.f32 %v4514_v33, %v4513_v60  ;;  %v9430_v0 = vpop.f32.mrf.mxu0 }
 0x763   :  { %11259 = vst [vmem:[#allocation12_spill] sm:$0xff] %v9430_v0  ;;  %v4516_v15 = vsel %vm1180_vm2, %v9430_v0, 0.0  ;;  %v4638_v36 = vmul.f32 %v9430_v0, %v9430_v0  ;;  %v4718_v59 = vsel %vm1180_vm2, %v4640_v2, 0.0 }
 0x764   :  { %v4713_v35 = vadd.f32 %v4712_v57, %v4711_v23  ;;  %v4517_v13 = vadd.f32 %v4516_v15, %v4515_v31  ;;  %v9439_v26 = vpop.f32.mrf.mxu0 }
 0x765   :  { %11260 = vst [vmem:[#allocation16_spill] sm:$0xff] %v9439_v26  ;;  %v4714_v24 = vsel %vm1180_vm2, %v4638_v36, 0.0  ;;  %v4643_v27 = vmul.f32 %v9439_v26, %v9439_v26  ;;  %v4526_v44 = vsel %vm1180_vm2, %v9439_v26, 0.0 }
 0x766   :  { %v4519_v1 = vadd.f32 %v4518_v5, %v4517_v13  ;;  %v4715_v4 = vadd.f32 %v4714_v24, %v4713_v35  ;;  %v9446_v7 = vpop.f32.mrf.mxu0 }
 0x767   :  { %11261 = vst [vmem:[#allocation93_spill] sm:$0xff] %v9446_v7  ;;  %v4641_v28 = vmul.f32 %v9446_v7, %v9446_v7  ;;  %v4522_v40 = vsel %vm1180_vm2, %v9446_v7, 0.0  ;;  %v4724_v23 = vsel %vm1180_vm2, %v4643_v27, 0.0 }
 0x768   :  { %v4521_v55 = vadd.f32 %v4520_v19, %v4519_v1  ;;  %v4717_v46 = vadd.f32 %v4716_v21, %v4715_v4  ;;  %v9453_v51 = vpop.f32.mrf.mxu0 }
 0x769   :  { %11262 = vst [vmem:[#allocation94_spill] sm:$0xff] %v9453_v51  ;;  %v4720_v43 = vsel %vm1180_vm2, %v4641_v28, 0.0  ;;  %v4644_v29 = vmul.f32 %v9453_v51, %v9453_v51  ;;  %v4528_v31 = vsel %vm1180_vm2, %v9453_v51, 0.0 }
 0x76a   :  { %v4719_v9 = vadd.f32 %v4718_v59, %v4717_v46  ;;  %v4523_v47 = vadd.f32 %v4522_v40, %v4521_v55  ;;  %v9458_v45 = vpop.f32.mrf.mxu0 }
 0x76b   :  { %11263 = vst [vmem:[#allocation92_spill] sm:$0xff] %v9458_v45  ;;  %v4524_v17 = vsel %vm1180_vm2, %v9458_v45, 0.0  ;;  %v4642_v25 = vmul.f32 %v9458_v45, %v9458_v45  ;;  %v4726_v35 = vsel %vm1180_vm2, %v4644_v29, 0.0 }
 0x76c   :  { %v4721_v48 = vadd.f32 %v4720_v43, %v4719_v9  ;;  %v4525_v30 = vadd.f32 %v4524_v17, %v4523_v47  ;;  %v9467_v63 = vpop.f32.mrf.mxu0 }
 0x76d   :  { %11264 = vst [vmem:[#allocation91_spill] sm:$0xff] %v9467_v63  ;;  %v4722_v60 = vsel %vm1180_vm2, %v4642_v25, 0.0  ;;  %v4647_v1 = vmul.f32 %v9467_v63, %v9467_v63  ;;  %v4534_v59 = vsel %vm1180_vm2, %v9467_v63, 0.0 }
 0x76e   :  { %v4527_v52 = vadd.f32 %v4526_v44, %v4525_v30  ;;  %v4723_v16 = vadd.f32 %v4722_v60, %v4721_v48  ;;  %v9474_v33 = vpop.f32.mrf.mxu0 }
 0x76f   :  { %11265 = vst [vmem:[#allocation95_spill] sm:$0xff] %v9474_v33  ;;  %v4645_v50 = vmul.f32 %v9474_v33, %v9474_v33  ;;  %v4530_v13 = vsel %vm1180_vm2, %v9474_v33, 0.0  ;;  %v4732_v17 = vsel %vm1180_vm2, %v4647_v1, 0.0 }
 0x770   :  { %v4529_v57 = vadd.f32 %v4528_v31, %v4527_v52  ;;  %v4725_v15 = vadd.f32 %v4724_v23, %v4723_v16  ;;  %v9481_v36 = vpop.f32.mrf.mxu0 }
 0x771   :  { %11266 = vst [vmem:[#allocation96_spill] sm:$0xff] %v9481_v36  ;;  %v4728_v4 = vsel %vm1180_vm2, %v4645_v50, 0.0  ;;  %v4648_v40 = vmul.f32 %v9481_v36, %v9481_v36  ;;  %v4536_v25 = vsel %vm1180_vm2, %v9481_v36, 0.0 }
 0x772   :  { %v4727_v5 = vadd.f32 %v4726_v35, %v4725_v15  ;;  %v4531_v2 = vadd.f32 %v4530_v13, %v4529_v57  ;;  %v9486_v24 = vpop.f32.mrf.mxu0 }
 0x773   :  { %11267 = vst [vmem:[#allocation68_spill] sm:$0xff] %v9486_v24  ;;  %v4532_v21 = vsel %vm1180_vm2, %v9486_v24, 0.0  ;;  %v4646_v19 = vmul.f32 %v9486_v24, %v9486_v24  ;;  %v4734_v60 = vsel %vm1180_vm2, %v4648_v40, 0.0 }
 0x774   :  { %v4729_v28 = vadd.f32 %v4728_v4, %v4727_v5  ;;  %v4533_v55 = vadd.f32 %v4532_v21, %v4531_v2  ;;  %v9495_v46 = vpop.f32.mrf.mxu0 }
 0x775   :  { %11268 = vst [vmem:[#allocation97_spill] sm:$0xff] %v9495_v46  ;;  %v4730_v9 = vsel %vm1180_vm2, %v4646_v19, 0.0  ;;  %v4651_v50 = vmul.f32 %v9495_v46, %v9495_v46  ;;  %v4542_v1 = vsel %vm1180_vm2, %v9495_v46, 0.0 }
 0x776   :  { %v4535_v47 = vadd.f32 %v4534_v59, %v4533_v55  ;;  %v4731_v27 = vadd.f32 %v4730_v9, %v4729_v28  ;;  %v9502_v43 = vpop.f32.mrf.mxu0 }
 0x777   :  { %11269 = vst [vmem:[#allocation100_spill] sm:$0xff] %v9502_v43  ;;  %v4649_v48 = vmul.f32 %v9502_v43, %v9502_v43  ;;  %v4538_v52 = vsel %vm1180_vm2, %v9502_v43, 0.0  ;;  %v4740_v59 = vsel %vm1180_vm2, %v4651_v50, 0.0 }
 0x778   :  { %v4537_v30 = vadd.f32 %v4536_v25, %v4535_v47  ;;  %v4733_v44 = vadd.f32 %v4732_v17, %v4731_v27  ;;  %v9509_v29 = vpop.f32.mrf.mxu0 }
 0x779   :  { %11270 = vst [vmem:[#allocation101_spill] sm:$0xff] %v9509_v29  ;;  %v4736_v57 = vsel %vm1180_vm2, %v4649_v48, 0.0  ;;  %v4652_v4 = vmul.f32 %v9509_v29, %v9509_v29  ;;  %v4544_v40 = vsel %vm1180_vm2, %v9509_v29, 0.0 }
 0x77a   :  { %v4735_v16 = vadd.f32 %v4734_v60, %v4733_v44  ;;  %v4539_v23 = vadd.f32 %v4538_v52, %v4537_v30  ;;  %v9514_v31 = vpop.f32.mrf.mxu0 }
 0x77b   :  { %11271 = vst [vmem:[#allocation98_spill] sm:$0xff] %v9514_v31  ;;  %v4540_v15 = vsel %vm1180_vm2, %v9514_v31, 0.0  ;;  %v4650_v35 = vmul.f32 %v9514_v31, %v9514_v31  ;;  %v4742_v25 = vsel %vm1180_vm2, %v4652_v4, 0.0 }
 0x77c   :  { %v4737_v13 = vadd.f32 %v4736_v57, %v4735_v16  ;;  %v4541_v5 = vadd.f32 %v4540_v15, %v4539_v23  ;;  %v9523_v2 = vpop.f32.mrf.mxu0 }
 0x77d   :  { %11272 = vst [vmem:[#allocation99_spill] sm:$0xff] %v9523_v2  ;;  %v4738_v21 = vsel %vm1180_vm2, %v4650_v35, 0.0  ;;  %v4655_v52 = vmul.f32 %v9523_v2, %v9523_v2 }
 0x77e   :  { %v4543_v19 = vadd.f32 %v4542_v1, %v4541_v5  ;;  %v4739_v28 = vadd.f32 %v4738_v21, %v4737_v13  ;;  %v9530_v55 = vpop.f32.mrf.mxu0  ;;  %v4550_v13 = vsel %vm1180_vm2, %v9523_v2, 0.0 }
 0x77f   :  { %11273 = vst [vmem:[#allocation104_spill] sm:$0xff] %v9530_v55  ;;  %v4653_v9 = vmul.f32 %v9530_v55, %v9530_v55  ;;  %v4546_v48 = vsel %vm1180_vm2, %v9530_v55, 0.0 }
 0x780   :  { %v4545_v47 = vadd.f32 %v4544_v40, %v4543_v19  ;;  %v4741_v27 = vadd.f32 %v4740_v59, %v4739_v28  ;;  %v9537_v17 = vpop.f32.mrf.mxu0  ;;  %v4748_v28 = vsel %vm1180_vm2, %v4655_v52, 0.0 }
 0x781   :  { %11274 = vst [vmem:[#allocation105_spill] sm:$0xff] %v9537_v17  ;;  %v4744_v16 = vsel %vm1180_vm2, %v4653_v9, 0.0  ;;  %v4656_v5 = vmul.f32 %v9537_v17, %v9537_v17  ;;  %v4552_v59 = vsel %vm1180_vm2, %v9537_v17, 0.0 }
 0x782   :  { %v4743_v30 = vadd.f32 %v4742_v25, %v4741_v27  ;;  %v4547_v44 = vadd.f32 %v4546_v48, %v4545_v47  ;;  %v9542_v60 = vpop.f32.mrf.mxu0 }
 0x783   :  { %11275 = vst [vmem:[#allocation102_spill] sm:$0xff] %v9542_v60  ;;  %v4548_v23 = vsel %vm1180_vm2, %v9542_v60, 0.0  ;;  %v4654_v50 = vmul.f32 %v9542_v60, %v9542_v60  ;;  %v4750_v25 = vsel %vm1180_vm2, %v4656_v5, 0.0 }
 0x784   :  { %v4745_v57 = vadd.f32 %v4744_v16, %v4743_v30  ;;  %v4549_v15 = vadd.f32 %v4548_v23, %v4547_v44  ;;  %v9551_v35 = vpop.f32.mrf.mxu0 }
 0x785   :  { %v4746_v1 = vsel %vm1180_vm2, %v4654_v50, 0.0  ;;  %v4659_v52 = vmul.f32 %v9551_v35, %v9551_v35 }
 0x786   :  { %v4551_v4 = vadd.f32 %v4550_v13, %v4549_v15  ;;  %v4747_v21 = vadd.f32 %v4746_v1, %v4745_v57  ;;  %v9558_v19 = vpop.f32.mrf.mxu0  ;;  %v4558_v1 = vsel %vm1180_vm2, %v9551_v35, 0.0 }
 0x787   :  { %v4657_v40 = vmul.f32 %v9558_v19, %v9558_v19  ;;  %v4554_v48 = vsel %vm1180_vm2, %v9558_v19, 0.0 }
 0x788   :  { %v4749_v9 = vadd.f32 %v4748_v28, %v4747_v21  ;;  %v4553_v47 = vadd.f32 %v4552_v59, %v4551_v4  ;;  %v9565_v27 = vpop.f32.mrf.mxu0 }
 0x789   :  { %v4752_v23 = vsel %vm1180_vm2, %v4657_v40, 0.0  ;;  %v4660_v4 = vmul.f32 %v9565_v27, %v9565_v27 }
 0x78a   :  { %v4555_v30 = vadd.f32 %v4554_v48, %v4553_v47  ;;  %v4751_v44 = vadd.f32 %v4750_v25, %v4749_v9  ;;  %v9570_v16 = vpop.f32.mrf.mxu0  ;;  %v4756_v9 = vsel %vm1180_vm2, %v4659_v52, 0.0  ;;  %v4560_v47 = vsel %vm1180_vm2, %v9565_v27, 0.0 }
 0x78b   :  { %v4556_v50 = vsel %vm1180_vm2, %v9570_v16, 0.0  ;;  %v4658_v57 = vmul.f32 %v9570_v16, %v9570_v16 }
 0x78c   :  { %v4753_v15 = vadd.f32 %v4752_v23, %v4751_v44  ;;  %v4557_v13 = vadd.f32 %v4556_v50, %v4555_v30  ;;  %v9579_v5 = vpop.f32.mrf.mxu0  ;;  %v4758_v23 = vsel %vm1180_vm2, %v4660_v4, 0.0 }
 0x78d   :  { %v4754_v21 = vsel %vm1180_vm2, %v4658_v57, 0.0  ;;  %v4663_v52 = vmul.f32 %v9579_v5, %v9579_v5 }
 0x78e   :  { %v4559_v28 = vadd.f32 %v4558_v1, %v4557_v13  ;;  %v4755_v59 = vadd.f32 %v4754_v21, %v4753_v15  ;;  %v9586_v40 = vpop.f32.mrf.mxu0 }
 0x78f   :  { %v4661_v25 = vmul.f32 %v9586_v40, %v9586_v40  ;;  %v4562_v50 = vsel %vm1180_vm2, %v9586_v40, 0.0  ;;  %v4764_v2 = vsel %vm1180_vm2, %v4663_v52, 0.0 }
 0x790   :  { %v4757_v48 = vadd.f32 %v4756_v9, %v4755_v59  ;;  %v4561_v30 = vadd.f32 %v4560_v47, %v4559_v28  ;;  %v9593_v44 = vpop.f32.mrf.mxu0  ;;  %v4566_v47 = vsel %vm1180_vm2, %v9579_v5, 0.0 }
 0x791   :  { %v4760_v1 = vsel %vm1180_vm2, %v4661_v25, 0.0 }
 0x792   :  { %v4563_v57 = vadd.f32 %v4562_v50, %v4561_v30  ;;  %v4759_v15 = vadd.f32 %v4758_v23, %v4757_v48  ;;  %v9598_v13 = vpop.f32.mrf.mxu0  ;;  %v4664_v48 = vmul.f32 %v9593_v44, %v9593_v44 }
 0x793   :  { %v4564_v21 = vsel %vm1180_vm2, %v9598_v13, 0.0  ;;  %v4662_v28 = vmul.f32 %v9598_v13, %v9598_v13 }
 0x794   :  { %v4761_v59 = vadd.f32 %v4760_v1, %v4759_v15  ;;  %v4565_v4 = vadd.f32 %v4564_v21, %v4563_v57  ;;  %v9607_v9 = vpop.f32.mrf.mxu0  ;;  %v4568_v15 = vsel %vm1180_vm2, %v9593_v44, 0.0  ;;  %v4766_v55 = vsel %vm1180_vm2, %v4664_v48, 0.0 }
 0x795   :  { %v4762_v30 = vsel %vm1180_vm2, %v4662_v28, 0.0  ;;  %v4667_v52 = vmul.f32 %v9607_v9, %v9607_v9 }
 0x796   :  { %v4567_v23 = vadd.f32 %v4566_v47, %v4565_v4  ;;  %v4763_v25 = vadd.f32 %v4762_v30, %v4761_v59  ;;  %v9614_v50 = vpop.f32.mrf.mxu0 }
 0x797   :  { %v4665_v57 = vmul.f32 %v9614_v50, %v9614_v50  ;;  %v4570_v28 = vsel %vm1180_vm2, %v9614_v50, 0.0  ;;  %v4772_v46 = vsel %vm1180_vm2, %v4667_v52, 0.0 }
 0x798   :  { %v4765_v1 = vadd.f32 %v4764_v2, %v4763_v25  ;;  %v4569_v21 = vadd.f32 %v4568_v15, %v4567_v23  ;;  %v9621_v17 = vpop.f32.mrf.mxu0 }
 0x799   :  { %v4768_v30 = vsel %vm1180_vm2, %v4665_v57, 0.0 }
 0x79a   :  { %v4571_v59 = vadd.f32 %v4570_v28, %v4569_v21  ;;  %v4767_v4 = vadd.f32 %v4766_v55, %v4765_v1  ;;  %v9626_v47 = vpop.f32.mrf.mxu0  ;;  %v4574_v55 = vsel %vm1180_vm2, %v9607_v9, 0.0  ;;  %v4668_v1 = vmul.f32 %v9621_v17, %v9621_v17 }
 0x79b   :  { %v4572_v2 = vsel %vm1180_vm2, %v9626_v47, 0.0  ;;  %v4666_v23 = vmul.f32 %v9626_v47, %v9626_v47 }
 0x79c   :  { %v4769_v25 = vadd.f32 %v4768_v30, %v4767_v4  ;;  %v4573_v48 = vadd.f32 %v4572_v2, %v4571_v59  ;;  %v9635_v15 = vpop.f32.mrf.mxu0  ;;  %v4576_v4 = vsel %vm1180_vm2, %v9621_v17, 0.0  ;;  %v4774_v43 = vsel %vm1180_vm2, %v4668_v1, 0.0 }
 0x79d   :  { %v4770_v21 = vsel %vm1180_vm2, %v4666_v23, 0.0  ;;  %v4671_v52 = vmul.f32 %v9635_v15, %v9635_v15 }
 0x79e   :  { %v4575_v28 = vadd.f32 %v4574_v55, %v4573_v48  ;;  %v4771_v57 = vadd.f32 %v4770_v21, %v4769_v25  ;;  %v9642_v60 = vpop.f32.mrf.mxu0 }
 0x79f   :  { %v4669_v59 = vmul.f32 %v9642_v60, %v9642_v60  ;;  %v4578_v23 = vsel %vm1180_vm2, %v9642_v60, 0.0  ;;  %v4780_v63 = vsel %vm1180_vm2, %v4671_v52, 0.0 }
 0x7a0   :  { %v4773_v30 = vadd.f32 %v4772_v46, %v4771_v57  ;;  %v4577_v2 = vadd.f32 %v4576_v4, %v4575_v28  ;;  %v9649_v29 = vpop.f32.mrf.mxu0 }
 0x7a1   :  { %v4776_v21 = vsel %vm1180_vm2, %v4669_v59, 0.0 }
 0x7a2   :  { %v4579_v25 = vadd.f32 %v4578_v23, %v4577_v2  ;;  %v4775_v48 = vadd.f32 %v4774_v43, %v4773_v30  ;;  %v9654_v55 = vpop.f32.mrf.mxu0  ;;  %v4582_v43 = vsel %vm1180_vm2, %v9635_v15, 0.0  ;;  %v4672_v30 = vmul.f32 %v9649_v29, %v9649_v29 }
 0x7a3   :  { %v4580_v46 = vsel %vm1180_vm2, %v9654_v55, 0.0  ;;  %v4670_v28 = vmul.f32 %v9654_v55, %v9654_v55 }
 0x7a4   :  { %v4777_v57 = vadd.f32 %v4776_v21, %v4775_v48  ;;  %v4581_v1 = vadd.f32 %v4580_v46, %v4579_v25  ;;  %v9663_v4 = vpop.f32.mrf.mxu0  ;;  %v4584_v48 = vsel %vm1180_vm2, %v9649_v29, 0.0  ;;  %v4782_v33 = vsel %vm1180_vm2, %v4672_v30, 0.0 }
 0x7a5   :  { %v4778_v2 = vsel %vm1180_vm2, %v4670_v28, 0.0  ;;  %v4675_v52 = vmul.f32 %v9663_v4, %v9663_v4 }
 0x7a6   :  { %v4583_v23 = vadd.f32 %v4582_v43, %v4581_v1  ;;  %v4779_v59 = vadd.f32 %v4778_v2, %v4777_v57  ;;  %v9670_v31 = vpop.f32.mrf.mxu0 }
 0x7a7   :  { %v4673_v25 = vmul.f32 %v9670_v31, %v9670_v31  ;;  %v4586_v28 = vsel %vm1180_vm2, %v9670_v31, 0.0  ;;  %v4788_v26 = vsel %vm1180_vm2, %v4675_v52, 0.0 }
 0x7a8   :  { %v4781_v21 = vadd.f32 %v4780_v63, %v4779_v59  ;;  %v4585_v46 = vadd.f32 %v4584_v48, %v4583_v23  ;;  %v9677_v36 = vpop.f32.mrf.mxu0 }
 0x7a9   :  { %v4784_v2 = vsel %vm1180_vm2, %v4673_v25, 0.0 }
 0x7aa   :  { %v4587_v57 = vadd.f32 %v4586_v28, %v4585_v46  ;;  %v4783_v1 = vadd.f32 %v4782_v33, %v4781_v21  ;;  %v9682_v43 = vpop.f32.mrf.mxu0  ;;  %v4590_v33 = vsel %vm1180_vm2, %v9663_v4, 0.0  ;;  %v4676_v21 = vmul.f32 %v9677_v36, %v9677_v36 }
 0x7ab   :  { %v4588_v63 = vsel %vm1180_vm2, %v9682_v43, 0.0  ;;  %v4674_v23 = vmul.f32 %v9682_v43, %v9682_v43 }
 0x7ac   :  { %v4785_v59 = vadd.f32 %v4784_v2, %v4783_v1  ;;  %v4589_v30 = vadd.f32 %v4588_v63, %v4587_v57  ;;  %v9691_v48 = vpop.f32.mrf.mxu0  ;;  %v4592_v1 = vsel %vm1180_vm2, %v9677_v36, 0.0 }
 0x7ad   :  { %v4786_v46 = vsel %vm1180_vm2, %v4674_v23, 0.0  ;;  %v1015_v23 = vld [vmem:[%s10606_s11] sm:$0x1]  ;;  %v4679_v52 = vmul.f32 %v9691_v48, %v9691_v48 }
 0x7ae   :  { %v4591_v28 = vadd.f32 %v4590_v33, %v4589_v30  ;;  %v4787_v25 = vadd.f32 %v4786_v46, %v4785_v59  ;;  %v9698_v24 = vpop.f32.mrf.mxu0  ;;  %v4790_v59 = vsel %vm1180_vm2, %v4676_v21, 0.0 }
 0x7af   :  { %v4677_v57 = vmul.f32 %v9698_v24, %v9698_v24  ;;  %v4594_v30 = vsel %vm1180_vm2, %v9698_v24, 0.0 }
 0x7b0   :  { %v4789_v2 = vadd.f32 %v4788_v26, %v4787_v25  ;;  %v4593_v63 = vadd.f32 %v4592_v1, %v4591_v28  ;;  %v9705_v51 = vpop.f32.mrf.mxu0 }
 0x7b1   :  { %v4792_v28 = vsel %vm1180_vm2, %v4677_v57, 0.0 }
 0x7b2   :  { %v4595_v33 = vadd.f32 %v4594_v30, %v4593_v63  ;;  %v4791_v46 = vadd.f32 %v4790_v59, %v4789_v2  ;;  %v9715_v7 = vpop.f32.mrf.mxu0  ;;  %v1041_v26 = vpop.permute.xlu0 %1040  ;;  %v4598_v63 = vsel %vm1180_vm2, %v9691_v48, 0.0  ;;  %v4680_v2 = vmul.f32 %v9705_v51, %v9705_v51 }
 0x7b3   :  { %v4596_v25 = vsel %vm1180_vm2, %v9715_v7, 0.0  ;;  %v4678_v1 = vmul.f32 %v9715_v7, %v9715_v7  ;;  %v1043_v21 = vsub.f32 %v1015_v23, %v1041_v26  ;;  %v4796_v23 = vsel %vm1180_vm2, %v4679_v52, 0.0 }
 0x7b4   :  { %v4793_v45 = vadd.f32 %v4792_v28, %v4791_v46  ;;  %v4597_v41 = vadd.f32 %v4596_v25, %v4595_v33  ;;  %v9722_v39 = vpop.f32.mrf.mxu0  ;;  %v4600_v33 = vsel %vm1180_vm2, %v9705_v51, 0.0 }
 0x7b5   :  { %v4794_v59 = vsel %vm1180_vm2, %v4678_v1, 0.0  ;;  %v1112_v57 = vrot.slane %v1043_v21, %v11149_v54  ;;  %v4798_v1 = vsel %vm1180_vm2, %v4680_v2, 0.0 }
 0x7b6   :  { %v4599_v30 = vadd.f32 %v4598_v63, %v4597_v41  ;;  %v4795_v12 = vadd.f32 %v4794_v59, %v4793_v45  ;;  %v9730_v0 = vpop.f32.mrf.mxu0  ;;  %v4683_v63 = vmul.f32 %v9722_v39, %v9722_v39 }
 0x7b7   :  { %v4681_v46 = vmul.f32 %v9730_v0, %v9730_v0  ;;  %1113 = vrot.lane.b32.xlu1 %v1112_v57, %s5910_s3  ;;  %v4602_v41 = vsel %vm1180_vm2, %v9730_v0, 0.0 }
 0x7b8   :  { %v4797_v26 = vadd.f32 %v4796_v23, %v4795_v12  ;;  %v4601_v28 = vadd.f32 %v4600_v33, %v4599_v30  ;;  %v9738_v25 = vpop.f32.mrf.mxu0  ;;  %v4606_v33 = vsel %vm1180_vm2, %v9722_v39, 0.0  ;;  %v4804_v6 = vsel %vm1180_vm2, %v4683_v63, 0.0 }
 0x7b9   :  { %v4800_v59 = vsel %vm1180_vm2, %v4681_v46, 0.0 }
 0x7ba   :  { %v4603_v45 = vadd.f32 %v4602_v41, %v4601_v28  ;;  %v4799_v21 = vadd.f32 %v4798_v1, %v4797_v26  ;;  %v9743_v52 = vpop.f32.mrf.mxu0  ;;  %v4684_v26 = vmul.f32 %v9738_v25, %v9738_v25 }
 0x7bb   :  { %v4604_v12 = vsel %vm1180_vm2, %v9743_v52, 0.0  ;;  %v4682_v57 = vmul.f32 %v9743_v52, %v9743_v52 }
 0x7bc   :  { %v4801_v30 = vadd.f32 %v4800_v59, %v4799_v21  ;;  %v4605_v2 = vadd.f32 %v4604_v12, %v4603_v45  ;;  %v9752_v23 = vpop.f32.mrf.mxu0  ;;  %v4608_v21 = vsel %vm1180_vm2, %v9738_v25, 0.0  ;;  %v4806_v10 = vsel %vm1180_vm2, %v4684_v26, 0.0 }
 0x7bd   :  { %v4802_v28 = vsel %vm1180_vm2, %v4682_v57, 0.0  ;;  %v4687_v63 = vmul.f32 %v9752_v23, %v9752_v23 }
 0x7be   :  { %v4607_v1 = vadd.f32 %v4606_v33, %v4605_v2  ;;  %v4803_v46 = vadd.f32 %v4802_v28, %v4801_v30  ;;  %v9759_v41 = vpop.f32.mrf.mxu0 }
 0x7bf   :  { %v4685_v45 = vmul.f32 %v9759_v41, %v9759_v41  ;;  %v4610_v57 = vsel %vm1180_vm2, %v9759_v41, 0.0 }
 0x7c0   :  { %v4805_v59 = vadd.f32 %v4804_v6, %v4803_v46  ;;  %v4609_v12 = vadd.f32 %v4608_v21, %v4607_v1  ;;  %v9766_v56 = vpop.f32.mrf.mxu0  ;;  %v4614_v46 = vsel %vm1180_vm2, %v9752_v23, 0.0 }
 0x7c1   :  { %v4808_v28 = vsel %vm1180_vm2, %v4685_v45, 0.0  ;;  %v4688_v26 = vmul.f32 %v9766_v56, %v9766_v56  ;;  %v4616_v45 = vsel %vm1180_vm2, %v9766_v56, 0.0 }
 0x7c2   :  { %v4611_v30 = vadd.f32 %v4610_v57, %v4609_v12  ;;  %v4807_v2 = vadd.f32 %v4806_v10, %v4805_v59  ;;  %v4479_v33 = vpop.f32.mrf.mxu0  ;;  %v4812_v12 = vsel %vm1180_vm2, %v4687_v63, 0.0 }
 0x7c3   :  { %v4612_v14 = vsel %vm1180_vm2, %v4479_v33, 0.0  ;;  %v4686_v37 = vmul.f32 %v4479_v33, %v4479_v33 }
 0x7c4   :  { %v4809_v6 = vadd.f32 %v4808_v28, %v4807_v2  ;;  %v4613_v1 = vadd.f32 %v4612_v14, %v4611_v30  ;;  %v4814_v2 = vsel %vm1180_vm2, %v4688_v26, 0.0 }
 0x7c5   :  { %v4810_v21 = vsel %vm1180_vm2, %v4686_v37, 0.0 }
 0x7c6   :  { %v4615_v10 = vadd.f32 %v4614_v46, %v4613_v1  ;;  %v4811_v59 = vadd.f32 %v4810_v21, %v4809_v6 }
 0x7c8   :  { %v4617_v57 = vadd.f32 %v4616_v45, %v4615_v10  ;;  %v4813_v61 = vadd.f32 %v4812_v12, %v4811_v59 }
 0x7ca   :  { %v4618_v14 = vrot.slane %v4617_v57, 4  ;;  %v4815_v30 = vadd.f32 %v4814_v2, %v4813_v61  ;;  %v4823_v61 = vld [vmem:[%s10607_s8] sm:$0x1] }
 0x7cc   :  { %v4619_v28 = vadd.f32 %v4618_v14, %v4617_v57  ;;  %v4816_v20 = vrot.slane %v4815_v30, 4 }
 0x7ce   :  { %v4620_v22 = vrot.slane %v4619_v28, 2  ;;  %v4817_v11 = vadd.f32 %v4816_v20, %v4815_v30 }
 0x7d0   :  { %v4621_v42 = vadd.f32 %v4620_v22, %v4619_v28  ;;  %v4818_v18 = vrot.slane %v4817_v11, 2 }
 0x7d2   :  { %v4622_v37 = vrot.slane %v4621_v42, 1  ;;  %v4819_v1 = vadd.f32 %v4818_v18, %v4817_v11 }
 0x7d4   :  { %v4623_v6 = vadd.f32 %v4622_v37, %v4621_v42  ;;  %v4820_v46 = vrot.slane %v4819_v1, 1  ;;  %v4830_v42 = vld [vmem:[%s10608_s9] sm:$0x1] }
 0x7d6   :  { %v4624_v63 = vmul.f32 0.001953125, %v4623_v6  ;;  %v4821_v21 = vadd.f32 %v4820_v46, %v4819_v1 }
 0x7d8   :  { %v4822_v34 = vmul.f32 0.001953125, %v4821_v21  ;;  %v4824_v32 = vmul.f32 %v4624_v63, %v4624_v63 }
 0x7da   :  { %v4825_v10 = vsub.f32 %v4822_v34, %v4824_v32 }
 0x7dc   :  { %v4826_v59 = vmax.f32 %v4825_v10, 0.0 }
 0x7de   :  { %v4827_v12 = vadd.f32 1e-05, %v4826_v59 }
 0x7e0   :  { %5908 = vrsqrt.f32 %v4827_v12 }
 0x7ed   :  { %v5909_v26 = vpop.eup %5908 }
 0x7ee   :  { %v4829_v20 = vmul.f32 %v5909_v26, %v4823_v61 }
 0x7f0   :  { %v9788_v22 = vrot.slane %v4829_v20, %v11149_v54  ;;  %v4831_v18 = vmul.f32 %v4829_v20, %v4624_v63 }
 0x7f2   :  { %v4900_v11 = vmul.f32 %v9788_v22, %v4479_v33  ;;  %v4832_v32 = vsub.f32 %v4830_v42, %v4831_v18  ;;  %v4872_v45 = vmul.f32 %v9788_v22, %v9570_v16  ;;  %v4871_v57 = vmul.f32 %v9788_v22, %v9558_v19 }
 0x7f3   :  { %v4874_v2 = vmul.f32 %v9565_v27, %v9788_v22  ;;  %v4873_v33 = vmul.f32 %v9551_v35, %v9788_v22  ;;  %v4876_v14 = vmul.f32 %v9788_v22, %v9598_v13  ;;  %v4875_v35 = vmul.f32 %v9788_v22, %v9586_v40 }
 0x7f4   :  { %v9795_v34 = vrot.slane %v4832_v32, %v11149_v54  ;;  %v4878_v13 = vmul.f32 %v9593_v44, %v9788_v22  ;;  %v4877_v28 = vmul.f32 %v9579_v5, %v9788_v22  ;;  %v4880_v37 = vmul.f32 %v9788_v22, %v9626_v47 }
 0x7f5   :  { %v4879_v1 = vmul.f32 %v9788_v22, %v9614_v50  ;;  %v4882_v6 = vmul.f32 %v9621_v17, %v9788_v22  ;;  %v4881_v46 = vmul.f32 %v9607_v9, %v9788_v22  ;;  %v4884_v47 = vmul.f32 %v9788_v22, %v9654_v55 }
 0x7f6   :  { %v9808_v30 = vadd.f32 %v9795_v34, %v4872_v45  ;;  %v9811_v54 = vadd.f32 %v9795_v34, %v4871_v57  ;;  %v9814_v16 = vadd.f32 %v9795_v34, %v4874_v2  ;;  %v9817_v19 = vadd.f32 %v9795_v34, %v4873_v33 }
 0x7f7   :  { %v9820_v27 = vadd.f32 %v9795_v34, %v4876_v14  ;;  %v9837_v40 = vadd.f32 %v9795_v34, %v4875_v35  ;;  %v9840_v44 = vadd.f32 %v9795_v34, %v4878_v13  ;;  %v9843_v5 = vadd.f32 %v9795_v34, %v4877_v28 }
 0x7f8   :  { %v9848_v50 = vadd.f32 %v9795_v34, %v4880_v37  ;;  %v9851_v17 = vadd.f32 %v9795_v34, %v4879_v1  ;;  %v9854_v9 = vadd.f32 %v9795_v34, %v4882_v6  ;;  %v9857_v63 = vadd.f32 %v9795_v34, %v4881_v46 }
 0x7f9   :  { %v9860_v21 = vadd.f32 %v9795_v34, %v4884_v47  ;;  %v4883_v10 = vmul.f32 %v9788_v22, %v9642_v60  ;;  %v4886_v55 = vmul.f32 %v9649_v29, %v9788_v22  ;;  %v4885_v59 = vmul.f32 %v9635_v15, %v9788_v22 }
 0x7fa   :  { %v4888_v12 = vmul.f32 %v9788_v22, %v9682_v43  ;;  %v4887_v61 = vmul.f32 %v9788_v22, %v9670_v31  ;;  %v4890_v26 = vmul.f32 %v9677_v36, %v9788_v22  ;;  %v4889_v20 = vmul.f32 %v9663_v4, %v9788_v22 }
 0x7fb   :  { %v9877_v60 = vadd.f32 %v9795_v34, %v4883_v10  ;;  %v9880_v29 = vadd.f32 %v9795_v34, %v4886_v55  ;;  %v9883_v15 = vadd.f32 %v9795_v34, %v4885_v59  ;;  %v4892_v43 = vmul.f32 %v9788_v22, %v9715_v7 }
 0x7fc   :  { %v9888_v31 = vadd.f32 %v9795_v34, %v4888_v12  ;;  %v9891_v36 = vadd.f32 %v9795_v34, %v4887_v61  ;;  %v9894_v4 = vadd.f32 %v9795_v34, %v4890_v26  ;;  %v9897_v18 = vadd.f32 %v9795_v34, %v4889_v20  ;;  %v11277_v20 = vld [vmem:[#allocation10_spill] sm:$0xff] }
 0x7fd   :  { %v9900_v42 = vadd.f32 %v9795_v34, %v4892_v43  ;;  %v4891_v32 = vmul.f32 %v9788_v22, %v9698_v24  ;;  %v4894_v7 = vmul.f32 %v9705_v51, %v9788_v22  ;;  %v4893_v45 = vmul.f32 %v9691_v48, %v9788_v22 }
 0x7fe   :  { %v4896_v57 = vmul.f32 %v9788_v22, %v9743_v52  ;;  %v4895_v2 = vmul.f32 %v9788_v22, %v9730_v0  ;;  %v4898_v33 = vmul.f32 %v9738_v25, %v9788_v22  ;;  %v4897_v14 = vmul.f32 %v9722_v39, %v9788_v22 }
 0x7ff   :  { %v9917_v24 = vadd.f32 %v9795_v34, %v4891_v32  ;;  %v9920_v51 = vadd.f32 %v9795_v34, %v4894_v7  ;;  %v9923_v48 = vadd.f32 %v9795_v34, %v4893_v45  ;;  %v9926_v52 = vadd.f32 %v9795_v34, %v4900_v11  ;;  %v11279_v45 = vld [vmem:[#allocation20_spill] sm:$0xff] }
 0x800   :  { %v9929_v0 = vadd.f32 %v9795_v34, %v4896_v57  ;;  %v9932_v25 = vadd.f32 %v9795_v34, %v4895_v2  ;;  %v9935_v39 = vadd.f32 %v9795_v34, %v4898_v33  ;;  %v9938_v35 = vadd.f32 %v9795_v34, %v4897_v14  ;;  %v11280_v14 = vld [vmem:[#allocation22_spill] sm:$0xff] }
 0x801   :  { %v4899_v13 = vmul.f32 %v9788_v22, %v9759_v41  ;;  %v4902_v28 = vmul.f32 %v9766_v56, %v9788_v22  ;;  %v4901_v11 = vmul.f32 %v9752_v23, %v9788_v22  ;;  %v1045_v46 = vmul.f32 %v9329_v58, %v11150_v38 }
 0x802   :  { %v1044_v41 = vmul.f32 %v9329_v58, %v11151_v49  ;;  %v1047_v10 = vmul.f32 %v11153_v53, %v9329_v58  ;;  %v1046_v55 = vmul.f32 %v11152_v8, %v9329_v58  ;;  %v1049_v59 = vmul.f32 %v9329_v58, %v11155_v3  ;;  %v11276_v8 = vld [vmem:[#allocation14_spill] sm:$0xff] }
 0x803   :  { %v9947_v37 = vadd.f32 %v9795_v34, %v4899_v13  ;;  %v9950_v1 = vadd.f32 %v9795_v34, %v4902_v28  ;;  %v9953_v6 = vadd.f32 %v9795_v34, %v4901_v11  ;;  %v1048_v12 = vmul.f32 %v9329_v58, %v11154_v62  ;;  %v11278_v62 = vld [vmem:[#allocation24_spill] sm:$0xff]  ;;  %v11281_v28 = vld [vmem:[#allocation18_spill] sm:$0xff] }
 0x804   :  { %v1051_v26 = vmul.f32 %v11276_v8, %v9329_v58  ;;  %v1050_v43 = vmul.f32 %v11277_v20, %v9329_v58  ;;  %v1053_v7 = vmul.f32 %v9329_v58, %v11278_v62  ;;  %v1052_v57 = vmul.f32 %v9329_v58, %v11279_v45  ;;  %v11286_v20 = vld [vmem:[#allocation40_spill] sm:$0xff]  ;;  %v11288_v45 = vld [vmem:[#allocation38_spill] sm:$0xff] }
 0x805   :  { %v1055_v13 = vmul.f32 %v11280_v14, %v9329_v58  ;;  %v1054_v11 = vmul.f32 %v11281_v28, %v9329_v58  ;;  %v11290_v28 = vld [vmem:[#allocation48_spill] sm:$0xff] }
 0x829   :  { %v9959_v47 = vpop.permute.xlu1 %1113 }
 0x82a   :  { %v1117_v56 = vadd.f32 %v9959_v47, %v1045_v46  ;;  %v1116_v23 = vadd.f32 %v9959_v47, %v1044_v41  ;;  %v1119_v38 = vadd.f32 %v9959_v47, %v1047_v10  ;;  %v1118_v49 = vadd.f32 %v9959_v47, %v1046_v55  ;;  %v11283_v10 = vld [vmem:[#allocation28_spill] sm:$0xff] }
 0x82b   :  { %v1121_v61 = vadd.f32 %v9959_v47, %v1049_v59  ;;  %v1120_v53 = vadd.f32 %v9959_v47, %v1048_v12  ;;  %v1123_v32 = vadd.f32 %v9959_v47, %v1051_v26  ;;  %v1122_v3 = vadd.f32 %v9959_v47, %v1050_v43  ;;  %v11284_v59 = vld [vmem:[#allocation30_spill] sm:$0xff] }
 0x82c   :  { %5039 = vrot.lane.b32.xlu1 %v1117_v56, %s5913_s17  ;;  %5037 = vrot.lane.b32.xlu0 %v1116_v23, %s5913_s17  ;;  %v1125_v2 = vadd.f32 %v9959_v47, %v1053_v7  ;;  %v1124_v33 = vadd.f32 %v9959_v47, %v1052_v57  ;;  %v1127_v46 = vadd.f32 %v9959_v47, %v1055_v13  ;;  %v11282_v56 = vld [vmem:[#allocation32_spill] sm:$0xff] }
 0x82d   :  { %v1126_v41 = vadd.f32 %v9959_v47, %v1054_v11  ;;  %v1057_v23 = vmul.f32 %v9329_v58, %v11282_v56  ;;  %v1056_v55 = vmul.f32 %v9329_v58, %v11283_v10  ;;  %v1059_v12 = vmul.f32 %v11284_v59, %v9329_v58  ;;  %v11292_v10 = vld [vmem:[#allocation46_spill] sm:$0xff] }
 0x82e   :  { %v1061_v43 = vmul.f32 %v9329_v58, %v11286_v20  ;;  %v1063_v57 = vmul.f32 %v11288_v45, %v9329_v58  ;;  %v1065_v11 = vmul.f32 %v9329_v58, %v11290_v28 }
 0x82f   :  { %v1131_v8 = vadd.f32 %v9959_v47, %v1059_v12 }
 0x830   :  { %5043 = vrot.lane.b32.xlu1 %v1119_v38, %s5913_s17  ;;  %5041 = vrot.lane.b32.xlu0 %v1118_v49, %s5913_s17  ;;  %v1129_v38 = vadd.f32 %v9959_v47, %v1057_v23  ;;  %v1128_v49 = vadd.f32 %v9959_v47, %v1056_v55  ;;  %v1133_v62 = vadd.f32 %v9959_v47, %v1061_v43 }
 0x831   :  { %v1135_v14 = vadd.f32 %v9959_v47, %v1063_v57  ;;  %v1137_v56 = vadd.f32 %v9959_v47, %v1065_v11  ;;  %v1067_v55 = vmul.f32 %v11292_v10, %v9329_v58 }
 0x833   :  { %v1139_v59 = vadd.f32 %v9959_v47, %v1067_v55 }
 0x834   :  { %5047 = vrot.lane.b32.xlu1 %v1121_v61, %s5913_s17  ;;  %5045 = vrot.lane.b32.xlu0 %v1120_v53, %s5913_s17  ;;  %v11285_v61 = vld [vmem:[#allocation26_spill] sm:$0xff] }
 0x835   :  { %v1058_v53 = vmul.f32 %v11285_v61, %v9329_v58  ;;  %v11294_v61 = vld [vmem:[#allocation56_spill] sm:$0xff] }
 0x837   :  { %v1130_v26 = vadd.f32 %v9959_v47, %v1058_v53  ;;  %v1069_v53 = vmul.f32 %v9329_v58, %v11294_v61 }
 0x838   :  { %5051 = vrot.lane.b32.xlu1 %v1123_v32, %s5913_s17  ;;  %5049 = vrot.lane.b32.xlu0 %v1122_v3, %s5913_s17  ;;  %v11287_v32 = vld [vmem:[#allocation36_spill] sm:$0xff] }
 0x839   :  { %v1060_v3 = vmul.f32 %v9329_v58, %v11287_v32  ;;  %v1141_v20 = vadd.f32 %v9959_v47, %v1069_v53  ;;  %v11296_v32 = vld [vmem:[#allocation54_spill] sm:$0xff] }
 0x83b   :  { %v1132_v7 = vadd.f32 %v9959_v47, %v1060_v3  ;;  %v1071_v3 = vmul.f32 %v11296_v32, %v9329_v58 }
 0x83c   :  { %5055 = vrot.lane.b32.xlu1 %v1125_v2, %s5913_s17  ;;  %5053 = vrot.lane.b32.xlu0 %v1124_v33, %s5913_s17  ;;  %v11289_v2 = vld [vmem:[#allocation34_spill] sm:$0xff] }
 0x83d   :  { %v1062_v33 = vmul.f32 %v11289_v2, %v9329_v58  ;;  %v1143_v45 = vadd.f32 %v9959_v47, %v1071_v3  ;;  %v11298_v2 = vld [vmem:[#allocation64_spill] sm:$0xff] }
 0x83f   :  { %v1134_v13 = vadd.f32 %v9959_v47, %v1062_v33  ;;  %v1073_v33 = vmul.f32 %v9329_v58, %v11298_v2 }
 0x840   :  { %5059 = vrot.lane.b32.xlu1 %v1127_v46, %s5913_s17  ;;  %5057 = vrot.lane.b32.xlu0 %v1126_v41, %s5913_s17  ;;  %v11291_v46 = vld [vmem:[#allocation44_spill] sm:$0xff] }
 0x841   :  { %v1064_v41 = vmul.f32 %v9329_v58, %v11291_v46  ;;  %v1145_v28 = vadd.f32 %v9959_v47, %v1073_v33  ;;  %v11300_v46 = vld [vmem:[#allocation62_spill] sm:$0xff] }
 0x843   :  { %v1136_v23 = vadd.f32 %v9959_v47, %v1064_v41  ;;  %v1075_v41 = vmul.f32 %v11300_v46, %v9329_v58 }
 0x844   :  { %5063 = vrot.lane.b32.xlu1 %v1129_v38, %s5913_s17  ;;  %5061 = vrot.lane.b32.xlu0 %v1128_v49, %s5913_s17  ;;  %v11293_v38 = vld [vmem:[#allocation42_spill] sm:$0xff] }
 0x845   :  { %v1066_v49 = vmul.f32 %v11293_v38, %v9329_v58  ;;  %v1147_v10 = vadd.f32 %v9959_v47, %v1075_v41  ;;  %v11302_v38 = vld [vmem:[#allocation9_spill] sm:$0xff] }
 0x847   :  { %v1138_v12 = vadd.f32 %v9959_v47, %v1066_v49  ;;  %v1077_v49 = vmul.f32 %v9329_v58, %v11302_v38 }
 0x848   :  { %5067 = vrot.lane.b32.xlu1 %v1131_v8, %s5913_s17  ;;  %5065 = vrot.lane.b32.xlu0 %v1130_v26, %s5913_s17  ;;  %v11295_v8 = vld [vmem:[#allocation52_spill] sm:$0xff] }
 0x849   :  { %v1068_v26 = vmul.f32 %v9329_v58, %v11295_v8  ;;  %v1149_v61 = vadd.f32 %v9959_v47, %v1077_v49  ;;  %v11304_v8 = vld [vmem:[#allocation7_spill] sm:$0xff] }
 0x84b   :  { %v1140_v43 = vadd.f32 %v9959_v47, %v1068_v26  ;;  %v1079_v26 = vmul.f32 %v11304_v8, %v9329_v58 }
 0x84c   :  { %5071 = vrot.lane.b32.xlu1 %v1133_v62, %s5913_s17  ;;  %5069 = vrot.lane.b32.xlu0 %v1132_v7, %s5913_s17  ;;  %v11297_v62 = vld [vmem:[#allocation50_spill] sm:$0xff] }
 0x84d   :  { %v1070_v7 = vmul.f32 %v11297_v62, %v9329_v58  ;;  %v1151_v32 = vadd.f32 %v9959_v47, %v1079_v26  ;;  %v11306_v62 = vld [vmem:[#allocation17_spill] sm:$0xff] }
 0x84f   :  { %v1142_v57 = vadd.f32 %v9959_v47, %v1070_v7  ;;  %v1081_v7 = vmul.f32 %v9329_v58, %v11306_v62 }
 0x850   :  { %5075 = vrot.lane.b32.xlu1 %v1135_v14, %s5913_s17  ;;  %5073 = vrot.lane.b32.xlu0 %v1134_v13, %s5913_s17  ;;  %v11299_v14 = vld [vmem:[#allocation60_spill] sm:$0xff] }
 0x851   :  { %v1072_v13 = vmul.f32 %v9329_v58, %v11299_v14  ;;  %v1153_v2 = vadd.f32 %v9959_v47, %v1081_v7  ;;  %v11308_v14 = vld [vmem:[#allocation15_spill] sm:$0xff] }
 0x853   :  { %v1144_v11 = vadd.f32 %v9959_v47, %v1072_v13  ;;  %v1083_v13 = vmul.f32 %v11308_v14, %v9329_v58 }
 0x854   :  { %5079 = vrot.lane.b32.xlu1 %v1137_v56, %s5913_s17  ;;  %5077 = vrot.lane.b32.xlu0 %v1136_v23, %s5913_s17  ;;  %v11301_v56 = vld [vmem:[#allocation58_spill] sm:$0xff] }
 0x855   :  { %v1074_v23 = vmul.f32 %v11301_v56, %v9329_v58  ;;  %v1155_v46 = vadd.f32 %v9959_v47, %v1083_v13  ;;  %v11310_v56 = vld [vmem:[#allocation25_spill] sm:$0xff] }
 0x857   :  { %v1146_v55 = vadd.f32 %v9959_v47, %v1074_v23  ;;  %v1085_v23 = vmul.f32 %v9329_v58, %v11310_v56 }
 0x858   :  { %5083 = vrot.lane.b32.xlu1 %v1139_v59, %s5913_s17  ;;  %5081 = vrot.lane.b32.xlu0 %v1138_v12, %s5913_s17  ;;  %v11303_v59 = vld [vmem:[#allocation5_spill] sm:$0xff] }
 0x859   :  { %v1076_v12 = vmul.f32 %v9329_v58, %v11303_v59  ;;  %v1157_v38 = vadd.f32 %v9959_v47, %v1085_v23  ;;  %v11312_v59 = vld [vmem:[#allocation23_spill] sm:$0xff] }
 0x85b   :  { %v1148_v53 = vadd.f32 %v9959_v47, %v1076_v12  ;;  %v1087_v12 = vmul.f32 %v11312_v59, %v9329_v58 }
 0x85c   :  { %5087 = vrot.lane.b32.xlu1 %v1141_v20, %s5913_s17  ;;  %5085 = vrot.lane.b32.xlu0 %v1140_v43, %s5913_s17  ;;  %v11305_v20 = vld [vmem:[#allocation3_spill] sm:$0xff] }
 0x85d   :  { %v1078_v43 = vmul.f32 %v11305_v20, %v9329_v58  ;;  %v1159_v8 = vadd.f32 %v9959_v47, %v1087_v12  ;;  %v11314_v20 = vld [vmem:[#allocation33_spill] sm:$0xff] }
 0x85f   :  { %v1150_v3 = vadd.f32 %v9959_v47, %v1078_v43  ;;  %v1089_v43 = vmul.f32 %v9329_v58, %v11314_v20 }
 0x860   :  { %5091 = vrot.lane.b32.xlu1 %v1143_v45, %s5913_s17  ;;  %5089 = vrot.lane.b32.xlu0 %v1142_v57, %s5913_s17  ;;  %v11307_v45 = vld [vmem:[#allocation13_spill] sm:$0xff] }
 0x861   :  { %v1080_v57 = vmul.f32 %v9329_v58, %v11307_v45  ;;  %v1161_v62 = vadd.f32 %v9959_v47, %v1089_v43  ;;  %v11316_v45 = vld [vmem:[#allocation31_spill] sm:$0xff] }
 0x863   :  { %v1152_v33 = vadd.f32 %v9959_v47, %v1080_v57  ;;  %v1091_v57 = vmul.f32 %v11316_v45, %v9329_v58 }
 0x864   :  { %5095 = vrot.lane.b32.xlu1 %v1145_v28, %s5913_s17  ;;  %5093 = vrot.lane.b32.xlu0 %v1144_v11, %s5913_s17  ;;  %v11309_v28 = vld [vmem:[#allocation11_spill] sm:$0xff] }
 0x865   :  { %v1082_v11 = vmul.f32 %v11309_v28, %v9329_v58  ;;  %v1163_v14 = vadd.f32 %v9959_v47, %v1091_v57  ;;  %v11318_v28 = vld [vmem:[#allocation41_spill] sm:$0xff] }
 0x867   :  { %v1154_v41 = vadd.f32 %v9959_v47, %v1082_v11  ;;  %v1093_v11 = vmul.f32 %v9329_v58, %v11318_v28 }
 0x868   :  { %5099 = vrot.lane.b32.xlu1 %v1147_v10, %s5913_s17  ;;  %5097 = vrot.lane.b32.xlu0 %v1146_v55, %s5913_s17  ;;  %v11311_v10 = vld [vmem:[#allocation21_spill] sm:$0xff] }
 0x869   :  { %v1084_v55 = vmul.f32 %v9329_v58, %v11311_v10  ;;  %v1165_v56 = vadd.f32 %v9959_v47, %v1093_v11  ;;  %v11320_v10 = vld [vmem:[#allocation39_spill] sm:$0xff] }
 0x86b   :  { %v1156_v49 = vadd.f32 %v9959_v47, %v1084_v55  ;;  %v1095_v55 = vmul.f32 %v11320_v10, %v9329_v58  ;;  %v11330_v10 = vld [vmem:[#allocation55_spill] sm:$0xff] }
 0x86c   :  { %5103 = vrot.lane.b32.xlu1 %v1149_v61, %s5913_s17  ;;  %5101 = vrot.lane.b32.xlu0 %v1148_v53, %s5913_s17  ;;  %v11313_v61 = vld [vmem:[#allocation19_spill] sm:$0xff] }
 0x86d   :  { %v1086_v53 = vmul.f32 %v11313_v61, %v9329_v58  ;;  %v1167_v59 = vadd.f32 %v9959_v47, %v1095_v55  ;;  %v11322_v61 = vld [vmem:[#allocation49_spill] sm:$0xff]  ;;  %v1103_v55 = vmul.f32 %v11330_v10, %v9329_v58 }
 0x86f   :  { %v1158_v26 = vadd.f32 %v9959_v47, %v1086_v53  ;;  %v1097_v53 = vmul.f32 %v9329_v58, %v11322_v61 }
 0x870   :  { %5107 = vrot.lane.b32.xlu1 %v1151_v32, %s5913_s17  ;;  %5105 = vrot.lane.b32.xlu0 %v1150_v3, %s5913_s17  ;;  %v11315_v32 = vld [vmem:[#allocation29_spill] sm:$0xff] }
 0x871   :  { %v1088_v3 = vmul.f32 %v9329_v58, %v11315_v32  ;;  %v1169_v20 = vadd.f32 %v9959_v47, %v1097_v53  ;;  %v11324_v32 = vld [vmem:[#allocation47_spill] sm:$0xff] }
 0x873   :  { %v1160_v7 = vadd.f32 %v9959_v47, %v1088_v3  ;;  %v1099_v3 = vmul.f32 %v11324_v32, %v9329_v58  ;;  %v11332_v32 = vld [vmem:[#allocation82_spill] sm:$0xff] }
 0x874   :  { %5111 = vrot.lane.b32.xlu1 %v1153_v2, %s5913_s17  ;;  %5109 = vrot.lane.b32.xlu0 %v1152_v33, %s5913_s17  ;;  %v11317_v2 = vld [vmem:[#allocation27_spill] sm:$0xff] }
 0x875   :  { %v1090_v33 = vmul.f32 %v11317_v2, %v9329_v58  ;;  %v1171_v45 = vadd.f32 %v9959_v47, %v1099_v3  ;;  %v11326_v2 = vld [vmem:[#allocation57_spill] sm:$0xff]  ;;  %v4842_v3 = vmul.f32 %v11332_v32, %v9788_v22 }
 0x877   :  { %v1162_v13 = vadd.f32 %v9959_v47, %v1090_v33  ;;  %v1101_v33 = vmul.f32 %v9329_v58, %v11326_v2  ;;  %v11335_v2 = vld [vmem:[#allocation61_spill] sm:$0xff] }
 0x878   :  { %5115 = vrot.lane.b32.xlu1 %v1155_v46, %s5913_s17  ;;  %5113 = vrot.lane.b32.xlu0 %v1154_v41, %s5913_s17  ;;  %v11319_v46 = vld [vmem:[#allocation37_spill] sm:$0xff] }
 0x879   :  { %v1092_v41 = vmul.f32 %v9329_v58, %v11319_v46  ;;  %v1173_v28 = vadd.f32 %v9959_v47, %v1101_v33  ;;  %v11328_v46 = vld [vmem:[#allocation84_spill] sm:$0xff]  ;;  %v1104_v33 = vmul.f32 %v9329_v58, %v11335_v2 }
 0x87b   :  { %v1164_v23 = vadd.f32 %v9959_v47, %v1092_v41  ;;  %v4840_v41 = vmul.f32 %v9788_v22, %v11328_v46 }
 0x87c   :  { %5119 = vrot.lane.b32.xlu1 %v1157_v38, %s5913_s17  ;;  %5117 = vrot.lane.b32.xlu0 %v1156_v49, %s5913_s17  ;;  %v11321_v38 = vld [vmem:[#allocation35_spill] sm:$0xff] }
 0x87d   :  { %v1094_v49 = vmul.f32 %v11321_v38, %v9329_v58  ;;  %v11331_v38 = vld [vmem:[#allocation51_spill] sm:$0xff] }
 0x87f   :  { %v1166_v12 = vadd.f32 %v9959_v47, %v1094_v49  ;;  %v1102_v49 = vmul.f32 %v11331_v38, %v9329_v58  ;;  %v11336_v38 = vld [vmem:[#allocation88_spill] sm:$0xff] }
 0x880   :  { %5123 = vrot.lane.b32.xlu1 %v1159_v8, %s5913_s17  ;;  %5121 = vrot.lane.b32.xlu0 %v1158_v26, %s5913_s17  ;;  %v11323_v8 = vld [vmem:[#allocation45_spill] sm:$0xff] }
 0x881   :  { %v1096_v26 = vmul.f32 %v9329_v58, %v11323_v8  ;;  %v1175_v8 = vadd.f32 %v9959_v47, %v1103_v55 }
 0x883   :  { %v1168_v43 = vadd.f32 %v9959_v47, %v1096_v26  ;;  %v1174_v26 = vadd.f32 %v9959_v47, %v1102_v49  ;;  %v4844_v49 = vmul.f32 %v9788_v22, %v11336_v38  ;;  %v11342_v38 = vld [vmem:[#allocation8_spill] sm:$0xff] }
 0x884   :  { %5127 = vrot.lane.b32.xlu1 %v1161_v62, %s5913_s17  ;;  %5125 = vrot.lane.b32.xlu0 %v1160_v7, %s5913_s17  ;;  %v11325_v62 = vld [vmem:[#allocation43_spill] sm:$0xff] }
 0x885   :  { %v1098_v7 = vmul.f32 %v11325_v62, %v9329_v58  ;;  %v11333_v62 = vld [vmem:[#allocation83_spill] sm:$0xff]  ;;  %v4914_v32 = vadd.f32 %v9795_v34, %v4844_v49  ;;  %v4848_v49 = vmul.f32 %v9788_v22, %v11342_v38 }
 0x887   :  { %v1170_v57 = vadd.f32 %v9959_v47, %v1098_v7  ;;  %v4841_v7 = vmul.f32 %v11333_v62, %v9788_v22 }
 0x888   :  { %5131 = vrot.lane.b32.xlu1 %v1163_v14, %s5913_s17  ;;  %5129 = vrot.lane.b32.xlu0 %v1162_v13, %s5913_s17  ;;  %v11327_v14 = vld [vmem:[#allocation53_spill] sm:$0xff] }
 0x889   :  { %v1100_v13 = vmul.f32 %v9329_v58, %v11327_v14 }
 0x88b   :  { %v1172_v11 = vadd.f32 %v9959_v47, %v1100_v13 }
 0x88c   :  { %5135 = vrot.lane.b32.xlu1 %v1165_v56, %s5913_s17  ;;  %5133 = vrot.lane.b32.xlu0 %v1164_v23, %s5913_s17  ;;  %v11329_v56 = vld [vmem:[#allocation85_spill] sm:$0xff] }
 0x88d   :  { %v4839_v23 = vmul.f32 %v9788_v22, %v11329_v56 }
 0x890   :  { %5139 = vrot.lane.b32.xlu1 %v1167_v59, %s5913_s17  ;;  %5137 = vrot.lane.b32.xlu0 %v1166_v12, %s5913_s17  ;;  %v4910_v59 = vadd.f32 %v9795_v34, %v4840_v41  ;;  %v4909_v12 = vadd.f32 %v9795_v34, %v4839_v23  ;;  %v1176_v23 = vadd.f32 %v9959_v47, %v1104_v33  ;;  %v11340_v33 = vld [vmem:[#allocation86_spill] sm:$0xff] }
 0x894   :  { %5143 = vrot.lane.b32.xlu1 %v1169_v20, %s5913_s17  ;;  %5141 = vrot.lane.b32.xlu0 %v1168_v43, %s5913_s17 }
 0x898   :  { %5147 = vrot.lane.b32.xlu1 %v1171_v45, %s5913_s17  ;;  %5145 = vrot.lane.b32.xlu0 %v1170_v57, %s5913_s17  ;;  %v11334_v45 = vld [vmem:[#allocation65_spill] sm:$0xff] }
 0x899   :  { %v1105_v57 = vmul.f32 %v9329_v58, %v11334_v45 }
 0x89b   :  { %v1177_v56 = vadd.f32 %v9959_v47, %v1105_v57 }
 0x89c   :  { %5151 = vrot.lane.b32.xlu1 %v1173_v28, %s5913_s17  ;;  %5149 = vrot.lane.b32.xlu0 %v1172_v11, %s5913_s17  ;;  %v4912_v28 = vadd.f32 %v9795_v34, %v4842_v3  ;;  %v4911_v11 = vadd.f32 %v9795_v34, %v4841_v7 }
 0x89e   :  { %v5040_v61 = vpop.permute.xlu1 %5039  ;;  %v5038_v53 = vpop.permute.xlu0 %5037 }
 0x89f   :  { %v5230_v20 = vadd.f32 %v5040_v61, %v4910_v59  ;;  %v5229_v43 = vadd.f32 %v5038_v53, %v4909_v12  ;;  %v11337_v59 = vld [vmem:[#allocation89_spill] sm:$0xff]  ;;  %v11338_v61 = vld [vmem:[#allocation63_spill] sm:$0xff] }
 0x8a0   :  { %5155 = vrot.lane.b32.xlu1 %v1175_v8, %s5913_s17  ;;  %5153 = vrot.lane.b32.xlu0 %v1174_v26, %s5913_s17  ;;  %v4843_v12 = vmul.f32 %v9788_v22, %v11337_v59  ;;  %v1107_v53 = vmul.f32 %v11338_v61, %v9329_v58  ;;  %v11339_v8 = vld [vmem:[#allocation59_spill] sm:$0xff]  ;;  %v11343_v59 = vld [vmem:[#allocation66_spill] sm:$0xff] }
 0x8a1   :  { %v5294_v14 = vmax.f32 %v5230_v20, 0.0  ;;  %v5293_v13 = vmax.f32 %v5229_v43, 0.0  ;;  %v1106_v26 = vmul.f32 %v11339_v8, %v9329_v58  ;;  %v4918_v8 = vadd.f32 %v9795_v34, %v4848_v49 }
 0x8a2   :  { %v5044_v46 = vpop.permute.xlu1 %5043  ;;  %v5042_v41 = vpop.permute.xlu0 %5041  ;;  %v4913_v3 = vadd.f32 %v9795_v34, %v4843_v12  ;;  %v1179_v45 = vadd.f32 %v9959_v47, %v1107_v53  ;;  %v4847_v12 = vmul.f32 %v9788_v22, %v11343_v59 }
 0x8a3   :  { %5358 = vst.msk [vmem:[%s10609_s12 + $0x8] sm:$0xff] %vm1180_vm2, %v5294_v14  ;;  %5357 = vst.msk [vmem:[%s10609_s12] sm:$0xff] %vm1180_vm2, %v5293_v13  ;;  %v5232_v10 = vadd.f32 %v5044_v46, %v4912_v28  ;;  %v5231_v55 = vadd.f32 %v5042_v41, %v4911_v11  ;;  %v1178_v57 = vadd.f32 %v9959_v47, %v1106_v26  ;;  %v11341_v13 = vld [vmem:[#allocation87_spill] sm:$0xff] }
 0x8a4   :  { %5159 = vrot.lane.b32.xlu1 %v1177_v56, %s5913_s17  ;;  %5157 = vrot.lane.b32.xlu0 %v1176_v23, %s5913_s17  ;;  %v4846_v14 = vmul.f32 %v11340_v33, %v9788_v22  ;;  %v4845_v28 = vmul.f32 %v11341_v13, %v9788_v22  ;;  %v4917_v26 = vadd.f32 %v9795_v34, %v4847_v12 }
 0x8a5   :  { %v5296_v20 = vmax.f32 %v5232_v10, 0.0  ;;  %v5295_v43 = vmax.f32 %v5231_v55, 0.0 }
 0x8a6   :  { %v5048_v62 = vpop.permute.xlu1 %5047  ;;  %v5046_v7 = vpop.permute.xlu0 %5045  ;;  %v4916_v46 = vadd.f32 %v9795_v34, %v4846_v14  ;;  %v4915_v41 = vadd.f32 %v9795_v34, %v4845_v28 }
 0x8a7   :  { %5360 = vst.msk [vmem:[%s10609_s12 + $0x18] sm:$0xff] %vm1180_vm2, %v5296_v20  ;;  %5359 = vst.msk [vmem:[%s10609_s12 + $0x10] sm:$0xff] %vm1180_vm2, %v5295_v43  ;;  %v5234_v58 = vadd.f32 %v5048_v62, %v4914_v32  ;;  %v5233_v2 = vadd.f32 %v5046_v7, %v4913_v3  ;;  %v11344_v62 = vld [vmem:[#allocation67_spill] sm:$0xff] }
 0x8a8   :  { %5163 = vrot.lane.b32.xlu1 %v1179_v45, %s5913_s17  ;;  %5161 = vrot.lane.b32.xlu0 %v1178_v57, %s5913_s17  ;;  %v4850_v7 = vmul.f32 %v11344_v62, %v9788_v22  ;;  %v11345_v45 = vld [vmem:[#allocation90_spill] sm:$0xff] }
 0x8a9   :  { %v5298_v47 = vmax.f32 %v5234_v58, 0.0  ;;  %v5297_v11 = vmax.f32 %v5233_v2, 0.0  ;;  %v4849_v57 = vmul.f32 %v11345_v45, %v9788_v22 }
 0x8aa   :  { %v5052_v56 = vpop.permute.xlu1 %5051  ;;  %v5050_v23 = vpop.permute.xlu0 %5049  ;;  %v4920_v33 = vadd.f32 %v9795_v34, %v4850_v7 }
 0x8ab   :  { %5362 = vst.msk [vmem:[%s10609_s12 + $0x28] sm:$0xff] %vm1180_vm2, %v5298_v47  ;;  %5361 = vst.msk [vmem:[%s10609_s12 + $0x20] sm:$0xff] %vm1180_vm2, %v5297_v11  ;;  %v5236_v10 = vadd.f32 %v5052_v56, %v4916_v46  ;;  %v5235_v55 = vadd.f32 %v5050_v23, %v4915_v41  ;;  %v4919_v14 = vadd.f32 %v9795_v34, %v4849_v57  ;;  %v11346_v46 = vld [vmem:[#allocation12_spill] sm:$0xff]  ;;  %v11347_v56 = vld [vmem:[#allocation2_spill] sm:$0xff] }
 0x8ac   :  { %v4852_v41 = vmul.f32 %v9788_v22, %v11346_v46  ;;  %v4851_v23 = vmul.f32 %v9788_v22, %v11347_v56 }
 0x8ad   :  { %v5300_v61 = vmax.f32 %v5236_v10, 0.0  ;;  %v5299_v53 = vmax.f32 %v5235_v55, 0.0 }
 0x8ae   :  { %v5056_v20 = vpop.permute.xlu1 %5055  ;;  %v5054_v43 = vpop.permute.xlu0 %5053  ;;  %v4922_v38 = vadd.f32 %v9795_v34, %v4852_v41  ;;  %v4921_v49 = vadd.f32 %v9795_v34, %v4851_v23 }
 0x8af   :  { %5364 = vst.msk [vmem:[%s10609_s12 + $0x38] sm:$0xff] %vm1180_vm2, %v5300_v61  ;;  %5363 = vst.msk [vmem:[%s10609_s12 + $0x30] sm:$0xff] %vm1180_vm2, %v5299_v53  ;;  %v5238_v32 = vadd.f32 %v5056_v20, %v4918_v8  ;;  %v5237_v3 = vadd.f32 %v5054_v43, %v4917_v26  ;;  %v11348_v8 = vld [vmem:[#allocation6_spill] sm:$0xff]  ;;  %v11349_v20 = vld [vmem:[#allocation4_spill] sm:$0xff] }
 0x8b0   :  { %v4854_v26 = vmul.f32 %v11348_v8, %v9788_v22  ;;  %v4853_v43 = vmul.f32 %v11349_v20, %v9788_v22 }
 0x8b1   :  { %v5302_v58 = vmax.f32 %v5238_v32, 0.0  ;;  %v5301_v2 = vmax.f32 %v5237_v3, 0.0 }
 0x8b2   :  { %v5060_v13 = vpop.permute.xlu1 %5059  ;;  %v5058_v28 = vpop.permute.xlu0 %5057  ;;  %v4924_v62 = vadd.f32 %v9795_v34, %v4854_v26  ;;  %v4923_v7 = vadd.f32 %v9795_v34, %v4853_v43 }
 0x8b3   :  { %5366 = vst.msk [vmem:[%s10609_s12 + $0x48] sm:$0xff] %vm1180_vm2, %v5302_v58  ;;  %5365 = vst.msk [vmem:[%s10609_s12 + $0x40] sm:$0xff] %vm1180_vm2, %v5301_v2  ;;  %v5240_v47 = vadd.f32 %v5060_v13, %v4920_v33  ;;  %v5239_v11 = vadd.f32 %v5058_v28, %v4919_v14  ;;  %v11350_v33 = vld [vmem:[#allocation92_spill] sm:$0xff]  ;;  %v11351_v13 = vld [vmem:[#allocation93_spill] sm:$0xff] }
 0x8b4   :  { %v4856_v14 = vmul.f32 %v9788_v22, %v11350_v33  ;;  %v4855_v28 = vmul.f32 %v9788_v22, %v11351_v13 }
 0x8b5   :  { %v5304_v10 = vmax.f32 %v5240_v47, 0.0  ;;  %v5303_v55 = vmax.f32 %v5239_v11, 0.0 }
 0x8b6   :  { %v5064_v59 = vpop.permute.xlu1 %5063  ;;  %v5062_v12 = vpop.permute.xlu0 %5061  ;;  %v4926_v46 = vadd.f32 %v9795_v34, %v4856_v14  ;;  %v4925_v41 = vadd.f32 %v9795_v34, %v4855_v28 }
 0x8b7   :  { %5368 = vst.msk [vmem:[%s10609_s12 + $0x58] sm:$0xff] %vm1180_vm2, %v5304_v10  ;;  %5367 = vst.msk [vmem:[%s10609_s12 + $0x50] sm:$0xff] %vm1180_vm2, %v5303_v55  ;;  %v5242_v61 = vadd.f32 %v5064_v59, %v4922_v38  ;;  %v5241_v53 = vadd.f32 %v5062_v12, %v4921_v49  ;;  %v11352_v38 = vld [vmem:[#allocation94_spill] sm:$0xff]  ;;  %v11353_v59 = vld [vmem:[#allocation16_spill] sm:$0xff] }
 0x8b8   :  { %v4858_v49 = vmul.f32 %v11352_v38, %v9788_v22  ;;  %v4857_v12 = vmul.f32 %v11353_v59, %v9788_v22 }
 0x8b9   :  { %v5306_v32 = vmax.f32 %v5242_v61, 0.0  ;;  %v5305_v3 = vmax.f32 %v5241_v53, 0.0 }
 0x8ba   :  { %v5068_v45 = vpop.permute.xlu1 %5067  ;;  %v5066_v57 = vpop.permute.xlu0 %5065  ;;  %v4928_v8 = vadd.f32 %v9795_v34, %v4858_v49  ;;  %v4927_v26 = vadd.f32 %v9795_v34, %v4857_v12 }
 0x8bb   :  { %5370 = vst.msk [vmem:[%s10609_s12 + $0x68] sm:$0xff] %vm1180_vm2, %v5306_v32  ;;  %5369 = vst.msk [vmem:[%s10609_s12 + $0x60] sm:$0xff] %vm1180_vm2, %v5305_v3  ;;  %v5244_v58 = vadd.f32 %v5068_v45, %v4924_v62  ;;  %v5243_v2 = vadd.f32 %v5066_v57, %v4923_v7  ;;  %v11354_v62 = vld [vmem:[#allocation68_spill] sm:$0xff]  ;;  %v11355_v45 = vld [vmem:[#allocation95_spill] sm:$0xff] }
 0x8bc   :  { %v4860_v7 = vmul.f32 %v9788_v22, %v11354_v62  ;;  %v4859_v57 = vmul.f32 %v9788_v22, %v11355_v45 }
 0x8bd   :  { %v5308_v47 = vmax.f32 %v5244_v58, 0.0  ;;  %v5307_v11 = vmax.f32 %v5243_v2, 0.0 }
 0x8be   :  { %v5072_v56 = vpop.permute.xlu1 %5071  ;;  %v5070_v23 = vpop.permute.xlu0 %5069  ;;  %v4930_v33 = vadd.f32 %v9795_v34, %v4860_v7  ;;  %v4929_v14 = vadd.f32 %v9795_v34, %v4859_v57 }
 0x8bf   :  { %5372 = vst.msk [vmem:[%s10609_s12 + $0x78] sm:$0xff] %vm1180_vm2, %v5308_v47  ;;  %5371 = vst.msk [vmem:[%s10609_s12 + $0x70] sm:$0xff] %vm1180_vm2, %v5307_v11  ;;  %v5246_v10 = vadd.f32 %v5072_v56, %v4926_v46  ;;  %v5245_v55 = vadd.f32 %v5070_v23, %v4925_v41  ;;  %v11356_v46 = vld [vmem:[#allocation96_spill] sm:$0xff]  ;;  %v11357_v56 = vld [vmem:[#allocation91_spill] sm:$0xff] }
 0x8c0   :  { %v4862_v41 = vmul.f32 %v11356_v46, %v9788_v22  ;;  %v4861_v23 = vmul.f32 %v11357_v56, %v9788_v22 }
 0x8c1   :  { %v5310_v61 = vmax.f32 %v5246_v10, 0.0  ;;  %v5309_v53 = vmax.f32 %v5245_v55, 0.0 }
 0x8c2   :  { %v5076_v20 = vpop.permute.xlu1 %5075  ;;  %v5074_v43 = vpop.permute.xlu0 %5073  ;;  %v4932_v38 = vadd.f32 %v9795_v34, %v4862_v41  ;;  %v4931_v49 = vadd.f32 %v9795_v34, %v4861_v23 }
 0x8c3   :  { %5374 = vst.msk [vmem:[%s10609_s12 + $0x88] sm:$0xff] %vm1180_vm2, %v5310_v61  ;;  %5373 = vst.msk [vmem:[%s10609_s12 + $0x80] sm:$0xff] %vm1180_vm2, %v5309_v53  ;;  %v5248_v32 = vadd.f32 %v5076_v20, %v4928_v8  ;;  %v5247_v3 = vadd.f32 %v5074_v43, %v4927_v26  ;;  %v11358_v8 = vld [vmem:[#allocation98_spill] sm:$0xff]  ;;  %v11359_v20 = vld [vmem:[#allocation100_spill] sm:$0xff] }
 0x8c4   :  { %v4864_v26 = vmul.f32 %v9788_v22, %v11358_v8  ;;  %v4863_v43 = vmul.f32 %v9788_v22, %v11359_v20 }
 0x8c5   :  { %v5312_v58 = vmax.f32 %v5248_v32, 0.0  ;;  %v5311_v2 = vmax.f32 %v5247_v3, 0.0 }
 0x8c6   :  { %v5080_v13 = vpop.permute.xlu1 %5079  ;;  %v5078_v28 = vpop.permute.xlu0 %5077  ;;  %v4934_v62 = vadd.f32 %v9795_v34, %v4864_v26  ;;  %v4933_v7 = vadd.f32 %v9795_v34, %v4863_v43 }
 0x8c7   :  { %5376 = vst.msk [vmem:[%s10609_s12 + $0x98] sm:$0xff] %vm1180_vm2, %v5312_v58  ;;  %5375 = vst.msk [vmem:[%s10609_s12 + $0x90] sm:$0xff] %vm1180_vm2, %v5311_v2  ;;  %v5250_v47 = vadd.f32 %v5080_v13, %v4930_v33  ;;  %v5249_v11 = vadd.f32 %v5078_v28, %v4929_v14  ;;  %v11360_v33 = vld [vmem:[#allocation101_spill] sm:$0xff] }
 0x8c8   :  { %v4866_v14 = vmul.f32 %v11360_v33, %v9788_v22  ;;  %v11361_v13 = vld [vmem:[#allocation97_spill] sm:$0xff] }
 0x8c9   :  { %v5314_v10 = vmax.f32 %v5250_v47, 0.0  ;;  %v5313_v55 = vmax.f32 %v5249_v11, 0.0  ;;  %v4865_v28 = vmul.f32 %v11361_v13, %v9788_v22 }
 0x8ca   :  { %v5084_v59 = vpop.permute.xlu1 %5083  ;;  %v5082_v12 = vpop.permute.xlu0 %5081  ;;  %v4936_v46 = vadd.f32 %v9795_v34, %v4866_v14 }
 0x8cb   :  { %5378 = vst.msk [vmem:[%s10609_s12 + $0xa8] sm:$0xff] %vm1180_vm2, %v5314_v10  ;;  %5377 = vst.msk [vmem:[%s10609_s12 + $0xa0] sm:$0xff] %vm1180_vm2, %v5313_v55  ;;  %v5252_v61 = vadd.f32 %v5084_v59, %v4932_v38  ;;  %v5251_v53 = vadd.f32 %v5082_v12, %v4931_v49  ;;  %v4935_v41 = vadd.f32 %v9795_v34, %v4865_v28  ;;  %v11362_v38 = vld [vmem:[#allocation102_spill] sm:$0xff]  ;;  %v11363_v59 = vld [vmem:[#allocation104_spill] sm:$0xff] }
 0x8cc   :  { %v4868_v49 = vmul.f32 %v9788_v22, %v11362_v38  ;;  %v4867_v12 = vmul.f32 %v9788_v22, %v11363_v59 }
 0x8cd   :  { %v5316_v32 = vmax.f32 %v5252_v61, 0.0  ;;  %v5315_v3 = vmax.f32 %v5251_v53, 0.0 }
 0x8ce   :  { %v5088_v45 = vpop.permute.xlu1 %5087  ;;  %v5086_v57 = vpop.permute.xlu0 %5085  ;;  %v4938_v8 = vadd.f32 %v9795_v34, %v4868_v49  ;;  %v4937_v26 = vadd.f32 %v9795_v34, %v4867_v12 }
 0x8cf   :  { %5380 = vst.msk [vmem:[%s10609_s12 + $0xb8] sm:$0xff] %vm1180_vm2, %v5316_v32  ;;  %5379 = vst.msk [vmem:[%s10609_s12 + $0xb0] sm:$0xff] %vm1180_vm2, %v5315_v3  ;;  %v5254_v58 = vadd.f32 %v5088_v45, %v4934_v62  ;;  %v5253_v2 = vadd.f32 %v5086_v57, %v4933_v7  ;;  %v11364_v62 = vld [vmem:[#allocation105_spill] sm:$0xff]  ;;  %v11365_v45 = vld [vmem:[#allocation99_spill] sm:$0xff] }
 0x8d0   :  { %v4870_v7 = vmul.f32 %v11364_v62, %v9788_v22  ;;  %v4869_v57 = vmul.f32 %v11365_v45, %v9788_v22 }
 0x8d1   :  { %v5318_v47 = vmax.f32 %v5254_v58, 0.0  ;;  %v5317_v11 = vmax.f32 %v5253_v2, 0.0 }
 0x8d2   :  { %v5092_v56 = vpop.permute.xlu1 %5091  ;;  %v5090_v23 = vpop.permute.xlu0 %5089  ;;  %v4940_v33 = vadd.f32 %v9795_v34, %v4870_v7  ;;  %v4939_v14 = vadd.f32 %v9795_v34, %v4869_v57 }
 0x8d3   :  { %5382 = vst.msk [vmem:[%s10609_s12 + $0xc8] sm:$0xff] %vm1180_vm2, %v5318_v47  ;;  %5381 = vst.msk [vmem:[%s10609_s12 + $0xc0] sm:$0xff] %vm1180_vm2, %v5317_v11  ;;  %v5256_v10 = vadd.f32 %v5092_v56, %v4936_v46  ;;  %v5255_v55 = vadd.f32 %v5090_v23, %v4935_v41 }
 0x8d5   :  { %v5320_v61 = vmax.f32 %v5256_v10, 0.0  ;;  %v5319_v53 = vmax.f32 %v5255_v55, 0.0 }
 0x8d6   :  { %v5096_v20 = vpop.permute.xlu1 %5095  ;;  %v5094_v43 = vpop.permute.xlu0 %5093 }
 0x8d7   :  { %5384 = vst.msk [vmem:[%s10609_s12 + $0xd8] sm:$0xff] %vm1180_vm2, %v5320_v61  ;;  %5383 = vst.msk [vmem:[%s10609_s12 + $0xd0] sm:$0xff] %vm1180_vm2, %v5319_v53  ;;  %v5258_v32 = vadd.f32 %v5096_v20, %v4938_v8  ;;  %v5257_v3 = vadd.f32 %v5094_v43, %v4937_v26 }
 0x8d9   :  { %v5322_v58 = vmax.f32 %v5258_v32, 0.0  ;;  %v5321_v2 = vmax.f32 %v5257_v3, 0.0 }
 0x8da   :  { %v5100_v13 = vpop.permute.xlu1 %5099  ;;  %v5098_v28 = vpop.permute.xlu0 %5097 }
 0x8db   :  { %5386 = vst.msk [vmem:[%s10609_s12 + $0xe8] sm:$0xff] %vm1180_vm2, %v5322_v58  ;;  %5385 = vst.msk [vmem:[%s10609_s12 + $0xe0] sm:$0xff] %vm1180_vm2, %v5321_v2  ;;  %v5260_v47 = vadd.f32 %v5100_v13, %v4940_v33  ;;  %v5259_v22 = vadd.f32 %v5098_v28, %v4939_v14 }
 0x8dd   :  { %v5324_v11 = vmax.f32 %v5260_v47, 0.0  ;;  %v5323_v46 = vmax.f32 %v5259_v22, 0.0 }
 0x8de   :  { %v5104_v41 = vpop.permute.xlu1 %5103  ;;  %v5102_v56 = vpop.permute.xlu0 %5101 }
 0x8df   :  { %5388 = vst.msk [vmem:[%s10609_s12 + $0xf8] sm:$0xff] %vm1180_vm2, %v5324_v11  ;;  %5387 = vst.msk [vmem:[%s10609_s12 + $0xf0] sm:$0xff] %vm1180_vm2, %v5323_v46  ;;  %v5262_v34 = vadd.f32 %v5104_v41, %v9808_v30  ;;  %v5261_v23 = vadd.f32 %v5102_v56, %v9811_v54 }
 0x8e1   :  { %v5326_v10 = vmax.f32 %v5262_v34, 0.0  ;;  %v5325_v55 = vmax.f32 %v5261_v23, 0.0 }
 0x8e2   :  { %v5108_v38 = vpop.permute.xlu1 %5107  ;;  %v5106_v49 = vpop.permute.xlu0 %5105 }
 0x8e3   :  { %5390 = vst.msk [vmem:[%s10609_s12 + $0x108] sm:$0xff] %vm1180_vm2, %v5326_v10  ;;  %5389 = vst.msk [vmem:[%s10609_s12 + $0x100] sm:$0xff] %vm1180_vm2, %v5325_v55  ;;  %v5264_v59 = vadd.f32 %v5108_v38, %v9814_v16  ;;  %v5263_v30 = vadd.f32 %v5106_v49, %v9817_v19 }
 0x8e5   :  { %v5328_v12 = vmax.f32 %v5264_v59, 0.0  ;;  %v5327_v54 = vmax.f32 %v5263_v30, 0.0 }
 0x8e6   :  { %v5112_v61 = vpop.permute.xlu1 %5111  ;;  %v5110_v53 = vpop.permute.xlu0 %5109 }
 0x8e7   :  { %5392 = vst.msk [vmem:[%s10609_s12 + $0x118] sm:$0xff] %vm1180_vm2, %v5328_v12  ;;  %5391 = vst.msk [vmem:[%s10609_s12 + $0x110] sm:$0xff] %vm1180_vm2, %v5327_v54  ;;  %v5266_v8 = vadd.f32 %v5112_v61, %v9820_v27  ;;  %v5265_v16 = vadd.f32 %v5110_v53, %v9837_v40 }
 0x8e9   :  { %v5330_v26 = vmax.f32 %v5266_v8, 0.0  ;;  %v5329_v19 = vmax.f32 %v5265_v16, 0.0 }
 0x8ea   :  { %v5116_v20 = vpop.permute.xlu1 %5115  ;;  %v5114_v43 = vpop.permute.xlu0 %5113 }
 0x8eb   :  { %5394 = vst.msk [vmem:[%s10609_s12 + $0x128] sm:$0xff] %vm1180_vm2, %v5330_v26  ;;  %5393 = vst.msk [vmem:[%s10609_s12 + $0x120] sm:$0xff] %vm1180_vm2, %v5329_v19  ;;  %v5268_v32 = vadd.f32 %v5116_v20, %v9840_v44  ;;  %v5267_v27 = vadd.f32 %v5114_v43, %v9843_v5 }
 0x8ed   :  { %v5332_v3 = vmax.f32 %v5268_v32, 0.0  ;;  %v5331_v40 = vmax.f32 %v5267_v27, 0.0 }
 0x8ee   :  { %v5120_v62 = vpop.permute.xlu1 %5119  ;;  %v5118_v7 = vpop.permute.xlu0 %5117 }
 0x8ef   :  { %5396 = vst.msk [vmem:[%s10609_s12 + $0x138] sm:$0xff] %vm1180_vm2, %v5332_v3  ;;  %5395 = vst.msk [vmem:[%s10609_s12 + $0x130] sm:$0xff] %vm1180_vm2, %v5331_v40  ;;  %v5270_v45 = vadd.f32 %v5120_v62, %v9848_v50  ;;  %v5269_v44 = vadd.f32 %v5118_v7, %v9851_v17 }
 0x8f1   :  { %v5334_v57 = vmax.f32 %v5270_v45, 0.0  ;;  %v5333_v5 = vmax.f32 %v5269_v44, 0.0 }
 0x8f2   :  { %v5124_v58 = vpop.permute.xlu1 %5123  ;;  %v5122_v2 = vpop.permute.xlu0 %5121 }
 0x8f3   :  { %5398 = vst.msk [vmem:[%s10609_s12 + $0x148] sm:$0xff] %vm1180_vm2, %v5334_v57  ;;  %5397 = vst.msk [vmem:[%s10609_s12 + $0x140] sm:$0xff] %vm1180_vm2, %v5333_v5  ;;  %v5272_v33 = vadd.f32 %v5124_v58, %v9854_v9  ;;  %v5271_v50 = vadd.f32 %v5122_v2, %v9857_v63 }
 0x8f5   :  { %v5336_v14 = vmax.f32 %v5272_v33, 0.0  ;;  %v5335_v17 = vmax.f32 %v5271_v50, 0.0 }
 0x8f6   :  { %v5128_v13 = vpop.permute.xlu1 %5127  ;;  %v5126_v28 = vpop.permute.xlu0 %5125 }
 0x8f7   :  { %5400 = vst.msk [vmem:[%s10609_s12 + $0x158] sm:$0xff] %vm1180_vm2, %v5336_v14  ;;  %5399 = vst.msk [vmem:[%s10609_s12 + $0x150] sm:$0xff] %vm1180_vm2, %v5335_v17  ;;  %v5274_v47 = vadd.f32 %v5128_v13, %v9860_v21  ;;  %v5273_v9 = vadd.f32 %v5126_v28, %v9877_v60 }
 0x8f9   :  { %v5338_v22 = vmax.f32 %v5274_v47, 0.0  ;;  %v5337_v63 = vmax.f32 %v5273_v9, 0.0 }
 0x8fa   :  { %v5132_v11 = vpop.permute.xlu1 %5131  ;;  %v5130_v46 = vpop.permute.xlu0 %5129 }
 0x8fb   :  { %5402 = vst.msk [vmem:[%s10609_s12 + $0x168] sm:$0xff] %vm1180_vm2, %v5338_v22  ;;  %5401 = vst.msk [vmem:[%s10609_s12 + $0x160] sm:$0xff] %vm1180_vm2, %v5337_v63  ;;  %v5276_v41 = vadd.f32 %v5132_v11, %v9880_v29  ;;  %v5275_v21 = vadd.f32 %v5130_v46, %v9883_v15 }
 0x8fd   :  { %v5340_v56 = vmax.f32 %v5276_v41, 0.0  ;;  %v5339_v60 = vmax.f32 %v5275_v21, 0.0 }
 0x8fe   :  { %v5136_v34 = vpop.permute.xlu1 %5135  ;;  %v5134_v23 = vpop.permute.xlu0 %5133 }
 0x8ff   :  { %5404 = vst.msk [vmem:[%s10609_s12 + $0x178] sm:$0xff] %vm1180_vm2, %v5340_v56  ;;  %5403 = vst.msk [vmem:[%s10609_s12 + $0x170] sm:$0xff] %vm1180_vm2, %v5339_v60  ;;  %v5278_v10 = vadd.f32 %v5136_v34, %v9888_v31  ;;  %v5277_v29 = vadd.f32 %v5134_v23, %v9891_v36 }
 0x901   :  { %v5342_v55 = vmax.f32 %v5278_v10, 0.0  ;;  %v5341_v15 = vmax.f32 %v5277_v29, 0.0 }
 0x902   :  { %v5140_v38 = vpop.permute.xlu1 %5139  ;;  %v5138_v49 = vpop.permute.xlu0 %5137 }
 0x903   :  { %5406 = vst.msk [vmem:[%s10609_s12 + $0x188] sm:$0xff] %vm1180_vm2, %v5342_v55  ;;  %5405 = vst.msk [vmem:[%s10609_s12 + $0x180] sm:$0xff] %vm1180_vm2, %v5341_v15  ;;  %v5280_v59 = vadd.f32 %v5140_v38, %v9894_v4  ;;  %v5279_v31 = vadd.f32 %v5138_v49, %v9897_v18 }
 0x905   :  { %v5344_v30 = vmax.f32 %v5280_v59, 0.0  ;;  %v5343_v36 = vmax.f32 %v5279_v31, 0.0 }
 0x906   :  { %v5144_v12 = vpop.permute.xlu1 %5143  ;;  %v5142_v54 = vpop.permute.xlu0 %5141 }
 0x907   :  { %5408 = vst.msk [vmem:[%s10609_s12 + $0x198] sm:$0xff] %vm1180_vm2, %v5344_v30  ;;  %5407 = vst.msk [vmem:[%s10609_s12 + $0x190] sm:$0xff] %vm1180_vm2, %v5343_v36  ;;  %v5282_v61 = vadd.f32 %v5144_v12, %v9900_v42  ;;  %v5281_v4 = vadd.f32 %v5142_v54, %v9917_v24 }
 0x909   :  { %v5346_v53 = vmax.f32 %v5282_v61, 0.0  ;;  %v5345_v18 = vmax.f32 %v5281_v4, 0.0 }
 0x90a   :  { %v5148_v8 = vpop.permute.xlu1 %5147  ;;  %v5146_v16 = vpop.permute.xlu0 %5145 }
 0x90b   :  { %5410 = vst.msk [vmem:[%s10609_s12 + $0x1a8] sm:$0xff] %vm1180_vm2, %v5346_v53  ;;  %5409 = vst.msk [vmem:[%s10609_s12 + $0x1a0] sm:$0xff] %vm1180_vm2, %v5345_v18  ;;  %v5284_v26 = vadd.f32 %v5148_v8, %v9920_v51  ;;  %v5283_v42 = vadd.f32 %v5146_v16, %v9923_v48 }
 0x90d   :  { %v5348_v19 = vmax.f32 %v5284_v26, 0.0  ;;  %v5347_v24 = vmax.f32 %v5283_v42, 0.0 }
 0x90e   :  { %v5152_v20 = vpop.permute.xlu1 %5151  ;;  %v5150_v43 = vpop.permute.xlu0 %5149 }
 0x90f   :  { %5412 = vst.msk [vmem:[%s10609_s12 + $0x1b8] sm:$0xff] %vm1180_vm2, %v5348_v19  ;;  %5411 = vst.msk [vmem:[%s10609_s12 + $0x1b0] sm:$0xff] %vm1180_vm2, %v5347_v24  ;;  %v5286_v32 = vadd.f32 %v5152_v20, %v9929_v0  ;;  %v5285_v51 = vadd.f32 %v5150_v43, %v9932_v25 }
 0x911   :  { %v5350_v27 = vmax.f32 %v5286_v32, 0.0  ;;  %v5349_v48 = vmax.f32 %v5285_v51, 0.0 }
 0x912   :  { %v5156_v3 = vpop.permute.xlu1 %5155  ;;  %v5154_v40 = vpop.permute.xlu0 %5153 }
 0x913   :  { %5414 = vst.msk [vmem:[%s10609_s12 + $0x1c8] sm:$0xff] %vm1180_vm2, %v5350_v27  ;;  %5413 = vst.msk [vmem:[%s10609_s12 + $0x1c0] sm:$0xff] %vm1180_vm2, %v5349_v48  ;;  %v5288_v62 = vadd.f32 %v5156_v3, %v9935_v39  ;;  %v5287_v0 = vadd.f32 %v5154_v40, %v9938_v35 }
 0x915   :  { %v5352_v7 = vmax.f32 %v5288_v62, 0.0  ;;  %v5351_v25 = vmax.f32 %v5287_v0, 0.0 }
 0x916   :  { %v5160_v45 = vpop.permute.xlu1 %5159  ;;  %v5158_v44 = vpop.permute.xlu0 %5157 }
 0x917   :  { %5416 = vst.msk [vmem:[%s10609_s12 + $0x1d8] sm:$0xff] %vm1180_vm2, %v5352_v7  ;;  %5415 = vst.msk [vmem:[%s10609_s12 + $0x1d0] sm:$0xff] %vm1180_vm2, %v5351_v25  ;;  %v5290_v57 = vadd.f32 %v5160_v45, %v9926_v52  ;;  %v5289_v39 = vadd.f32 %v5158_v44, %v9947_v37 }
 0x919   :  { %v5354_v5 = vmax.f32 %v5290_v57, 0.0  ;;  %v5353_v35 = vmax.f32 %v5289_v39, 0.0 }
 0x91a   :  { %v5164_v58 = vpop.permute.xlu1 %5163  ;;  %v5162_v2 = vpop.permute.xlu0 %5161 }
 0x91b   :  { %5418 = vst.msk [vmem:[%s10609_s12 + $0x1e8] sm:$0xff] %vm1180_vm2, %v5354_v5  ;;  %5417 = vst.msk [vmem:[%s10609_s12 + $0x1e0] sm:$0xff] %vm1180_vm2, %v5353_v35  ;;  %v5292_v33 = vadd.f32 %v5164_v58, %v9950_v1  ;;  %v5291_v52 = vadd.f32 %v5162_v2, %v9953_v6 }
 0x91d   :  { %v5356_v50 = vmax.f32 %v5292_v33, 0.0  ;;  %v5355_v37 = vmax.f32 %v5291_v52, 0.0 }
 0x91f   :  { %5420 = vst.msk [vmem:[%s10609_s12 + $0x1f8] sm:$0xff] %vm1180_vm2, %v5356_v50  ;;  %5419 = vst.msk [vmem:[%s10609_s12 + $0x1f0] sm:$0xff] %vm1180_vm2, %v5355_v37 }

</bundles_post_ra>
